<compile_context>
chip_gen: v5e
topology: v5e:2x2
jax: 0.10.0
libtpu: 0.0.40
codegen_flags: <defaults>
</compile_context>

<pallas_src>
import numpy as np
import jax
import jax.numpy as jnp
from jax.experimental import pallas as pl
from jax.experimental.pallas import tpu as pltpu

BN_EPS = 1e-5
MXU_DTYPE = jnp.bfloat16          # MXU-native input dtype; accumulation stays f32


# ------------------------- in-kernel building blocks ------------------------ #

def _pad_into(xp_ref, interior):
    """Write `interior` (BT, H, W, C) into the (BT, H+2, W+2, C) VMEM scratch,
    zeroing ONLY the 1-pixel halo (not the whole buffer)."""
    BT, Hp, Wp, C = xp_ref.shape
    H, W = Hp - 2, Wp - 2
    zrow = jnp.zeros((BT, 1, Wp, C), xp_ref.dtype)
    zcol = jnp.zeros((BT, H, 1, C), xp_ref.dtype)
    xp_ref[:, 0:1, :, :] = zrow                      # top halo row
    xp_ref[:, H + 1:H + 2, :, :] = zrow              # bottom halo row
    xp_ref[:, 1:H + 1, 0:1, :] = zcol                # left halo column
    xp_ref[:, 1:H + 1, W + 1:W + 2, :] = zcol        # right halo column
    xp_ref[:, 1:H + 1, 1:W + 1, :] = interior.astype(xp_ref.dtype)


def _conv3x3(xp_ref, w_ref):
    """3x3 'same' conv as 9 per-tap MXU matmuls accumulated in f32.
    xp_ref: (BT, H+2, W+2, Cin) f32 padded activations (VMEM scratch)
    w_ref:  (9, Cin, Cout) bf16, tap-major rows (row = 3*ky + kx)
    Returns f32 (BT*H*W, Cout)."""
    BT, Hp, Wp, Cin = xp_ref.shape
    H, W = Hp - 2, Wp - 2
    acc = None
    for ky in range(3):
        for kx in range(3):
            slab = xp_ref[:, ky:ky + H, kx:kx + W, :].reshape(BT * H * W, Cin)
            part = jnp.dot(slab.astype(w_ref.dtype),          # bf16 MXU inputs
                           w_ref[3 * ky + kx],
                           preferred_element_type=jnp.float32)
            acc = part if acc is None else acc + part         # MRB-friendly on v7x
    return acc


def _channel_stats(v):
    """Per-channel (sum, sum_of_squares) of an (N, C) f32 block -> (2, C)."""
    s = jnp.sum(v, axis=0, keepdims=True)
    s2 = jnp.sum(v * v, axis=0, keepdims=True)
    return jnp.concatenate([s, s2], axis=0)


# --------------------------------- kernels ---------------------------------- #

def conv1_kernel(x_ref, w1_ref, conv_ref, stats_ref, xp_ref):
    """x_ref (BT,H,W,Cin) bf16 -> raw conv1 (BT,H,W,Cout) f32 + per-tile stats."""
    BT, H, W, _ = x_ref.shape
    Cout = w1_ref.shape[-1]
    _pad_into(xp_ref, x_ref[...])
    acc = _conv3x3(xp_ref, w1_ref)                           # (BT*H*W, Cout) f32
    conv_ref[...] = acc.reshape(BT, H, W, Cout)
    stats_ref[...] = _channel_stats(acc).reshape(1, 2, Cout)


def conv2_kernel(h_ref, scale_ref, shift_ref, w2_ref, conv_ref, stats_ref, hp_ref):
    """bn1+relu applied to raw conv1, then conv2 + per-tile stats."""
    BT, H, W, _ = h_ref.shape
    Cout = w2_ref.shape[-1]
    h1 = jnp.maximum(h_ref[...] * scale_ref[...] + shift_ref[...], 0.0)
    _pad_into(hp_ref, h1)
    acc = _conv3x3(hp_ref, w2_ref)                           # (BT*H*W, Cout) f32
    conv_ref[...] = acc.reshape(BT, H, W, Cout)
    stats_ref[...] = _channel_stats(acc).reshape(1, 2, Cout)


def bn2_pool_kernel(h_ref, scale_ref, shift_ref, o_ref):
    """bn2 (scale/shift already include the 0.25 pool factor) + relu + 2x2 avg pool."""
    BT, H, W, C = h_ref.shape
    Ho, Wo = H // 2, W // 2
    # relu(z) * 0.25 == relu(z * 0.25): the 0.25 is folded into scale/shift.
    h2 = jnp.maximum(h_ref[...] * scale_ref[...] + shift_ref[...], 0.0)
    hw = h2.reshape(BT, H, Wo, 2, C)
    sw = hw[:, :, :, 0, :] + hw[:, :, :, 1, :]               # pool along W
    sh = sw.reshape(BT, Ho, 2, Wo, C)
    o_ref[...] = sh[:, :, 0, :, :] + sh[:, :, 1, :, :]       # pool along H


# ------------------------------ JAX wrapper -------------------------------- #

def _bn_scale_shift(stats_tiles, count, extra_scale=1.0):
    """Reduce per-tile (sum, sum_sq) stats -> per-channel (scale, shift) for a
    fresh BatchNorm2d in training mode (gamma=1, beta=0, biased var, eps=1e-5)."""
    s = jnp.sum(stats_tiles, axis=0)                         # (2, C)
    mean = s[0] / count
    var = jnp.maximum(s[1] / count - mean * mean, 0.0)       # clamp single-pass var
    scale = jax.lax.rsqrt(var + BN_EPS) * extra_scale
    shift = -mean * scale
    return (scale.reshape(1, -1).astype(jnp.float32),
            shift.reshape(1, -1).astype(jnp.float32))


def conv_block_forward(x_nchw, w1_oihw, w2_oihw, pool_size=(2, 2), pool_type="avg",
                       batch_tile=1):
    """ConvBlock.forward. x_nchw: (B, Cin, H, W); weights in PyTorch OIHW."""
    if pool_type != "avg" or tuple(pool_size) != (2, 2):
        # TODO(synk): 'max' and 'avg+max' pooling variants not implemented.
        raise NotImplementedError("only pool_type='avg', pool_size=(2,2)")

    B, Cin, H, W = x_nchw.shape
    Cout = w1_oihw.shape[0]
    assert H % 2 == 0 and W % 2 == 0, "2x2 avg pool needs even H and W"
    assert B % batch_tile == 0
    nb = B // batch_tile
    Ho, Wo = H // 2, W // 2
    n_rows = float(B * H * W)

    # NHWC for the kernels; bf16 activations/weights feed the MXU.
    # TODO(synk): keep the model NHWC end-to-end so this transpose is done once
    # per network, not per ConvBlock.
    x = jnp.transpose(x_nchw, (0, 2, 3, 1)).astype(MXU_DTYPE)
    # OIHW -> (ky, kx, Cin, Cout) -> (9, Cin, Cout): tap-major, row = 3*ky + kx.
    w1 = jnp.transpose(w1_oihw, (2, 3, 1, 0)).reshape(9, Cin, Cout).astype(MXU_DTYPE)
    w2 = jnp.transpose(w2_oihw, (2, 3, 1, 0)).reshape(9, Cout, Cout).astype(MXU_DTYPE)

    cparams = pltpu.CompilerParams(
        dimension_semantics=("parallel",),            # megacore sharding on v7x
        vmem_limit_bytes=48 * 1024 * 1024,            # TODO(synk): per-generation budget
    )

    def act_block(c, h, w):
        return pl.BlockSpec((batch_tile, h, w, c), lambda i: (i, 0, 0, 0))

    def const_block(shape):                           # resident across the grid
        return pl.BlockSpec(shape, lambda i: (0,) * len(shape))

    stats_block = pl.BlockSpec((1, 2, Cout), lambda i: (i, 0, 0))

    # ---- pass 1: conv1 -> raw activations + per-tile BN1 stats ----
    conv1_raw, stats1 = pl.pallas_call(
        conv1_kernel,
        grid=(nb,),
        in_specs=[act_block(Cin, H, W), const_block((9, Cin, Cout))],
        out_specs=(act_block(Cout, H, W), stats_block),
        out_shape=(jax.ShapeDtypeStruct((B, H, W, Cout), jnp.float32),
                   jax.ShapeDtypeStruct((nb, 2, Cout), jnp.float32)),
        scratch_shapes=[pltpu.VMEM((batch_tile, H + 2, W + 2, Cin), jnp.float32)],
        compiler_params=cparams,
    )(x, w1)
    scale1, shift1 = _bn_scale_shift(stats1, n_rows)

    # ---- pass 2: bn1+relu -> conv2 -> raw activations + per-tile BN2 stats ----
    conv2_raw, stats2 = pl.pallas_call(
        conv2_kernel,
        grid=(nb,),
        in_specs=[act_block(Cout, H, W),
                  const_block((1, Cout)), const_block((1, Cout)),
                  const_block((9, Cout, Cout))],
        out_specs=(act_block(Cout, H, W), stats_block),
        out_shape=(jax.ShapeDtypeStruct((B, H, W, Cout), jnp.float32),
                   jax.ShapeDtypeStruct((nb, 2, Cout), jnp.float32)),
        scratch_shapes=[pltpu.VMEM((batch_tile, H + 2, W + 2, Cout), jnp.float32)],
        compiler_params=cparams,
    )(conv1_raw, scale1, shift1, w2)
    # Fold the 2x2 avg-pool 0.25 into the BN2 affine (free multiply).
    scale2, shift2 = _bn_scale_shift(stats2, n_rows, extra_scale=0.25)

    # ---- pass 3: bn2(+0.25) + relu -> 2x2 avg pool ----
    out_nhwc = pl.pallas_call(
        bn2_pool_kernel,
        grid=(nb,),
        in_specs=[act_block(Cout, H, W),
                  const_block((1, Cout)), const_block((1, Cout))],
        out_specs=act_block(Cout, Ho, Wo),
        out_shape=jax.ShapeDtypeStruct((B, Ho, Wo, Cout), jnp.float32),
        compiler_params=cparams,
    )(conv2_raw, scale2, shift2)

    return jnp.transpose(out_nhwc, (0, 3, 1, 2))      # back to NCHW at the boundary


# ---------------------- deterministic parameter init ----------------------- #

def xavier_uniform_conv(key, cout, cin, kh, kw):
    fan_in = cin * kh * kw
    fan_out = cout * kh * kw
    bound = float(np.sqrt(6.0 / (fan_in + fan_out)))
    return jax.random.uniform(key, (cout, cin, kh, kw), jnp.float32, -bound, bound)


# ------------------------------- reference --------------------------------- #

def _reference(x, w1, w2):
    def conv(v, w):
        return jax.lax.conv_general_dilated(
            v, w, window_strides=(1, 1), padding=((1, 1), (1, 1)),
            dimension_numbers=("NCHW", "OIHW", "NCHW"))

    def bn_relu(v):
        mean = jnp.mean(v, axis=(0, 2, 3), keepdims=True)
        var = jnp.mean((v - mean) ** 2, axis=(0, 2, 3), keepdims=True)
        return jnp.maximum((v - mean) * jax.lax.rsqrt(var + BN_EPS), 0.0)

    h = bn_relu(conv(x, w1))
    h = bn_relu(conv(h, w2))
    B, C, Hh, Ww = h.shape
    return h.reshape(B, C, Hh // 2, 2, Ww // 2, 2).mean(axis=(3, 5))


# ---------------------------------- main ------------------------------------ #

if __name__ == "__main__":
    B, Cin, Cout, H, W = 2, 4, 8, 16, 16

    key = jax.random.PRNGKey(0)
    k1, k2, kx = jax.random.split(key, 3)
    w1 = xavier_uniform_conv(k1, Cout, Cin, 3, 3)     # conv1.weight, bias=False
    w2 = xavier_uniform_conv(k2, Cout, Cout, 3, 3)    # conv2.weight, bias=False
    x = jax.random.normal(kx, (B, Cin, H, W), jnp.float32)

    out = jax.jit(conv_block_forward)(x, w1, w2)
    out = jax.block_until_ready(out)
    assert out.shape == (B, Cout, H // 2, W // 2), out.shape

    # f32 reference; tolerance loosened because the kernel deliberately feeds
    # bf16 operands to the MXU (f32 accumulation).
    ref = _reference(x, w1, w2)
    np.testing.assert_allclose(np.asarray(out), np.asarray(ref), rtol=3e-2, atol=3e-2)

    print("KERNEL_OK")
</pallas_src>

<mosaic_0001>
module attributes {stable_mosaic.version = 11 : i64} {
  func.func @conv1_kernel(%arg0: i32, %arg1: memref<1x16x16x4xbf16, #tpu.memory_space<vmem>>, %arg2: memref<9x4x8xbf16, #tpu.memory_space<vmem>>, %arg3: memref<1x16x16x8xf32, #tpu.memory_space<vmem>>, %arg4: memref<1x2x8xf32, #tpu.memory_space<vmem>>, %arg5: memref<1x18x18x4xf32, #tpu.memory_space<vmem>>) attributes {dimension_semantics = [#tpu.dimension_semantics<parallel>], iteration_bounds = array<i64: 2>, scalar_prefetch = 0 : i64, scratch_operands = 1 : i64, tpu.core_type = #tpu.core_type<tc>, window_params = [{transform_indices = @transform_0, window_bounds = array<i64: 1, 16, 16, 4>}, {pipeline_mode = #tpu.pipeline_mode<synchronous>, transform_indices = @transform_1, window_bounds = array<i64: 9, 4, 8>}, {transform_indices = @transform_2, window_bounds = array<i64: 1, 16, 16, 8>}, {transform_indices = @transform_3, window_bounds = array<i64: 1, 2, 8>}]} {
    %c0 = arith.constant 0 : index
    %c0_0 = arith.constant 0 : index
    %c0_1 = arith.constant 0 : index
    %c0_2 = arith.constant 0 : index
    %0 = vector.load %arg1[%c0, %c0_0, %c0_1, %c0_2] : memref<1x16x16x4xbf16, #tpu.memory_space<vmem>>, vector<1x16x16x4xbf16>
    %cst = arith.constant 0.000000e+00 : f32
    %1 = vector.broadcast %cst : f32 to vector<1x1x18x4xf32>
    %cst_3 = arith.constant 0.000000e+00 : f32
    %2 = vector.broadcast %cst_3 : f32 to vector<1x16x1x4xf32>
    %c0_4 = arith.constant 0 : index
    %c0_5 = arith.constant 0 : index
    %c0_6 = arith.constant 0 : index
    %c0_7 = arith.constant 0 : index
    %3 = vector.load %arg5[%c0_4, %c0_5, %c0_6, %c0_7] : memref<1x18x18x4xf32, #tpu.memory_space<vmem>>, vector<1x1x18x4xf32>
    tpu.vector_store %arg5[%c0_4, %c0_5, %c0_6, %c0_7], %1 {strides = array<i32>} : memref<1x18x18x4xf32, #tpu.memory_space<vmem>>, vector<1x1x18x4xf32>,
    %c0_8 = arith.constant 0 : index
    %c17 = arith.constant 17 : index
    %c0_9 = arith.constant 0 : index
    %c0_10 = arith.constant 0 : index
    %4 = vector.load %arg5[%c0_8, %c17, %c0_9, %c0_10] : memref<1x18x18x4xf32, #tpu.memory_space<vmem>>, vector<1x1x18x4xf32>
    tpu.vector_store %arg5[%c0_8, %c17, %c0_9, %c0_10], %1 {strides = array<i32>} : memref<1x18x18x4xf32, #tpu.memory_space<vmem>>, vector<1x1x18x4xf32>,
    %c0_11 = arith.constant 0 : index
    %c1 = arith.constant 1 : index
    %c0_12 = arith.constant 0 : index
    %c0_13 = arith.constant 0 : index
    %5 = vector.load %arg5[%c0_11, %c1, %c0_12, %c0_13] : memref<1x18x18x4xf32, #tpu.memory_space<vmem>>, vector<1x16x1x4xf32>
    tpu.vector_store %arg5[%c0_11, %c1, %c0_12, %c0_13], %2 {strides = array<i32>} : memref<1x18x18x4xf32, #tpu.memory_space<vmem>>, vector<1x16x1x4xf32>,
    %c0_14 = arith.constant 0 : index
    %c1_15 = arith.constant 1 : index
    %c17_16 = arith.constant 17 : index
    %c0_17 = arith.constant 0 : index
    %6 = vector.load %arg5[%c0_14, %c1_15, %c17_16, %c0_17] : memref<1x18x18x4xf32, #tpu.memory_space<vmem>>, vector<1x16x1x4xf32>
    tpu.vector_store %arg5[%c0_14, %c1_15, %c17_16, %c0_17], %2 {strides = array<i32>} : memref<1x18x18x4xf32, #tpu.memory_space<vmem>>, vector<1x16x1x4xf32>,
    %7 = arith.extf %0 : vector<1x16x16x4xbf16> to vector<1x16x16x4xf32>
    %c0_18 = arith.constant 0 : index
    %c1_19 = arith.constant 1 : index
    %c1_20 = arith.constant 1 : index
    %c0_21 = arith.constant 0 : index
    %8 = vector.load %arg5[%c0_18, %c1_19, %c1_20, %c0_21] : memref<1x18x18x4xf32, #tpu.memory_space<vmem>>, vector<1x16x16x4xf32>
    tpu.vector_store %arg5[%c0_18, %c1_19, %c1_20, %c0_21], %7 {strides = array<i32>} : memref<1x18x18x4xf32, #tpu.memory_space<vmem>>, vector<1x16x16x4xf32>,
    %c0_22 = arith.constant 0 : index
    %c0_23 = arith.constant 0 : index
    %c0_24 = arith.constant 0 : index
    %c0_25 = arith.constant 0 : index
    %9 = vector.load %arg5[%c0_22, %c0_23, %c0_24, %c0_25] : memref<1x18x18x4xf32, #tpu.memory_space<vmem>>, vector<1x16x16x4xf32>
    %10 = vector.shape_cast %9 : vector<1x16x16x4xf32> to vector<256x4xf32>
    %11 = arith.truncf %10 : vector<256x4xf32> to vector<256x4xbf16>
    %c0_26 = arith.constant 0 : index
    %c0_27 = arith.constant 0 : index
    %c0_28 = arith.constant 0 : index
    %12 = vector.load %arg2[%c0_26, %c0_27, %c0_28] : memref<9x4x8xbf16, #tpu.memory_space<vmem>>, vector<1x4x8xbf16>
    %13 = vector.shape_cast %12 : vector<1x4x8xbf16> to vector<4x8xbf16>
    %cst_29 = arith.constant dense<0.000000e+00> : vector<256x8xf32>
    %14 = tpu.matmul %11, %13, %cst_29 {dimension_numbers = #tpu.dot_dimension_numbers<[1], [0], [0], [1], [0, 0, 1, 1], [], []>} : vector<256x4xbf16>, vector<4x8xbf16>, vector<256x8xf32> -> vector<256x8xf32>
    %c0_30 = arith.constant 0 : index
    %c0_31 = arith.constant 0 : index
    %c1_32 = arith.constant 1 : index
    %c0_33 = arith.constant 0 : index
    %15 = vector.load %arg5[%c0_30, %c0_31, %c1_32, %c0_33] : memref<1x18x18x4xf32, #tpu.memory_space<vmem>>, vector<1x16x16x4xf32>
    %16 = vector.shape_cast %15 : vector<1x16x16x4xf32> to vector<256x4xf32>
    %17 = arith.truncf %16 : vector<256x4xf32> to vector<256x4xbf16>
    %c1_34 = arith.constant 1 : index
    %c0_35 = arith.constant 0 : index
    %c0_36 = arith.constant 0 : index
    %18 = vector.load %arg2[%c1_34, %c0_35, %c0_36] : memref<9x4x8xbf16, #tpu.memory_space<vmem>>, vector<1x4x8xbf16>
    %19 = vector.shape_cast %18 : vector<1x4x8xbf16> to vector<4x8xbf16>
    %cst_37 = arith.constant dense<0.000000e+00> : vector<256x8xf32>
    %20 = tpu.matmul %17, %19, %cst_37 {dimension_numbers = #tpu.dot_dimension_numbers<[1], [0], [0], [1], [0, 0, 1, 1], [], []>} : vector<256x4xbf16>, vector<4x8xbf16>, vector<256x8xf32> -> vector<256x8xf32>
    %21 = arith.addf %14, %20 : vector<256x8xf32>
    %c0_38 = arith.constant 0 : index
    %c0_39 = arith.constant 0 : index
    %c2 = arith.constant 2 : index
    %c0_40 = arith.constant 0 : index
    %22 = vector.load %arg5[%c0_38, %c0_39, %c2, %c0_40] : memref<1x18x18x4xf32, #tpu.memory_space<vmem>>, vector<1x16x16x4xf32>
    %23 = vector.shape_cast %22 : vector<1x16x16x4xf32> to vector<256x4xf32>
    %24 = arith.truncf %23 : vector<256x4xf32> to vector<256x4xbf16>
    %c2_41 = arith.constant 2 : index
    %c0_42 = arith.constant 0 : index
    %c0_43 = arith.constant 0 : index
    %25 = vector.load %arg2[%c2_41, %c0_42, %c0_43] : memref<9x4x8xbf16, #tpu.memory_space<vmem>>, vector<1x4x8xbf16>
    %26 = vector.shape_cast %25 : vector<1x4x8xbf16> to vector<4x8xbf16>
    %cst_44 = arith.constant dense<0.000000e+00> : vector<256x8xf32>
    %27 = tpu.matmul %24, %26, %cst_44 {dimension_numbers = #tpu.dot_dimension_numbers<[1], [0], [0], [1], [0, 0, 1, 1], [], []>} : vector<256x4xbf16>, vector<4x8xbf16>, vector<256x8xf32> -> vector<256x8xf32>
    %28 = arith.addf %21, %27 : vector<256x8xf32>
    %c0_45 = arith.constant 0 : index
    %c1_46 = arith.constant 1 : index
    %c0_47 = arith.constant 0 : index
    %c0_48 = arith.constant 0 : index
    %29 = vector.load %arg5[%c0_45, %c1_46, %c0_47, %c0_48] : memref<1x18x18x4xf32, #tpu.memory_space<vmem>>, vector<1x16x16x4xf32>
    %30 = vector.shape_cast %29 : vector<1x16x16x4xf32> to vector<256x4xf32>
    %31 = arith.truncf %30 : vector<256x4xf32> to vector<256x4xbf16>
    %c3 = arith.constant 3 : index
    %c0_49 = arith.constant 0 : index
    %c0_50 = arith.constant 0 : index
    %32 = vector.load %arg2[%c3, %c0_49, %c0_50] : memref<9x4x8xbf16, #tpu.memory_space<vmem>>, vector<1x4x8xbf16>
    %33 = vector.shape_cast %32 : vector<1x4x8xbf16> to vector<4x8xbf16>
    %cst_51 = arith.constant dense<0.000000e+00> : vector<256x8xf32>
    %34 = tpu.matmul %31, %33, %cst_51 {dimension_numbers = #tpu.dot_dimension_numbers<[1], [0], [0], [1], [0, 0, 1, 1], [], []>} : vector<256x4xbf16>, vector<4x8xbf16>, vector<256x8xf32> -> vector<256x8xf32>
    %35 = arith.addf %28, %34 : vector<256x8xf32>
    %c0_52 = arith.constant 0 : index
    %c1_53 = arith.constant 1 : index
    %c1_54 = arith.constant 1 : index
    %c0_55 = arith.constant 0 : index
    %36 = vector.load %arg5[%c0_52, %c1_53, %c1_54, %c0_55] : memref<1x18x18x4xf32, #tpu.memory_space<vmem>>, vector<1x16x16x4xf32>
    %37 = vector.shape_cast %36 : vector<1x16x16x4xf32> to vector<256x4xf32>
    %38 = arith.truncf %37 : vector<256x4xf32> to vector<256x4xbf16>
    %c4 = arith.constant 4 : index
    %c0_56 = arith.constant 0 : index
    %c0_57 = arith.constant 0 : index
    %39 = vector.load %arg2[%c4, %c0_56, %c0_57] : memref<9x4x8xbf16, #tpu.memory_space<vmem>>, vector<1x4x8xbf16>
    %40 = vector.shape_cast %39 : vector<1x4x8xbf16> to vector<4x8xbf16>
    %cst_58 = arith.constant dense<0.000000e+00> : vector<256x8xf32>
    %41 = tpu.matmul %38, %40, %cst_58 {dimension_numbers = #tpu.dot_dimension_numbers<[1], [0], [0], [1], [0, 0, 1, 1], [], []>} : vector<256x4xbf16>, vector<4x8xbf16>, vector<256x8xf32> -> vector<256x8xf32>
    %42 = arith.addf %35, %41 : vector<256x8xf32>
    %c0_59 = arith.constant 0 : index
    %c1_60 = arith.constant 1 : index
    %c2_61 = arith.constant 2 : index
    %c0_62 = arith.constant 0 : index
    %43 = vector.load %arg5[%c0_59, %c1_60, %c2_61, %c0_62] : memref<1x18x18x4xf32, #tpu.memory_space<vmem>>, vector<1x16x16x4xf32>
    %44 = vector.shape_cast %43 : vector<1x16x16x4xf32> to vector<256x4xf32>
    %45 = arith.truncf %44 : vector<256x4xf32> to vector<256x4xbf16>
    %c5 = arith.constant 5 : index
    %c0_63 = arith.constant 0 : index
    %c0_64 = arith.constant 0 : index
    %46 = vector.load %arg2[%c5, %c0_63, %c0_64] : memref<9x4x8xbf16, #tpu.memory_space<vmem>>, vector<1x4x8xbf16>
    %47 = vector.shape_cast %46 : vector<1x4x8xbf16> to vector<4x8xbf16>
    %cst_65 = arith.constant dense<0.000000e+00> : vector<256x8xf32>
    %48 = tpu.matmul %45, %47, %cst_65 {dimension_numbers = #tpu.dot_dimension_numbers<[1], [0], [0], [1], [0, 0, 1, 1], [], []>} : vector<256x4xbf16>, vector<4x8xbf16>, vector<256x8xf32> -> vector<256x8xf32>
    %49 = arith.addf %42, %48 : vector<256x8xf32>
    %c0_66 = arith.constant 0 : index
    %c2_67 = arith.constant 2 : index
    %c0_68 = arith.constant 0 : index
    %c0_69 = arith.constant 0 : index
    %50 = vector.load %arg5[%c0_66, %c2_67, %c0_68, %c0_69] : memref<1x18x18x4xf32, #tpu.memory_space<vmem>>, vector<1x16x16x4xf32>
    %51 = vector.shape_cast %50 : vector<1x16x16x4xf32> to vector<256x4xf32>
    %52 = arith.truncf %51 : vector<256x4xf32> to vector<256x4xbf16>
    %c6 = arith.constant 6 : index
    %c0_70 = arith.constant 0 : index
    %c0_71 = arith.constant 0 : index
    %53 = vector.load %arg2[%c6, %c0_70, %c0_71] : memref<9x4x8xbf16, #tpu.memory_space<vmem>>, vector<1x4x8xbf16>
    %54 = vector.shape_cast %53 : vector<1x4x8xbf16> to vector<4x8xbf16>
    %cst_72 = arith.constant dense<0.000000e+00> : vector<256x8xf32>
    %55 = tpu.matmul %52, %54, %cst_72 {dimension_numbers = #tpu.dot_dimension_numbers<[1], [0], [0], [1], [0, 0, 1, 1], [], []>} : vector<256x4xbf16>, vector<4x8xbf16>, vector<256x8xf32> -> vector<256x8xf32>
    %56 = arith.addf %49, %55 : vector<256x8xf32>
    %c0_73 = arith.constant 0 : index
    %c2_74 = arith.constant 2 : index
    %c1_75 = arith.constant 1 : index
    %c0_76 = arith.constant 0 : index
    %57 = vector.load %arg5[%c0_73, %c2_74, %c1_75, %c0_76] : memref<1x18x18x4xf32, #tpu.memory_space<vmem>>, vector<1x16x16x4xf32>
    %58 = vector.shape_cast %57 : vector<1x16x16x4xf32> to vector<256x4xf32>
    %59 = arith.truncf %58 : vector<256x4xf32> to vector<256x4xbf16>
    %c7 = arith.constant 7 : index
    %c0_77 = arith.constant 0 : index
    %c0_78 = arith.constant 0 : index
    %60 = vector.load %arg2[%c7, %c0_77, %c0_78] : memref<9x4x8xbf16, #tpu.memory_space<vmem>>, vector<1x4x8xbf16>
    %61 = vector.shape_cast %60 : vector<1x4x8xbf16> to vector<4x8xbf16>
    %cst_79 = arith.constant dense<0.000000e+00> : vector<256x8xf32>
    %62 = tpu.matmul %59, %61, %cst_79 {dimension_numbers = #tpu.dot_dimension_numbers<[1], [0], [0], [1], [0, 0, 1, 1], [], []>} : vector<256x4xbf16>, vector<4x8xbf16>, vector<256x8xf32> -> vector<256x8xf32>
    %63 = arith.addf %56, %62 : vector<256x8xf32>
    %c0_80 = arith.constant 0 : index
    %c2_81 = arith.constant 2 : index
    %c2_82 = arith.constant 2 : index
    %c0_83 = arith.constant 0 : index
    %64 = vector.load %arg5[%c0_80, %c2_81, %c2_82, %c0_83] : memref<1x18x18x4xf32, #tpu.memory_space<vmem>>, vector<1x16x16x4xf32>
    %65 = vector.shape_cast %64 : vector<1x16x16x4xf32> to vector<256x4xf32>
    %66 = arith.truncf %65 : vector<256x4xf32> to vector<256x4xbf16>
    %c8 = arith.constant 8 : index
    %c0_84 = arith.constant 0 : index
    %c0_85 = arith.constant 0 : index
    %67 = vector.load %arg2[%c8, %c0_84, %c0_85] : memref<9x4x8xbf16, #tpu.memory_space<vmem>>, vector<1x4x8xbf16>
    %68 = vector.shape_cast %67 : vector<1x4x8xbf16> to vector<4x8xbf16>
    %cst_86 = arith.constant dense<0.000000e+00> : vector<256x8xf32>
    %69 = tpu.matmul %66, %68, %cst_86 {dimension_numbers = #tpu.dot_dimension_numbers<[1], [0], [0], [1], [0, 0, 1, 1], [], []>} : vector<256x4xbf16>, vector<4x8xbf16>, vector<256x8xf32> -> vector<256x8xf32>
    %70 = arith.addf %63, %69 : vector<256x8xf32>
    %71 = vector.shape_cast %70 : vector<256x8xf32> to vector<1x16x16x8xf32>
    %c0_87 = arith.constant 0 : index
    %c0_88 = arith.constant 0 : index
    %c0_89 = arith.constant 0 : index
    %c0_90 = arith.constant 0 : index
    %72 = vector.load %arg3[%c0_87, %c0_88, %c0_89, %c0_90] : memref<1x16x16x8xf32, #tpu.memory_space<vmem>>, vector<1x16x16x8xf32>
    tpu.vector_store %arg3[%c0_87, %c0_88, %c0_89, %c0_90], %71 {strides = array<i32>} : memref<1x16x16x8xf32, #tpu.memory_space<vmem>>, vector<1x16x16x8xf32>,
    %cst_91 = arith.constant dense<0.000000e+00> : vector<8xf32>
    %73 = vector.multi_reduction <add>, %70, %cst_91 [0] : vector<256x8xf32> to vector<8xf32>
    %74 = vector.shape_cast %73 : vector<8xf32> to vector<1x8xf32>
    %75 = arith.mulf %70, %70 : vector<256x8xf32>
    %cst_92 = arith.constant dense<0.000000e+00> : vector<8xf32>
    %76 = vector.multi_reduction <add>, %75, %cst_92 [0] : vector<256x8xf32> to vector<8xf32>
    %77 = vector.shape_cast %76 : vector<8xf32> to vector<1x8xf32>
    %78 = tpu.concatenate %74, %77 in 0 : vector<1x8xf32>, vector<1x8xf32> -> vector<2x8xf32>
    %79 = vector.shape_cast %78 : vector<2x8xf32> to vector<1x2x8xf32>
    %c0_93 = arith.constant 0 : index
    %c0_94 = arith.constant 0 : index
    %c0_95 = arith.constant 0 : index
    %80 = vector.load %arg4[%c0_93, %c0_94, %c0_95] : memref<1x2x8xf32, #tpu.memory_space<vmem>>, vector<1x2x8xf32>
    tpu.vector_store %arg4[%c0_93, %c0_94, %c0_95], %79 {strides = array<i32>} : memref<1x2x8xf32, #tpu.memory_space<vmem>>, vector<1x2x8xf32>,
    return
  }
  func.func @transform_0(%arg0: i32) -> (i32, i32, i32, i32) {
    %c0_i32 = arith.constant 0 : i32
    %c0_i32_0 = arith.constant 0 : i32
    %c0_i32_1 = arith.constant 0 : i32
    %c0_i32_2 = arith.constant 0 : i32
    return %arg0, %c0_i32, %c0_i32_0, %c0_i32_1 : i32, i32, i32, i32
  }
  func.func @transform_1(%arg0: i32) -> (i32, i32, i32) {
    %c0_i32 = arith.constant 0 : i32
    %c0_i32_0 = arith.constant 0 : i32
    %c0_i32_1 = arith.constant 0 : i32
    %c0_i32_2 = arith.constant 0 : i32
    return %c0_i32, %c0_i32_0, %c0_i32_1 : i32, i32, i32
  }
  func.func @transform_2(%arg0: i32) -> (i32, i32, i32, i32) {
    %c0_i32 = arith.constant 0 : i32
    %c0_i32_0 = arith.constant 0 : i32
    %c0_i32_1 = arith.constant 0 : i32
    %c0_i32_2 = arith.constant 0 : i32
    return %arg0, %c0_i32, %c0_i32_0, %c0_i32_1 : i32, i32, i32, i32
  }
  func.func @transform_3(%arg0: i32) -> (i32, i32, i32) {
    %c0_i32 = arith.constant 0 : i32
    %c0_i32_0 = arith.constant 0 : i32
    %c0_i32_1 = arith.constant 0 : i32
    return %arg0, %c0_i32, %c0_i32_0 : i32, i32, i32
  }
}

module attributes {stable_mosaic.version = 11 : i64} {
  func.func @bn2_pool_kernel(%arg0: i32, %arg1: memref<1x16x16x8xf32, #tpu.memory_space<vmem>>, %arg2: memref<1x8xf32, #tpu.memory_space<vmem>>, %arg3: memref<1x8xf32, #tpu.memory_space<vmem>>, %arg4: memref<1x8x8x8xf32, #tpu.memory_space<vmem>>) attributes {dimension_semantics = [#tpu.dimension_semantics<parallel>], iteration_bounds = array<i64: 2>, scalar_prefetch = 0 : i64, scratch_operands = 0 : i64, tpu.core_type = #tpu.core_type<tc>, window_params = [{transform_indices = @transform_0, window_bounds = array<i64: 1, 16, 16, 8>}, {pipeline_mode = #tpu.pipeline_mode<synchronous>, transform_indices = @transform_1, window_bounds = array<i64: 1, 8>}, {pipeline_mode = #tpu.pipeline_mode<synchronous>, transform_indices = @transform_2, window_bounds = array<i64: 1, 8>}, {transform_indices = @transform_3, window_bounds = array<i64: 1, 8, 8, 8>}]} {
    %c0 = arith.constant 0 : index
    %c0_0 = arith.constant 0 : index
    %c0_1 = arith.constant 0 : index
    %c0_2 = arith.constant 0 : index
    %0 = vector.load %arg1[%c0, %c0_0, %c0_1, %c0_2] : memref<1x16x16x8xf32, #tpu.memory_space<vmem>>, vector<1x16x16x8xf32>
    %c0_3 = arith.constant 0 : index
    %c0_4 = arith.constant 0 : index
    %1 = vector.load %arg2[%c0_3, %c0_4] : memref<1x8xf32, #tpu.memory_space<vmem>>, vector<1x8xf32>
    %2 = vector.shape_cast %1 : vector<1x8xf32> to vector<1x1x1x8xf32>
    %3 = vector.broadcast %2 : vector<1x1x1x8xf32> to vector<1x16x16x8xf32>
    %4 = arith.mulf %0, %3 : vector<1x16x16x8xf32>
    %c0_5 = arith.constant 0 : index
    %c0_6 = arith.constant 0 : index
    %5 = vector.load %arg3[%c0_5, %c0_6] : memref<1x8xf32, #tpu.memory_space<vmem>>, vector<1x8xf32>
    %6 = vector.shape_cast %5 : vector<1x8xf32> to vector<1x1x1x8xf32>
    %7 = vector.broadcast %6 : vector<1x1x1x8xf32> to vector<1x16x16x8xf32>
    %8 = arith.addf %4, %7 : vector<1x16x16x8xf32>
    %cst = arith.constant 0.000000e+00 : f32
    %9 = vector.broadcast %cst : f32 to vector<1x16x16x8xf32>
    %10 = arith.maximumf %8, %9 : vector<1x16x16x8xf32>
    %11 = vector.shape_cast %10 : vector<1x16x16x8xf32> to vector<1x16x8x2x8xf32>
    %12 = vector.extract_strided_slice %11 {offsets = [0, 0, 0, 0, 0], sizes = [1, 16, 8, 1, 8], strides = [1, 1, 1, 1, 1]} : vector<1x16x8x2x8xf32> to vector<1x16x8x1x8xf32>
    %13 = vector.shape_cast %12 : vector<1x16x8x1x8xf32> to vector<1x16x8x8xf32>
    %14 = vector.extract_strided_slice %11 {offsets = [0, 0, 0, 1, 0], sizes = [1, 16, 8, 1, 8], strides = [1, 1, 1, 1, 1]} : vector<1x16x8x2x8xf32> to vector<1x16x8x1x8xf32>
    %15 = vector.shape_cast %14 : vector<1x16x8x1x8xf32> to vector<1x16x8x8xf32>
    %16 = arith.addf %13, %15 : vector<1x16x8x8xf32>
    %17 = vector.shape_cast %16 : vector<1x16x8x8xf32> to vector<1x8x2x8x8xf32>
    %18 = vector.extract_strided_slice %17 {offsets = [0, 0, 0, 0, 0], sizes = [1, 8, 1, 8, 8], strides = [1, 1, 1, 1, 1]} : vector<1x8x2x8x8xf32> to vector<1x8x1x8x8xf32>
    %19 = vector.shape_cast %18 : vector<1x8x1x8x8xf32> to vector<1x8x8x8xf32>
    %20 = vector.extract_strided_slice %17 {offsets = [0, 0, 1, 0, 0], sizes = [1, 8, 1, 8, 8], strides = [1, 1, 1, 1, 1]} : vector<1x8x2x8x8xf32> to vector<1x8x1x8x8xf32>
    %21 = vector.shape_cast %20 : vector<1x8x1x8x8xf32> to vector<1x8x8x8xf32>
    %22 = arith.addf %19, %21 : vector<1x8x8x8xf32>
    %c0_7 = arith.constant 0 : index
    %c0_8 = arith.constant 0 : index
    %c0_9 = arith.constant 0 : index
    %c0_10 = arith.constant 0 : index
    %23 = vector.load %arg4[%c0_7, %c0_8, %c0_9, %c0_10] : memref<1x8x8x8xf32, #tpu.memory_space<vmem>>, vector<1x8x8x8xf32>
    tpu.vector_store %arg4[%c0_7, %c0_8, %c0_9, %c0_10], %22 {strides = array<i32>} : memref<1x8x8x8xf32, #tpu.memory_space<vmem>>, vector<1x8x8x8xf32>,
    return
  }
  func.func @transform_0(%arg0: i32) -> (i32, i32, i32, i32) {
    %c0_i32 = arith.constant 0 : i32
    %c0_i32_0 = arith.constant 0 : i32
    %c0_i32_1 = arith.constant 0 : i32
    %c0_i32_2 = arith.constant 0 : i32
    return %arg0, %c0_i32, %c0_i32_0, %c0_i32_1 : i32, i32, i32, i32
  }
  func.func @transform_1(%arg0: i32) -> (i32, i32) {
    %c0_i32 = arith.constant 0 : i32
    %c0_i32_0 = arith.constant 0 : i32
    %c0_i32_1 = arith.constant 0 : i32
    return %c0_i32, %c0_i32_0 : i32, i32
  }
  func.func @transform_2(%arg0: i32) -> (i32, i32) {
    %c0_i32 = arith.constant 0 : i32
    %c0_i32_0 = arith.constant 0 : i32
    %c0_i32_1 = arith.constant 0 : i32
    return %c0_i32, %c0_i32_0 : i32, i32
  }
  func.func @transform_3(%arg0: i32) -> (i32, i32, i32, i32) {
    %c0_i32 = arith.constant 0 : i32
    %c0_i32_0 = arith.constant 0 : i32
    %c0_i32_1 = arith.constant 0 : i32
    %c0_i32_2 = arith.constant 0 : i32
    return %arg0, %c0_i32, %c0_i32_0, %c0_i32_1 : i32, i32, i32, i32
  }
}

module attributes {stable_mosaic.version = 11 : i64} {
  func.func @conv2_kernel(%arg0: i32, %arg1: memref<1x16x16x8xf32, #tpu.memory_space<vmem>>, %arg2: memref<1x8xf32, #tpu.memory_space<vmem>>, %arg3: memref<1x8xf32, #tpu.memory_space<vmem>>, %arg4: memref<9x8x8xbf16, #tpu.memory_space<vmem>>, %arg5: memref<1x16x16x8xf32, #tpu.memory_space<vmem>>, %arg6: memref<1x2x8xf32, #tpu.memory_space<vmem>>, %arg7: memref<1x18x18x8xf32, #tpu.memory_space<vmem>>) attributes {dimension_semantics = [#tpu.dimension_semantics<parallel>], iteration_bounds = array<i64: 2>, scalar_prefetch = 0 : i64, scratch_operands = 1 : i64, tpu.core_type = #tpu.core_type<tc>, window_params = [{transform_indices = @transform_0, window_bounds = array<i64: 1, 16, 16, 8>}, {pipeline_mode = #tpu.pipeline_mode<synchronous>, transform_indices = @transform_1, window_bounds = array<i64: 1, 8>}, {pipeline_mode = #tpu.pipeline_mode<synchronous>, transform_indices = @transform_2, window_bounds = array<i64: 1, 8>}, {pipeline_mode = #tpu.pipeline_mode<synchronous>, transform_indices = @transform_3, window_bounds = array<i64: 9, 8, 8>}, {transform_indices = @transform_4, window_bounds = array<i64: 1, 16, 16, 8>}, {transform_indices = @transform_5, window_bounds = array<i64: 1, 2, 8>}]} {
    %c0 = arith.constant 0 : index
    %c0_0 = arith.constant 0 : index
    %c0_1 = arith.constant 0 : index
    %c0_2 = arith.constant 0 : index
    %0 = vector.load %arg1[%c0, %c0_0, %c0_1, %c0_2] : memref<1x16x16x8xf32, #tpu.memory_space<vmem>>, vector<1x16x16x8xf32>
    %c0_3 = arith.constant 0 : index
    %c0_4 = arith.constant 0 : index
    %1 = vector.load %arg2[%c0_3, %c0_4] : memref<1x8xf32, #tpu.memory_space<vmem>>, vector<1x8xf32>
    %2 = vector.shape_cast %1 : vector<1x8xf32> to vector<1x1x1x8xf32>
    %3 = vector.broadcast %2 : vector<1x1x1x8xf32> to vector<1x16x16x8xf32>
    %4 = arith.mulf %0, %3 : vector<1x16x16x8xf32>
    %c0_5 = arith.constant 0 : index
    %c0_6 = arith.constant 0 : index
    %5 = vector.load %arg3[%c0_5, %c0_6] : memref<1x8xf32, #tpu.memory_space<vmem>>, vector<1x8xf32>
    %6 = vector.shape_cast %5 : vector<1x8xf32> to vector<1x1x1x8xf32>
    %7 = vector.broadcast %6 : vector<1x1x1x8xf32> to vector<1x16x16x8xf32>
    %8 = arith.addf %4, %7 : vector<1x16x16x8xf32>
    %cst = arith.constant 0.000000e+00 : f32
    %9 = vector.broadcast %cst : f32 to vector<1x16x16x8xf32>
    %10 = arith.maximumf %8, %9 : vector<1x16x16x8xf32>
    %cst_7 = arith.constant 0.000000e+00 : f32
    %11 = vector.broadcast %cst_7 : f32 to vector<1x1x18x8xf32>
    %cst_8 = arith.constant 0.000000e+00 : f32
    %12 = vector.broadcast %cst_8 : f32 to vector<1x16x1x8xf32>
    %c0_9 = arith.constant 0 : index
    %c0_10 = arith.constant 0 : index
    %c0_11 = arith.constant 0 : index
    %c0_12 = arith.constant 0 : index
    %13 = vector.load %arg7[%c0_9, %c0_10, %c0_11, %c0_12] : memref<1x18x18x8xf32, #tpu.memory_space<vmem>>, vector<1x1x18x8xf32>
    tpu.vector_store %arg7[%c0_9, %c0_10, %c0_11, %c0_12], %11 {strides = array<i32>} : memref<1x18x18x8xf32, #tpu.memory_space<vmem>>, vector<1x1x18x8xf32>,
    %c0_13 = arith.constant 0 : index
    %c17 = arith.constant 17 : index
    %c0_14 = arith.constant 0 : index
    %c0_15 = arith.constant 0 : index
    %14 = vector.load %arg7[%c0_13, %c17, %c0_14, %c0_15] : memref<1x18x18x8xf32, #tpu.memory_space<vmem>>, vector<1x1x18x8xf32>
    tpu.vector_store %arg7[%c0_13, %c17, %c0_14, %c0_15], %11 {strides = array<i32>} : memref<1x18x18x8xf32, #tpu.memory_space<vmem>>, vector<1x1x18x8xf32>,
    %c0_16 = arith.constant 0 : index
    %c1 = arith.constant 1 : index
    %c0_17 = arith.constant 0 : index
    %c0_18 = arith.constant 0 : index
    %15 = vector.load %arg7[%c0_16, %c1, %c0_17, %c0_18] : memref<1x18x18x8xf32, #tpu.memory_space<vmem>>, vector<1x16x1x8xf32>
    tpu.vector_store %arg7[%c0_16, %c1, %c0_17, %c0_18], %12 {strides = array<i32>} : memref<1x18x18x8xf32, #tpu.memory_space<vmem>>, vector<1x16x1x8xf32>,
    %c0_19 = arith.constant 0 : index
    %c1_20 = arith.constant 1 : index
    %c17_21 = arith.constant 17 : index
    %c0_22 = arith.constant 0 : index
    %16 = vector.load %arg7[%c0_19, %c1_20, %c17_21, %c0_22] : memref<1x18x18x8xf32, #tpu.memory_space<vmem>>, vector<1x16x1x8xf32>
    tpu.vector_store %arg7[%c0_19, %c1_20, %c17_21, %c0_22], %12 {strides = array<i32>} : memref<1x18x18x8xf32, #tpu.memory_space<vmem>>, vector<1x16x1x8xf32>,
    %c0_23 = arith.constant 0 : index
    %c1_24 = arith.constant 1 : index
    %c1_25 = arith.constant 1 : index
    %c0_26 = arith.constant 0 : index
    %17 = vector.load %arg7[%c0_23, %c1_24, %c1_25, %c0_26] : memref<1x18x18x8xf32, #tpu.memory_space<vmem>>, vector<1x16x16x8xf32>
    tpu.vector_store %arg7[%c0_23, %c1_24, %c1_25, %c0_26], %10 {strides = array<i32>} : memref<1x18x18x8xf32, #tpu.memory_space<vmem>>, vector<1x16x16x8xf32>,
    %c0_27 = arith.constant 0 : index
    %c0_28 = arith.constant 0 : index
    %c0_29 = arith.constant 0 : index
    %c0_30 = arith.constant 0 : index
    %18 = vector.load %arg7[%c0_27, %c0_28, %c0_29, %c0_30] : memref<1x18x18x8xf32, #tpu.memory_space<vmem>>, vector<1x16x16x8xf32>
    %19 = vector.shape_cast %18 : vector<1x16x16x8xf32> to vector<256x8xf32>
    %20 = arith.truncf %19 : vector<256x8xf32> to vector<256x8xbf16>
    %c0_31 = arith.constant 0 : index
    %c0_32 = arith.constant 0 : index
    %c0_33 = arith.constant 0 : index
    %21 = vector.load %arg4[%c0_31, %c0_32, %c0_33] : memref<9x8x8xbf16, #tpu.memory_space<vmem>>, vector<1x8x8xbf16>
    %22 = vector.shape_cast %21 : vector<1x8x8xbf16> to vector<8x8xbf16>
    %cst_34 = arith.constant dense<0.000000e+00> : vector<256x8xf32>
    %23 = tpu.matmul %20, %22, %cst_34 {dimension_numbers = #tpu.dot_dimension_numbers<[1], [0], [0], [1], [0, 0, 1, 1], [], []>} : vector<256x8xbf16>, vector<8x8xbf16>, vector<256x8xf32> -> vector<256x8xf32>
    %c0_35 = arith.constant 0 : index
    %c0_36 = arith.constant 0 : index
    %c1_37 = arith.constant 1 : index
    %c0_38 = arith.constant 0 : index
    %24 = vector.load %arg7[%c0_35, %c0_36, %c1_37, %c0_38] : memref<1x18x18x8xf32, #tpu.memory_space<vmem>>, vector<1x16x16x8xf32>
    %25 = vector.shape_cast %24 : vector<1x16x16x8xf32> to vector<256x8xf32>
    %26 = arith.truncf %25 : vector<256x8xf32> to vector<256x8xbf16>
    %c1_39 = arith.constant 1 : index
    %c0_40 = arith.constant 0 : index
    %c0_41 = arith.constant 0 : index
    %27 = vector.load %arg4[%c1_39, %c0_40, %c0_41] : memref<9x8x8xbf16, #tpu.memory_space<vmem>>, vector<1x8x8xbf16>
    %28 = vector.shape_cast %27 : vector<1x8x8xbf16> to vector<8x8xbf16>
    %cst_42 = arith.constant dense<0.000000e+00> : vector<256x8xf32>
    %29 = tpu.matmul %26, %28, %cst_42 {dimension_numbers = #tpu.dot_dimension_numbers<[1], [0], [0], [1], [0, 0, 1, 1], [], []>} : vector<256x8xbf16>, vector<8x8xbf16>, vector<256x8xf32> -> vector<256x8xf32>
    %30 = arith.addf %23, %29 : vector<256x8xf32>
    %c0_43 = arith.constant 0 : index
    %c0_44 = arith.constant 0 : index
    %c2 = arith.constant 2 : index
    %c0_45 = arith.constant 0 : index
    %31 = vector.load %arg7[%c0_43, %c0_44, %c2, %c0_45] : memref<1x18x18x8xf32, #tpu.memory_space<vmem>>, vector<1x16x16x8xf32>
    %32 = vector.shape_cast %31 : vector<1x16x16x8xf32> to vector<256x8xf32>
    %33 = arith.truncf %32 : vector<256x8xf32> to vector<256x8xbf16>
    %c2_46 = arith.constant 2 : index
    %c0_47 = arith.constant 0 : index
    %c0_48 = arith.constant 0 : index
    %34 = vector.load %arg4[%c2_46, %c0_47, %c0_48] : memref<9x8x8xbf16, #tpu.memory_space<vmem>>, vector<1x8x8xbf16>
    %35 = vector.shape_cast %34 : vector<1x8x8xbf16> to vector<8x8xbf16>
    %cst_49 = arith.constant dense<0.000000e+00> : vector<256x8xf32>
    %36 = tpu.matmul %33, %35, %cst_49 {dimension_numbers = #tpu.dot_dimension_numbers<[1], [0], [0], [1], [0, 0, 1, 1], [], []>} : vector<256x8xbf16>, vector<8x8xbf16>, vector<256x8xf32> -> vector<256x8xf32>
    %37 = arith.addf %30, %36 : vector<256x8xf32>
    %c0_50 = arith.constant 0 : index
    %c1_51 = arith.constant 1 : index
    %c0_52 = arith.constant 0 : index
    %c0_53 = arith.constant 0 : index
    %38 = vector.load %arg7[%c0_50, %c1_51, %c0_52, %c0_53] : memref<1x18x18x8xf32, #tpu.memory_space<vmem>>, vector<1x16x16x8xf32>
    %39 = vector.shape_cast %38 : vector<1x16x16x8xf32> to vector<256x8xf32>
    %40 = arith.truncf %39 : vector<256x8xf32> to vector<256x8xbf16>
    %c3 = arith.constant 3 : index
    %c0_54 = arith.constant 0 : index
    %c0_55 = arith.constant 0 : index
    %41 = vector.load %arg4[%c3, %c0_54, %c0_55] : memref<9x8x8xbf16, #tpu.memory_space<vmem>>, vector<1x8x8xbf16>
    %42 = vector.shape_cast %41 : vector<1x8x8xbf16> to vector<8x8xbf16>
    %cst_56 = arith.constant dense<0.000000e+00> : vector<256x8xf32>
    %43 = tpu.matmul %40, %42, %cst_56 {dimension_numbers = #tpu.dot_dimension_numbers<[1], [0], [0], [1], [0, 0, 1, 1], [], []>} : vector<256x8xbf16>, vector<8x8xbf16>, vector<256x8xf32> -> vector<256x8xf32>
    %44 = arith.addf %37, %43 : vector<256x8xf32>
    %c0_57 = arith.constant 0 : index
    %c1_58 = arith.constant 1 : index
    %c1_59 = arith.constant 1 : index
    %c0_60 = arith.constant 0 : index
    %45 = vector.load %arg7[%c0_57, %c1_58, %c1_59, %c0_60] : memref<1x18x18x8xf32, #tpu.memory_space<vmem>>, vector<1x16x16x8xf32>
    %46 = vector.shape_cast %45 : vector<1x16x16x8xf32> to vector<256x8xf32>
    %47 = arith.truncf %46 : vector<256x8xf32> to vector<256x8xbf16>
    %c4 = arith.constant 4 : index
    %c0_61 = arith.constant 0 : index
    %c0_62 = arith.constant 0 : index
    %48 = vector.load %arg4[%c4, %c0_61, %c0_62] : memref<9x8x8xbf16, #tpu.memory_space<vmem>>, vector<1x8x8xbf16>
    %49 = vector.shape_cast %48 : vector<1x8x8xbf16> to vector<8x8xbf16>
    %cst_63 = arith.constant dense<0.000000e+00> : vector<256x8xf32>
    %50 = tpu.matmul %47, %49, %cst_63 {dimension_numbers = #tpu.dot_dimension_numbers<[1], [0], [0], [1], [0, 0, 1, 1], [], []>} : vector<256x8xbf16>, vector<8x8xbf16>, vector<256x8xf32> -> vector<256x8xf32>
    %51 = arith.addf %44, %50 : vector<256x8xf32>
    %c0_64 = arith.constant 0 : index
    %c1_65 = arith.constant 1 : index
    %c2_66 = arith.constant 2 : index
    %c0_67 = arith.constant 0 : index
    %52 = vector.load %arg7[%c0_64, %c1_65, %c2_66, %c0_67] : memref<1x18x18x8xf32, #tpu.memory_space<vmem>>, vector<1x16x16x8xf32>
    %53 = vector.shape_cast %52 : vector<1x16x16x8xf32> to vector<256x8xf32>
    %54 = arith.truncf %53 : vector<256x8xf32> to vector<256x8xbf16>
    %c5 = arith.constant 5 : index
    %c0_68 = arith.constant 0 : index
    %c0_69 = arith.constant 0 : index
    %55 = vector.load %arg4[%c5, %c0_68, %c0_69] : memref<9x8x8xbf16, #tpu.memory_space<vmem>>, vector<1x8x8xbf16>
    %56 = vector.shape_cast %55 : vector<1x8x8xbf16> to vector<8x8xbf16>
    %cst_70 = arith.constant dense<0.000000e+00> : vector<256x8xf32>
    %57 = tpu.matmul %54, %56, %cst_70 {dimension_numbers = #tpu.dot_dimension_numbers<[1], [0], [0], [1], [0, 0, 1, 1], [], []>} : vector<256x8xbf16>, vector<8x8xbf16>, vector<256x8xf32> -> vector<256x8xf32>
    %58 = arith.addf %51, %57 : vector<256x8xf32>
    %c0_71 = arith.constant 0 : index
    %c2_72 = arith.constant 2 : index
    %c0_73 = arith.constant 0 : index
    %c0_74 = arith.constant 0 : index
    %59 = vector.load %arg7[%c0_71, %c2_72, %c0_73, %c0_74] : memref<1x18x18x8xf32, #tpu.memory_space<vmem>>, vector<1x16x16x8xf32>
    %60 = vector.shape_cast %59 : vector<1x16x16x8xf32> to vector<256x8xf32>
    %61 = arith.truncf %60 : vector<256x8xf32> to vector<256x8xbf16>
    %c6 = arith.constant 6 : index
    %c0_75 = arith.constant 0 : index
    %c0_76 = arith.constant 0 : index
    %62 = vector.load %arg4[%c6, %c0_75, %c0_76] : memref<9x8x8xbf16, #tpu.memory_space<vmem>>, vector<1x8x8xbf16>
    %63 = vector.shape_cast %62 : vector<1x8x8xbf16> to vector<8x8xbf16>
    %cst_77 = arith.constant dense<0.000000e+00> : vector<256x8xf32>
    %64 = tpu.matmul %61, %63, %cst_77 {dimension_numbers = #tpu.dot_dimension_numbers<[1], [0], [0], [1], [0, 0, 1, 1], [], []>} : vector<256x8xbf16>, vector<8x8xbf16>, vector<256x8xf32> -> vector<256x8xf32>
    %65 = arith.addf %58, %64 : vector<256x8xf32>
    %c0_78 = arith.constant 0 : index
    %c2_79 = arith.constant 2 : index
    %c1_80 = arith.constant 1 : index
    %c0_81 = arith.constant 0 : index
    %66 = vector.load %arg7[%c0_78, %c2_79, %c1_80, %c0_81] : memref<1x18x18x8xf32, #tpu.memory_space<vmem>>, vector<1x16x16x8xf32>
    %67 = vector.shape_cast %66 : vector<1x16x16x8xf32> to vector<256x8xf32>
    %68 = arith.truncf %67 : vector<256x8xf32> to vector<256x8xbf16>
    %c7 = arith.constant 7 : index
    %c0_82 = arith.constant 0 : index
    %c0_83 = arith.constant 0 : index
    %69 = vector.load %arg4[%c7, %c0_82, %c0_83] : memref<9x8x8xbf16, #tpu.memory_space<vmem>>, vector<1x8x8xbf16>
    %70 = vector.shape_cast %69 : vector<1x8x8xbf16> to vector<8x8xbf16>
    %cst_84 = arith.constant dense<0.000000e+00> : vector<256x8xf32>
    %71 = tpu.matmul %68, %70, %cst_84 {dimension_numbers = #tpu.dot_dimension_numbers<[1], [0], [0], [1], [0, 0, 1, 1], [], []>} : vector<256x8xbf16>, vector<8x8xbf16>, vector<256x8xf32> -> vector<256x8xf32>
    %72 = arith.addf %65, %71 : vector<256x8xf32>
    %c0_85 = arith.constant 0 : index
    %c2_86 = arith.constant 2 : index
    %c2_87 = arith.constant 2 : index
    %c0_88 = arith.constant 0 : index
    %73 = vector.load %arg7[%c0_85, %c2_86, %c2_87, %c0_88] : memref<1x18x18x8xf32, #tpu.memory_space<vmem>>, vector<1x16x16x8xf32>
    %74 = vector.shape_cast %73 : vector<1x16x16x8xf32> to vector<256x8xf32>
    %75 = arith.truncf %74 : vector<256x8xf32> to vector<256x8xbf16>
    %c8 = arith.constant 8 : index
    %c0_89 = arith.constant 0 : index
    %c0_90 = arith.constant 0 : index
    %76 = vector.load %arg4[%c8, %c0_89, %c0_90] : memref<9x8x8xbf16, #tpu.memory_space<vmem>>, vector<1x8x8xbf16>
    %77 = vector.shape_cast %76 : vector<1x8x8xbf16> to vector<8x8xbf16>
    %cst_91 = arith.constant dense<0.000000e+00> : vector<256x8xf32>
    %78 = tpu.matmul %75, %77, %cst_91 {dimension_numbers = #tpu.dot_dimension_numbers<[1], [0], [0], [1], [0, 0, 1, 1], [], []>} : vector<256x8xbf16>, vector<8x8xbf16>, vector<256x8xf32> -> vector<256x8xf32>
    %79 = arith.addf %72, %78 : vector<256x8xf32>
    %80 = vector.shape_cast %79 : vector<256x8xf32> to vector<1x16x16x8xf32>
    %c0_92 = arith.constant 0 : index
    %c0_93 = arith.constant 0 : index
    %c0_94 = arith.constant 0 : index
    %c0_95 = arith.constant 0 : index
    %81 = vector.load %arg5[%c0_92, %c0_93, %c0_94, %c0_95] : memref<1x16x16x8xf32, #tpu.memory_space<vmem>>, vector<1x16x16x8xf32>
    tpu.vector_store %arg5[%c0_92, %c0_93, %c0_94, %c0_95], %80 {strides = array<i32>} : memref<1x16x16x8xf32, #tpu.memory_space<vmem>>, vector<1x16x16x8xf32>,
    %cst_96 = arith.constant dense<0.000000e+00> : vector<8xf32>
    %82 = vector.multi_reduction <add>, %79, %cst_96 [0] : vector<256x8xf32> to vector<8xf32>
    %83 = vector.shape_cast %82 : vector<8xf32> to vector<1x8xf32>
    %84 = arith.mulf %79, %79 : vector<256x8xf32>
    %cst_97 = arith.constant dense<0.000000e+00> : vector<8xf32>
    %85 = vector.multi_reduction <add>, %84, %cst_97 [0] : vector<256x8xf32> to vector<8xf32>
    %86 = vector.shape_cast %85 : vector<8xf32> to vector<1x8xf32>
    %87 = tpu.concatenate %83, %86 in 0 : vector<1x8xf32>, vector<1x8xf32> -> vector<2x8xf32>
    %88 = vector.shape_cast %87 : vector<2x8xf32> to vector<1x2x8xf32>
    %c0_98 = arith.constant 0 : index
    %c0_99 = arith.constant 0 : index
    %c0_100 = arith.constant 0 : index
    %89 = vector.load %arg6[%c0_98, %c0_99, %c0_100] : memref<1x2x8xf32, #tpu.memory_space<vmem>>, vector<1x2x8xf32>
    tpu.vector_store %arg6[%c0_98, %c0_99, %c0_100], %88 {strides = array<i32>} : memref<1x2x8xf32, #tpu.memory_space<vmem>>, vector<1x2x8xf32>,
    return
  }
  func.func @transform_0(%arg0: i32) -> (i32, i32, i32, i32) {
    %c0_i32 = arith.constant 0 : i32
    %c0_i32_0 = arith.constant 0 : i32
    %c0_i32_1 = arith.constant 0 : i32
    %c0_i32_2 = arith.constant 0 : i32
    return %arg0, %c0_i32, %c0_i32_0, %c0_i32_1 : i32, i32, i32, i32
  }
  func.func @transform_1(%arg0: i32) -> (i32, i32) {
    %c0_i32 = arith.constant 0 : i32
    %c0_i32_0 = arith.constant 0 : i32
    %c0_i32_1 = arith.constant 0 : i32
    return %c0_i32, %c0_i32_0 : i32, i32
  }
  func.func @transform_2(%arg0: i32) -> (i32, i32) {
    %c0_i32 = arith.constant 0 : i32
    %c0_i32_0 = arith.constant 0 : i32
    %c0_i32_1 = arith.constant 0 : i32
    return %c0_i32, %c0_i32_0 : i32, i32
  }
  func.func @transform_3(%arg0: i32) -> (i32, i32, i32) {
    %c0_i32 = arith.constant 0 : i32
    %c0_i32_0 = arith.constant 0 : i32
    %c0_i32_1 = arith.constant 0 : i32
    %c0_i32_2 = arith.constant 0 : i32
    return %c0_i32, %c0_i32_0, %c0_i32_1 : i32, i32, i32
  }
  func.func @transform_4(%arg0: i32) -> (i32, i32, i32, i32) {
    %c0_i32 = arith.constant 0 : i32
    %c0_i32_0 = arith.constant 0 : i32
    %c0_i32_1 = arith.constant 0 : i32
    %c0_i32_2 = arith.constant 0 : i32
    return %arg0, %c0_i32, %c0_i32_0, %c0_i32_1 : i32, i32, i32, i32
  }
  func.func @transform_5(%arg0: i32) -> (i32, i32, i32) {
    %c0_i32 = arith.constant 0 : i32
    %c0_i32_0 = arith.constant 0 : i32
    %c0_i32_1 = arith.constant 0 : i32
    return %arg0, %c0_i32, %c0_i32_0 : i32, i32, i32
  }
}

</mosaic_0001>

<bundles_post_ra>
// kernel: conv_block_forward.5
= control target key start
LH: loop header
LB: loop body
LE: loop exit
PB: predicated region body
PF: predicated region fallthrough
CT: control target
= control target key end

     0   :  { %s1549_s12 = smov 0   ;;  %s3339_s0 = inlined_call_operand.vmem [shape: f32[2,16,16,8], index: 0, kind: input, shape index: {}]   ;;  %s3340_s1 = inlined_call_operand.vmem [shape: f32[1,8], index: 1, kind: input, shape index: {}]   ;;  %s3341_s2 = inlined_call_operand.vmem [shape: f32[1,8], index: 2, kind: input, shape index: {}]   ;;  %s3342_s3 = inlined_call_operand.vmem [shape: f32[2,8,8,8], index: 3, kind: output, shape index: {}]  }
   0x1 LB: > { %s1370_s13 = sadd.s32 4294967295, %s1527_s12   ;;  %p1374_p0 = scmp.ge.s32.totalorder %s1527_s12, 1  ;;  %s1527_s12 = sphi %s1549_s12, %s13_s12  }
   0x2   : > { %p137_p1 = scmp.lt.s32.totalorder %s1527_s12, 3 }
   0x4   : > { %p138_p2 = pnand %p1374_p0, %p137_p1 }
   0x6   : > { %141 = sbr.rel (%p138_p2) target bundleno = 270 (0x10e), region = 32 }
   0xb   : > { %p161_p3 = scmp.lt.s32.totalorder %s1370_s13, 1  ;;  %v1562_v0 = vld [vmem:[%s3340_s1] ss:$0 sm:$0xff]  ;;  %vm1235_vm0 = vcmask 1041409   ;;  %vm1237_vm1 = vcmask 1042434   ;;  %vm1239_vm2 = vcmask 1043459  }
   0xc   : > { %v1573_v1 = vld [vmem:[%s3341_s2] ss:$0 sm:$0xff]  ;;  %vm1241_vm3 = vcmask 1044484   ;;  %vm1243_vm4 = vcmask 1045509   ;;  %vm1245_vm5 = vcmask 1046534   ;;  %vm1247_vm6 = vcmask 1047559  }
   0xd   : > { %s3944_s13 = smov (!%p161_p3, %s1370_s13), 1  ;;  %vm1306_vm7 = vcmask 64512  }
   0xe   : > { %s1509_s16 = sshll.u32 %s3944_s13, 8  ;;  %s1510_s22 = sshll.u32 %s3944_s13, 6 }
   0xf   : > { %s1568_s19 = scalar_lea.vmem %s3339_s0, %s1509_s16  ;;  %s170_s25 = scalar_lea.vmem %s3342_s3, %s1510_s22 }
  0x10   : > { %v171_v2 = vld [vmem:[%s1568_s19] sm:$0xff]  ;;  %v172_v3 = vld [vmem:[%s1568_s19 + $0x8] sm:$0xff]  ;;  %v173_v4 = vld [vmem:[%s1568_s19 + $0x10] sm:$0xff] }
  0x11   : > { %v174_v5 = vld [vmem:[%s1568_s19 + $0x18] sm:$0xff]  ;;  %v175_v6 = vld [vmem:[%s1568_s19 + $0x20] sm:$0xff]  ;;  %v176_v7 = vld [vmem:[%s1568_s19 + $0x28] sm:$0xff]  ;;  %v207_v8 = vmul.f32 %v1562_v0, %v171_v2  ;;  %v208_v12 = vmul.f32 %v1562_v0, %v172_v3  ;;  %v209_v16 = vmul.f32 %v1562_v0, %v173_v4 }
  0x12   : > { %v177_v9 = vld [vmem:[%s1568_s19 + $0x30] sm:$0xff]  ;;  %v178_v10 = vld [vmem:[%s1568_s19 + $0x38] sm:$0xff]  ;;  %v179_v11 = vld [vmem:[%s1568_s19 + $0x40] sm:$0xff]  ;;  %v210_v17 = vmul.f32 %v1562_v0, %v174_v5  ;;  %v211_v21 = vmul.f32 %v1562_v0, %v175_v6  ;;  %v212_v22 = vmul.f32 %v1562_v0, %v176_v7 }
  0x13   : > { %v180_v13 = vld [vmem:[%s1568_s19 + $0x48] sm:$0xff]  ;;  %v181_v14 = vld [vmem:[%s1568_s19 + $0x50] sm:$0xff]  ;;  %v182_v15 = vld [vmem:[%s1568_s19 + $0x58] sm:$0xff]  ;;  %v213_v23 = vmul.f32 %v1562_v0, %v177_v9  ;;  %v214_v24 = vmul.f32 %v1562_v0, %v178_v10  ;;  %v215_v28 = vmul.f32 %v1562_v0, %v179_v11  ;;  %v1605_v31 = vadd.f32 %v1573_v1, %v207_v8 }
  0x14   : > { %v183_v18 = vld [vmem:[%s1568_s19 + $0x60] sm:$0xff]  ;;  %v184_v19 = vld [vmem:[%s1568_s19 + $0x68] sm:$0xff]  ;;  %v185_v20 = vld [vmem:[%s1568_s19 + $0x70] sm:$0xff]  ;;  %v216_v29 = vmul.f32 %v1562_v0, %v180_v13  ;;  %v217_v30 = vmul.f32 %v1562_v0, %v181_v14  ;;  %v218_v35 = vmul.f32 %v1562_v0, %v182_v15  ;;  %v244_v38 = vadd.f32 %v1573_v1, %v208_v12 }
  0x15   : > { %v186_v25 = vld [vmem:[%s1568_s19 + $0x78] sm:$0xff]  ;;  %v187_v26 = vld [vmem:[%s1568_s19 + $0x80] sm:$0xff]  ;;  %v188_v27 = vld [vmem:[%s1568_s19 + $0x88] sm:$0xff]  ;;  %v219_v36 = vmul.f32 %v1562_v0, %v183_v18  ;;  %v220_v37 = vmul.f32 %v1562_v0, %v184_v19  ;;  %v221_v42 = vmul.f32 %v1562_v0, %v185_v20  ;;  %v245_v45 = vadd.f32 %v1573_v1, %v209_v16 }
  0x16   : > { %v189_v32 = vld [vmem:[%s1568_s19 + $0x90] sm:$0xff]  ;;  %v190_v33 = vld [vmem:[%s1568_s19 + $0x98] sm:$0xff]  ;;  %v191_v34 = vld [vmem:[%s1568_s19 + $0xa0] sm:$0xff]  ;;  %v222_v43 = vmul.f32 %v1562_v0, %v186_v25  ;;  %v223_v44 = vmul.f32 %v1562_v0, %v187_v26  ;;  %v224_v49 = vmul.f32 %v1562_v0, %v188_v27  ;;  %v246_v52 = vadd.f32 %v1573_v1, %v210_v17 }
  0x17   : > { %v192_v39 = vld [vmem:[%s1568_s19 + $0xa8] sm:$0xff]  ;;  %v193_v40 = vld [vmem:[%s1568_s19 + $0xb0] sm:$0xff]  ;;  %v194_v41 = vld [vmem:[%s1568_s19 + $0xb8] sm:$0xff]  ;;  %v225_v50 = vmul.f32 %v1562_v0, %v189_v32  ;;  %v226_v51 = vmul.f32 %v1562_v0, %v190_v33  ;;  %v227_v56 = vmul.f32 %v1562_v0, %v191_v34  ;;  %v247_v59 = vadd.f32 %v1573_v1, %v211_v21 }
  0x18   : > { %v195_v46 = vld [vmem:[%s1568_s19 + $0xc0] sm:$0xff]  ;;  %v196_v47 = vld [vmem:[%s1568_s19 + $0xc8] sm:$0xff]  ;;  %v197_v48 = vld [vmem:[%s1568_s19 + $0xd0] sm:$0xff]  ;;  %v228_v57 = vmul.f32 %v1562_v0, %v192_v39  ;;  %v229_v58 = vmul.f32 %v1562_v0, %v193_v40  ;;  %v230_v62 = vmul.f32 %v1562_v0, %v194_v41  ;;  %v248_v3 = vadd.f32 %v1573_v1, %v212_v22 }
  0x19   : > { %v198_v53 = vld [vmem:[%s1568_s19 + $0xd8] sm:$0xff]  ;;  %v199_v54 = vld [vmem:[%s1568_s19 + $0xe0] sm:$0xff]  ;;  %v200_v55 = vld [vmem:[%s1568_s19 + $0xe8] sm:$0xff]  ;;  %v231_v63 = vmul.f32 %v1562_v0, %v195_v46  ;;  %v232_v2 = vmul.f32 %v1562_v0, %v196_v47  ;;  %v233_v4 = vmul.f32 %v1562_v0, %v197_v48  ;;  %v249_v7 = vadd.f32 %v1573_v1, %v213_v23 }
  0x1a   : > { %v201_v60 = vld [vmem:[%s1568_s19 + $0xf0] sm:$0xff]  ;;  %v202_v61 = vld [vmem:[%s1568_s19 + $0xf8] sm:$0xff]  ;;  %v234_v5 = vmul.f32 %v1562_v0, %v198_v53  ;;  %v235_v6 = vmul.f32 %v1562_v0, %v199_v54  ;;  %v236_v8 = vmul.f32 %v1562_v0, %v200_v55  ;;  %v250_v11 = vadd.f32 %v1573_v1, %v214_v24 }
  0x1b   : > { %v237_v9 = vmul.f32 %v1562_v0, %v201_v60  ;;  %v238_v10 = vmul.f32 %v1562_v0, %v202_v61  ;;  %v251_v12 = vadd.f32 %v1573_v1, %v215_v28  ;;  %v252_v13 = vadd.f32 %v1573_v1, %v216_v29 }
  0x1c   : > { %v253_v14 = vadd.f32 %v1573_v1, %v217_v30  ;;  %v254_v15 = vadd.f32 %v1573_v1, %v218_v35  ;;  %v255_v16 = vadd.f32 %v1573_v1, %v219_v36  ;;  %v256_v17 = vadd.f32 %v1573_v1, %v220_v37 }
  0x1d   : > { %v257_v18 = vadd.f32 %v1573_v1, %v221_v42  ;;  %v258_v19 = vadd.f32 %v1573_v1, %v222_v43  ;;  %v259_v0 = vadd.f32 %v1573_v1, %v223_v44  ;;  %v260_v20 = vadd.f32 %v1573_v1, %v224_v49 }
  0x1e   : > { %v261_v21 = vadd.f32 %v1573_v1, %v225_v50  ;;  %v262_v22 = vadd.f32 %v1573_v1, %v226_v51  ;;  %v263_v23 = vadd.f32 %v1573_v1, %v227_v56  ;;  %v264_v24 = vadd.f32 %v1573_v1, %v228_v57 }
  0x1f   : > { %v265_v25 = vadd.f32 %v1573_v1, %v229_v58  ;;  %v266_v26 = vadd.f32 %v1573_v1, %v230_v62  ;;  %v267_v27 = vadd.f32 %v1573_v1, %v231_v63  ;;  %v268_v28 = vadd.f32 %v1573_v1, %v232_v2 }
  0x20   : > { %v269_v29 = vadd.f32 %v1573_v1, %v233_v4  ;;  %v270_v30 = vadd.f32 %v1573_v1, %v234_v5  ;;  %v271_v32 = vadd.f32 %v1573_v1, %v235_v6  ;;  %v272_v33 = vadd.f32 %v1573_v1, %v236_v8 }
  0x21   : > { %v273_v34 = vadd.f32 %v1573_v1, %v237_v9  ;;  %v274_v35 = vadd.f32 %v1573_v1, %v238_v10  ;;  %v1674_v36 = vmax.f32 %v1605_v31, 0.0  ;;  %v1676_v37 = vmax.f32 %v244_v38, 0.0 }
  0x22   : > { %v1678_v39 = vmax.f32 %v245_v45, 0.0  ;;  %v1680_v40 = vmax.f32 %v246_v52, 0.0  ;;  %v1682_v41 = vmax.f32 %v247_v59, 0.0  ;;  %v1684_v42 = vmax.f32 %v248_v3, 0.0 }
  0x23   : > { %v1686_v43 = vmax.f32 %v249_v7, 0.0  ;;  %v1688_v44 = vmax.f32 %v250_v11, 0.0  ;;  %v1690_v46 = vmax.f32 %v251_v12, 0.0  ;;  %v1692_v1 = vmax.f32 %v252_v13, 0.0 }
  0x24   : > { %v1694_v31 = vmax.f32 %v253_v14, 0.0  ;;  %v1696_v38 = vmax.f32 %v254_v15, 0.0  ;;  %v1698_v45 = vmax.f32 %v255_v16, 0.0  ;;  %v1700_v47 = vmax.f32 %v256_v17, 0.0 }
  0x25   : > { %v1702_v48 = vmax.f32 %v257_v18, 0.0  ;;  %v1704_v49 = vmax.f32 %v258_v19, 0.0  ;;  %v1706_v50 = vmax.f32 %v259_v0, 0.0  ;;  %v1708_v51 = vmax.f32 %v260_v20, 0.0 }
  0x26   : > { %v1710_v52 = vmax.f32 %v261_v21, 0.0  ;;  %v1712_v53 = vmax.f32 %v262_v22, 0.0  ;;  %v1714_v54 = vmax.f32 %v263_v23, 0.0  ;;  %v1716_v55 = vmax.f32 %v264_v24, 0.0 }
  0x27   : > { %v1718_v56 = vmax.f32 %v265_v25, 0.0  ;;  %v1720_v57 = vmax.f32 %v266_v26, 0.0  ;;  %v1722_v58 = vmax.f32 %v267_v27, 0.0  ;;  %v1724_v59 = vmax.f32 %v268_v28, 0.0 }
  0x28   : > { %v1726_v60 = vmax.f32 %v269_v29, 0.0  ;;  %v1728_v61 = vmax.f32 %v270_v30, 0.0  ;;  %v1730_v62 = vmax.f32 %v271_v32, 0.0  ;;  %v1732_v63 = vmax.f32 %v272_v33, 0.0 }
  0x29   : > { %v1734_v2 = vmax.f32 %v273_v34, 0.0  ;;  %v1736_v3 = vmax.f32 %v274_v35, 0.0  ;;  %v3343_v4 = vrot.slane %v1674_v36, 2  ;;  %v3344_v5 = vrot.slane %v1674_v36, 4 }
  0x2a   : > { %v3345_v6 = vrot.slane %v1674_v36, 6  ;;  %v3346_v7 = vrot.slane %v1676_v37, 2  ;;  %v3347_v8 = vrot.slane %v1676_v37, 4  ;;  %v3348_v9 = vrot.slane %v1676_v37, 6 }
  0x2b   : > { %v3349_v10 = vrot.slane %v1678_v39, 2  ;;  %v3350_v11 = vrot.slane %v1678_v39, 4  ;;  %v3351_v12 = vrot.slane %v1678_v39, 6  ;;  %v3352_v13 = vrot.slane %v1680_v40, 2 }
  0x2c   : > { %v3353_v14 = vrot.slane %v1680_v40, 4  ;;  %v3354_v15 = vrot.slane %v1680_v40, 6  ;;  %v3355_v16 = vrot.slane %v1682_v41, 2  ;;  %v3356_v17 = vrot.slane %v1682_v41, 4 }
  0x2d   : > { %v3357_v18 = vrot.slane %v1682_v41, 6  ;;  %v3358_v19 = vrot.slane %v1684_v42, 2  ;;  %v3359_v0 = vrot.slane %v1684_v42, 4  ;;  %v3360_v20 = vrot.slane %v1684_v42, 6 }
  0x2e   : > { %v3361_v21 = vrot.slane %v1686_v43, 2  ;;  %v3362_v22 = vrot.slane %v1686_v43, 4  ;;  %v3363_v23 = vrot.slane %v1686_v43, 6  ;;  %v3364_v24 = vrot.slane %v1688_v44, 2 }
  0x2f   : > { %v1837_v30 = vrot.slane %v3343_v4, 9  ;;  %v1841_v33 = vrot.slane %v3344_v5, 9  ;;  %v1845_v35 = vrot.slane %v3345_v6, 9  ;;  %v1850_v27 = vrot.slane %v3346_v7, 9 }
  0x30   : > { %v1854_v29 = vrot.slane %v3347_v8, 9  ;;  %v1858_v4 = vrot.slane %v3348_v9, 9  ;;  %v1863_v6 = vrot.slane %v3349_v10, 9  ;;  %v1867_v26 = vrot.slane %v3350_v11, 9 }
  0x31   : > { %v1871_v7 = vrot.slane %v3351_v12, 9  ;;  %v1876_v9 = vrot.slane %v3352_v13, 9  ;;  %v1880_v5 = vrot.slane %v3353_v14, 9  ;;  %v1884_v10 = vrot.slane %v3354_v15, 9 }
  0x32   : > { %v1889_v12 = vrot.slane %v3355_v16, 9  ;;  %v1893_v8 = vrot.slane %v3356_v17, 9  ;;  %v1897_v13 = vrot.slane %v3357_v18, 9  ;;  %v1902_v15 = vrot.slane %v3358_v19, 9 }
  0x33   : > { %v1906_v11 = vrot.slane %v3359_v0, 9  ;;  %v1910_v16 = vrot.slane %v3360_v20, 9  ;;  %v1915_v18 = vrot.slane %v3361_v21, 9  ;;  %v1919_v14 = vrot.slane %v3362_v22, 9 }
  0x34   : > { %v1923_v19 = vrot.slane %v3363_v23, 9  ;;  %v1928_v20 = vrot.slane %v3364_v24, 9  ;;  %v3380_v17 = vrot.slane %v1688_v44, 4  ;;  %v3382_v21 = vrot.slane %v1688_v44, 6 }
  0x35   : > { %v3384_v34 = vrot.slane %v1690_v46, 2  ;;  %v3386_v0 = vrot.slane %v1690_v46, 4  ;;  %v3388_v24 = vrot.slane %v1690_v46, 6  ;;  %v3392_v22 = vrot.slane %v1692_v1, 4 }
  0x36   : > { %3379 = vst [vmem:[#allocation2_spill] sm:$0xff] %v1928_v20  ;;  %v1932_v28 = vrot.slane %v3380_v17, 9  ;;  %v1936_v25 = vrot.slane %v3382_v21, 9  ;;  %v3398_v17 = vrot.slane %v1694_v31, 4 }
  0x37   : > { %v1941_v23 = vrot.slane %v3384_v34, 9  ;;  %v1945_v32 = vrot.slane %v3386_v0, 9  ;;  %v1949_v20 = vrot.slane %v3388_v24, 9  ;;  %v3394_v34 = vrot.slane %v1692_v1, 6 }
  0x38   : > { %3381 = vst [vmem:[#allocation3_spill] sm:$0xff] %v1932_v28  ;;  %v3390_v28 = vrot.slane %v1692_v1, 2  ;;  %v3404_v0 = vrot.slane %v1696_v38, 4 }
  0x39   : > { %3383 = vst [vmem:[#allocation4_spill] sm:$0xff] %v1936_v25  ;;  %v1958_v25 = vrot.slane %v3392_v22, 9  ;;  %v3410_v22 = vrot.slane %v1698_v45, 4 }
  0x3a   : > { %3385 = vst [vmem:[#allocation5_spill] sm:$0xff] %v1941_v23  ;;  %v1954_v21 = vrot.slane %v3390_v28, 9  ;;  %v1962_v23 = vrot.slane %v3394_v34, 9  ;;  %v3400_v28 = vrot.slane %v1694_v31, 6 }
  0x3b   : > { %3387 = vst [vmem:[#allocation6_spill] sm:$0xff] %v1945_v32  ;;  %v3396_v32 = vrot.slane %v1694_v31, 2 }
  0x3c   : > { %3389 = vst [vmem:[#allocation7_spill] sm:$0xff] %v1949_v20  ;;  %v1971_v20 = vrot.slane %v3398_v17, 9  ;;  %v3416_v17 = vrot.slane %v1700_v47, 4 }
  0x3d   : > { %3391 = vst [vmem:[#allocation8_spill] sm:$0xff] %v1954_v21  ;;  %v1967_v24 = vrot.slane %v3396_v32, 9  ;;  %v1975_v21 = vrot.slane %v3400_v28, 9  ;;  %v3406_v32 = vrot.slane %v1696_v38, 6 }
  0x3e   : > { %3393 = vst [vmem:[#allocation9_spill] sm:$0xff] %v1958_v25  ;;  %v3402_v25 = vrot.slane %v1696_v38, 2 }
  0x3f   : > { %3395 = vst [vmem:[#allocation10_spill] sm:$0xff] %v1962_v23  ;;  %v1984_v23 = vrot.slane %v3404_v0, 9  ;;  %v3422_v0 = vrot.slane %v1702_v48, 4 }
  0x40   : > { %3397 = vst [vmem:[#allocation11_spill] sm:$0xff] %v1967_v24  ;;  %v1980_v34 = vrot.slane %v3402_v25, 9  ;;  %v1988_v24 = vrot.slane %v3406_v32, 9  ;;  %v3412_v25 = vrot.slane %v1698_v45, 6 }
  0x41   : > { %3399 = vst [vmem:[#allocation12_spill] sm:$0xff] %v1971_v20  ;;  %v3408_v20 = vrot.slane %v1698_v45, 2 }
  0x42   : > { %3401 = vst [vmem:[#allocation13_spill] sm:$0xff] %v1975_v21  ;;  %v1997_v21 = vrot.slane %v3410_v22, 9  ;;  %v3428_v22 = vrot.slane %v1704_v49, 4 }
  0x43   : > { %3403 = vst [vmem:[#allocation14_spill] sm:$0xff] %v1980_v34  ;;  %v1993_v28 = vrot.slane %v3408_v20, 9  ;;  %v2001_v34 = vrot.slane %v3412_v25, 9  ;;  %v3418_v20 = vrot.slane %v1700_v47, 6 }
  0x44   : > { %3405 = vst [vmem:[#allocation15_spill] sm:$0xff] %v1984_v23  ;;  %v3414_v23 = vrot.slane %v1700_v47, 2 }
  0x45   : > { %3407 = vst [vmem:[#allocation16_spill] sm:$0xff] %v1988_v24  ;;  %v2010_v24 = vrot.slane %v3416_v17, 9  ;;  %v3434_v17 = vrot.slane %v1706_v50, 4 }
  0x46   : > { %3409 = vst [vmem:[#allocation17_spill] sm:$0xff] %v1993_v28  ;;  %v2006_v32 = vrot.slane %v3414_v23, 9  ;;  %v2014_v28 = vrot.slane %v3418_v20, 9  ;;  %v3424_v23 = vrot.slane %v1702_v48, 6 }
  0x47   : > { %3411 = vst [vmem:[#allocation18_spill] sm:$0xff] %v1997_v21  ;;  %v3420_v21 = vrot.slane %v1702_v48, 2 }
  0x48   : > { %3413 = vst [vmem:[#allocation19_spill] sm:$0xff] %v2001_v34  ;;  %v2023_v34 = vrot.slane %v3422_v0, 9  ;;  %v3440_v0 = vrot.slane %v1708_v51, 4 }
  0x49   : > { %3415 = vst [vmem:[#allocation20_spill] sm:$0xff] %v2006_v32  ;;  %v2019_v25 = vrot.slane %v3420_v21, 9  ;;  %v2027_v32 = vrot.slane %v3424_v23, 9  ;;  %v3430_v21 = vrot.slane %v1704_v49, 6 }
  0x4a   : > { %3417 = vst [vmem:[#allocation21_spill] sm:$0xff] %v2010_v24  ;;  %v3426_v24 = vrot.slane %v1704_v49, 2 }
  0x4b   : > { %3419 = vst [vmem:[#allocation22_spill] sm:$0xff] %v2014_v28  ;;  %v2036_v28 = vrot.slane %v3428_v22, 9  ;;  %v3446_v22 = vrot.slane %v1710_v52, 4 }
  0x4c   : > { %3421 = vst [vmem:[#allocation23_spill] sm:$0xff] %v2019_v25  ;;  %v2032_v20 = vrot.slane %v3426_v24, 9  ;;  %v2040_v25 = vrot.slane %v3430_v21, 9  ;;  %v3436_v24 = vrot.slane %v1706_v50, 6 }
  0x4d   : > { %3423 = vst [vmem:[#allocation24_spill] sm:$0xff] %v2023_v34  ;;  %v3432_v34 = vrot.slane %v1706_v50, 2 }
  0x4e   : > { %3425 = vst [vmem:[#allocation25_spill] sm:$0xff] %v2027_v32  ;;  %v2049_v32 = vrot.slane %v3434_v17, 9  ;;  %v3452_v17 = vrot.slane %v1712_v53, 4 }
  0x4f   : > { %3427 = vst [vmem:[#allocation26_spill] sm:$0xff] %v2032_v20  ;;  %v2045_v23 = vrot.slane %v3432_v34, 9  ;;  %v2053_v20 = vrot.slane %v3436_v24, 9  ;;  %v3442_v34 = vrot.slane %v1708_v51, 6 }
  0x50   : > { %3429 = vst [vmem:[#allocation27_spill] sm:$0xff] %v2036_v28  ;;  %v3438_v28 = vrot.slane %v1708_v51, 2 }
  0x51   : > { %3431 = vst [vmem:[#allocation28_spill] sm:$0xff] %v2040_v25  ;;  %v2062_v25 = vrot.slane %v3440_v0, 9  ;;  %v3458_v0 = vrot.slane %v1714_v54, 4 }
  0x52   : > { %3433 = vst [vmem:[#allocation29_spill] sm:$0xff] %v2045_v23  ;;  %v2058_v21 = vrot.slane %v3438_v28, 9  ;;  %v2066_v23 = vrot.slane %v3442_v34, 9  ;;  %v3448_v28 = vrot.slane %v1710_v52, 6 }
  0x53   : > { %3435 = vst [vmem:[#allocation30_spill] sm:$0xff] %v2049_v32  ;;  %v3444_v32 = vrot.slane %v1710_v52, 2 }
  0x54   : > { %3437 = vst [vmem:[#allocation31_spill] sm:$0xff] %v2053_v20  ;;  %v2075_v20 = vrot.slane %v3446_v22, 9  ;;  %v3464_v22 = vrot.slane %v1716_v55, 4 }
  0x55   : > { %3439 = vst [vmem:[#allocation32_spill] sm:$0xff] %v2058_v21  ;;  %v2071_v24 = vrot.slane %v3444_v32, 9  ;;  %v2079_v21 = vrot.slane %v3448_v28, 9  ;;  %v3454_v32 = vrot.slane %v1712_v53, 6 }
  0x56   : > { %3441 = vst [vmem:[#allocation33_spill] sm:$0xff] %v2062_v25  ;;  %v3450_v25 = vrot.slane %v1712_v53, 2 }
  0x57   : > { %3443 = vst [vmem:[#allocation34_spill] sm:$0xff] %v2066_v23  ;;  %v2088_v23 = vrot.slane %v3452_v17, 9  ;;  %v3470_v17 = vrot.slane %v1718_v56, 4 }
  0x58   : > { %3445 = vst [vmem:[#allocation35_spill] sm:$0xff] %v2071_v24  ;;  %v2084_v34 = vrot.slane %v3450_v25, 9  ;;  %v2092_v24 = vrot.slane %v3454_v32, 9  ;;  %v3460_v25 = vrot.slane %v1714_v54, 6 }
  0x59   : > { %3447 = vst [vmem:[#allocation36_spill] sm:$0xff] %v2075_v20  ;;  %v3456_v20 = vrot.slane %v1714_v54, 2 }
  0x5a   : > { %3449 = vst [vmem:[#allocation37_spill] sm:$0xff] %v2079_v21  ;;  %v2101_v21 = vrot.slane %v3458_v0, 9  ;;  %v3476_v0 = vrot.slane %v1720_v57, 4 }
  0x5b   : > { %3451 = vst [vmem:[#allocation38_spill] sm:$0xff] %v2084_v34  ;;  %v2097_v28 = vrot.slane %v3456_v20, 9  ;;  %v2105_v34 = vrot.slane %v3460_v25, 9  ;;  %v3466_v20 = vrot.slane %v1716_v55, 6 }
  0x5c   : > { %3453 = vst [vmem:[#allocation39_spill] sm:$0xff] %v2088_v23  ;;  %v3462_v23 = vrot.slane %v1716_v55, 2 }
  0x5d   : > { %3455 = vst [vmem:[#allocation40_spill] sm:$0xff] %v2092_v24  ;;  %v2114_v24 = vrot.slane %v3464_v22, 9  ;;  %v3482_v22 = vrot.slane %v1722_v58, 4 }
  0x5e   : > { %3457 = vst [vmem:[#allocation41_spill] sm:$0xff] %v2097_v28  ;;  %v2110_v32 = vrot.slane %v3462_v23, 9  ;;  %v2118_v28 = vrot.slane %v3466_v20, 9  ;;  %v3472_v23 = vrot.slane %v1718_v56, 6 }
  0x5f   : > { %3459 = vst [vmem:[#allocation42_spill] sm:$0xff] %v2101_v21  ;;  %v3468_v21 = vrot.slane %v1718_v56, 2 }
  0x60   : > { %3461 = vst [vmem:[#allocation43_spill] sm:$0xff] %v2105_v34  ;;  %v2127_v34 = vrot.slane %v3470_v17, 9  ;;  %v3488_v17 = vrot.slane %v1724_v59, 4 }
  0x61   : > { %3463 = vst [vmem:[#allocation44_spill] sm:$0xff] %v2110_v32  ;;  %v2123_v25 = vrot.slane %v3468_v21, 9  ;;  %v2131_v32 = vrot.slane %v3472_v23, 9  ;;  %v3478_v21 = vrot.slane %v1720_v57, 6 }
  0x62   : > { %3465 = vst [vmem:[#allocation45_spill] sm:$0xff] %v2114_v24  ;;  %v3474_v24 = vrot.slane %v1720_v57, 2 }
  0x63   : > { %3467 = vst [vmem:[#allocation46_spill] sm:$0xff] %v2118_v28  ;;  %v2140_v28 = vrot.slane %v3476_v0, 9  ;;  %v3494_v0 = vrot.slane %v1726_v60, 4 }
  0x64   : > { %3469 = vst [vmem:[#allocation47_spill] sm:$0xff] %v2123_v25  ;;  %v2136_v20 = vrot.slane %v3474_v24, 9  ;;  %v2144_v25 = vrot.slane %v3478_v21, 9  ;;  %v3484_v24 = vrot.slane %v1722_v58, 6 }
  0x65   : > { %3471 = vst [vmem:[#allocation48_spill] sm:$0xff] %v2127_v34  ;;  %v3480_v34 = vrot.slane %v1722_v58, 2 }
  0x66   : > { %3473 = vst [vmem:[#allocation49_spill] sm:$0xff] %v2131_v32  ;;  %v2153_v32 = vrot.slane %v3482_v22, 9  ;;  %v3500_v22 = vrot.slane %v1728_v61, 4 }
  0x67   : > { %3475 = vst [vmem:[#allocation50_spill] sm:$0xff] %v2136_v20  ;;  %v2149_v23 = vrot.slane %v3480_v34, 9  ;;  %v2157_v20 = vrot.slane %v3484_v24, 9  ;;  %v3490_v34 = vrot.slane %v1724_v59, 6 }
  0x68   : > { %3477 = vst [vmem:[#allocation51_spill] sm:$0xff] %v2140_v28  ;;  %v3486_v28 = vrot.slane %v1724_v59, 2 }
  0x69   : > { %3479 = vst [vmem:[#allocation52_spill] sm:$0xff] %v2144_v25  ;;  %v2166_v25 = vrot.slane %v3488_v17, 9  ;;  %v3506_v17 = vrot.slane %v1730_v62, 4 }
  0x6a   : > { %3481 = vst [vmem:[#allocation53_spill] sm:$0xff] %v2149_v23  ;;  %v2162_v21 = vrot.slane %v3486_v28, 9  ;;  %v2170_v23 = vrot.slane %v3490_v34, 9  ;;  %v3496_v28 = vrot.slane %v1726_v60, 6 }
  0x6b   : > { %3483 = vst [vmem:[#allocation54_spill] sm:$0xff] %v2153_v32  ;;  %v3492_v32 = vrot.slane %v1726_v60, 2 }
  0x6c   : > { %3485 = vst [vmem:[#allocation55_spill] sm:$0xff] %v2157_v20  ;;  %v2179_v20 = vrot.slane %v3494_v0, 9  ;;  %v3512_v0 = vrot.slane %v1732_v63, 4 }
  0x6d   : > { %3487 = vst [vmem:[#allocation56_spill] sm:$0xff] %v2162_v21  ;;  %v2175_v24 = vrot.slane %v3492_v32, 9  ;;  %v2183_v21 = vrot.slane %v3496_v28, 9  ;;  %v3502_v32 = vrot.slane %v1728_v61, 6 }
  0x6e   : > { %3489 = vst [vmem:[#allocation57_spill] sm:$0xff] %v2166_v25  ;;  %v3498_v25 = vrot.slane %v1728_v61, 2 }
  0x6f   : > { %3491 = vst [vmem:[#allocation58_spill] sm:$0xff] %v2170_v23  ;;  %v2192_v23 = vrot.slane %v3500_v22, 9  ;;  %v3518_v22 = vrot.slane %v1734_v2, 4 }
  0x70   : > { %3493 = vst [vmem:[#allocation59_spill] sm:$0xff] %v2175_v24  ;;  %v2188_v34 = vrot.slane %v3498_v25, 9  ;;  %v2196_v24 = vrot.slane %v3502_v32, 9  ;;  %v3508_v25 = vrot.slane %v1730_v62, 6 }
  0x71   : > { %3495 = vst [vmem:[#allocation60_spill] sm:$0xff] %v2179_v20  ;;  %v3504_v20 = vrot.slane %v1730_v62, 2 }
  0x72   : > { %3497 = vst [vmem:[#allocation61_spill] sm:$0xff] %v2183_v21  ;;  %v2205_v21 = vrot.slane %v3506_v17, 9  ;;  %v3523_v17 = vrot.slane %v1736_v3, 4 }
  0x73   : > { %3499 = vst [vmem:[#allocation62_spill] sm:$0xff] %v2188_v34  ;;  %v2201_v28 = vrot.slane %v3504_v20, 9  ;;  %v2209_v34 = vrot.slane %v3508_v25, 9  ;;  %v3514_v20 = vrot.slane %v1732_v63, 6 }
  0x74   : > { %3501 = vst [vmem:[#allocation63_spill] sm:$0xff] %v2192_v23  ;;  %v3510_v23 = vrot.slane %v1732_v63, 2 }
  0x75   : > { %3503 = vst [vmem:[#allocation64_spill] sm:$0xff] %v2196_v24  ;;  %v2218_v24 = vrot.slane %v3512_v0, 9 }
  0x76   : > { %3505 = vst [vmem:[#allocation65_spill] sm:$0xff] %v2201_v28  ;;  %v2214_v32 = vrot.slane %v3510_v23, 9  ;;  %v2222_v28 = vrot.slane %v3514_v20, 9  ;;  %v3520_v23 = vrot.slane %v1734_v2, 6 }
  0x77   : > { %3507 = vst [vmem:[#allocation66_spill] sm:$0xff] %v2205_v21  ;;  %v3516_v21 = vrot.slane %v1734_v2, 2 }
  0x78   : > { %3509 = vst [vmem:[#allocation67_spill] sm:$0xff] %v2209_v34  ;;  %v2231_v34 = vrot.slane %v3518_v22, 9  ;;  %v3526_v22 = vrot.slane %v1674_v36, 9 }
  0x79   : > { %3511 = vst [vmem:[#allocation68_spill] sm:$0xff] %v2214_v32  ;;  %v2227_v25 = vrot.slane %v3516_v21, 9  ;;  %v2235_v32 = vrot.slane %v3520_v23, 9  ;;  %v3524_v21 = vrot.slane %v1736_v3, 6  ;;  %v3528_v23 = vrot.slane %v1674_v36, 2 }
  0x7a   : > { %3513 = vst [vmem:[#allocation69_spill] sm:$0xff] %v2218_v24  ;;  %v3521_v24 = vrot.slane %v1736_v3, 2 }
  0x7b   : > { %3515 = vst [vmem:[#allocation70_spill] sm:$0xff] %v2222_v28  ;;  %v2244_v28 = vrot.slane %v3523_v17, 9  ;;  %v2258_v0 = vadd.f32 %v1837_v30, %v3528_v23  ;;  %v3530_v17 = vrot.slane %v1674_v36, 6  ;;  %v3533_v23 = vrot.slane %v1676_v37, 4 }
  0x7c   : > { %3517 = vst [vmem:[#allocation71_spill] sm:$0xff] %v2227_v25  ;;  %v2240_v20 = vrot.slane %v3521_v24, 9  ;;  %v2248_v25 = vrot.slane %v3524_v21, 9  ;;  %v3529_v24 = vrot.slane %v1674_v36, 4 }
  0x7d   : > { %3519 = vst [vmem:[#allocation72_spill] sm:$0xff] %v2231_v34  ;;  %v2253_v34 = vadd.f32 %v3526_v22, %v1674_v36  ;;  %v2268_v21 = vadd.f32 %v1845_v35, %v3530_v17  ;;  %v3534_v36 = vrot.slane %v1676_v37, 6  ;;  %v3536_v17 = vrot.slane %v1678_v39, 2 }
  0x7e   : > { %3522 = vst [vmem:[#allocation73_spill] sm:$0xff] %v2240_v20  ;;  %v2263_v20 = vadd.f32 %v1841_v33, %v3529_v24  ;;  %v2283_v33 = vadd.f32 %v1854_v29, %v3533_v23  ;;  %v3535_v24 = vrot.slane %v1678_v39, 9  ;;  %v3539_v23 = vrot.slane %v1680_v40, 9 }
  0x7f   : > { %3525 = vst [vmem:[#allocation74_spill] sm:$0xff] %v2248_v25  ;;  %v3531_v25 = vrot.slane %v1676_v37, 9  ;;  %v2288_v35 = vadd.f32 %v1858_v4, %v3534_v36 }
  0x80   : > { %3527 = vst [vmem:[#allocation75_spill] sm:$0xff] %v2253_v34  ;;  %v3532_v34 = vrot.slane %v1676_v37, 2  ;;  %v2313_v36 = vadd.f32 %v3539_v23, %v1680_v40  ;;  %v3544_v23 = vrot.slane %v1682_v41, 2 }
  0x81   : > { %v2273_v22 = vadd.f32 %v3531_v25, %v1676_v37  ;;  %v2293_v25 = vadd.f32 %v3535_v24, %v1678_v39  ;;  %v3538_v37 = vrot.slane %v1678_v39, 6  ;;  %v3540_v24 = vrot.slane %v1680_v40, 2 }
  0x82   : > { %v2278_v30 = vadd.f32 %v1850_v27, %v3532_v34  ;;  %v2298_v27 = vadd.f32 %v1863_v6, %v3536_v17  ;;  %v3537_v34 = vrot.slane %v1678_v39, 4  ;;  %v3541_v17 = vrot.slane %v1680_v40, 4 }
  0x83   : > { %v2308_v4 = vadd.f32 %v1871_v7, %v3538_v37  ;;  %v2318_v6 = vadd.f32 %v1876_v9, %v3540_v24  ;;  %v3542_v39 = vrot.slane %v1680_v40, 6  ;;  %v2338_v9 = vadd.f32 %v1889_v12, %v3544_v23 }
  0x84   : > { %v2303_v29 = vadd.f32 %v1867_v26, %v3537_v34  ;;  %v2323_v26 = vadd.f32 %v1880_v5, %v3541_v17  ;;  %v3543_v34 = vrot.slane %v1682_v41, 9  ;;  %v3545_v24 = vrot.slane %v1682_v41, 4 }
  0x85   : > { %v2328_v7 = vadd.f32 %v1884_v10, %v3542_v39  ;;  %v3546_v40 = vrot.slane %v1682_v41, 6  ;;  %v3547_v17 = vrot.slane %v1684_v42, 9  ;;  %v3550_v23 = vrot.slane %v1684_v42, 4 }
  0x86   : > { %v2333_v37 = vadd.f32 %v3543_v34, %v1682_v41  ;;  %v2343_v5 = vadd.f32 %v1893_v8, %v3545_v24  ;;  %v3548_v34 = vrot.slane %v1684_v42, 2  ;;  %v3552_v41 = vrot.slane %v1684_v42, 6 }
  0x87   : > { %v2348_v10 = vadd.f32 %v1897_v13, %v3546_v40  ;;  %v2353_v39 = vadd.f32 %v3547_v17, %v1684_v42  ;;  %v2363_v8 = vadd.f32 %v1906_v11, %v3550_v23  ;;  %v3554_v24 = vrot.slane %v1686_v43, 9 }
  0x88   : > { %v2358_v12 = vadd.f32 %v1902_v15, %v3548_v34  ;;  %v2368_v13 = vadd.f32 %v1910_v16, %v3552_v41  ;;  %v3555_v17 = vrot.slane %v1686_v43, 2  ;;  %v3556_v34 = vrot.slane %v1686_v43, 4 }
  0x89   : > { %3551 = vst [vmem:[#allocation77_spill] sm:$0xff] %v2363_v8  ;;  %v2373_v40 = vadd.f32 %v3554_v24, %v1686_v43  ;;  %v3557_v42 = vrot.slane %v1686_v43, 6  ;;  %v3558_v23 = vrot.slane %v1688_v44, 9  ;;  %v3560_v24 = vrot.slane %v1688_v44, 2  ;;  %v3564_v8 = vld [vmem:[#allocation3_spill] sm:$0xff] }
  0x8a   : > { %3549 = vst [vmem:[#allocation76_spill] sm:$0xff] %v2358_v12  ;;  %v2378_v15 = vadd.f32 %v1915_v18, %v3555_v17  ;;  %v2383_v11 = vadd.f32 %v1919_v14, %v3556_v34  ;;  %v3563_v17 = vrot.slane %v1688_v44, 4  ;;  %v3565_v43 = vrot.slane %v1688_v44, 6  ;;  %v3566_v34 = vld [vmem:[#allocation4_spill] sm:$0xff] }
  0x8b   : > { %3553 = vst [vmem:[#allocation78_spill] sm:$0xff] %v2368_v13  ;;  %v2388_v16 = vadd.f32 %v1923_v19, %v3557_v42  ;;  %v2393_v41 = vadd.f32 %v3558_v23, %v1688_v44  ;;  %v3561_v13 = vld [vmem:[#allocation2_spill] sm:$0xff]  ;;  %v3568_v42 = vrot.slane %v1690_v46, 9  ;;  %v3570_v12 = vrot.slane %v1690_v46, 2 }
  0x8c   : > { %v2398_v18 = vadd.f32 %v3561_v13, %v3560_v24  ;;  %v2403_v14 = vadd.f32 %v3564_v8, %v3563_v17  ;;  %v2408_v19 = vadd.f32 %v3566_v34, %v3565_v43  ;;  %v3573_v24 = vrot.slane %v1690_v46, 4  ;;  %v3577_v17 = vld [vmem:[#allocation7_spill] sm:$0xff] }
  0x8d   : > { %3559 = vst [vmem:[#allocation79_spill] sm:$0xff] %v2393_v41  ;;  %v2413_v23 = vadd.f32 %v3568_v42, %v1690_v46  ;;  %v3571_v41 = vld [vmem:[#allocation5_spill] sm:$0xff]  ;;  %v3576_v44 = vrot.slane %v1690_v46, 6  ;;  %v3579_v34 = vrot.slane %v1692_v1, 9  ;;  %v3587_v46 = vrot.slane %v1692_v1, 6 }
  0x8e   : > { %3562 = vst [vmem:[#allocation2_spill] sm:$0xff] %v2398_v18  ;;  %v2418_v13 = vadd.f32 %v3571_v41, %v3570_v12  ;;  %v3574_v18 = vld [vmem:[#allocation6_spill] sm:$0xff]  ;;  %v3584_v41 = vrot.slane %v1692_v1, 4 }
  0x8f   : > { %3567 = vst [vmem:[#allocation3_spill] sm:$0xff] %v2408_v19  ;;  %v2423_v8 = vadd.f32 %v3574_v18, %v3573_v24  ;;  %v2428_v43 = vadd.f32 %v3577_v17, %v3576_v44  ;;  %v2433_v42 = vadd.f32 %v3579_v34, %v1692_v1  ;;  %v3582_v19 = vld [vmem:[#allocation8_spill] sm:$0xff]  ;;  %v3588_v24 = vld [vmem:[#allocation10_spill] sm:$0xff]  ;;  %v3590_v17 = vrot.slane %v1694_v31, 9 }
  0x90   : > { %3569 = vst [vmem:[#allocation4_spill] sm:$0xff] %v2413_v23  ;;  %v3581_v23 = vrot.slane %v1692_v1, 2  ;;  %v2448_v44 = vadd.f32 %v3588_v24, %v3587_v46  ;;  %v3595_v1 = vrot.slane %v1694_v31, 6  ;;  %v3598_v24 = vrot.slane %v1696_v38, 9 }
  0x91   : > { %3572 = vst [vmem:[#allocation5_spill] sm:$0xff] %v2418_v13  ;;  %v3585_v13 = vld [vmem:[#allocation9_spill] sm:$0xff]  ;;  %v2453_v34 = vadd.f32 %v3590_v17, %v1694_v31 }
  0x92   : > { %3575 = vst [vmem:[#allocation6_spill] sm:$0xff] %v2423_v8  ;;  %v2438_v12 = vadd.f32 %v3582_v19, %v3581_v23  ;;  %v2443_v18 = vadd.f32 %v3585_v13, %v3584_v41  ;;  %v3593_v23 = vrot.slane %v1694_v31, 4  ;;  %v3596_v41 = vld [vmem:[#allocation13_spill] sm:$0xff]  ;;  %v2473_v17 = vadd.f32 %v3598_v24, %v1696_v38  ;;  %v3604_v8 = vld [vmem:[#allocation15_spill] sm:$0xff] }
  0x93   : > { %3578 = vst [vmem:[#allocation7_spill] sm:$0xff] %v2428_v43  ;;  %v3592_v43 = vld [vmem:[#allocation11_spill] sm:$0xff]  ;;  %v2468_v46 = vadd.f32 %v3596_v41, %v3595_v1  ;;  %v3608_v41 = vrot.slane %v1698_v45, 9 }
  0x94   : > { %3580 = vst [vmem:[#allocation80_spill] sm:$0xff] %v2433_v42  ;;  %v3591_v42 = vrot.slane %v1694_v31, 2  ;;  %v3605_v31 = vrot.slane %v1696_v38, 6 }
  0x95   : > { %3583 = vst [vmem:[#allocation8_spill] sm:$0xff] %v2438_v12  ;;  %v3594_v12 = vld [vmem:[#allocation12_spill] sm:$0xff]  ;;  %v2493_v24 = vadd.f32 %v3608_v41, %v1698_v45 }
  0x96   : > { %3586 = vst [vmem:[#allocation9_spill] sm:$0xff] %v2443_v18  ;;  %v2458_v19 = vadd.f32 %v3592_v43, %v3591_v42  ;;  %v2463_v13 = vadd.f32 %v3594_v12, %v3593_v23  ;;  %v3601_v18 = vld [vmem:[#allocation14_spill] sm:$0xff]  ;;  %v3603_v42 = vrot.slane %v1696_v38, 4  ;;  %v3606_v23 = vld [vmem:[#allocation16_spill] sm:$0xff] }
  0x97   : > { %3589 = vst [vmem:[#allocation10_spill] sm:$0xff] %v2448_v44  ;;  %v3600_v44 = vrot.slane %v1696_v38, 2  ;;  %v2488_v1 = vadd.f32 %v3606_v23, %v3605_v31  ;;  %v3616_v38 = vrot.slane %v1698_v45, 6  ;;  %v3619_v23 = vrot.slane %v1700_v47, 9 }
  0x98   : > { %3597 = vst [vmem:[#allocation11_spill] sm:$0xff] %v2468_v46  ;;  %v2483_v12 = vadd.f32 %v3604_v8, %v3603_v42  ;;  %v3611_v46 = vld [vmem:[#allocation17_spill] sm:$0xff]  ;;  %v3617_v42 = vld [vmem:[#allocation19_spill] sm:$0xff] }
  0x99   : > { %3599 = vst [vmem:[#allocation12_spill] sm:$0xff] %v2473_v17  ;;  %v2478_v43 = vadd.f32 %v3601_v18, %v3600_v44  ;;  %v3610_v17 = vrot.slane %v1698_v45, 2  ;;  %v3613_v44 = vrot.slane %v1698_v45, 4  ;;  %v2508_v31 = vadd.f32 %v3617_v42, %v3616_v38 }
  0x9a   : > { %3607 = vst [vmem:[#allocation14_spill] sm:$0xff] %v2488_v1  ;;  %v2513_v41 = vadd.f32 %v3619_v23, %v1700_v47  ;;  %v3622_v1 = vld [vmem:[#allocation20_spill] sm:$0xff]  ;;  %v3627_v45 = vrot.slane %v1700_v47, 6  ;;  %v3630_v42 = vrot.slane %v1702_v48, 9 }
  0x9b   : > { %3602 = vst [vmem:[#allocation13_spill] sm:$0xff] %v2478_v43  ;;  %v2498_v18 = vadd.f32 %v3611_v46, %v3610_v17  ;;  %v3614_v43 = vld [vmem:[#allocation18_spill] sm:$0xff]  ;;  %v3624_v17 = vrot.slane %v1700_v47, 4 }
  0x9c   : > { %3609 = vst [vmem:[#allocation15_spill] sm:$0xff] %v2493_v24  ;;  %v2503_v8 = vadd.f32 %v3614_v43, %v3613_v44  ;;  %v3621_v24 = vrot.slane %v1700_v47, 2  ;;  %v3628_v44 = vld [vmem:[#allocation22_spill] sm:$0xff]  ;;  %v2533_v23 = vadd.f32 %v3630_v42, %v1702_v48  ;;  %v3635_v47 = vrot.slane %v1702_v48, 6 }
  0x9d   : > { %3612 = vst [vmem:[#allocation16_spill] sm:$0xff] %v2498_v18  ;;  %v3625_v18 = vld [vmem:[#allocation21_spill] sm:$0xff]  ;;  %v2528_v38 = vadd.f32 %v3628_v44, %v3627_v45  ;;  %v3638_v44 = vrot.slane %v1704_v49, 9 }
  0x9e   : > { %3615 = vst [vmem:[#allocation17_spill] sm:$0xff] %v2503_v8  ;;  %v2518_v46 = vadd.f32 %v3622_v1, %v3621_v24  ;;  %v2523_v43 = vadd.f32 %v3625_v18, %v3624_v17  ;;  %v3633_v24 = vrot.slane %v1702_v48, 4  ;;  %v3636_v17 = vld [vmem:[#allocation25_spill] sm:$0xff]  ;;  %v3644_v8 = vld [vmem:[#allocation27_spill] sm:$0xff] }
  0x9f   : > { %3618 = vst [vmem:[#allocation18_spill] sm:$0xff] %v2508_v31  ;;  %v3632_v31 = vld [vmem:[#allocation23_spill] sm:$0xff]  ;;  %v2548_v45 = vadd.f32 %v3636_v17, %v3635_v47  ;;  %v2553_v42 = vadd.f32 %v3638_v44, %v1704_v49  ;;  %v3648_v17 = vrot.slane %v1706_v50, 9 }
  0xa0   : > { %3620 = vst [vmem:[#allocation19_spill] sm:$0xff] %v2513_v41  ;;  %v3631_v41 = vrot.slane %v1702_v48, 2  ;;  %v3645_v48 = vrot.slane %v1704_v49, 6 }
  0xa1   : > { %3623 = vst [vmem:[#allocation20_spill] sm:$0xff] %v2518_v46  ;;  %v3634_v46 = vld [vmem:[#allocation24_spill] sm:$0xff]  ;;  %v2573_v44 = vadd.f32 %v3648_v17, %v1706_v50 }
  0xa2   : > { %3626 = vst [vmem:[#allocation21_spill] sm:$0xff] %v2523_v43  ;;  %v2538_v1 = vadd.f32 %v3632_v31, %v3631_v41  ;;  %v2543_v18 = vadd.f32 %v3634_v46, %v3633_v24  ;;  %v3641_v43 = vld [vmem:[#allocation26_spill] sm:$0xff]  ;;  %v3643_v41 = vrot.slane %v1704_v49, 4  ;;  %v3646_v24 = vld [vmem:[#allocation28_spill] sm:$0xff] }
  0xa3   : > { %3629 = vst [vmem:[#allocation22_spill] sm:$0xff] %v2528_v38  ;;  %v3640_v38 = vrot.slane %v1704_v49, 2  ;;  %v2568_v47 = vadd.f32 %v3646_v24, %v3645_v48  ;;  %v3656_v49 = vrot.slane %v1706_v50, 6  ;;  %v3659_v24 = vrot.slane %v1708_v51, 9 }
  0xa4   : > { %3637 = vst [vmem:[#allocation23_spill] sm:$0xff] %v2548_v45  ;;  %v2563_v46 = vadd.f32 %v3644_v8, %v3643_v41  ;;  %v3651_v45 = vld [vmem:[#allocation29_spill] sm:$0xff]  ;;  %v3657_v41 = vld [vmem:[#allocation31_spill] sm:$0xff] }
  0xa5   : > { %3639 = vst [vmem:[#allocation24_spill] sm:$0xff] %v2553_v42  ;;  %v2558_v31 = vadd.f32 %v3641_v43, %v3640_v38  ;;  %v3650_v42 = vrot.slane %v1706_v50, 2  ;;  %v3653_v38 = vrot.slane %v1706_v50, 4  ;;  %v2588_v48 = vadd.f32 %v3657_v41, %v3656_v49 }
  0xa6   : > { %3647 = vst [vmem:[#allocation26_spill] sm:$0xff] %v2568_v47  ;;  %v2593_v17 = vadd.f32 %v3659_v24, %v1708_v51  ;;  %v3662_v47 = vld [vmem:[#allocation32_spill] sm:$0xff]  ;;  %v3667_v50 = vrot.slane %v1708_v51, 6  ;;  %v3670_v41 = vrot.slane %v1710_v52, 9 }
  0xa7   : > { %3642 = vst [vmem:[#allocation25_spill] sm:$0xff] %v2558_v31  ;;  %v2578_v43 = vadd.f32 %v3651_v45, %v3650_v42  ;;  %v3654_v31 = vld [vmem:[#allocation30_spill] sm:$0xff]  ;;  %v3664_v42 = vrot.slane %v1708_v51, 4 }
  0xa8   : > { %3649 = vst [vmem:[#allocation27_spill] sm:$0xff] %v2573_v44  ;;  %v2583_v8 = vadd.f32 %v3654_v31, %v3653_v38  ;;  %v3661_v44 = vrot.slane %v1708_v51, 2  ;;  %v3668_v38 = vld [vmem:[#allocation34_spill] sm:$0xff]  ;;  %v2613_v24 = vadd.f32 %v3670_v41, %v1710_v52  ;;  %v3675_v51 = vrot.slane %v1710_v52, 6 }
  0xa9   : > { %3652 = vst [vmem:[#allocation28_spill] sm:$0xff] %v2578_v43  ;;  %v3665_v43 = vld [vmem:[#allocation33_spill] sm:$0xff]  ;;  %v2608_v49 = vadd.f32 %v3668_v38, %v3667_v50  ;;  %v3678_v38 = vrot.slane %v1712_v53, 9 }
  0xaa   : > { %3655 = vst [vmem:[#allocation29_spill] sm:$0xff] %v2583_v8  ;;  %v2598_v45 = vadd.f32 %v3662_v47, %v3661_v44  ;;  %v2603_v31 = vadd.f32 %v3665_v43, %v3664_v42  ;;  %v3673_v44 = vrot.slane %v1710_v52, 4  ;;  %v3676_v42 = vld [vmem:[#allocation37_spill] sm:$0xff]  ;;  %v3684_v8 = vld [vmem:[#allocation39_spill] sm:$0xff] }
  0xab   : > { %3658 = vst [vmem:[#allocation30_spill] sm:$0xff] %v2588_v48  ;;  %v3672_v48 = vld [vmem:[#allocation35_spill] sm:$0xff]  ;;  %v2628_v50 = vadd.f32 %v3676_v42, %v3675_v51  ;;  %v2633_v41 = vadd.f32 %v3678_v38, %v1712_v53  ;;  %v3688_v42 = vrot.slane %v1714_v54, 9 }
  0xac   : > { %3660 = vst [vmem:[#allocation31_spill] sm:$0xff] %v2593_v17  ;;  %v3671_v17 = vrot.slane %v1710_v52, 2  ;;  %v3685_v52 = vrot.slane %v1712_v53, 6 }
  0xad   : > { %3663 = vst [vmem:[#allocation32_spill] sm:$0xff] %v2598_v45  ;;  %v3674_v45 = vld [vmem:[#allocation36_spill] sm:$0xff]  ;;  %v2653_v38 = vadd.f32 %v3688_v42, %v1714_v54 }
  0xae   : > { %3666 = vst [vmem:[#allocation33_spill] sm:$0xff] %v2603_v31  ;;  %v2618_v47 = vadd.f32 %v3672_v48, %v3671_v17  ;;  %v2623_v43 = vadd.f32 %v3674_v45, %v3673_v44  ;;  %v3681_v31 = vld [vmem:[#allocation38_spill] sm:$0xff]  ;;  %v3683_v17 = vrot.slane %v1712_v53, 4  ;;  %v3686_v44 = vld [vmem:[#allocation40_spill] sm:$0xff] }
  0xaf   : > { %3669 = vst [vmem:[#allocation34_spill] sm:$0xff] %v2608_v49  ;;  %v3680_v49 = vrot.slane %v1712_v53, 2  ;;  %v2648_v51 = vadd.f32 %v3686_v44, %v3685_v52  ;;  %v3696_v53 = vrot.slane %v1714_v54, 6  ;;  %v3699_v44 = vrot.slane %v1716_v55, 9 }
  0xb0   : > { %3677 = vst [vmem:[#allocation35_spill] sm:$0xff] %v2628_v50  ;;  %v2643_v45 = vadd.f32 %v3684_v8, %v3683_v17  ;;  %v3691_v50 = vld [vmem:[#allocation41_spill] sm:$0xff]  ;;  %v3697_v17 = vld [vmem:[#allocation43_spill] sm:$0xff] }
  0xb1   : > { %3679 = vst [vmem:[#allocation36_spill] sm:$0xff] %v2633_v41  ;;  %v2638_v48 = vadd.f32 %v3681_v31, %v3680_v49  ;;  %v3690_v41 = vrot.slane %v1714_v54, 2  ;;  %v3693_v49 = vrot.slane %v1714_v54, 4  ;;  %v2668_v52 = vadd.f32 %v3697_v17, %v3696_v53 }
  0xb2   : > { %3687 = vst [vmem:[#allocation38_spill] sm:$0xff] %v2648_v51  ;;  %v2673_v42 = vadd.f32 %v3699_v44, %v1716_v55  ;;  %v3702_v51 = vld [vmem:[#allocation44_spill] sm:$0xff]  ;;  %v3707_v54 = vrot.slane %v1716_v55, 6  ;;  %v3710_v17 = vrot.slane %v1718_v56, 9 }
  0xb3   : > { %3682 = vst [vmem:[#allocation37_spill] sm:$0xff] %v2638_v48  ;;  %v2658_v31 = vadd.f32 %v3691_v50, %v3690_v41  ;;  %v3694_v48 = vld [vmem:[#allocation42_spill] sm:$0xff]  ;;  %v3704_v41 = vrot.slane %v1716_v55, 4 }
  0xb4   : > { %3689 = vst [vmem:[#allocation39_spill] sm:$0xff] %v2653_v38  ;;  %v2663_v8 = vadd.f32 %v3694_v48, %v3693_v49  ;;  %v3701_v38 = vrot.slane %v1716_v55, 2  ;;  %v3708_v49 = vld [vmem:[#allocation46_spill] sm:$0xff]  ;;  %v2693_v44 = vadd.f32 %v3710_v17, %v1718_v56  ;;  %v3715_v55 = vrot.slane %v1718_v56, 6 }
  0xb5   : > { %3692 = vst [vmem:[#allocation40_spill] sm:$0xff] %v2658_v31  ;;  %v3705_v31 = vld [vmem:[#allocation45_spill] sm:$0xff]  ;;  %v2688_v53 = vadd.f32 %v3708_v49, %v3707_v54  ;;  %v3718_v49 = vrot.slane %v1720_v57, 9 }
  0xb6   : > { %3695 = vst [vmem:[#allocation41_spill] sm:$0xff] %v2663_v8  ;;  %v2678_v50 = vadd.f32 %v3702_v51, %v3701_v38  ;;  %v2683_v48 = vadd.f32 %v3705_v31, %v3704_v41  ;;  %v3713_v38 = vrot.slane %v1718_v56, 4  ;;  %v3716_v41 = vld [vmem:[#allocation49_spill] sm:$0xff]  ;;  %v3724_v8 = vld [vmem:[#allocation51_spill] sm:$0xff] }
  0xb7   : > { %3698 = vst [vmem:[#allocation42_spill] sm:$0xff] %v2668_v52  ;;  %v3712_v52 = vld [vmem:[#allocation47_spill] sm:$0xff]  ;;  %v2708_v54 = vadd.f32 %v3716_v41, %v3715_v55  ;;  %v2713_v17 = vadd.f32 %v3718_v49, %v1720_v57  ;;  %v3728_v41 = vrot.slane %v1722_v58, 9 }
  0xb8   : > { %3700 = vst [vmem:[#allocation43_spill] sm:$0xff] %v2673_v42  ;;  %v3711_v42 = vrot.slane %v1718_v56, 2  ;;  %v3725_v56 = vrot.slane %v1720_v57, 6 }
  0xb9   : > { %3703 = vst [vmem:[#allocation44_spill] sm:$0xff] %v2678_v50  ;;  %v3714_v50 = vld [vmem:[#allocation48_spill] sm:$0xff]  ;;  %v2733_v49 = vadd.f32 %v3728_v41, %v1722_v58 }
  0xba   : > { %3706 = vst [vmem:[#allocation45_spill] sm:$0xff] %v2683_v48  ;;  %v2698_v51 = vadd.f32 %v3712_v52, %v3711_v42  ;;  %v2703_v31 = vadd.f32 %v3714_v50, %v3713_v38  ;;  %v3721_v48 = vld [vmem:[#allocation50_spill] sm:$0xff]  ;;  %v3723_v42 = vrot.slane %v1720_v57, 4  ;;  %v3726_v38 = vld [vmem:[#allocation52_spill] sm:$0xff] }
  0xbb   : > { %3709 = vst [vmem:[#allocation46_spill] sm:$0xff] %v2688_v53  ;;  %v3720_v53 = vrot.slane %v1720_v57, 2  ;;  %v2728_v55 = vadd.f32 %v3726_v38, %v3725_v56  ;;  %v3736_v57 = vrot.slane %v1722_v58, 6  ;;  %v3739_v38 = vrot.slane %v1724_v59, 9 }
  0xbc   : > { %3717 = vst [vmem:[#allocation47_spill] sm:$0xff] %v2708_v54  ;;  %v2723_v50 = vadd.f32 %v3724_v8, %v3723_v42  ;;  %v3731_v54 = vld [vmem:[#allocation53_spill] sm:$0xff]  ;;  %v3737_v42 = vld [vmem:[#allocation55_spill] sm:$0xff] }
  0xbd   : > { %3719 = vst [vmem:[#allocation48_spill] sm:$0xff] %v2713_v17  ;;  %v2718_v52 = vadd.f32 %v3721_v48, %v3720_v53  ;;  %v3730_v17 = vrot.slane %v1722_v58, 2  ;;  %v3733_v53 = vrot.slane %v1722_v58, 4  ;;  %v2748_v56 = vadd.f32 %v3737_v42, %v3736_v57 }
  0xbe   : > { %3727 = vst [vmem:[#allocation50_spill] sm:$0xff] %v2728_v55  ;;  %v2753_v41 = vadd.f32 %v3739_v38, %v1724_v59  ;;  %v3742_v55 = vld [vmem:[#allocation56_spill] sm:$0xff]  ;;  %v3747_v58 = vrot.slane %v1724_v59, 6  ;;  %v3750_v42 = vrot.slane %v1726_v60, 9 }
  0xbf   : > { %3722 = vst [vmem:[#allocation49_spill] sm:$0xff] %v2718_v52  ;;  %v2738_v48 = vadd.f32 %v3731_v54, %v3730_v17  ;;  %v3734_v52 = vld [vmem:[#allocation54_spill] sm:$0xff]  ;;  %v3744_v17 = vrot.slane %v1724_v59, 4 }
  0xc0   : > { %3729 = vst [vmem:[#allocation51_spill] sm:$0xff] %v2733_v49  ;;  %v2743_v8 = vadd.f32 %v3734_v52, %v3733_v53  ;;  %v3741_v49 = vrot.slane %v1724_v59, 2  ;;  %v3748_v53 = vld [vmem:[#allocation58_spill] sm:$0xff]  ;;  %v2773_v38 = vadd.f32 %v3750_v42, %v1726_v60  ;;  %v3755_v59 = vrot.slane %v1726_v60, 6 }
  0xc1   : > { %3732 = vst [vmem:[#allocation52_spill] sm:$0xff] %v2738_v48  ;;  %v3745_v48 = vld [vmem:[#allocation57_spill] sm:$0xff]  ;;  %v2768_v57 = vadd.f32 %v3748_v53, %v3747_v58  ;;  %v3758_v53 = vrot.slane %v1728_v61, 9 }
  0xc2   : > { %3735 = vst [vmem:[#allocation53_spill] sm:$0xff] %v2743_v8  ;;  %v2758_v54 = vadd.f32 %v3742_v55, %v3741_v49  ;;  %v2763_v52 = vadd.f32 %v3745_v48, %v3744_v17  ;;  %v3753_v49 = vrot.slane %v1726_v60, 4  ;;  %v3756_v17 = vld [vmem:[#allocation61_spill] sm:$0xff]  ;;  %v3764_v8 = vld [vmem:[#allocation63_spill] sm:$0xff] }
  0xc3   : > { %3738 = vst [vmem:[#allocation54_spill] sm:$0xff] %v2748_v56  ;;  %v3752_v56 = vld [vmem:[#allocation59_spill] sm:$0xff]  ;;  %v2788_v58 = vadd.f32 %v3756_v17, %v3755_v59  ;;  %v2793_v42 = vadd.f32 %v3758_v53, %v1728_v61  ;;  %v3768_v17 = vrot.slane %v1730_v62, 9 }
  0xc4   : > { %3740 = vst [vmem:[#allocation55_spill] sm:$0xff] %v2753_v41  ;;  %v3751_v41 = vrot.slane %v1726_v60, 2  ;;  %v3765_v60 = vrot.slane %v1728_v61, 6 }
  0xc5   : > { %3743 = vst [vmem:[#allocation56_spill] sm:$0xff] %v2758_v54  ;;  %v3754_v54 = vld [vmem:[#allocation60_spill] sm:$0xff]  ;;  %v2813_v53 = vadd.f32 %v3768_v17, %v1730_v62 }
  0xc6   : > { %3746 = vst [vmem:[#allocation57_spill] sm:$0xff] %v2763_v52  ;;  %v2778_v55 = vadd.f32 %v3752_v56, %v3751_v41  ;;  %v2783_v48 = vadd.f32 %v3754_v54, %v3753_v49  ;;  %v3761_v52 = vld [vmem:[#allocation62_spill] sm:$0xff]  ;;  %v3763_v41 = vrot.slane %v1728_v61, 4  ;;  %v3766_v49 = vld [vmem:[#allocation64_spill] sm:$0xff] }
  0xc7   : > { %3749 = vst [vmem:[#allocation58_spill] sm:$0xff] %v2768_v57  ;;  %v3760_v57 = vrot.slane %v1728_v61, 2  ;;  %v2808_v59 = vadd.f32 %v3766_v49, %v3765_v60  ;;  %v3775_v61 = vrot.slane %v1730_v62, 6  ;;  %v3778_v49 = vrot.slane %v1732_v63, 9 }
  0xc8   : > { %3757 = vst [vmem:[#allocation59_spill] sm:$0xff] %v2788_v58  ;;  %v2803_v54 = vadd.f32 %v3764_v8, %v3763_v41  ;;  %v3771_v58 = vld [vmem:[#allocation65_spill] sm:$0xff]  ;;  %v3776_v41 = vld [vmem:[#allocation67_spill] sm:$0xff] }
  0xc9   : > { %3759 = vst [vmem:[#allocation60_spill] sm:$0xff] %v2793_v42  ;;  %v2798_v56 = vadd.f32 %v3761_v52, %v3760_v57  ;;  %v3770_v42 = vrot.slane %v1730_v62, 2  ;;  %v3773_v57 = vrot.slane %v1730_v62, 4  ;;  %v2828_v60 = vadd.f32 %v3776_v41, %v3775_v61 }
  0xca   : > { %3767 = vst [vmem:[#allocation62_spill] sm:$0xff] %v2808_v59  ;;  %v2833_v17 = vadd.f32 %v3778_v49, %v1732_v63  ;;  %v3781_v59 = vld [vmem:[#allocation68_spill] sm:$0xff]  ;;  %v3786_v62 = vrot.slane %v1732_v63, 6  ;;  %v3789_v41 = vrot.slane %v1734_v2, 9 }
  0xcb   : > { %3762 = vst [vmem:[#allocation61_spill] sm:$0xff] %v2798_v56  ;;  %v2818_v52 = vadd.f32 %v3771_v58, %v3770_v42  ;;  %v3774_v56 = vld [vmem:[#allocation66_spill] sm:$0xff]  ;;  %v3783_v42 = vrot.slane %v1732_v63, 4 }
  0xcc   : > { %3769 = vst [vmem:[#allocation63_spill] sm:$0xff] %v2813_v53  ;;  %v2823_v8 = vadd.f32 %v3774_v56, %v3773_v57  ;;  %v3780_v53 = vrot.slane %v1732_v63, 2  ;;  %v3787_v57 = vld [vmem:[#allocation70_spill] sm:$0xff]  ;;  %v2853_v49 = vadd.f32 %v3789_v41, %v1734_v2  ;;  %v3794_v63 = vrot.slane %v1734_v2, 6 }
  0xcd   : > { %3772 = vst [vmem:[#allocation64_spill] sm:$0xff] %v2818_v52  ;;  %v3784_v52 = vld [vmem:[#allocation69_spill] sm:$0xff]  ;;  %v2848_v61 = vadd.f32 %v3787_v57, %v3786_v62  ;;  %v3795_v62 = vrot.slane %v1736_v3, 9  ;;  %v3796_v41 = vrot.slane %v1736_v3, 2 }
  0xce   : > { %3777 = vst [vmem:[#allocation65_spill] sm:$0xff] %v2828_v60  ;;  %v2838_v58 = vadd.f32 %v3781_v59, %v3780_v53  ;;  %v2843_v56 = vadd.f32 %v3784_v52, %v3783_v42  ;;  %v3791_v60 = vld [vmem:[#allocation71_spill] sm:$0xff]  ;;  %v3792_v53 = vrot.slane %v1734_v2, 4  ;;  %v2868_v42 = vadd.f32 %v2235_v32, %v3794_v63 }
  0xcf   : > { %3779 = vst [vmem:[#allocation66_spill] sm:$0xff] %v2833_v17  ;;  %v3790_v17 = vrot.slane %v1734_v2, 2  ;;  %v2873_v57 = vadd.f32 %v3795_v62, %v1736_v3  ;;  %v3799_v2 = vrot.slane %v1736_v3, 6  ;;  %v3801_v63 = vld [vmem:[#allocation75_spill] sm:$0xff]  ;;  %v2896_v62 = vadd.f32 %v2298_v27, %v2258_v0 }
  0xd0   : > { %3782 = vst [vmem:[#allocation67_spill] sm:$0xff] %v2838_v58  ;;  %v3793_v58 = vld [vmem:[#allocation72_spill] sm:$0xff]  ;;  %v2916_v0 = vadd.f32 %v2323_v26, %v2283_v33  ;;  %v2936_v33 = vadd.f32 %v2388_v16, %v2348_v10  ;;  %v3802_v27 = vld [vmem:[#allocation79_spill] sm:$0xff] }
  0xd1   : > { %3785 = vst [vmem:[#allocation68_spill] sm:$0xff] %v2843_v56  ;;  %v2858_v59 = vadd.f32 %v3791_v60, %v3790_v17  ;;  %v2863_v52 = vadd.f32 %v3793_v58, %v3792_v53  ;;  %v3798_v17 = vrot.slane %v1736_v3, 4  ;;  %v3800_v53 = vld [vmem:[#allocation74_spill] sm:$0xff]  ;;  %v2892_v56 = vadd.f32 %v2293_v25, %v3801_v63  ;;  %v3812_v16 = vld [vmem:[#allocation7_spill] sm:$0xff]  ;;  %v3816_v63 = vld [vmem:[#allocation8_spill] sm:$0xff] }
  0xd2   : > { %3788 = vst [vmem:[#allocation69_spill] sm:$0xff] %v2848_v61  ;;  %v3797_v61 = vld [vmem:[#allocation73_spill] sm:$0xff]  ;;  %v2888_v32 = vadd.f32 %v3800_v53, %v3799_v2  ;;  %v2908_v3 = vadd.f32 %v2313_v36, %v2273_v22  ;;  %v2912_v25 = vadd.f32 %v2318_v6, %v2278_v30  ;;  %v2928_v22 = vadd.f32 %v2378_v15, %v2338_v9  ;;  %v3811_v15 = vld [vmem:[#allocation6_spill] sm:$0xff]  ;;  %v3815_v2 = vld [vmem:[#allocation12_spill] sm:$0xff] }
  0xd3   : > { %v2878_v60 = vadd.f32 %v3797_v61, %v3796_v41  ;;  %v2883_v58 = vadd.f32 %v2244_v28, %v3798_v17  ;;  %v2900_v61 = vadd.f32 %v2303_v29, %v2263_v20  ;;  %v2904_v28 = vadd.f32 %v2308_v4, %v2268_v21  ;;  %v3803_v29 = vld [vmem:[#allocation76_spill] sm:$0xff]  ;;  %v3804_v4 = vld [vmem:[#allocation2_spill] sm:$0xff]  ;;  %v3805_v6 = vld [vmem:[#allocation77_spill] sm:$0xff] }
  0xd4   : > { %v2920_v20 = vadd.f32 %v2328_v7, %v2288_v35  ;;  %v2924_v21 = vadd.f32 %v2373_v40, %v2333_v37  ;;  %v2932_v30 = vadd.f32 %v2383_v11, %v2343_v5  ;;  %v2940_v35 = vadd.f32 %v3802_v27, %v2353_v39  ;;  %v3806_v7 = vld [vmem:[#allocation78_spill] sm:$0xff]  ;;  %v3807_v37 = vld [vmem:[#allocation3_spill] sm:$0xff]  ;;  %v3809_v5 = vld [vmem:[#allocation4_spill] sm:$0xff] }
  0xd5   : > { %v2944_v36 = vadd.f32 %v3804_v4, %v3803_v29  ;;  %v2948_v26 = vadd.f32 %v2403_v14, %v3805_v6  ;;  %v2952_v9 = vadd.f32 %v3807_v37, %v3806_v7  ;;  %v2956_v10 = vadd.f32 %v2453_v34, %v3809_v5  ;;  %v3810_v40 = vld [vmem:[#allocation5_spill] sm:$0xff]  ;;  %v3813_v41 = vld [vmem:[#allocation11_spill] sm:$0xff]  ;;  %v3814_v17 = vld [vmem:[#allocation80_spill] sm:$0xff] }
  0xd6   : > { %v2960_v39 = vadd.f32 %v2458_v19, %v3810_v40  ;;  %v2964_v11 = vadd.f32 %v2463_v13, %v3811_v15  ;;  %v2968_v14 = vadd.f32 %v3813_v41, %v3812_v16  ;;  %v2972_v53 = vadd.f32 %v3815_v2, %v3814_v17  ;;  %v3817_v27 = vld [vmem:[#allocation13_spill] sm:$0xff]  ;;  %v3820_v4 = vld [vmem:[#allocation10_spill] sm:$0xff]  ;;  %v3823_v7 = vld [vmem:[#allocation15_spill] sm:$0xff] }
  0xd7   : > { %3808 = vst [vmem:[#allocation70_spill] sm:$0xff] %v2952_v9  ;;  %v2976_v34 = vadd.f32 %v3817_v27, %v3816_v63  ;;  %v3818_v29 = vld [vmem:[#allocation9_spill] sm:$0xff]  ;;  %v3821_v6 = vld [vmem:[#allocation14_spill] sm:$0xff]  ;;  %v2988_v37 = vadd.f32 %v2533_v23, %v3823_v7  ;;  %v3824_v5 = vld [vmem:[#allocation16_spill] sm:$0xff] }
  0xd8   : > { %v2980_v19 = vadd.f32 %v2483_v12, %v3818_v29  ;;  %v2984_v13 = vadd.f32 %v3821_v6, %v3820_v4  ;;  %v2992_v40 = vadd.f32 %v2538_v1, %v3824_v5  ;;  %v3825_v15 = vld [vmem:[#allocation17_spill] sm:$0xff]  ;;  %v3826_v41 = vld [vmem:[#allocation18_spill] sm:$0xff]  ;;  %v3827_v17 = vld [vmem:[#allocation23_spill] sm:$0xff] }
  0xd9   : > { %v2996_v16 = vadd.f32 %v2543_v18, %v3825_v15  ;;  %v3000_v12 = vadd.f32 %v3827_v17, %v3826_v41  ;;  %v3828_v2 = vld [vmem:[#allocation19_spill] sm:$0xff]  ;;  %v3829_v63 = vld [vmem:[#allocation24_spill] sm:$0xff]  ;;  %v3831_v4 = vld [vmem:[#allocation25_spill] sm:$0xff] }
  0xda   : > { %3819 = vst [vmem:[#allocation71_spill] sm:$0xff] %v2980_v19  ;;  %v3004_v27 = vadd.f32 %v3829_v63, %v3828_v2  ;;  %v3830_v29 = vld [vmem:[#allocation20_spill] sm:$0xff]  ;;  %v3833_v6 = vld [vmem:[#allocation21_spill] sm:$0xff]  ;;  %v3835_v7 = vld [vmem:[#allocation22_spill] sm:$0xff] }
  0xdb   : > { %3822 = vst [vmem:[#allocation72_spill] sm:$0xff] %v2984_v13  ;;  %v3008_v23 = vadd.f32 %v3831_v4, %v3830_v29  ;;  %v3012_v1 = vadd.f32 %v2563_v46, %v3833_v6  ;;  %v3836_v5 = vld [vmem:[#allocation26_spill] sm:$0xff]  ;;  %v3838_v15 = vld [vmem:[#allocation27_spill] sm:$0xff]  ;;  %v3839_v17 = vld [vmem:[#allocation28_spill] sm:$0xff] }
  0xdc   : > { %v3016_v18 = vadd.f32 %v3836_v5, %v3835_v7  ;;  %v3020_v41 = vadd.f32 %v2613_v24, %v3838_v15  ;;  %v3024_v2 = vadd.f32 %v2618_v47, %v3839_v17  ;;  %v3841_v63 = vld [vmem:[#allocation29_spill] sm:$0xff]  ;;  %v3842_v4 = vld [vmem:[#allocation30_spill] sm:$0xff]  ;;  %v3845_v6 = vld [vmem:[#allocation31_spill] sm:$0xff] }
  0xdd   : > { %3832 = vst [vmem:[#allocation73_spill] sm:$0xff] %v3008_v23  ;;  %v3028_v29 = vadd.f32 %v2623_v43, %v3841_v63  ;;  %v3843_v23 = vld [vmem:[#allocation35_spill] sm:$0xff]  ;;  %v3848_v5 = vld [vmem:[#allocation32_spill] sm:$0xff]  ;;  %v3851_v15 = vld [vmem:[#allocation33_spill] sm:$0xff] }
  0xde   : > { %3834 = vst [vmem:[#allocation74_spill] sm:$0xff] %v3012_v1  ;;  %v3032_v46 = vadd.f32 %v3843_v23, %v3842_v4  ;;  %v3846_v1 = vld [vmem:[#allocation36_spill] sm:$0xff]  ;;  %v3044_v47 = vadd.f32 %v2643_v45, %v3851_v15  ;;  %v3853_v17 = vld [vmem:[#allocation34_spill] sm:$0xff]  ;;  %v3856_v63 = vld [vmem:[#allocation39_spill] sm:$0xff] }
  0xdf   : > { %3837 = vst [vmem:[#allocation75_spill] sm:$0xff] %v3016_v18  ;;  %v3036_v7 = vadd.f32 %v3846_v1, %v3845_v6  ;;  %v3849_v18 = vld [vmem:[#allocation37_spill] sm:$0xff]  ;;  %v3052_v23 = vadd.f32 %v2693_v44, %v3856_v63  ;;  %v3857_v4 = vld [vmem:[#allocation40_spill] sm:$0xff]  ;;  %v3862_v15 = vld [vmem:[#allocation43_spill] sm:$0xff] }
  0xe0   : > { %3840 = vst [vmem:[#allocation79_spill] sm:$0xff] %v3024_v2  ;;  %v3040_v24 = vadd.f32 %v3849_v18, %v3848_v5  ;;  %v3854_v2 = vld [vmem:[#allocation38_spill] sm:$0xff]  ;;  %v3056_v1 = vadd.f32 %v2698_v51, %v3857_v4  ;;  %v3859_v6 = vld [vmem:[#allocation41_spill] sm:$0xff] }
  0xe1   : > { %3844 = vst [vmem:[#allocation76_spill] sm:$0xff] %v3032_v46  ;;  %v3048_v43 = vadd.f32 %v3854_v2, %v3853_v17  ;;  %v3060_v18 = vadd.f32 %v2703_v31, %v3859_v6  ;;  %v3860_v5 = vld [vmem:[#allocation42_spill] sm:$0xff]  ;;  %v3864_v17 = vld [vmem:[#allocation44_spill] sm:$0xff]  ;;  %v3867_v63 = vld [vmem:[#allocation45_spill] sm:$0xff] }
  0xe2   : > { %3847 = vst [vmem:[#allocation2_spill] sm:$0xff] %v3036_v7  ;;  %v3076_v51 = vadd.f32 %v2723_v50, %v3867_v63  ;;  %v3869_v4 = vld [vmem:[#allocation46_spill] sm:$0xff]  ;;  %v3872_v6 = vld [vmem:[#allocation51_spill] sm:$0xff] }
  0xe3   : > { %3850 = vst [vmem:[#allocation77_spill] sm:$0xff] %v3040_v24  ;;  %v3861_v24 = vld [vmem:[#allocation47_spill] sm:$0xff] }
  0xe4   : > { %3852 = vst [vmem:[#allocation78_spill] sm:$0xff] %v3044_v47  ;;  %v3064_v45 = vadd.f32 %v3861_v24, %v3860_v5  ;;  %v3863_v47 = vld [vmem:[#allocation48_spill] sm:$0xff]  ;;  %v3084_v24 = vadd.f32 %v2773_v38, %v3872_v6  ;;  %v3878_v63 = vld [vmem:[#allocation55_spill] sm:$0xff]  ;;  %v3882_v6 = vld [vmem:[#allocation57_spill] sm:$0xff] }
  0xe5   : > { %3855 = vst [vmem:[#allocation3_spill] sm:$0xff] %v3048_v43  ;;  %v3068_v2 = vadd.f32 %v3863_v47, %v3862_v15  ;;  %v3865_v43 = vld [vmem:[#allocation49_spill] sm:$0xff]  ;;  %v3873_v5 = vld [vmem:[#allocation52_spill] sm:$0xff] }
  0xe6   : > { %3858 = vst [vmem:[#allocation4_spill] sm:$0xff] %v3056_v1  ;;  %v3072_v44 = vadd.f32 %v3865_v43, %v3864_v17  ;;  %v3870_v1 = vld [vmem:[#allocation50_spill] sm:$0xff]  ;;  %v3088_v47 = vadd.f32 %v2778_v55, %v3873_v5  ;;  %v3875_v15 = vld [vmem:[#allocation53_spill] sm:$0xff]  ;;  %v3108_v55 = vadd.f32 %v2803_v54, %v3882_v6  ;;  %v3890_v6 = vld [vmem:[#allocation67_spill] sm:$0xff] }
  0xe7   : > { %3868 = vst [vmem:[#allocation6_spill] sm:$0xff] %v3076_v51  ;;  %v3080_v31 = vadd.f32 %v3870_v1, %v3869_v4  ;;  %v3092_v43 = vadd.f32 %v2783_v48, %v3875_v15  ;;  %v3876_v17 = vld [vmem:[#allocation54_spill] sm:$0xff]  ;;  %v3879_v51 = vld [vmem:[#allocation60_spill] sm:$0xff]  ;;  %v3886_v15 = vld [vmem:[#allocation63_spill] sm:$0xff] }
  0xe8   : > { %3866 = vst [vmem:[#allocation5_spill] sm:$0xff] %v3072_v44  ;;  %v3877_v44 = vld [vmem:[#allocation59_spill] sm:$0xff]  ;;  %v3100_v1 = vadd.f32 %v3879_v51, %v3878_v63  ;;  %v3880_v4 = vld [vmem:[#allocation56_spill] sm:$0xff]  ;;  %v3883_v5 = vld [vmem:[#allocation58_spill] sm:$0xff] }
  0xe9   : > { %3871 = vst [vmem:[#allocation7_spill] sm:$0xff] %v3080_v31  ;;  %v3096_v50 = vadd.f32 %v3877_v44, %v3876_v17  ;;  %v3881_v31 = vld [vmem:[#allocation61_spill] sm:$0xff]  ;;  %v3116_v44 = vadd.f32 %v2853_v49, %v3886_v15  ;;  %v3887_v17 = vld [vmem:[#allocation64_spill] sm:$0xff]  ;;  %v3136_v49 = vadd.f32 %v2878_v60, %v3890_v6  ;;  %v1179_v6 = vperm.slane %v2924_v21, 0 }
  0xea   : > { %3874 = vst [vmem:[#allocation11_spill] sm:$0xff] %v3088_v47  ;;  %v3104_v38 = vadd.f32 %v3881_v31, %v3880_v4  ;;  %v3884_v47 = vld [vmem:[#allocation62_spill] sm:$0xff]  ;;  %v3120_v51 = vadd.f32 %v2858_v59, %v3887_v17  ;;  %v3124_v31 = vadd.f32 %v2863_v52, %v2823_v8  ;;  %v3888_v63 = vld [vmem:[#allocation65_spill] sm:$0xff]  ;;  %v1171_v52 = vperm.slane %v2892_v56, 0 }
  0xeb   : > { %v3112_v48 = vadd.f32 %v3884_v47, %v3883_v5  ;;  %v3128_v54 = vadd.f32 %v2868_v42, %v3888_v63  ;;  %v3889_v4 = vld [vmem:[#allocation66_spill] sm:$0xff]  ;;  %v3891_v5 = vld [vmem:[#allocation68_spill] sm:$0xff]  ;;  %v3892_v15 = vld [vmem:[#allocation69_spill] sm:$0xff]  ;;  %v1172_v42 = vperm.slane %v2896_v62, 0  ;;  %v1181_v56 = vperm.slane %v2932_v30, 0 }
  0xec   : > { %v3132_v47 = vadd.f32 %v2873_v57, %v3889_v4  ;;  %v3140_v59 = vadd.f32 %v2883_v58, %v3891_v5  ;;  %v3144_v8 = vadd.f32 %v2888_v32, %v3892_v15  ;;  %v1180_v32 = vperm.slane %v2928_v22, 0  ;;  %v3894_v57 = vld [vmem:[#allocation73_spill] sm:$0xff]  ;;  %v3900_v19 = vld [vmem:[#allocation3_spill] sm:$0xff] }
  0xed   : > { %3885 = vst [vmem:[#allocation80_spill] sm:$0xff] %v3112_v48  ;;  %v1187_v4 = vperm.slane %v2956_v10, 0  ;;  %v1188_v58 = vperm.slane %v2960_v39, 0  ;;  %v1189_v21 = vperm.slane %v2964_v11, 0  ;;  %v1190_v22 = vperm.slane %v2968_v14, 0  ;;  %v3897_v48 = vld [vmem:[#allocation79_spill] sm:$0xff] }
  0xee   : > { %3893 = vst [vmem:[#allocation12_spill] sm:$0xff] %v3144_v8  ;;  %v1195_v63 = vperm.slane %v2988_v37, 0  ;;  %v1196_v60 = vperm.slane %v2992_v40, 0  ;;  %v1197_v10 = vperm.slane %v2996_v16, 0  ;;  %v1198_v39 = vperm.slane %v3000_v12, 0  ;;  %v3898_v13 = vld [vmem:[#allocation77_spill] sm:$0xff] }
  0xef   : > { %v1199_v11 = vperm.slane %v3004_v27, 0  ;;  %v1203_v5 = vperm.slane %v3020_v41, 0  ;;  %v1204_v15 = vperm.slane %v3897_v48, 0  ;;  %v1205_v37 = vperm.slane %v3028_v29, 0  ;;  %v3901_v17 = vld [vmem:[#allocation4_spill] sm:$0xff]  ;;  %v3902_v8 = vld [vmem:[#allocation5_spill] sm:$0xff] }
  0xf0   : > { %v1211_v30 = vperm.slane %v3052_v23, 0  ;;  %v1212_v62 = vperm.slane %v3901_v17, 0  ;;  %v1213_v41 = vperm.slane %v3060_v18, 0  ;;  %v1214_v48 = vperm.slane %v3064_v45, 0  ;;  %v3903_v46 = vld [vmem:[#allocation6_spill] sm:$0xff]  ;;  %v3904_v7 = vld [vmem:[#allocation7_spill] sm:$0xff] }
  0xf1   : > { %v1219_v27 = vperm.slane %v3084_v24, 0  ;;  %v3905_v9 = vld [vmem:[#allocation11_spill] sm:$0xff]  ;;  %v1221_v23 = vperm.slane %v3092_v43, 0  ;;  %v1222_v17 = vperm.slane %v3096_v50, 0  ;;  %v1223_v18 = vperm.slane %v3100_v1, 0 }
  0xf2   : > { %v1220_v14 = vperm.slane %v3905_v9, 0  ;;  %v1224_v45 = vperm.slane %v3104_v38, 0  ;;  %v1225_v29 = vperm.slane %v3108_v55, 0  ;;  %v1227_v40 = vperm.slane %v3116_v44, 0 }
  0xf3   : > { %v1228_v16 = vperm.slane %v3120_v51, 0  ;;  %v1229_v12 = vperm.slane %v3124_v31, 0  ;;  %v1236_v9 = vsel %vm1235_vm0, %v1172_v42, %v1171_v52  ;;  %v3906_v24 = vperm.slane %v2900_v61, 0 }
  0xf4   : > { %v1249_v50 = vsel %vm1235_vm0, %v1180_v32, %v1179_v6  ;;  %v3907_v1 = vperm.slane %v2904_v28, 0  ;;  %v1256_v31 = vsel %vm1235_vm0, %v1188_v58, %v1187_v4  ;;  %v1263_v52 = vsel %vm1235_vm0, %v1196_v60, %v1195_v63 }
  0xf5   : > { %v1238_v43 = vsel %vm1237_vm1, %v3906_v24, %v1236_v9  ;;  %v1250_v51 = vsel %vm1237_vm1, %v1181_v56, %v1249_v50  ;;  %v3908_v42 = vperm.slane %v2908_v3, 0  ;;  %v3909_v9 = vperm.slane %v2936_v33, 0 }
  0xf6   : > { %v1240_v44 = vsel %vm1239_vm2, %v3907_v1, %v1238_v43  ;;  %v1257_v6 = vsel %vm1237_vm1, %v1189_v21, %v1256_v31  ;;  %v1264_v28 = vsel %vm1237_vm1, %v1197_v10, %v1263_v52  ;;  %v3910_v32 = vperm.slane %v2912_v25, 0  ;;  %v3918_v31 = vld [vmem:[#allocation71_spill] sm:$0xff] }
  0xf7   : > { %v1242_v61 = vsel %vm1241_vm3, %v3908_v42, %v1240_v44  ;;  %v1251_v24 = vsel %vm1239_vm2, %v3909_v9, %v1250_v51  ;;  %v3911_v4 = vperm.slane %v2940_v35, 0  ;;  %v1258_v3 = vsel %vm1239_vm2, %v1190_v22, %v1257_v6  ;;  %v3921_v42 = vld [vmem:[#allocation76_spill] sm:$0xff] }
  0xf8   : > { %v1244_v56 = vsel %vm1243_vm4, %v3910_v32, %v1242_v61  ;;  %v1265_v60 = vsel %vm1239_vm2, %v1198_v39, %v1264_v28  ;;  %v3912_v33 = vperm.slane %v2916_v0, 0  ;;  %v3913_v21 = vperm.slane %v2944_v36, 0 }
  0xf9   : > { %v1252_v63 = vsel %vm1241_vm3, %v3911_v4, %v1251_v24  ;;  %v3914_v25 = vperm.slane %v2972_v53, 0  ;;  %v1266_v35 = vsel %vm1241_vm3, %v1199_v11, %v1265_v60  ;;  %v1230_v50 = vperm.slane %v3128_v54, 0  ;;  %v3923_v24 = vld [vmem:[#allocation2_spill] sm:$0xff] }
  0xfa   : > { %v1246_v58 = vsel %vm1245_vm5, %v3912_v33, %v1244_v56  ;;  %v1253_v10 = vsel %vm1243_vm4, %v3913_v21, %v1252_v63  ;;  %v1231_v22 = vperm.slane %v3132_v47, 0  ;;  %v1232_v39 = vperm.slane %v3136_v49, 0  ;;  %v3930_v4 = vld [vmem:[#allocation70_spill] sm:$0xff]  ;;  %v3934_v21 = vld [vmem:[#allocation80_spill] sm:$0xff] }
  0xfb   : > { %v1259_v43 = vsel %vm1241_vm3, %v3914_v25, %v1258_v3  ;;  %v3915_v0 = vperm.slane %v2976_v34, 0  ;;  %v1233_v36 = vperm.slane %v3140_v59, 0  ;;  %v3916_v44 = vperm.slane %v2920_v20, 0  ;;  %v3932_v3 = vld [vmem:[#allocation78_spill] sm:$0xff]  ;;  %v3935_v25 = vld [vmem:[#allocation72_spill] sm:$0xff] }
  0xfc   : > { %v3917_v51 = vperm.slane %v2948_v26, 0  ;;  %v1270_v54 = vsel %vm1235_vm0, %v1204_v15, %v1203_v5  ;;  %v3919_v47 = vperm.slane %v3918_v31, 0  ;;  %v3920_v34 = vperm.slane %v3894_v57, 0 }
  0xfd   : > { %v1260_v1 = vsel %vm1243_vm4, %v3915_v0, %v1259_v43  ;;  %v1248_v53 = vsel %vm1247_vm6, %v3916_v44, %v1246_v58  ;;  %v1271_v59 = vsel %vm1237_vm1, %v1205_v37, %v1270_v54  ;;  %v1277_v20 = vsel %vm1235_vm0, %v1212_v62, %v1211_v30 }
  0xfe   : > { %v1254_v11 = vsel %vm1245_vm5, %v3917_v51, %v1253_v10  ;;  %v1261_v49 = vsel %vm1245_vm5, %v3919_v47, %v1260_v1  ;;  %v1267_v52 = vsel %vm1243_vm4, %v3920_v34, %v1266_v35  ;;  %v3922_v61 = vperm.slane %v3921_v42, 0  ;;  %v3939_v1 = vld [vmem:[#allocation75_spill] sm:$0xff]  ;;  %1307 = vst.msk [vmem:[%s170_s25] sm:$0xff] %vm1306_vm7, %v1248_v53 }
  0xff   : > { %v1278_v9 = vsel %vm1237_vm1, %v1213_v41, %v1277_v20  ;;  %v1284_v5 = vsel %vm1235_vm0, %v1220_v14, %v1219_v27  ;;  %v1291_v15 = vsel %vm1235_vm0, %v1228_v16, %v1227_v40  ;;  %v3924_v6 = vperm.slane %v3923_v24, 0  ;;  %v3927_v27 = vld [vmem:[#allocation74_spill] sm:$0xff] }
 0x100   : > { %v1272_v26 = vsel %vm1239_vm2, %v3922_v61, %v1271_v59  ;;  %v1279_v28 = vsel %vm1239_vm2, %v1214_v48, %v1278_v9  ;;  %v1285_v37 = vsel %vm1237_vm1, %v1221_v23, %v1284_v5  ;;  %v1292_v62 = vsel %vm1237_vm1, %v1229_v12, %v1291_v15 }
 0x101   : > { %v1273_v57 = vsel %vm1241_vm3, %v3924_v6, %v1272_v26  ;;  %v3925_v30 = vperm.slane %v3898_v13, 0  ;;  %v3926_v41 = vperm.slane %v3068_v2, 0  ;;  %v1286_v40 = vsel %vm1239_vm2, %v1222_v17, %v1285_v37 }
 0x102   : > { %v1293_v16 = vsel %vm1239_vm2, %v1230_v50, %v1292_v62  ;;  %v3928_v48 = vperm.slane %v3927_v27, 0  ;;  %v3929_v13 = vperm.slane %v3902_v8, 0  ;;  %v1287_v2 = vsel %vm1241_vm3, %v1223_v18, %v1286_v40 }
 0x103   : > { %v1274_v32 = vsel %vm1243_vm4, %v3925_v30, %v1273_v57  ;;  %v1280_v14 = vsel %vm1241_vm3, %v3926_v41, %v1279_v28  ;;  %v1294_v56 = vsel %vm1241_vm3, %v1231_v22, %v1293_v16  ;;  %v3931_v17 = vperm.slane %v3930_v4, 0  ;;  %v3938_v22 = vld [vmem:[#allocation12_spill] sm:$0xff] }
 0x104   : > { %v1268_v12 = vsel %vm1245_vm5, %v3928_v48, %v1267_v52  ;;  %v1281_v23 = vsel %vm1243_vm4, %v3929_v13, %v1280_v14  ;;  %v3933_v60 = vperm.slane %v3932_v3, 0  ;;  %v1288_v58 = vsel %vm1243_vm4, %v1224_v45, %v1287_v2 }
 0x105   : > { %v1255_v63 = vsel %vm1247_vm6, %v3931_v17, %v1254_v11  ;;  %v1295_v8 = vsel %vm1243_vm4, %v1232_v39, %v1294_v56  ;;  %v1226_v10 = vperm.slane %v3934_v21, 0  ;;  %v3936_v18 = vperm.slane %v3935_v25, 0 }
 0x106   : > { %v1275_v33 = vsel %vm1245_vm5, %v3933_v60, %v1274_v32  ;;  %v3937_v35 = vperm.slane %v3903_v46, 0  ;;  %v1234_v0 = vperm.slane %v3938_v22, 0  ;;  %v3940_v44 = vperm.slane %v3939_v1, 0  ;;  %1308 = vst.msk [vmem:[%s170_s25 + $0x8] sm:$0xff] %vm1306_vm7, %v1255_v63 }
 0x107   : > { %v1262_v43 = vsel %vm1247_vm6, %v3936_v18, %v1261_v49  ;;  %v1289_v45 = vsel %vm1245_vm5, %v1225_v29, %v1288_v58  ;;  %v3941_v39 = vperm.slane %v3900_v19, 0  ;;  %v1296_v46 = vsel %vm1245_vm5, %v1233_v36, %v1295_v8 }
 0x108   : > { %v1282_v50 = vsel %vm1245_vm5, %v3937_v35, %v1281_v23  ;;  %v1269_v38 = vsel %vm1247_vm6, %v3940_v44, %v1268_v12  ;;  %v3942_v11 = vperm.slane %v3904_v7, 0  ;;  %1309 = vst.msk [vmem:[%s170_s25 + $0x10] sm:$0xff] %vm1306_vm7, %v1262_v43  ;;  %v1290_v55 = vsel %vm1247_vm6, %v1226_v10, %v1289_v45 }
 0x109   : > { %v1276_v51 = vsel %vm1247_vm6, %v3941_v39, %v1275_v33  ;;  %1310 = vst.msk [vmem:[%s170_s25 + $0x18] sm:$0xff] %vm1306_vm7, %v1269_v38  ;;  %v1297_v29 = vsel %vm1247_vm6, %v1234_v0, %v1296_v46 }
 0x10a   : > { %v1283_v54 = vsel %vm1247_vm6, %v3942_v11, %v1282_v50  ;;  %1311 = vst.msk [vmem:[%s170_s25 + $0x20] sm:$0xff] %vm1306_vm7, %v1276_v51 }
 0x10b   : > { %1312 = vst.msk [vmem:[%s170_s25 + $0x28] sm:$0xff] %vm1306_vm7, %v1283_v54 }
 0x10c   : > { %1313 = vst.msk [vmem:[%s170_s25 + $0x30] sm:$0xff] %vm1306_vm7, %v1290_v55 }
 0x10d   : > { %1314 = vst.msk [vmem:[%s170_s25 + $0x38] sm:$0xff] %vm1306_vm7, %v1297_v29 }
 0x10e PF: > { %s13_s12 = sadd.s32 1, %s1527_s12  }
 0x10f   : > { %p10_p4 = scmp.ge.s32.totalorder %s13_s12, 4  }
 0x111   :  { %12 = sbr.rel (!%p10_p4) target bundleno = 1 (0x1), region = 62 }

// kernel: conv_block_forward.3
= control target key start
LH: loop header
LB: loop body
LE: loop exit
PB: predicated region body
PF: predicated region fallthrough
CT: control target
= control target key end

     0   :  { %s2836_s12 = smov 0   ;;  %s3680_s0 = inlined_call_operand.vmem [shape: bf16[2,16,16,4], index: 0, kind: input, shape index: {}]   ;;  %s3681_s1 = inlined_call_operand.vmem [shape: bf16[9,4,8], index: 1, kind: input, shape index: {}]   ;;  %s3682_s2 = inlined_call_operand.vmem [shape: f32[2,16,16,8], index: 2, kind: output, shape index: {0}]   ;;  %s3683_s3 = inlined_call_operand.vmem [shape: f32[2,2,8], index: 3, kind: output, shape index: {1}]  }
   0x1 LB: > { %s2550_s13 = sadd.s32 4294967295, %s2813_s12   ;;  %p2554_p0 = scmp.ge.s32.totalorder %s2813_s12, 1  ;;  %s2813_s12 = sphi %s2836_s12, %s14_s12  }
   0x2   : > { %p140_p1 = scmp.lt.s32.totalorder %s2813_s12, 3 }
   0x4   : > { %p141_p2 = pnand %p2554_p0, %p140_p1 }
   0x6   : > { %144 = sbr.rel (%p141_p2) target bundleno = 757 (0x2f5), region = 28 }
   0xb   : > { %v2560_v0 = vld [vmem:[%s3681_s1 + $0x2] sm:$0x3]  ;;  %vm469_vm0 = vcmask 1041408   ;;  %p168_p3 = scmp.lt.s32.totalorder %s2550_s13, 1  ;;  %vm215_vm1 = vcmask 31744   ;;  %v2815_v3 = vmov 0.0  }
   0xc   : > { %v471_v1 = vsel %vm469_vm0, %v2560_v0, 0  ;;  %v2593_v2 = vld [vmem:[%s3681_s1 + $0x4] sm:$0x3]  ;;  %216 = vst.msk [vmem:[#allocation2] sm:$0xff] %vm215_vm1, %v2815_v3  ;;  %vm218_vm2 = vcmask 25600   ;;  %vm225_vm3 = vcmask 24576  }
   0xd   : > { %2795 = vmatpush.bf16.msra.mxu1 %v471_v1  ;;  %2796 = vmatpush.bf16.msra.mxu2 %v471_v1  ;;  %s3730_s13 = smov (!%p168_p3, %s2550_s13), 1  ;;  %v801_v4 = vsel %vm469_vm0, %v2593_v2, 0  ;;  %217 = vst.msk [vmem:[#allocation2 + $0x8] sm:$0xff] %vm215_vm1, %v2815_v3  ;;  %v2610_v5 = vld [vmem:[%s3681_s1 + $0x6] sm:$0x3]  ;;  %vm2257_vm4 = vcmask 64512  }
   0xe   : > { %2797 = vmatpush.bf16.msra.mxu3 %v471_v1  ;;  %480 = vmatpush.bf16.msra.mxu0 %v471_v1  ;;  %219 = vst.msk [vmem:[#allocation2 + $0x10] sm:$0x3] %vm218_vm2, %v2815_v3  ;;  %v1023_v6 = vsel %vm469_vm0, %v2610_v5, 0  ;;  %v370_v7 = vld [vmem:[%s3681_s1] sm:$0x3]  ;;  %s2714_s22 = sshll.u32 %s3730_s13, 7 }
   0xf   : > { %223 = vst.msk [vmem:[#allocation2 + $0x1a8] sm:$0x3] %vm218_vm2, %v2815_v3  ;;  %v611_v8 = vsel %vm469_vm0, %v370_v7, 0  ;;  %s2872_s25 = scalar_lea.vmem %s3680_s0, %s2714_s22  ;;  %v2627_v9 = vld [vmem:[%s3681_s1 + $0x8] sm:$0x3]  ;;  %s2715_s9 = sshll.u32 %s3730_s13, 8 }
  0x10   : > { %221 = vst.msk [vmem:[#allocation2 + $0x198] sm:$0xff] %vm215_vm1, %v2815_v3  ;;  %v2782_v10 = vld [vmem:[%s2872_s25 + $0x18] sm:$0xff]   ;;  %v1245_v13 = vsel %vm469_vm0, %v2627_v9, 0  ;;  %v2783_v18 = vld [vmem:[%s2872_s25 + $0x20] sm:$0xff]   ;;  %v2784_v34 = vld [vmem:[%s2872_s25 + $0x28] sm:$0xff]   ;;  %s3470_s14 = scalar_lea.vmem %s3682_s2, %s2715_s9  ;;  %s2559_s15 = sshll.u32 %s3730_s13, 1 }
  0x11   : > { %810 = vmatpush.bf16.msrb.mxu2 %v801_v4  ;;  %620 = vmatpush.bf16.msrb.mxu1 %v611_v8  ;;  %v2786_v11 = vld [vmem:[%s2872_s25 + $0x38] sm:$0xff]   ;;  %222 = vst.msk [vmem:[#allocation2 + $0x1a0] sm:$0xff] %vm215_vm1, %v2815_v3  ;;  %v2730_v14 = vunpack.c.l.bf16 %v2782_v10  ;;  %v2731_v15 = vunpack.c.h.bf16 %v2782_v10  ;;  %v2787_v23 = vld [vmem:[%s2872_s25 + $0x40] sm:$0xff]   ;;  %v2734_v25 = vunpack.c.l.bf16 %v2783_v18  ;;  %v2735_v26 = vunpack.c.h.bf16 %v2783_v18  ;;  %v2788_v40 = vld [vmem:[%s2872_s25 + $0x48] sm:$0xff]   ;;  %s181_s18 = scalar_lea.vmem %s3683_s3, %s2559_s15 }
  0x12   : > { %1032 = vmatpush.bf16.msrb.mxu3 %v1023_v6  ;;  %v2790_v12 = vld [vmem:[%s2872_s25 + $0x58] sm:$0xff]   ;;  %v2746_v16 = vunpack.c.l.bf16 %v2786_v11  ;;  %1254 = vmatpush.bf16.msrb.mxu0 %v1245_v13  ;;  %v2747_v17 = vunpack.c.h.bf16 %v2786_v11  ;;  %v2791_v27 = vld [vmem:[%s2872_s25 + $0x60] sm:$0xff]   ;;  %v2750_v28 = vunpack.c.l.bf16 %v2787_v23  ;;  %v2751_v29 = vunpack.c.h.bf16 %v2787_v23  ;;  %v2792_v46 = vld [vmem:[%s2872_s25 + $0x68] sm:$0xff]   ;;  %226 = vst.msk [vmem:[#allocation2 + $0x18] sm:$0x1] %vm225_vm3, %v2815_v3 }
  0x13   : > { %296 = vst.msk [vmem:[#allocation2 + $0x61] sm:$0xff] %vm215_vm1, %v2730_v14  ;;  %v2762_v19 = vunpack.c.l.bf16 %v2790_v12  ;;  %v2763_v21 = vunpack.c.h.bf16 %v2790_v12  ;;  %v2717_v30 = vld [vmem:[%s2872_s25] sm:$0xff]   ;;  %v2766_v31 = vunpack.c.l.bf16 %v2791_v27  ;;  %v2767_v33 = vunpack.c.h.bf16 %v2791_v27  ;;  %v2780_v51 = vld [vmem:[%s2872_s25 + $0x8] sm:$0xff]   ;;  %v2785_v54 = vld [vmem:[%s2872_s25 + $0x30] sm:$0xff]  }
  0x14   : > { %v371_v20 = vld [vmem:[#allocation2 + $0x1] sm:$0xff]  ;;  %297 = vst.msk [vmem:[#allocation2 + $0x69] sm:$0xff] %vm215_vm1, %v2731_v15  ;;  %v2718_v36 = vunpack.c.l.bf16 %v2717_v30  ;;  %v2719_v39 = vunpack.c.h.bf16 %v2717_v30  ;;  %v2738_v42 = vunpack.c.l.bf16 %v2784_v34  ;;  %v2739_v45 = vunpack.c.h.bf16 %v2784_v34  ;;  %v2789_v58 = vld [vmem:[%s2872_s25 + $0x50] sm:$0xff]  }
  0x15   : > { %v372_v22 = vld [vmem:[#allocation2 + $0x9] sm:$0xff]  ;;  %304 = vst.msk [vmem:[#allocation2 + $0xc1] sm:$0xff] %vm215_vm1, %v2746_v16  ;;  %v2754_v48 = vunpack.c.l.bf16 %v2788_v40  ;;  %v2755_v50 = vunpack.c.h.bf16 %v2788_v40  ;;  %v2770_v52 = vunpack.c.l.bf16 %v2792_v46  ;;  %v2771_v53 = vunpack.c.h.bf16 %v2792_v46 }
  0x16   : > { %v403_v24 = vpack.c.bf16 %v372_v22, %v371_v20  ;;  %305 = vst.msk [vmem:[#allocation2 + $0xc9] sm:$0xff] %vm215_vm1, %v2747_v17  ;;  %v2722_v55 = vunpack.c.l.bf16 %v2780_v51  ;;  %v2723_v56 = vunpack.c.h.bf16 %v2780_v51  ;;  %v2742_v57 = vunpack.c.l.bf16 %v2785_v54  ;;  %v2793_v61 = vld [vmem:[%s2872_s25 + $0x70] sm:$0xff]  }
  0x17   : > { %312 = vst.msk [vmem:[#allocation2 + $0x121] sm:$0xff] %vm215_vm1, %v2762_v19  ;;  %v2743_v60 = vunpack.c.h.bf16 %v2785_v54  ;;  %v2758_v1 = vunpack.c.l.bf16 %v2789_v58  ;;  %v2759_v4 = vunpack.c.h.bf16 %v2789_v58  ;;  %v2781_v5 = vld [vmem:[%s2872_s25 + $0x10] sm:$0xff]   ;;  %v2774_v8 = vunpack.c.l.bf16 %v2793_v61  ;;  %v702_v54 = vld [vmem:[#allocation2 + $0x2] sm:$0xff] }
  0x18   : > { %2561 = vmatmul.msk.bf16.vlgmr.msra.gmra.mxu0 %vm215_vm1, %v403_v24  ;;  %313 = vst.msk [vmem:[#allocation2 + $0x129] sm:$0xff] %vm215_vm1, %v2763_v21  ;;  %v2775_v10 = vunpack.c.h.bf16 %v2793_v61  ;;  %v2726_v13 = vunpack.c.l.bf16 %v2781_v5  ;;  %v2727_v15 = vunpack.c.h.bf16 %v2781_v5  ;;  %vm2460_vm5 = vcmask 1040384  }
  0x19   : > { %298 = vst.msk [vmem:[#allocation2 + $0x79] sm:$0xff] %vm215_vm1, %v2734_v25  ;;  %vm2462_vm6 = vcmask 58368  }
  0x1a   : > { %v379_v32 = vld [vmem:[#allocation2 + $0x61] sm:$0xff]  ;;  %299 = vst.msk [vmem:[#allocation2 + $0x81] sm:$0xff] %vm215_vm1, %v2735_v26 }
  0x1b   : > { %v380_v35 = vld [vmem:[#allocation2 + $0x69] sm:$0xff]  ;;  %306 = vst.msk [vmem:[#allocation2 + $0xd9] sm:$0xff] %vm215_vm1, %v2750_v28 }
  0x1c   : > { %v2900_v37 = vpack.c.bf16 %v380_v35, %v379_v32  ;;  %v387_v38 = vld [vmem:[#allocation2 + $0xc1] sm:$0xff]  ;;  %307 = vst.msk [vmem:[#allocation2 + $0xe1] sm:$0xff] %vm215_vm1, %v2751_v29  ;;  %v2678_v32 = vld [vmem:[%s3681_s1 + $0xe] sm:$0x3]  ;;  %v2644_v35 = vld [vmem:[%s3681_s1 + $0xa] sm:$0x3] }
  0x1d   : > { %v388_v41 = vld [vmem:[#allocation2 + $0xc9] sm:$0xff]  ;;  %314 = vst.msk [vmem:[#allocation2 + $0x139] sm:$0xff] %vm215_vm1, %v2766_v31  ;;  %v1912_v34 = vsel %vm469_vm0, %v2678_v32, 0 }
  0x1e   : > { %2565 = vmatmul.msk.bf16.vlgmr.msra.gmra.mxu1 %vm215_vm1, %v2900_v37  ;;  %v2907_v43 = vpack.c.bf16 %v388_v41, %v387_v38  ;;  %v395_v44 = vld [vmem:[#allocation2 + $0x121] sm:$0xff]  ;;  %315 = vst.msk [vmem:[#allocation2 + $0x141] sm:$0xff] %vm215_vm1, %v2767_v33  ;;  %v2661_v31 = vld [vmem:[%s3681_s1 + $0xc] sm:$0x3]  ;;  %v2695_v38 = vld [vmem:[%s3681_s1 + $0x10] sm:$0x3] }
  0x1f   : > { %v396_v47 = vld [vmem:[#allocation2 + $0x129] sm:$0xff]  ;;  %290 = vst.msk [vmem:[#allocation2 + $0x19] sm:$0xff] %vm215_vm1, %v2718_v36  ;;  %v1690_v33 = vsel %vm469_vm0, %v2661_v31, 0  ;;  %v1467_v36 = vsel %vm469_vm0, %v2644_v35, 0 }
  0x20   : > { %2569 = vmatmul.msk.bf16.vlgmr.msra.gmra.mxu2 %vm215_vm1, %v2907_v43  ;;  %v2914_v49 = vpack.c.bf16 %v396_v47, %v395_v44  ;;  %291 = vst.msk [vmem:[#allocation2 + $0x21] sm:$0xff] %vm215_vm1, %v2719_v39  ;;  %v381_v62 = vld [vmem:[#allocation2 + $0x79] sm:$0xff]  ;;  %1476 = vmatpush.bf16.msra.mxu1 %v1467_v36  ;;  %v2134_v39 = vsel %vm469_vm0, %v2695_v38, 0 }
  0x21   : > { %300 = vst.msk [vmem:[#allocation2 + $0x91] sm:$0xff] %vm215_vm1, %v2738_v42  ;;  %v382_v63 = vld [vmem:[#allocation2 + $0x81] sm:$0xff]  ;;  %1699 = vmatpush.bf16.msra.mxu2 %v1690_v33  ;;  %2143 = vmatpush.bf16.msra.mxu0 %v2134_v39 }
  0x22   : > { %2573 = vmatmul.msk.bf16.vlgmr.msra.gmra.mxu3 %vm215_vm1, %v2914_v49  ;;  %301 = vst.msk [vmem:[#allocation2 + $0x99] sm:$0xff] %vm215_vm1, %v2739_v45  ;;  %v389_v6 = vld [vmem:[#allocation2 + $0xd9] sm:$0xff]  ;;  %v2935_v9 = vpack.c.bf16 %v382_v63, %v381_v62 }
  0x23   : > { %308 = vst.msk [vmem:[#allocation2 + $0xf1] sm:$0xff] %vm215_vm1, %v2754_v48  ;;  %v390_v7 = vld [vmem:[#allocation2 + $0xe1] sm:$0xff]  ;;  %1921 = vmatpush.bf16.msra.mxu3 %v1912_v34 }
  0x24   : > { %309 = vst.msk [vmem:[#allocation2 + $0xf9] sm:$0xff] %vm215_vm1, %v2755_v50  ;;  %v397_v11 = vld [vmem:[#allocation2 + $0x139] sm:$0xff]  ;;  %v2941_v14 = vpack.c.bf16 %v390_v7, %v389_v6 }
  0x25   : > { %316 = vst.msk [vmem:[#allocation2 + $0x151] sm:$0xff] %vm215_vm1, %v2770_v52  ;;  %v398_v12 = vld [vmem:[#allocation2 + $0x141] sm:$0xff] }
  0x26   : > { %v373_v59 = vld [vmem:[#allocation2 + $0x19] sm:$0xff]  ;;  %317 = vst.msk [vmem:[#allocation2 + $0x159] sm:$0xff] %vm215_vm1, %v2771_v53  ;;  %v2947_v16 = vpack.c.bf16 %v398_v12, %v397_v11  ;;  %v323_v53 = vld [vmem:[#allocation2 + $0x8] sm:$0xff] }
  0x27   : > { %v374_v0 = vld [vmem:[#allocation2 + $0x21] sm:$0xff]  ;;  %292 = vst.msk [vmem:[#allocation2 + $0x31] sm:$0xff] %vm215_vm1, %v2722_v55  ;;  %v703_v55 = vld [vmem:[#allocation2 + $0xa] sm:$0xff] }
  0x28   : > { %v2930_v2 = vpack.c.bf16 %v374_v0, %v373_v59  ;;  %293 = vst.msk [vmem:[#allocation2 + $0x39] sm:$0xff] %vm215_vm1, %v2723_v56  ;;  %v383_v20 = vld [vmem:[#allocation2 + $0x91] sm:$0xff]  ;;  %v322_v52 = vld [vmem:[#allocation2] sm:$0xff]  ;;  %v734_v59 = vpack.c.bf16 %v703_v55, %v702_v54 }
  0x29   : > { %302 = vst.msk [vmem:[#allocation2 + $0xa9] sm:$0xff] %vm215_vm1, %v2742_v57  ;;  %v384_v21 = vld [vmem:[#allocation2 + $0x99] sm:$0xff]  ;;  %v354_v56 = vpack.c.bf16 %v323_v53, %v322_v52 }
  0x2a   : > { %2562 = vmatmul.msk.bf16.gmra.mxu0 %vm215_vm1, %v2930_v2  ;;  %303 = vst.msk [vmem:[#allocation2 + $0xb1] sm:$0xff] %vm215_vm1, %v2743_v60  ;;  %v391_v22 = vld [vmem:[#allocation2 + $0xf1] sm:$0xff]  ;;  %v2962_v24 = vpack.c.bf16 %v384_v21, %v383_v20  ;;  %v925_v58 = vld [vmem:[#allocation2 + $0x20] sm:$0xff] }
  0x2b   : > { %310 = vst.msk [vmem:[#allocation2 + $0x109] sm:$0xff] %vm215_vm1, %v2758_v1  ;;  %v392_v23 = vld [vmem:[#allocation2 + $0xf9] sm:$0xff]  ;;  %v710_v20 = vld [vmem:[#allocation2 + $0x62] sm:$0xff] }
  0x2c   : > { %311 = vst.msk [vmem:[#allocation2 + $0x111] sm:$0xff] %vm215_vm1, %v2759_v4  ;;  %v399_v25 = vld [vmem:[#allocation2 + $0x151] sm:$0xff]  ;;  %v2970_v27 = vpack.c.bf16 %v392_v23, %v391_v22  ;;  %v704_v61 = vld [vmem:[#allocation2 + $0x1a] sm:$0xff] }
  0x2d   : > { %318 = vst.msk [vmem:[#allocation2 + $0x169] sm:$0xff] %vm215_vm1, %v2774_v8  ;;  %v400_v26 = vld [vmem:[#allocation2 + $0x159] sm:$0xff] }
  0x2e   : > { %2566 = vmatmul.msk.bf16.gmra.mxu1 %vm215_vm1, %v2935_v9  ;;  %319 = vst.msk [vmem:[#allocation2 + $0x171] sm:$0xff] %vm215_vm1, %v2775_v10  ;;  %v375_v17 = vld [vmem:[#allocation2 + $0x31] sm:$0xff]  ;;  %v2978_v28 = vpack.c.bf16 %v400_v26, %v399_v25  ;;  %v933_v23 = vld [vmem:[#allocation2 + $0x80] sm:$0xff] }
  0x2f   : > { %294 = vst.msk [vmem:[#allocation2 + $0x49] sm:$0xff] %vm215_vm1, %v2726_v13  ;;  %v376_v18 = vld [vmem:[#allocation2 + $0x39] sm:$0xff]  ;;  %v931_v13 = vld [vmem:[#allocation2 + $0x68] sm:$0xff] }
  0x30   : > { %2570 = vmatmul.msk.bf16.gmra.mxu2 %vm215_vm1, %v2941_v14  ;;  %295 = vst.msk [vmem:[#allocation2 + $0x51] sm:$0xff] %vm215_vm1, %v2727_v15  ;;  %v2956_v19 = vpack.c.bf16 %v376_v18, %v375_v17  ;;  %v385_v41 = vld [vmem:[#allocation2 + $0xa9] sm:$0xff]  ;;  %v924_v57 = vld [vmem:[#allocation2 + $0x18] sm:$0xff] }
  0x31   : > { %227 = vst.msk [vmem:[#allocation2 + $0x30] sm:$0x1] %vm225_vm3, %v2815_v3  ;;  %v386_v42 = vld [vmem:[#allocation2 + $0xb1] sm:$0xff]  ;;  %v956_v60 = vpack.c.bf16 %v925_v58, %v924_v57  ;;  %v712_v33 = vld [vmem:[#allocation2 + $0x7a] sm:$0xff] }
  0x32   : > { %2574 = vmatmul.msk.bf16.gmra.mxu3 %vm215_vm1, %v2947_v16  ;;  %228 = vst.msk [vmem:[#allocation2 + $0x48] sm:$0x1] %vm225_vm3, %v2815_v3  ;;  %v393_v44 = vld [vmem:[#allocation2 + $0x109] sm:$0xff]  ;;  %v3026_v46 = vpack.c.bf16 %v386_v42, %v385_v41  ;;  %v927_v63 = vld [vmem:[#allocation2 + $0x38] sm:$0xff] }
  0x33   : > { %229 = vst.msk [vmem:[#allocation2 + $0x60] sm:$0x1] %vm225_vm3, %v2815_v3  ;;  %v394_v45 = vld [vmem:[#allocation2 + $0x111] sm:$0xff] }
  0x34   : > { %230 = vst.msk [vmem:[#allocation2 + $0x78] sm:$0x1] %vm225_vm3, %v2815_v3  ;;  %v401_v47 = vld [vmem:[#allocation2 + $0x169] sm:$0xff]  ;;  %v3034_v50 = vpack.c.bf16 %v394_v45, %v393_v44  ;;  %v935_v39 = vld [vmem:[#allocation2 + $0x98] sm:$0xff] }
  0x35   : > { %231 = vst.msk [vmem:[#allocation2 + $0x90] sm:$0x1] %vm225_vm3, %v2815_v3  ;;  %v402_v48 = vld [vmem:[#allocation2 + $0x171] sm:$0xff] }
  0x36   : > { %232 = vst.msk [vmem:[#allocation2 + $0xa8] sm:$0x1] %vm225_vm3, %v2815_v3  ;;  %v377_v29 = vld [vmem:[#allocation2 + $0x49] sm:$0xff]  ;;  %v3042_v51 = vpack.c.bf16 %v402_v48, %v401_v47  ;;  %v714_v53 = vld [vmem:[#allocation2 + $0x92] sm:$0xff] }
  0x37   : > { %233 = vst.msk [vmem:[#allocation2 + $0xc0] sm:$0x1] %vm225_vm3, %v2815_v3  ;;  %v378_v30 = vld [vmem:[#allocation2 + $0x51] sm:$0xff] }
  0x38   : > { %234 = vst.msk [vmem:[#allocation2 + $0xd8] sm:$0x1] %vm225_vm3, %v2815_v3  ;;  %v3016_v40 = vpack.c.bf16 %v378_v30, %v377_v29  ;;  %v929_v6 = vld [vmem:[#allocation2 + $0x50] sm:$0xff] }
  0x39   : > { %235 = vst.msk [vmem:[#allocation2 + $0xf0] sm:$0x1] %vm225_vm3, %v2815_v3  ;;  %v928_v5 = vld [vmem:[#allocation2 + $0x48] sm:$0xff]  ;;  %v937_v58 = vld [vmem:[#allocation2 + $0xb0] sm:$0xff] }
  0x3a   : > { %2563 = vmatmul.msk.bf16.gmra.mxu0 %vm215_vm1, %v2956_v19  ;;  %236 = vst.msk [vmem:[#allocation2 + $0x108] sm:$0x1] %vm225_vm3, %v2815_v3  ;;  %v3090_v8 = vpack.c.bf16 %v929_v6, %v928_v5  ;;  %v708_v10 = vld [vmem:[#allocation2 + $0x4a] sm:$0xff]  ;;  %v930_v12 = vld [vmem:[#allocation2 + $0x60] sm:$0xff] }
  0x3b   : > { %237 = vst.msk [vmem:[#allocation2 + $0x120] sm:$0x1] %vm225_vm3, %v2815_v3  ;;  %v3102_v17 = vpack.c.bf16 %v931_v13, %v930_v12  ;;  %v932_v22 = vld [vmem:[#allocation2 + $0x78] sm:$0xff]  ;;  %v939_v12 = vld [vmem:[#allocation2 + $0xc8] sm:$0xff] }
  0x3c   : > { %238 = vst.msk [vmem:[#allocation2 + $0x138] sm:$0x1] %vm225_vm3, %v2815_v3  ;;  %v3120_v29 = vpack.c.bf16 %v933_v23, %v932_v22  ;;  %v934_v38 = vld [vmem:[#allocation2 + $0x90] sm:$0xff] }
  0x3d   : > { %239 = vst.msk [vmem:[#allocation2 + $0x150] sm:$0x1] %vm225_vm3, %v2815_v3  ;;  %v3146_v44 = vpack.c.bf16 %v935_v39, %v934_v38  ;;  %v936_v57 = vld [vmem:[#allocation2 + $0xa8] sm:$0xff] }
  0x3e   : > { %2567 = vmatmul.msk.bf16.gmra.mxu1 %vm215_vm1, %v2962_v24  ;;  %240 = vst.msk [vmem:[#allocation2 + $0x168] sm:$0x1] %vm225_vm3, %v2815_v3  ;;  %v718_v38 = vld [vmem:[#allocation2 + $0xc2] sm:$0xff] }
  0x3f   : > { %241 = vst.msk [vmem:[#allocation2 + $0x180] sm:$0x1] %vm225_vm3, %v2815_v3 }
  0x40   : > { %2571 = vmatmul.msk.bf16.gmra.mxu2 %vm215_vm1, %v2970_v27  ;;  %242 = vst.msk [vmem:[#allocation2 + $0x29] sm:$0x1] %vm225_vm3, %v2815_v3 }
  0x41   : > { %243 = vst.msk [vmem:[#allocation2 + $0x41] sm:$0x1] %vm225_vm3, %v2815_v3 }
  0x42   : > { %2575 = vmatmul.msk.bf16.gmra.mxu3 %vm215_vm1, %v2978_v28  ;;  %244 = vst.msk [vmem:[#allocation2 + $0x59] sm:$0x1] %vm225_vm3, %v2815_v3 }
  0x43   : > { %245 = vst.msk [vmem:[#allocation2 + $0x71] sm:$0x1] %vm225_vm3, %v2815_v3 }
  0x44   : > { %246 = vst.msk [vmem:[#allocation2 + $0x89] sm:$0x1] %vm225_vm3, %v2815_v3 }
  0x45   : > { %247 = vst.msk [vmem:[#allocation2 + $0xa1] sm:$0x1] %vm225_vm3, %v2815_v3 }
  0x46   : > { %248 = vst.msk [vmem:[#allocation2 + $0xb9] sm:$0x1] %vm225_vm3, %v2815_v3 }
  0x47   : > { %249 = vst.msk [vmem:[#allocation2 + $0xd1] sm:$0x1] %vm225_vm3, %v2815_v3  ;;  %v705_v62 = vld [vmem:[#allocation2 + $0x22] sm:$0xff] }
  0x48   : > { %250 = vst.msk [vmem:[#allocation2 + $0xe9] sm:$0x1] %vm225_vm3, %v2815_v3  ;;  %v3075_v0 = vpack.c.bf16 %v705_v62, %v704_v61  ;;  %v707_v4 = vld [vmem:[#allocation2 + $0x3a] sm:$0xff]  ;;  %v3174_v61 = vpack.c.bf16 %v937_v58, %v936_v57 }
  0x49   : > { %251 = vst.msk [vmem:[#allocation2 + $0x101] sm:$0x1] %vm225_vm3, %v2815_v3  ;;  %v709_v11 = vld [vmem:[#allocation2 + $0x52] sm:$0xff]  ;;  %v941_v58 = vld [vmem:[#allocation2 + $0xe0] sm:$0xff] }
  0x4a   : > { %2564 = vmatmul.msk.bf16.gmra.mxu0 %vm215_vm1, %v3016_v40  ;;  %252 = vst.msk [vmem:[#allocation2 + $0x119] sm:$0x1] %vm225_vm3, %v2815_v3  ;;  %v3098_v15 = vpack.c.bf16 %v709_v11, %v708_v10  ;;  %v711_v21 = vld [vmem:[#allocation2 + $0x6a] sm:$0xff]  ;;  %v938_v11 = vld [vmem:[#allocation2 + $0xc0] sm:$0xff]  ;;  %v940_v57 = vld [vmem:[#allocation2 + $0xd8] sm:$0xff] }
  0x4b   : > { %253 = vst.msk [vmem:[#allocation2 + $0x131] sm:$0x1] %vm225_vm3, %v2815_v3  ;;  %v3114_v25 = vpack.c.bf16 %v711_v21, %v710_v20  ;;  %v713_v34 = vld [vmem:[#allocation2 + $0x82] sm:$0xff]  ;;  %v3202_v21 = vpack.c.bf16 %v939_v12, %v938_v11  ;;  %v3227_v12 = vpack.c.bf16 %v941_v58, %v940_v57 }
  0x4c   : > { %254 = vst.msk [vmem:[#allocation2 + $0x149] sm:$0x1] %vm225_vm3, %v2815_v3  ;;  %v3140_v41 = vpack.c.bf16 %v713_v34, %v712_v33  ;;  %v715_v54 = vld [vmem:[#allocation2 + $0x9a] sm:$0xff] }
  0x4d   : > { %255 = vst.msk [vmem:[#allocation2 + $0x161] sm:$0x1] %vm225_vm3, %v2815_v3  ;;  %v717_v5 = vld [vmem:[#allocation2 + $0xb2] sm:$0xff] }
  0x4e   : > { %2568 = vmatmul.msk.bf16.gmra.mxu1 %vm215_vm1, %v3026_v46  ;;  %256 = vst.msk [vmem:[#allocation2 + $0x179] sm:$0x1] %vm225_vm3, %v2815_v3  ;;  %v719_v39 = vld [vmem:[#allocation2 + $0xca] sm:$0xff] }
  0x4f   : > { %257 = vst.msk [vmem:[#allocation2 + $0x191] sm:$0x1] %vm225_vm3, %v2815_v3  ;;  %v926_v3 = vld [vmem:[#allocation2 + $0x30] sm:$0xff]  ;;  %v721_v57 = vld [vmem:[#allocation2 + $0xe2] sm:$0xff] }
  0x50   : > { %2572 = vmatmul.msk.bf16.gmra.mxu2 %vm215_vm1, %v3034_v50  ;;  %v3078_v1 = vpack.c.bf16 %v927_v63, %v926_v3  ;;  %3693 = vst [vmem:[#allocation5_spill] sm:$0xff] %v3174_v61 }
  0x51   : > { %3697 = vst [vmem:[#allocation9_spill] sm:$0xff] %v3202_v21 }
  0x52   : > { %2576 = vmatmul.msk.bf16.gmra.mxu3 %vm215_vm1, %v3042_v51 }
  0x5a   : > { %2628 = vmatmul.msk.bf16.vlgmr.msrb.gmra.mxu0 %vm215_vm1, %v2930_v2  ;;  %v706_v2 = vld [vmem:[#allocation2 + $0x32] sm:$0xff] }
  0x5b   : > { %v3086_v7 = vpack.c.bf16 %v707_v4, %v706_v2  ;;  %v716_v4 = vld [vmem:[#allocation2 + $0xaa] sm:$0xff] }
  0x5c   : > { %v3196_v13 = vpack.c.bf16 %v717_v5, %v716_v4  ;;  %v3221_v5 = vpack.c.bf16 %v719_v39, %v718_v38 }
  0x5e   : > { %2577 = vmatmul.msk.bf16.vlgmr.msrb.gmra.mxu1 %vm215_vm1, %v354_v56  ;;  %3695 = vst [vmem:[#allocation7_spill] sm:$0xff] %v3196_v13 }
  0x5f   : > { %3699 = vst [vmem:[#allocation11_spill] sm:$0xff] %v3221_v5 }
  0x60   : > { %2594 = vmatmul.msk.bf16.vlgmr.msrb.gmra.mxu2 %vm215_vm1, %v734_v59  ;;  %v3168_v59 = vpack.c.bf16 %v715_v54, %v714_v53 }
  0x62   : > { %2611 = vmatmul.msk.bf16.vlgmr.msrb.gmra.mxu3 %vm215_vm1, %v956_v60 }
  0x6a   : > { %2629 = vmatmul.msk.bf16.gmra.mxu0 %vm215_vm1, %v2956_v19 }
  0x6e   : > { %2578 = vmatmul.msk.bf16.gmra.mxu1 %vm215_vm1, %v956_v60 }
  0x70   : > { %2595 = vmatmul.msk.bf16.gmra.mxu2 %vm215_vm1, %v3075_v0 }
  0x72   : > { %2612 = vmatmul.msk.bf16.gmra.mxu3 %vm215_vm1, %v3078_v1 }
  0x7a   : > { %2630 = vmatmul.msk.bf16.gmra.mxu0 %vm215_vm1, %v3016_v40 }
  0x7e   : > { %2579 = vmatmul.msk.bf16.gmra.mxu1 %vm215_vm1, %v3078_v1 }
  0x80   : > { %2596 = vmatmul.msk.bf16.gmra.mxu2 %vm215_vm1, %v3086_v7 }
  0x82   : > { %2613 = vmatmul.msk.bf16.gmra.mxu3 %vm215_vm1, %v3090_v8 }
  0x8a   : > { %2631 = vmatmul.msk.bf16.gmra.mxu0 %vm215_vm1, %v2900_v37 }
  0x8e   : > { %2580 = vmatmul.msk.bf16.gmra.mxu1 %vm215_vm1, %v3090_v8 }
  0x90   : > { %2597 = vmatmul.msk.bf16.gmra.mxu2 %vm215_vm1, %v3098_v15 }
  0x92   : > { %2614 = vmatmul.msk.bf16.gmra.mxu3 %vm215_vm1, %v3102_v17 }
  0x95   : > { %v3108_v18 = vpop.f32.mrf.mxu0 }
  0x9a   : > { %2632 = vmatmul.msk.bf16.gmra.mxu0 %vm215_vm1, %v2935_v9 }
  0x9b   : > { %v3112_v37 = vpop.f32.mrf.mxu1 }
  0x9d   : > { %v3116_v26 = vpop.f32.mrf.mxu0 }
  0x9e   : > { %2581 = vmatmul.msk.bf16.gmra.mxu1 %vm215_vm1, %v3102_v17 }
  0xa0   : > { %2598 = vmatmul.msk.bf16.gmra.mxu2 %vm215_vm1, %v3114_v25 }
  0xa2   : > { %2615 = vmatmul.msk.bf16.gmra.mxu3 %vm215_vm1, %v3120_v29 }
  0xa3   : > { %v3126_v9 = vpop.f32.mrf.mxu2  ;;  %v3128_v30 = vpop.f32.mrf.mxu1 }
  0xa5   : > { %v3130_v31 = vpop.f32.mrf.mxu3 }
  0xa7   : > { %v3132_v32 = vpop.f32.mrf.mxu0 }
  0xaa   : > { %2633 = vmatmul.msk.bf16.gmra.mxu0 %vm215_vm1, %v2962_v24 }
  0xab   : > { %v3136_v35 = vpop.f32.mrf.mxu2  ;;  %v3138_v36 = vpop.f32.mrf.mxu1 }
  0xad   : > { %v3142_v42 = vpop.f32.mrf.mxu3 }
  0xae   : > { %2582 = vmatmul.msk.bf16.gmra.mxu1 %vm215_vm1, %v3120_v29 }
  0xaf   : > { %v3148_v45 = vpop.f32.mrf.mxu0 }
  0xb0   : > { %2599 = vmatmul.msk.bf16.gmra.mxu2 %vm215_vm1, %v3140_v41 }
  0xb2   : > { %2616 = vmatmul.msk.bf16.gmra.mxu3 %vm215_vm1, %v3146_v44 }
  0xb3   : > { %v3154_v24 = vpop.f32.mrf.mxu2  ;;  %v3156_v47 = vpop.f32.mrf.mxu1 }
  0xb5   : > { %v3158_v48 = vpop.f32.mrf.mxu3 }
  0xb6   : > { %3691 = vst [vmem:[#allocation3_spill] sm:$0xff] %v3158_v48  ;;  %v943_v48 = vld [vmem:[#allocation2 + $0xf8] sm:$0xff] }
  0xb7   : > { %v3160_v52 = vpop.f32.mrf.mxu0 }
  0xba   : > { %2634 = vmatmul.msk.bf16.gmra.mxu0 %vm215_vm1, %v3026_v46 }
  0xbb   : > { %v3164_v55 = vpop.f32.mrf.mxu2  ;;  %v3166_v56 = vpop.f32.mrf.mxu1 }
  0xbd   : > { %v3170_v60 = vpop.f32.mrf.mxu3 }
  0xbe   : > { %3692 = vst [vmem:[#allocation4_spill] sm:$0xff] %v3170_v60  ;;  %2583 = vmatmul.msk.bf16.gmra.mxu1 %vm215_vm1, %v3146_v44  ;;  %v942_v60 = vld [vmem:[#allocation2 + $0xf0] sm:$0xff] }
  0xbf   : > { %v3176_v62 = vpop.f32.mrf.mxu0 }
  0xc0   : > { %2600 = vmatmul.msk.bf16.gmra.mxu2 %vm215_vm1, %v3168_v59 }
  0xc2   : > { %2617 = vmatmul.msk.bf16.gmra.mxu3 %vm215_vm1, %v3174_v61 }
  0xc3   : > { %v3182_v46 = vpop.f32.mrf.mxu2  ;;  %v3184_v3 = vpop.f32.mrf.mxu1 }
  0xc5   : > { %v3186_v63 = vpop.f32.mrf.mxu3 }
  0xc6   : > { %3694 = vst [vmem:[#allocation6_spill] sm:$0xff] %v3186_v63 }
  0xc7   : > { %v3188_v2 = vpop.f32.mrf.mxu0 }
  0xca   : > { %2635 = vmatmul.msk.bf16.gmra.mxu0 %vm215_vm1, %v2907_v43 }
  0xcb   : > { %v3192_v6 = vpop.f32.mrf.mxu2  ;;  %v3194_v10 = vpop.f32.mrf.mxu1 }
  0xcd   : > { %v3198_v20 = vpop.f32.mrf.mxu3 }
  0xce   : > { %3696 = vst [vmem:[#allocation8_spill] sm:$0xff] %v3198_v20  ;;  %2584 = vmatmul.msk.bf16.gmra.mxu1 %vm215_vm1, %v3174_v61 }
  0xcf   : > { %v3204_v22 = vpop.f32.mrf.mxu0 }
  0xd0   : > { %2601 = vmatmul.msk.bf16.gmra.mxu2 %vm215_vm1, %v3196_v13 }
  0xd2   : > { %2618 = vmatmul.msk.bf16.gmra.mxu3 %vm215_vm1, %v3202_v21 }
  0xd3   : > { %v3210_v43 = vpop.f32.mrf.mxu2  ;;  %v3212_v23 = vpop.f32.mrf.mxu1 }
  0xd5   : > { %v3214_v33 = vpop.f32.mrf.mxu3 }
  0xd6   : > { %3698 = vst [vmem:[#allocation10_spill] sm:$0xff] %v3214_v33 }
  0xd7   : > { %v1256_v34 = vpop.f32.mrf.mxu0 }
  0xda   : > { %2636 = vmatmul.msk.bf16.gmra.mxu0 %vm215_vm1, %v2941_v14 }
  0xdb   : > { %v3218_v53 = vpop.f32.mrf.mxu2  ;;  %v622_v54 = vpop.f32.mrf.mxu1 }
  0xdc   : > { %v623_v4 = vadd.f32 %v622_v54, %v3108_v18 }
  0xdd   : > { %v3223_v11 = vpop.f32.mrf.mxu3 }
  0xde   : > { %3700 = vst [vmem:[#allocation12_spill] sm:$0xff] %v3223_v11  ;;  %2585 = vmatmul.msk.bf16.gmra.mxu1 %vm215_vm1, %v3202_v21  ;;  %v720_v21 = vld [vmem:[#allocation2 + $0xda] sm:$0xff] }
  0xdf   : > { %v1258_v33 = vpop.f32.mrf.mxu0 }
  0xe0   : > { %2602 = vmatmul.msk.bf16.gmra.mxu2 %vm215_vm1, %v3221_v5 }
  0xe2   : > { %2619 = vmatmul.msk.bf16.gmra.mxu3 %vm215_vm1, %v3227_v12 }
  0xe3   : > { %v812_v14 = vpop.f32.mrf.mxu2  ;;  %v624_v20 = vpop.f32.mrf.mxu1 }
  0xe4   : > { %v892_v63 = vadd.f32 %v812_v14, %v623_v4  ;;  %v625_v18 = vadd.f32 %v624_v20, %v3116_v26  ;;  %v3239_v4 = vpack.c.bf16 %v721_v57, %v720_v21 }
  0xe5   : > { %v1034_v38 = vpop.f32.mrf.mxu3 }
  0xe6   : > { %v1114_v39 = vadd.f32 %v1034_v38, %v892_v63  ;;  %v3243_v63 = vpack.c.bf16 %v943_v48, %v942_v60  ;;  %v722_v48 = vld [vmem:[#allocation2 + $0xf2] sm:$0xff]  ;;  %v723_v60 = vld [vmem:[#allocation2 + $0xfa] sm:$0xff] }
  0xe7   : > { %v1261_v54 = vpop.f32.mrf.mxu0 }
  0xe8   : > { %v3234_v11 = vadd.f32 %v1256_v34, %v1114_v39 }
  0xea   : > { %2637 = vmatmul.msk.bf16.gmra.mxu0 %vm215_vm1, %v2970_v27 }
  0xeb   : > { %v814_v58 = vpop.f32.mrf.mxu2  ;;  %v627_v5 = vpop.f32.mrf.mxu1 }
  0xec   : > { %v893_v61 = vadd.f32 %v814_v58, %v625_v18  ;;  %v628_v13 = vadd.f32 %v627_v5, %v3132_v32  ;;  %v944_v58 = vld [vmem:[#allocation2 + $0x108] sm:$0xff] }
  0xed   : > { %v1036_v26 = vpop.f32.mrf.mxu3 }
  0xee   : > { %v1115_v20 = vadd.f32 %v1036_v26, %v893_v61  ;;  %2586 = vmatmul.msk.bf16.gmra.mxu1 %vm215_vm1, %v3227_v12  ;;  %v945_v26 = vld [vmem:[#allocation2 + $0x110] sm:$0xff] }
  0xef   : > { %v1263_v34 = vpop.f32.mrf.mxu0 }
  0xf0   : > { %2603 = vmatmul.msk.bf16.gmra.mxu2 %vm215_vm1, %v3239_v4  ;;  %v3247_v27 = vadd.f32 %v1258_v33, %v1115_v20 }
  0xf2   : > { %3701 = vst [vmem:[#allocation13_spill] sm:$0xff] %v3247_v27  ;;  %2620 = vmatmul.msk.bf16.gmra.mxu3 %vm215_vm1, %v3243_v63 }
  0xf3   : > { %v817_v14 = vpop.f32.mrf.mxu2  ;;  %v629_v32 = vpop.f32.mrf.mxu1 }
  0xf4   : > { %v894_v21 = vadd.f32 %v817_v14, %v628_v13  ;;  %v630_v5 = vadd.f32 %v629_v32, %v3148_v45  ;;  %v3257_v13 = vpack.c.bf16 %v723_v60, %v722_v48 }
  0xf5   : > { %v1039_v61 = vpop.f32.mrf.mxu3 }
  0xf6   : > { %v1116_v18 = vadd.f32 %v1039_v61, %v894_v21 }
  0xf7   : > { %v1266_v38 = vpop.f32.mrf.mxu0 }
  0xf8   : > { %v3252_v39 = vadd.f32 %v1261_v54, %v1116_v18  ;;  %v3261_v54 = vpack.c.bf16 %v945_v26, %v944_v58  ;;  %v725_v58 = vld [vmem:[#allocation2 + $0x112] sm:$0xff] }
  0xfa   : > { %2638 = vmatmul.msk.bf16.gmra.mxu0 %vm215_vm1, %v3034_v50 }
  0xfb   : > { %v819_v33 = vpop.f32.mrf.mxu2  ;;  %v632_v57 = vpop.f32.mrf.mxu1 }
  0xfc   : > { %v895_v20 = vadd.f32 %v819_v33, %v630_v5  ;;  %v633_v27 = vadd.f32 %v632_v57, %v3160_v52  ;;  %v724_v57 = vld [vmem:[#allocation2 + $0x10a] sm:$0xff] }
  0xfd   : > { %v1041_v45 = vpop.f32.mrf.mxu3 }
  0xfe   : > { %v1117_v14 = vadd.f32 %v1041_v45, %v895_v20  ;;  %2587 = vmatmul.msk.bf16.gmra.mxu1 %vm215_vm1, %v3243_v63  ;;  %v946_v20 = vld [vmem:[#allocation2 + $0x120] sm:$0xff]  ;;  %v947_v45 = vld [vmem:[#allocation2 + $0x128] sm:$0xff] }
  0xff   : > { %v1268_v32 = vpop.f32.mrf.mxu0 }
 0x100   : > { %2604 = vmatmul.msk.bf16.gmra.mxu2 %vm215_vm1, %v3257_v13  ;;  %v3265_v50 = vadd.f32 %v1263_v34, %v1117_v14 }
 0x102   : > { %3702 = vst [vmem:[#allocation14_spill] sm:$0xff] %v3265_v50  ;;  %2621 = vmatmul.msk.bf16.gmra.mxu3 %vm215_vm1, %v3261_v54 }
 0x103   : > { %v822_v21 = vpop.f32.mrf.mxu2  ;;  %v634_v52 = vpop.f32.mrf.mxu1 }
 0x104   : > { %v896_v5 = vadd.f32 %v822_v21, %v633_v27  ;;  %v635_v61 = vadd.f32 %v634_v52, %v3176_v62  ;;  %v3275_v27 = vpack.c.bf16 %v725_v58, %v724_v57 }
 0x105   : > { %v1044_v18 = vpop.f32.mrf.mxu3 }
 0x106   : > { %v1118_v48 = vadd.f32 %v1044_v18, %v896_v5 }
 0x107   : > { %v1271_v60 = vpop.f32.mrf.mxu0 }
 0x108   : > { %v3270_v33 = vadd.f32 %v1266_v38, %v1118_v48  ;;  %v3279_v38 = vpack.c.bf16 %v947_v45, %v946_v20  ;;  %v727_v20 = vld [vmem:[#allocation2 + $0x12a] sm:$0xff] }
 0x10a   : > { %2639 = vmatmul.msk.bf16.gmra.mxu0 %vm215_vm1, %v2914_v49 }
 0x10b   : > { %v824_v34 = vpop.f32.mrf.mxu2  ;;  %v637_v26 = vpop.f32.mrf.mxu1 }
 0x10c   : > { %v897_v14 = vadd.f32 %v824_v34, %v635_v61  ;;  %v638_v50 = vadd.f32 %v637_v26, %v3188_v2  ;;  %v726_v26 = vld [vmem:[#allocation2 + $0x122] sm:$0xff] }
 0x10d   : > { %v1046_v62 = vpop.f32.mrf.mxu3 }
 0x10e   : > { %v1119_v21 = vadd.f32 %v1046_v62, %v897_v14  ;;  %2588 = vmatmul.msk.bf16.gmra.mxu1 %vm215_vm1, %v3261_v54  ;;  %v948_v14 = vld [vmem:[#allocation2 + $0x138] sm:$0xff]  ;;  %v949_v62 = vld [vmem:[#allocation2 + $0x140] sm:$0xff] }
 0x10f   : > { %v1273_v52 = vpop.f32.mrf.mxu0 }
 0x110   : > { %2605 = vmatmul.msk.bf16.gmra.mxu2 %vm215_vm1, %v3275_v27  ;;  %v3283_v49 = vadd.f32 %v1268_v32, %v1119_v21 }
 0x112   : > { %3703 = vst [vmem:[#allocation15_spill] sm:$0xff] %v3283_v49  ;;  %2622 = vmatmul.msk.bf16.gmra.mxu3 %vm215_vm1, %v3279_v38  ;;  %v3292_v49 = vpack.c.bf16 %v727_v20, %v726_v26  ;;  %v2794_v26 = vld [vmem:[%s2872_s25 + $0x78] sm:$0xff]  }
 0x113   : > { %v827_v5 = vpop.f32.mrf.mxu2  ;;  %v639_v2 = vpop.f32.mrf.mxu1 }
 0x114   : > { %v898_v61 = vadd.f32 %v827_v5, %v638_v50  ;;  %v640_v18 = vadd.f32 %v639_v2, %v3204_v22 }
 0x115   : > { %v1049_v48 = vpop.f32.mrf.mxu3 }
 0x116   : > { %v1120_v57 = vadd.f32 %v1049_v48, %v898_v61 }
 0x117   : > { %v1276_v58 = vpop.f32.mrf.mxu0 }
 0x118   : > { %v3288_v34 = vadd.f32 %v1271_v60, %v1120_v57  ;;  %v3296_v60 = vpack.c.bf16 %v949_v62, %v948_v14  ;;  %v2779_v14 = vunpack.c.h.bf16 %v2794_v26 }
 0x11a   : > { %2640 = vmatmul.msk.bf16.gmra.mxu0 %vm215_vm1, %v2947_v16  ;;  %321 = vst.msk [vmem:[#allocation2 + $0x189] sm:$0xff] %vm215_vm1, %v2779_v14 }
 0x11b   : > { %v829_v32 = vpop.f32.mrf.mxu2  ;;  %v642_v45 = vpop.f32.mrf.mxu1 }
 0x11c   : > { %v899_v21 = vadd.f32 %v829_v32, %v640_v18  ;;  %v643_v2 = vadd.f32 %v642_v45, %v3112_v37  ;;  %v2778_v32 = vunpack.c.l.bf16 %v2794_v26 }
 0x11d   : > { %v1051_v50 = vpop.f32.mrf.mxu3 }
 0x11e   : > { %v1121_v22 = vadd.f32 %v1051_v50, %v899_v21  ;;  %2589 = vmatmul.msk.bf16.gmra.mxu1 %vm215_vm1, %v3279_v38  ;;  %320 = vst.msk [vmem:[#allocation2 + $0x181] sm:$0xff] %vm215_vm1, %v2778_v32  ;;  %v729_v50 = vld [vmem:[#allocation2 + $0x142] sm:$0xff] }
 0x11f   : > { %v1278_v5 = vpop.f32.mrf.mxu0 }
 0x120   : > { %2606 = vmatmul.msk.bf16.gmra.mxu2 %vm215_vm1, %v3292_v49  ;;  %v3300_v16 = vadd.f32 %v1273_v52, %v1121_v22  ;;  %v728_v52 = vld [vmem:[#allocation2 + $0x13a] sm:$0xff] }
 0x122   : > { %3704 = vst [vmem:[#allocation16_spill] sm:$0xff] %v3300_v16  ;;  %2623 = vmatmul.msk.bf16.gmra.mxu3 %vm215_vm1, %v3296_v60 }
 0x123   : > { %v832_v61 = vpop.f32.mrf.mxu2  ;;  %v644_v18 = vpop.f32.mrf.mxu1 }
 0x124   : > { %v900_v48 = vadd.f32 %v832_v61, %v643_v2  ;;  %v645_v37 = vadd.f32 %v644_v18, %v3128_v30  ;;  %v950_v2 = vld [vmem:[#allocation2 + $0x150] sm:$0xff]  ;;  %v951_v61 = vld [vmem:[#allocation2 + $0x158] sm:$0xff] }
 0x125   : > { %v1054_v57 = vpop.f32.mrf.mxu3 }
 0x126   : > { %v1122_v20 = vadd.f32 %v1054_v57, %v900_v48  ;;  %v3313_v57 = vpack.c.bf16 %v729_v50, %v728_v52 }
 0x127   : > { %v1281_v62 = vpop.f32.mrf.mxu0 }
 0x128   : > { %v3307_v21 = vadd.f32 %v1276_v58, %v1122_v20  ;;  %v969_v58 = vpack.c.bf16 %v951_v61, %v950_v2  ;;  %v731_v2 = vld [vmem:[#allocation2 + $0x15a] sm:$0xff] }
 0x12a   : > { %3705 = vst [vmem:[#allocation17_spill] sm:$0xff] %v3307_v21  ;;  %2641 = vmatmul.msk.bf16.gmra.mxu0 %vm215_vm1, %v2978_v28 }
 0x12b   : > { %v834_v45 = vpop.f32.mrf.mxu2  ;;  %v647_v22 = vpop.f32.mrf.mxu1 }
 0x12c   : > { %v901_v48 = vadd.f32 %v834_v45, %v645_v37  ;;  %v648_v28 = vadd.f32 %v647_v22, %v3138_v36  ;;  %v952_v36 = vld [vmem:[#allocation2 + $0x168] sm:$0xff]  ;;  %v953_v22 = vld [vmem:[#allocation2 + $0x170] sm:$0xff] }
 0x12d   : > { %v1056_v26 = vpop.f32.mrf.mxu3 }
 0x12e   : > { %v1123_v32 = vadd.f32 %v1056_v26, %v901_v48  ;;  %2590 = vmatmul.msk.bf16.gmra.mxu1 %vm215_vm1, %v3296_v60  ;;  %v730_v26 = vld [vmem:[#allocation2 + $0x152] sm:$0xff] }
 0x12f   : > { %v1283_v20 = vpop.f32.mrf.mxu0  ;;  %v3328_v21 = vpack.c.bf16 %v731_v2, %v730_v26  ;;  %v1177_v26 = vld [vmem:[#allocation2 + $0x189] sm:$0xff] }
 0x130   : > { %2607 = vmatmul.msk.bf16.gmra.mxu2 %vm215_vm1, %v3313_v57  ;;  %v3319_v30 = vadd.f32 %v1278_v5, %v1123_v32 }
 0x131   : > { %3708 = vst [vmem:[#allocation20_spill] sm:$0xff] %v3328_v21 }
 0x132   : > { %3706 = vst [vmem:[#allocation18_spill] sm:$0xff] %v3319_v30  ;;  %2624 = vmatmul.msk.bf16.gmra.mxu3 %vm215_vm1, %v969_v58 }
 0x133   : > { %v837_v18 = vpop.f32.mrf.mxu2  ;;  %v649_v14 = vpop.f32.mrf.mxu1 }
 0x134   : > { %v902_v52 = vadd.f32 %v837_v18, %v648_v28  ;;  %v650_v61 = vadd.f32 %v649_v14, %v3156_v47 }
 0x135   : > { %v1059_v50 = vpop.f32.mrf.mxu3 }
 0x136   : > { %v1124_v37 = vadd.f32 %v1059_v50, %v902_v52 }
 0x137   : > { %v1286_v45 = vpop.f32.mrf.mxu0 }
 0x138   : > { %v3323_v48 = vadd.f32 %v1281_v62, %v1124_v37  ;;  %v970_v62 = vpack.c.bf16 %v953_v22, %v952_v36  ;;  %v1176_v37 = vld [vmem:[#allocation2 + $0x181] sm:$0xff]  ;;  %v732_v22 = vld [vmem:[#allocation2 + $0x16a] sm:$0xff] }
 0x13a   : > { %3707 = vst [vmem:[#allocation19_spill] sm:$0xff] %v3323_v48  ;;  %2642 = vmatmul.msk.bf16.gmra.mxu0 %vm215_vm1, %v3042_v51 }
 0x13b   : > { %v839_v5 = vpop.f32.mrf.mxu2  ;;  %v652_v32 = vpop.f32.mrf.mxu1 }
 0x13c   : > { %v903_v30 = vadd.f32 %v839_v5, %v650_v61  ;;  %v653_v51 = vadd.f32 %v652_v32, %v3166_v56  ;;  %v1193_v5 = vpack.c.bf16 %v1177_v26, %v1176_v37 }
 0x13d   : > { %v1061_v28 = vpop.f32.mrf.mxu3 }
 0x13e   : > { %v1125_v18 = vadd.f32 %v1061_v28, %v903_v30  ;;  %2591 = vmatmul.msk.bf16.gmra.mxu1 %vm215_vm1, %v969_v58  ;;  %v733_v28 = vld [vmem:[#allocation2 + $0x172] sm:$0xff] }
 0x13f   : > { %v1288_v52 = vpop.f32.mrf.mxu0 }
 0x140   : > { %2608 = vmatmul.msk.bf16.gmra.mxu2 %vm215_vm1, %v3328_v21  ;;  %v3333_v47 = vadd.f32 %v1283_v20, %v1125_v18  ;;  %v954_v18 = vld [vmem:[#allocation2 + $0x180] sm:$0xff]  ;;  %v749_v21 = vpack.c.bf16 %v733_v28, %v732_v22 }
 0x142   : > { %3709 = vst [vmem:[#allocation21_spill] sm:$0xff] %v3333_v47  ;;  %2625 = vmatmul.msk.bf16.gmra.mxu3 %vm215_vm1, %v970_v62  ;;  %v955_v47 = vld [vmem:[#allocation2 + $0x188] sm:$0xff] }
 0x143   : > { %v842_v14 = vpop.f32.mrf.mxu2  ;;  %v654_v50 = vpop.f32.mrf.mxu1 }
 0x144   : > { %v904_v2 = vadd.f32 %v842_v14, %v653_v51  ;;  %v655_v20 = vadd.f32 %v654_v50, %v3184_v3  ;;  %v971_v14 = vpack.c.bf16 %v955_v47, %v954_v18 }
 0x145   : > { %v1064_v61 = vpop.f32.mrf.mxu3 }
 0x146   : > { %v1126_v30 = vadd.f32 %v1064_v61, %v904_v2 }
 0x147   : > { %v1291_v58 = vpop.f32.mrf.mxu0 }
 0x148   : > { %v3337_v36 = vadd.f32 %v1286_v45, %v1126_v30 }
 0x14a   : > { %2643 = vmatmul.msk.bf16.gmra.mxu0 %vm215_vm1, %v1193_v5 }
 0x14b   : > { %v844_v56 = vpop.f32.mrf.mxu2  ;;  %v657_v32 = vpop.f32.mrf.mxu1 }
 0x14c   : > { %v905_v48 = vadd.f32 %v844_v56, %v655_v20  ;;  %v658_v3 = vadd.f32 %v657_v32, %v3194_v10 }
 0x14d   : > { %v1066_v16 = vpop.f32.mrf.mxu3 }
 0x14e   : > { %v1127_v51 = vadd.f32 %v1066_v16, %v905_v48  ;;  %2592 = vmatmul.msk.bf16.gmra.mxu1 %vm215_vm1, %v970_v62 }
 0x14f   : > { %v1293_v37 = vpop.f32.mrf.mxu0 }
 0x150   : > { %2609 = vmatmul.msk.bf16.gmra.mxu2 %vm215_vm1, %v749_v21  ;;  %v3343_v45 = vadd.f32 %v1288_v52, %v1127_v51 }
 0x152   : > { %2626 = vmatmul.msk.bf16.gmra.mxu3 %vm215_vm1, %v971_v14 }
 0x153   : > { %v847_v50 = vpop.f32.mrf.mxu2  ;;  %v659_v26 = vpop.f32.mrf.mxu1 }
 0x154   : > { %v906_v2 = vadd.f32 %v847_v50, %v658_v3  ;;  %v660_v16 = vadd.f32 %v659_v26, %v3212_v23 }
 0x155   : > { %v1069_v61 = vpop.f32.mrf.mxu3 }
 0x156   : > { %v1128_v30 = vadd.f32 %v1069_v61, %v906_v2 }
 0x157   : > { %v1296_v5 = vpop.f32.mrf.mxu0 }
 0x158   : > { %v3347_v22 = vadd.f32 %v1291_v58, %v1128_v30 }
 0x15a   : > { %2696 = vmatmul.msk.bf16.vlgmr.msra.gmra.mxu0 %vm215_vm1, %v3086_v7 }
 0x15b   : > { %v849_v21 = vpop.f32.mrf.mxu2  ;;  %v662_v48 = vpop.f32.mrf.mxu1 }
 0x15c   : > { %v907_v62 = vadd.f32 %v849_v21, %v660_v16  ;;  %v663_v58 = vadd.f32 %v662_v48, %v3126_v9 }
 0x15d   : > { %v1071_v52 = vpop.f32.mrf.mxu3 }
 0x15e   : > { %v1129_v10 = vadd.f32 %v1071_v52, %v907_v62  ;;  %2645 = vmatmul.msk.bf16.vlgmr.msra.gmra.mxu1 %vm215_vm1, %v3075_v0  ;;  %v1817_v52 = vld [vmem:[#allocation2 + $0x61] sm:$0xff] }
 0x15f   : > { %v1298_v47 = vpop.f32.mrf.mxu0 }
 0x160   : > { %2662 = vmatmul.msk.bf16.vlgmr.msra.gmra.mxu2 %vm215_vm1, %v3078_v1  ;;  %v3356_v28 = vadd.f32 %v1293_v37, %v1129_v10 }
 0x162   : > { %2679 = vmatmul.msk.bf16.vlgmr.msra.gmra.mxu3 %vm215_vm1, %v2956_v19 }
 0x163   : > { %v852_v23 = vpop.f32.mrf.mxu2  ;;  %v664_v20 = vpop.f32.mrf.mxu1 }
 0x164   : > { %v908_v56 = vadd.f32 %v852_v23, %v663_v58  ;;  %v665_v0 = vadd.f32 %v664_v20, %v3136_v35 }
 0x165   : > { %v1074_v32 = vpop.f32.mrf.mxu3 }
 0x166   : > { %v1130_v18 = vadd.f32 %v1074_v32, %v908_v56 }
 0x167   : > { %v1301_v51 = vpop.f32.mrf.mxu0 }
 0x168   : > { %v3361_v14 = vadd.f32 %v1296_v5, %v1130_v18 }
 0x16a   : > { %2697 = vmatmul.msk.bf16.gmra.mxu0 %vm215_vm1, %v3098_v15 }
 0x16b   : > { %v854_v1 = vpop.f32.mrf.mxu2  ;;  %v667_v37 = vpop.f32.mrf.mxu1 }
 0x16c   : > { %v909_v3 = vadd.f32 %v854_v1, %v665_v0  ;;  %v668_v2 = vadd.f32 %v667_v37, %v3154_v24  ;;  %v1818_v24 = vld [vmem:[#allocation2 + $0x69] sm:$0xff] }
 0x16d   : > { %v1076_v9 = vpop.f32.mrf.mxu3  ;;  %v1847_v58 = vpack.c.bf16 %v1818_v24, %v1817_v52 }
 0x16e   : > { %v1131_v50 = vadd.f32 %v1076_v9, %v909_v3  ;;  %2646 = vmatmul.msk.bf16.gmra.mxu1 %vm215_vm1, %v3086_v7  ;;  %v1819_v9 = vld [vmem:[#allocation2 + $0x79] sm:$0xff] }
 0x16f   : > { %v1303_v19 = vpop.f32.mrf.mxu0 }
 0x170   : > { %2663 = vmatmul.msk.bf16.gmra.mxu2 %vm215_vm1, %v3090_v8  ;;  %v3370_v26 = vadd.f32 %v1298_v47, %v1131_v50  ;;  %v1820_v50 = vld [vmem:[#allocation2 + $0x81] sm:$0xff] }
 0x172   : > { %2680 = vmatmul.msk.bf16.gmra.mxu3 %vm215_vm1, %v3016_v40 }
 0x173   : > { %v857_v35 = vpop.f32.mrf.mxu2  ;;  %v669_v61 = vpop.f32.mrf.mxu1 }
 0x174   : > { %v910_v30 = vadd.f32 %v857_v35, %v668_v2  ;;  %v670_v7 = vadd.f32 %v669_v61, %v3164_v55  ;;  %v1848_v35 = vpack.c.bf16 %v1820_v50, %v1819_v9  ;;  %v1823_v50 = vld [vmem:[#allocation2 + $0xa9] sm:$0xff] }
 0x175   : > { %v1079_v5 = vpop.f32.mrf.mxu3 }
 0x176   : > { %v1132_v16 = vadd.f32 %v1079_v5, %v910_v30 }
 0x177   : > { %v1306_v21 = vpop.f32.mrf.mxu0 }
 0x178   : > { %v3375_v48 = vadd.f32 %v1301_v51, %v1132_v16 }
 0x17a   : > { %2698 = vmatmul.msk.bf16.gmra.mxu0 %vm215_vm1, %v3114_v25 }
 0x17b   : > { %v859_v8 = vpop.f32.mrf.mxu2  ;;  %v672_v62 = vpop.f32.mrf.mxu1 }
 0x17c   : > { %v911_v10 = vadd.f32 %v859_v8, %v670_v7  ;;  %v673_v55 = vadd.f32 %v672_v62, %v3182_v46 }
 0x17d   : > { %v1081_v47 = vpop.f32.mrf.mxu3 }
 0x17e   : > { %v1133_v40 = vadd.f32 %v1081_v47, %v911_v10  ;;  %2647 = vmatmul.msk.bf16.gmra.mxu1 %vm215_vm1, %v3098_v15  ;;  %v1821_v10 = vld [vmem:[#allocation2 + $0x91] sm:$0xff]  ;;  %v1822_v47 = vld [vmem:[#allocation2 + $0x99] sm:$0xff] }
 0x17f   : > { %v1308_v23 = vpop.f32.mrf.mxu0 }
 0x180   : > { %2664 = vmatmul.msk.bf16.gmra.mxu2 %vm215_vm1, %v3102_v17  ;;  %v3384_v20 = vadd.f32 %v1303_v19, %v1133_v40 }
 0x182   : > { %2681 = vmatmul.msk.bf16.gmra.mxu3 %vm215_vm1, %v1847_v58 }
 0x183   : > { %v862_v56 = vpop.f32.mrf.mxu2  ;;  %v674_v32 = vpop.f32.mrf.mxu1 }
 0x184   : > { %v912_v18 = vadd.f32 %v862_v56, %v673_v55  ;;  %v675_v15 = vadd.f32 %v674_v32, %v3192_v6 }
 0x185   : > { %v1084_v51 = vpop.f32.mrf.mxu3 }
 0x186   : > { %v1134_v0 = vadd.f32 %v1084_v51, %v912_v18 }
 0x187   : > { %v1311_v1 = vpop.f32.mrf.mxu0 }
 0x188   : > { %v3388_v37 = vadd.f32 %v1306_v21, %v1134_v0 }
 0x18a   : > { %2699 = vmatmul.msk.bf16.gmra.mxu0 %vm215_vm1, %v3140_v41 }
 0x18b   : > { %v864_v17 = vpop.f32.mrf.mxu2  ;;  %v677_v3 = vpop.f32.mrf.mxu1 }
 0x18c   : > { %v913_v46 = vadd.f32 %v864_v17, %v675_v15  ;;  %v678_v6 = vadd.f32 %v677_v3, %v3210_v43  ;;  %v3710_v3 = vld [vmem:[#allocation7_spill] sm:$0xff] }
 0x18d   : > { %v1086_v19 = vpop.f32.mrf.mxu3 }
 0x18e   : > { %v1135_v2 = vadd.f32 %v1086_v19, %v913_v46  ;;  %2648 = vmatmul.msk.bf16.gmra.mxu1 %vm215_vm1, %v3114_v25  ;;  %v1824_v46 = vld [vmem:[#allocation2 + $0xb1] sm:$0xff] }
 0x18f   : > { %v1313_v61 = vpop.f32.mrf.mxu0 }
 0x190   : > { %2665 = vmatmul.msk.bf16.gmra.mxu2 %vm215_vm1, %v3120_v29  ;;  %v3397_v30 = vadd.f32 %v1308_v23, %v1135_v2  ;;  %v1849_v23 = vpack.c.bf16 %v1822_v47, %v1821_v10  ;;  %v3714_v47 = vld [vmem:[#allocation11_spill] sm:$0xff] }
 0x192   : > { %2682 = vmatmul.msk.bf16.gmra.mxu3 %vm215_vm1, %v1848_v35  ;;  %v1850_v35 = vpack.c.bf16 %v1824_v46, %v1823_v50 }
 0x193   : > { %v867_v5 = vpop.f32.mrf.mxu2  ;;  %v679_v16 = vpop.f32.mrf.mxu1 }
 0x194   : > { %v914_v21 = vadd.f32 %v867_v5, %v678_v6  ;;  %v680_v25 = vadd.f32 %v679_v16, %v3218_v53  ;;  %v3711_v6 = vld [vmem:[#allocation5_spill] sm:$0xff] }
 0x195   : > { %v1089_v7 = vpop.f32.mrf.mxu3 }
 0x196   : > { %v1136_v8 = vadd.f32 %v1089_v7, %v914_v21 }
 0x197   : > { %v1316_v62 = vpop.f32.mrf.mxu0 }
 0x198   : > { %v3401_v52 = vadd.f32 %v1311_v1, %v1136_v8 }
 0x19a   : > { %2700 = vmatmul.msk.bf16.gmra.mxu0 %vm215_vm1, %v3168_v59 }
 0x19b   : > { %v869_v29 = vpop.f32.mrf.mxu2  ;;  %v682_v24 = vpop.f32.mrf.mxu1 }
 0x19c   : > { %v915_v43 = vadd.f32 %v869_v29, %v680_v25  ;;  %v683_v53 = vadd.f32 %v682_v24, %v3130_v31 }
 0x19d   : > { %v1091_v40 = vpop.f32.mrf.mxu3 }
 0x19e   : > { %v1137_v58 = vadd.f32 %v1091_v40, %v915_v43  ;;  %2649 = vmatmul.msk.bf16.gmra.mxu1 %vm215_vm1, %v3140_v41 }
 0x19f   : > { %v1318_v55 = vpop.f32.mrf.mxu0 }
 0x1a0   : > { %2666 = vmatmul.msk.bf16.gmra.mxu2 %vm215_vm1, %v3146_v44  ;;  %v3410_v56 = vadd.f32 %v1313_v61, %v1137_v58  ;;  %v1825_v58 = vld [vmem:[#allocation2 + $0xc1] sm:$0xff] }
 0x1a2   : > { %2683 = vmatmul.msk.bf16.gmra.mxu3 %vm215_vm1, %v1849_v23  ;;  %v1826_v23 = vld [vmem:[#allocation2 + $0xc9] sm:$0xff] }
 0x1a3   : > { %v872_v32 = vpop.f32.mrf.mxu2  ;;  %v684_v18 = vpop.f32.mrf.mxu1 }
 0x1a4   : > { %v916_v51 = vadd.f32 %v872_v32, %v683_v53  ;;  %v685_v41 = vadd.f32 %v684_v18, %v3142_v42  ;;  %v3712_v42 = vld [vmem:[#allocation3_spill] sm:$0xff]  ;;  %v1851_v18 = vpack.c.bf16 %v1826_v23, %v1825_v58 }
 0x1a5   : > { %v1094_v0 = vpop.f32.mrf.mxu3 }
 0x1a6   : > { %v1138_v1 = vadd.f32 %v1094_v0, %v916_v51  ;;  %v3715_v0 = vld [vmem:[#allocation9_spill] sm:$0xff] }
 0x1a7   : > { %v1321_v15 = vpop.f32.mrf.mxu0 }
 0x1a8   : > { %v3414_v17 = vadd.f32 %v1316_v62, %v1138_v1 }
 0x1aa   : > { %2701 = vmatmul.msk.bf16.gmra.mxu0 %vm215_vm1, %v3710_v3 }
 0x1ab   : > { %v874_v44 = vpop.f32.mrf.mxu2  ;;  %v687_v9 = vpop.f32.mrf.mxu1 }
 0x1ac   : > { %v917_v31 = vadd.f32 %v874_v44, %v685_v41  ;;  %v688_v16 = vadd.f32 %v687_v9, %v3712_v42  ;;  %v1827_v42 = vld [vmem:[#allocation2 + $0xd9] sm:$0xff] }
 0x1ad   : > { %v1096_v19 = vpop.f32.mrf.mxu3 }
 0x1ae   : > { %v1139_v2 = vadd.f32 %v1096_v19, %v917_v31  ;;  %2650 = vmatmul.msk.bf16.gmra.mxu1 %vm215_vm1, %v3168_v59  ;;  %v3713_v59 = vld [vmem:[#allocation4_spill] sm:$0xff] }
 0x1af   : > { %v1323_v61 = vpop.f32.mrf.mxu0 }
 0x1b0   : > { %2667 = vmatmul.msk.bf16.gmra.mxu2 %vm215_vm1, %v3711_v6  ;;  %v3423_v5 = vadd.f32 %v1318_v55, %v1139_v2 }
 0x1b2   : > { %2684 = vmatmul.msk.bf16.gmra.mxu3 %vm215_vm1, %v1850_v35 }
 0x1b3   : > { %v877_v21 = vpop.f32.mrf.mxu2  ;;  %v689_v7 = vpop.f32.mrf.mxu1 }
 0x1b4   : > { %v918_v8 = vadd.f32 %v877_v21, %v688_v16  ;;  %v690_v10 = vadd.f32 %v689_v7, %v3713_v59  ;;  %v1828_v16 = vld [vmem:[#allocation2 + $0xe1] sm:$0xff] }
 0x1b5   : > { %v1099_v62 = vpop.f32.mrf.mxu3  ;;  %v3718_v59 = vld [vmem:[#allocation10_spill] sm:$0xff] }
 0x1b6   : > { %v1140_v25 = vadd.f32 %v1099_v62, %v918_v8  ;;  %v1852_v62 = vpack.c.bf16 %v1828_v16, %v1827_v42 }
 0x1b7   : > { %v1326_v29 = vpop.f32.mrf.mxu0 }
 0x1b8   : > { %v3427_v24 = vadd.f32 %v1321_v15, %v1140_v25  ;;  %v3716_v15 = vld [vmem:[#allocation6_spill] sm:$0xff] }
 0x1ba   : > { %2702 = vmatmul.msk.bf16.gmra.mxu0 %vm215_vm1, %v3714_v47 }
 0x1bb   : > { %v879_v43 = vpop.f32.mrf.mxu2  ;;  %v692_v40 = vpop.f32.mrf.mxu1 }
 0x1bc   : > { %v919_v55 = vadd.f32 %v879_v43, %v690_v10  ;;  %v693_v41 = vadd.f32 %v692_v40, %v3716_v15  ;;  %v1830_v15 = vld [vmem:[#allocation2 + $0xf9] sm:$0xff] }
 0x1bd   : > { %v1101_v53 = vpop.f32.mrf.mxu3 }
 0x1be   : > { %v1141_v32 = vadd.f32 %v1101_v53, %v919_v55  ;;  %2651 = vmatmul.msk.bf16.gmra.mxu1 %vm215_vm1, %v3710_v3  ;;  %v3717_v3 = vld [vmem:[#allocation8_spill] sm:$0xff] }
 0x1bf   : > { %v1328_v51 = vpop.f32.mrf.mxu0 }
 0x1c0   : > { %2668 = vmatmul.msk.bf16.gmra.mxu2 %vm215_vm1, %v3715_v0  ;;  %v3436_v1 = vadd.f32 %v1323_v61, %v1141_v32  ;;  %v1829_v0 = vld [vmem:[#allocation2 + $0xf1] sm:$0xff] }
 0x1c2   : > { %2685 = vmatmul.msk.bf16.gmra.mxu3 %vm215_vm1, %v1851_v18 }
 0x1c3   : > { %v882_v44 = vpop.f32.mrf.mxu2  ;;  %v694_v9 = vpop.f32.mrf.mxu1 }
 0x1c4   : > { %v920_v50 = vadd.f32 %v882_v44, %v693_v41  ;;  %v695_v35 = vadd.f32 %v694_v9, %v3717_v3 }
 0x1c5   : > { %v1104_v46 = vpop.f32.mrf.mxu3 }
 0x1c6   : > { %v1142_v31 = vadd.f32 %v1104_v46, %v920_v50  ;;  %v1853_v50 = vpack.c.bf16 %v1830_v15, %v1829_v0 }
 0x1c7   : > { %v1331_v19 = vpop.f32.mrf.mxu0 }
 0x1c8   : > { %v3440_v2 = vadd.f32 %v1326_v29, %v1142_v31 }
 0x1ca   : > { %2703 = vmatmul.msk.bf16.gmra.mxu0 %vm215_vm1, %v3239_v4 }
 0x1cb   : > { %v884_v6 = vpop.f32.mrf.mxu2  ;;  %v697_v61 = vpop.f32.mrf.mxu1 }
 0x1cc   : > { %v921_v21 = vadd.f32 %v884_v6, %v695_v35  ;;  %v698_v10 = vadd.f32 %v697_v61, %v3718_v59 }
 0x1cd   : > { %v1106_v7 = vpop.f32.mrf.mxu3 }
 0x1ce   : > { %v1143_v8 = vadd.f32 %v1106_v7, %v921_v21  ;;  %2652 = vmatmul.msk.bf16.gmra.mxu1 %vm215_vm1, %v3714_v47  ;;  %v3719_v47 = vld [vmem:[#allocation12_spill] sm:$0xff] }
 0x1cf   : > { %v1333_v25 = vpop.f32.mrf.mxu0 }
 0x1d0   : > { %2669 = vmatmul.msk.bf16.gmra.mxu2 %vm215_vm1, %v3227_v12  ;;  %v3449_v29 = vadd.f32 %v1328_v51, %v1143_v8  ;;  %v1831_v8 = vld [vmem:[#allocation2 + $0x109] sm:$0xff] }
 0x1d2   : > { %2686 = vmatmul.msk.bf16.gmra.mxu3 %vm215_vm1, %v1852_v62  ;;  %v1832_v62 = vld [vmem:[#allocation2 + $0x111] sm:$0xff] }
 0x1d3   : > { %v887_v43 = vpop.f32.mrf.mxu2  ;;  %v699_v40 = vpop.f32.mrf.mxu1 }
 0x1d4   : > { %v922_v58 = vadd.f32 %v887_v43, %v698_v10  ;;  %v700_v18 = vadd.f32 %v699_v40, %v3719_v47  ;;  %v1854_v43 = vpack.c.bf16 %v1832_v62, %v1831_v8 }
 0x1d5   : > { %v1109_v23 = vpop.f32.mrf.mxu3 }
 0x1d6   : > { %v1144_v55 = vadd.f32 %v1109_v23, %v922_v58 }
 0x1d7   : > { %v2145_v53 = vpop.f32.mrf.mxu0 }
 0x1d8   : > { %v3453_v32 = vadd.f32 %v1331_v19, %v1144_v55 }
 0x1da   : > { %2704 = vmatmul.msk.bf16.gmra.mxu0 %vm215_vm1, %v3257_v13 }
 0x1db   : > { %v889_v12 = vpop.f32.mrf.mxu2  ;;  %v1478_v51 = vpop.f32.mrf.mxu1 }
 0x1dc   : > { %v923_v41 = vadd.f32 %v889_v12, %v700_v18  ;;  %v1558_v19 = vadd.f32 %v1478_v51, %v3234_v11  ;;  %v3720_v11 = vld [vmem:[#allocation13_spill] sm:$0xff] }
 0x1dd   : > { %v1111_v44 = vpop.f32.mrf.mxu3 }
 0x1de   : > { %v1145_v9 = vadd.f32 %v1111_v44, %v923_v41  ;;  %2653 = vmatmul.msk.bf16.gmra.mxu1 %vm215_vm1, %v3239_v4 }
 0x1df   : > { %v2147_v46 = vpop.f32.mrf.mxu0 }
 0x1e0   : > { %2670 = vmatmul.msk.bf16.gmra.mxu2 %vm215_vm1, %v3243_v63  ;;  %v3462_v31 = vadd.f32 %v1333_v25, %v1145_v9 }
 0x1e2   : > { %2687 = vmatmul.msk.bf16.gmra.mxu3 %vm215_vm1, %v1853_v50 }
 0x1e3   : > { %v1701_v3 = vpop.f32.mrf.mxu2  ;;  %v1480_v35 = vpop.f32.mrf.mxu1 }
 0x1e4   : > { %v1781_v6 = vadd.f32 %v1701_v3, %v1558_v19  ;;  %v1559_v16 = vadd.f32 %v1480_v35, %v3720_v11  ;;  %v3721_v3 = vld [vmem:[#allocation14_spill] sm:$0xff] }
 0x1e5   : > { %v1923_v61 = vpop.f32.mrf.mxu3  ;;  %v1834_v11 = vld [vmem:[#allocation2 + $0x129] sm:$0xff] }
 0x1e6   : > { %v2003_v42 = vadd.f32 %v1923_v61, %v1781_v6 }
 0x1e7   : > { %v2150_v4 = vpop.f32.mrf.mxu0 }
 0x1e8   : > { %v2225_v63 = vadd.f32 %v2145_v53, %v2003_v42 }
 0x1ea   : > { %2258 = vst.msk [vmem:[%s3470_s14] sm:$0xff] %vm2257_vm4, %v2225_v63  ;;  %2705 = vmatmul.msk.bf16.gmra.mxu0 %vm215_vm1, %v3275_v27  ;;  %v2359_v58 = vmul.f32 %v2225_v63, %v2225_v63  ;;  %v2290_v55 = vsel %vm2257_vm4, %v2225_v63, 0.0  ;;  %v1833_v63 = vld [vmem:[#allocation2 + $0x121] sm:$0xff] }
 0x1eb   : > { %v1703_v21 = vpop.f32.mrf.mxu2  ;;  %v1483_v7 = vpop.f32.mrf.mxu1  ;;  %v1855_v62 = vpack.c.bf16 %v1834_v11, %v1833_v63 }
 0x1ec   : > { %v1782_v25 = vadd.f32 %v1703_v21, %v1559_v16  ;;  %v1560_v18 = vadd.f32 %v1483_v7, %v3252_v39  ;;  %v2391_v0 = vsel %vm2257_vm4, %v2359_v58, 0.0 }
 0x1ed   : > { %v1925_v59 = vpop.f32.mrf.mxu3 }
 0x1ee   : > { %v2004_v10 = vadd.f32 %v1925_v59, %v1782_v25  ;;  %2654 = vmatmul.msk.bf16.gmra.mxu1 %vm215_vm1, %v3257_v13 }
 0x1ef   : > { %v2152_v40 = vpop.f32.mrf.mxu0 }
 0x1f0   : > { %v2226_v23 = vadd.f32 %v2147_v46, %v2004_v10  ;;  %2671 = vmatmul.msk.bf16.gmra.mxu2 %vm215_vm1, %v3261_v54 }
 0x1f2   : > { %2259 = vst.msk [vmem:[%s3470_s14 + $0x8] sm:$0xff] %vm2257_vm4, %v2226_v23  ;;  %v2291_v53 = vsel %vm2257_vm4, %v2226_v23, 0.0  ;;  %v2360_v47 = vmul.f32 %v2226_v23, %v2226_v23  ;;  %2688 = vmatmul.msk.bf16.gmra.mxu3 %vm215_vm1, %v1854_v43 }
 0x1f3   : > { %v2292_v13 = vadd.f32 %v2291_v53, %v2290_v55  ;;  %v1706_v12 = vpop.f32.mrf.mxu2  ;;  %v1485_v51 = vpop.f32.mrf.mxu1 }
 0x1f4   : > { %v2392_v15 = vsel %vm2257_vm4, %v2360_v47, 0.0  ;;  %v1783_v54 = vadd.f32 %v1706_v12, %v1560_v18  ;;  %v1561_v35 = vadd.f32 %v1485_v51, %v3721_v3 }
 0x1f5   : > { %v2393_v41 = vadd.f32 %v2392_v15, %v2391_v0  ;;  %v1928_v44 = vpop.f32.mrf.mxu3  ;;  %v3722_v15 = vld [vmem:[#allocation15_spill] sm:$0xff] }
 0x1f6   : > { %v2005_v9 = vadd.f32 %v1928_v44, %v1783_v54 }
 0x1f7   : > { %v2155_v50 = vpop.f32.mrf.mxu0 }
 0x1f8   : > { %v2227_v46 = vadd.f32 %v2150_v4, %v2005_v9  ;;  %v1835_v9 = vld [vmem:[#allocation2 + $0x139] sm:$0xff] }
 0x1fa   : > { %2260 = vst.msk [vmem:[%s3470_s14 + $0x10] sm:$0xff] %vm2257_vm4, %v2227_v46  ;;  %v2293_v19 = vsel %vm2257_vm4, %v2227_v46, 0.0  ;;  %v2361_v39 = vmul.f32 %v2227_v46, %v2227_v46  ;;  %2706 = vmatmul.msk.bf16.gmra.mxu0 %vm215_vm1, %v3292_v49  ;;  %v1836_v46 = vld [vmem:[#allocation2 + $0x141] sm:$0xff] }
 0x1fb   : > { %v2294_v6 = vadd.f32 %v2293_v19, %v2292_v13  ;;  %v1708_v61 = vpop.f32.mrf.mxu2  ;;  %v1488_v42 = vpop.f32.mrf.mxu1 }
 0x1fc   : > { %v2394_v16 = vsel %vm2257_vm4, %v2361_v39, 0.0  ;;  %v1784_v21 = vadd.f32 %v1708_v61, %v1561_v35  ;;  %v1562_v58 = vadd.f32 %v1488_v42, %v3270_v33 }
 0x1fd   : > { %v2395_v4 = vadd.f32 %v2394_v16, %v2393_v41  ;;  %v1930_v7 = vpop.f32.mrf.mxu3 }
 0x1fe   : > { %v2006_v8 = vadd.f32 %v1930_v7, %v1784_v21  ;;  %2655 = vmatmul.msk.bf16.gmra.mxu1 %vm215_vm1, %v3275_v27 }
 0x1ff   : > { %v2157_v25 = vpop.f32.mrf.mxu0 }
 0x200   : > { %v2228_v59 = vadd.f32 %v2152_v40, %v2006_v8  ;;  %2672 = vmatmul.msk.bf16.gmra.mxu2 %vm215_vm1, %v3279_v38 }
 0x202   : > { %2261 = vst.msk [vmem:[%s3470_s14 + $0x18] sm:$0xff] %vm2257_vm4, %v2228_v59  ;;  %v2295_v10 = vsel %vm2257_vm4, %v2228_v59, 0.0  ;;  %v2362_v43 = vmul.f32 %v2228_v59, %v2228_v59  ;;  %2689 = vmatmul.msk.bf16.gmra.mxu3 %vm215_vm1, %v1855_v62  ;;  %v1392_v59 = vld [vmem:[#allocation2 + $0x13a] sm:$0xff] }
 0x203   : > { %v2296_v23 = vadd.f32 %v2295_v10, %v2294_v6  ;;  %v1711_v55 = vpop.f32.mrf.mxu2  ;;  %v1490_v53 = vpop.f32.mrf.mxu1  ;;  %v1856_v6 = vpack.c.bf16 %v1836_v46, %v1835_v9  ;;  %v1393_v10 = vld [vmem:[#allocation2 + $0x142] sm:$0xff] }
 0x204   : > { %v2396_v27 = vsel %vm2257_vm4, %v2362_v43, 0.0  ;;  %v1785_v47 = vadd.f32 %v1711_v55, %v1562_v58  ;;  %v1563_v33 = vadd.f32 %v1490_v53, %v3722_v15  ;;  %v1615_v58 = vld [vmem:[#allocation2 + $0x150] sm:$0xff]  ;;  %v3723_v53 = vld [vmem:[#allocation16_spill] sm:$0xff] }
 0x205   : > { %v2397_v40 = vadd.f32 %v2396_v27, %v2395_v4  ;;  %v1933_v18 = vpop.f32.mrf.mxu3 }
 0x206   : > { %v2007_v13 = vadd.f32 %v1933_v18, %v1785_v47  ;;  %v1412_v47 = vpack.c.bf16 %v1393_v10, %v1392_v59  ;;  %v1617_v10 = vld [vmem:[#allocation2 + $0x168] sm:$0xff] }
 0x207   : > { %v2160_v38 = vpop.f32.mrf.mxu0 }
 0x208   : > { %v2229_v12 = vadd.f32 %v2155_v50, %v2007_v13 }
 0x20a   : > { %2262 = vst.msk [vmem:[%s3470_s14 + $0x20] sm:$0xff] %vm2257_vm4, %v2229_v12  ;;  %v2297_v51 = vsel %vm2257_vm4, %v2229_v12, 0.0  ;;  %v2363_v0 = vmul.f32 %v2229_v12, %v2229_v12  ;;  %2707 = vmatmul.msk.bf16.gmra.mxu0 %vm215_vm1, %v3313_v57 }
 0x20b   : > { %v2298_v54 = vadd.f32 %v2297_v51, %v2296_v23  ;;  %v1713_v41 = vpop.f32.mrf.mxu2  ;;  %v1493_v44 = vpop.f32.mrf.mxu1  ;;  %v1616_v23 = vld [vmem:[#allocation2 + $0x158] sm:$0xff] }
 0x20c   : > { %v2398_v19 = vsel %vm2257_vm4, %v2363_v0, 0.0  ;;  %v1786_v39 = vadd.f32 %v1713_v41, %v1563_v33  ;;  %v1564_v11 = vadd.f32 %v1493_v44, %v3288_v34  ;;  %v1837_v51 = vld [vmem:[#allocation2 + $0x151] sm:$0xff]  ;;  %v1838_v0 = vld [vmem:[#allocation2 + $0x159] sm:$0xff]  ;;  %v1635_v33 = vpack.c.bf16 %v1616_v23, %v1615_v58 }
 0x20d   : > { %v2399_v50 = vadd.f32 %v2398_v19, %v2397_v40  ;;  %v1935_v3 = vpop.f32.mrf.mxu3  ;;  %v3724_v40 = vld [vmem:[#allocation20_spill] sm:$0xff]  ;;  %v1857_v9 = vpack.c.bf16 %v1838_v0, %v1837_v51 }
 0x20e   : > { %v2008_v35 = vadd.f32 %v1935_v3, %v1786_v39  ;;  %2656 = vmatmul.msk.bf16.gmra.mxu1 %vm215_vm1, %v3292_v49  ;;  %v3725_v3 = vld [vmem:[#allocation17_spill] sm:$0xff] }
 0x20f   : > { %v2162_v61 = vpop.f32.mrf.mxu0 }
 0x210   : > { %v2230_v42 = vadd.f32 %v2157_v25, %v2008_v35  ;;  %2673 = vmatmul.msk.bf16.gmra.mxu2 %vm215_vm1, %v3296_v60 }
 0x212   : > { %2263 = vst.msk [vmem:[%s3470_s14 + $0x28] sm:$0xff] %vm2257_vm4, %v2230_v42  ;;  %v2299_v57 = vsel %vm2257_vm4, %v2230_v42, 0.0  ;;  %v2364_v63 = vmul.f32 %v2230_v42, %v2230_v42  ;;  %2690 = vmatmul.msk.bf16.gmra.mxu3 %vm215_vm1, %v1856_v6 }
 0x213   : > { %v2300_v16 = vadd.f32 %v2299_v57, %v2298_v54  ;;  %v1716_v21 = vpop.f32.mrf.mxu2  ;;  %v1495_v4 = vpop.f32.mrf.mxu1 }
 0x214   : > { %v2400_v49 = vsel %vm2257_vm4, %v2364_v63, 0.0  ;;  %v1787_v7 = vadd.f32 %v1716_v21, %v1564_v11  ;;  %v1565_v27 = vadd.f32 %v1495_v4, %v3723_v53  ;;  %v2061_v63 = vld [vmem:[#allocation2 + $0x16a] sm:$0xff]  ;;  %v2062_v11 = vld [vmem:[#allocation2 + $0x172] sm:$0xff] }
 0x215   : > { %v2401_v8 = vadd.f32 %v2400_v49, %v2399_v50  ;;  %v1938_v62 = vpop.f32.mrf.mxu3 }
 0x216   : > { %v2009_v25 = vadd.f32 %v1938_v62, %v1787_v7  ;;  %v3538_v7 = vpack.c.bf16 %v2062_v11, %v2061_v63  ;;  %v1394_v62 = vld [vmem:[#allocation2 + $0x152] sm:$0xff] }
 0x217   : > { %v2165_v60 = vpop.f32.mrf.mxu0 }
 0x218   : > { %v2231_v43 = vadd.f32 %v2160_v38, %v2009_v25  ;;  %v1395_v25 = vld [vmem:[#allocation2 + $0x15a] sm:$0xff] }
 0x219   : > { %v1413_v53 = vpack.c.bf16 %v1395_v25, %v1394_v62  ;;  %v1620_v62 = vld [vmem:[#allocation2 + $0x188] sm:$0xff] }
 0x21a   : > { %2264 = vst.msk [vmem:[%s3470_s14 + $0x30] sm:$0xff] %vm2257_vm4, %v2231_v43  ;;  %v2301_v34 = vsel %vm2257_vm4, %v2231_v43, 0.0  ;;  %v2365_v55 = vmul.f32 %v2231_v43, %v2231_v43  ;;  %2708 = vmatmul.msk.bf16.gmra.mxu0 %vm215_vm1, %v3724_v40  ;;  %v1618_v43 = vld [vmem:[#allocation2 + $0x170] sm:$0xff] }
 0x21b   : > { %v2302_v18 = vadd.f32 %v2301_v34, %v2300_v16  ;;  %v1718_v13 = vpop.f32.mrf.mxu2  ;;  %v1498_v12 = vpop.f32.mrf.mxu1  ;;  %v3726_v34 = vld [vmem:[#allocation18_spill] sm:$0xff]  ;;  %v1636_v51 = vpack.c.bf16 %v1618_v43, %v1617_v10  ;;  %v3728_v10 = vld [vmem:[#allocation21_spill] sm:$0xff] }
 0x21c   : > { %v2402_v38 = vsel %vm2257_vm4, %v2365_v55, 0.0  ;;  %v1788_v15 = vadd.f32 %v1718_v13, %v1565_v27  ;;  %v1566_v35 = vadd.f32 %v1498_v12, %v3725_v3  ;;  %v1840_v13 = vld [vmem:[#allocation2 + $0x171] sm:$0xff] }
 0x21d   : > { %v2403_v54 = vadd.f32 %v2402_v38, %v2401_v8  ;;  %v1940_v41 = vpop.f32.mrf.mxu3 }
 0x21e   : > { %v2010_v44 = vadd.f32 %v1940_v41, %v1788_v15  ;;  %2657 = vmatmul.msk.bf16.gmra.mxu1 %vm215_vm1, %v1412_v47 }
 0x21f   : > { %v2167_v46 = vpop.f32.mrf.mxu0 }
 0x220   : > { %v2232_v19 = vadd.f32 %v2162_v61, %v2010_v44  ;;  %2674 = vmatmul.msk.bf16.gmra.mxu2 %vm215_vm1, %v1635_v33 }
 0x222   : > { %2265 = vst.msk [vmem:[%s3470_s14 + $0x38] sm:$0xff] %vm2257_vm4, %v2232_v19  ;;  %v2303_v39 = vsel %vm2257_vm4, %v2232_v19, 0.0  ;;  %v2366_v50 = vmul.f32 %v2232_v19, %v2232_v19  ;;  %2691 = vmatmul.msk.bf16.gmra.mxu3 %vm215_vm1, %v1857_v9  ;;  %v3727_v19 = vld [vmem:[#allocation19_spill] sm:$0xff] }
 0x223   : > { %v2304_v6 = vadd.f32 %v2303_v39, %v2302_v18  ;;  %v1721_v42 = vpop.f32.mrf.mxu2  ;;  %v1500_v57 = vpop.f32.mrf.mxu1  ;;  %v1839_v18 = vld [vmem:[#allocation2 + $0x169] sm:$0xff] }
 0x224   : > { %v2404_v16 = vsel %vm2257_vm4, %v2366_v50, 0.0  ;;  %v1789_v61 = vadd.f32 %v1721_v42, %v1566_v35  ;;  %v1567_v55 = vadd.f32 %v1500_v57, %v3726_v34  ;;  %v1858_v33 = vpack.c.bf16 %v1840_v13, %v1839_v18  ;;  %v2064_v42 = vld [vmem:[#allocation2 + $0x18a] sm:$0xff] }
 0x225   : > { %v2405_v21 = vadd.f32 %v2404_v16, %v2403_v54  ;;  %v1943_v4 = vpop.f32.mrf.mxu3 }
 0x226   : > { %v2011_v49 = vadd.f32 %v1943_v4, %v1789_v61 }
 0x227   : > { %v2170_v8 = vpop.f32.mrf.mxu0 }
 0x228   : > { %v2233_v59 = vadd.f32 %v2165_v60, %v2011_v49  ;;  %v1619_v49 = vld [vmem:[#allocation2 + $0x180] sm:$0xff] }
 0x22a   : > { %2266 = vst.msk [vmem:[%s3470_s14 + $0x40] sm:$0xff] %vm2257_vm4, %v2233_v59  ;;  %v2305_v58 = vsel %vm2257_vm4, %v2233_v59, 0.0  ;;  %v2367_v23 = vmul.f32 %v2233_v59, %v2233_v59  ;;  %2709 = vmatmul.msk.bf16.gmra.mxu0 %vm215_vm1, %v3538_v7 }
 0x22b   : > { %v2306_v27 = vadd.f32 %v2305_v58, %v2304_v6  ;;  %v1723_v47 = vpop.f32.mrf.mxu2  ;;  %v1503_v40 = vpop.f32.mrf.mxu1  ;;  %v2063_v6 = vld [vmem:[#allocation2 + $0x182] sm:$0xff] }
 0x22c   : > { %v2406_v60 = vsel %vm2257_vm4, %v2367_v23, 0.0  ;;  %v1790_v12 = vadd.f32 %v1723_v47, %v1567_v55  ;;  %v1568_v39 = vadd.f32 %v1503_v40, %v3727_v19  ;;  %v2081_v61 = vpack.c.bf16 %v2064_v42, %v2063_v6  ;;  %v1841_v55 = vld [vmem:[#allocation2 + $0x181] sm:$0xff] }
 0x22d   : > { %v2407_v0 = vadd.f32 %v2406_v60, %v2405_v21  ;;  %v1945_v38 = vpop.f32.mrf.mxu3  ;;  %v1637_v47 = vpack.c.bf16 %v1620_v62, %v1619_v49  ;;  %v1843_v62 = vld [vmem:[#allocation2 + $0x199] sm:$0xff] }
 0x22e   : > { %v2012_v15 = vadd.f32 %v1945_v38, %v1790_v12  ;;  %2658 = vmatmul.msk.bf16.gmra.mxu1 %vm215_vm1, %v1413_v53  ;;  %v1842_v53 = vld [vmem:[#allocation2 + $0x189] sm:$0xff] }
 0x22f   : > { %v2172_v54 = vpop.f32.mrf.mxu0  ;;  %v1859_v60 = vpack.c.bf16 %v1842_v53, %v1841_v55 }
 0x230   : > { %v2234_v41 = vadd.f32 %v2167_v46, %v2012_v15  ;;  %2675 = vmatmul.msk.bf16.gmra.mxu2 %vm215_vm1, %v1636_v51 }
 0x232   : > { %2267 = vst.msk [vmem:[%s3470_s14 + $0x48] sm:$0xff] %vm2257_vm4, %v2234_v41  ;;  %v2307_v44 = vsel %vm2257_vm4, %v2234_v41, 0.0  ;;  %v2368_v9 = vmul.f32 %v2234_v41, %v2234_v41  ;;  %2692 = vmatmul.msk.bf16.gmra.mxu3 %vm215_vm1, %v1858_v33 }
 0x233   : > { %v2308_v50 = vadd.f32 %v2307_v44, %v2306_v27  ;;  %v1726_v3 = vpop.f32.mrf.mxu2  ;;  %v1505_v35 = vpop.f32.mrf.mxu1 }
 0x234   : > { %v2408_v57 = vsel %vm2257_vm4, %v2368_v9, 0.0  ;;  %v1791_v46 = vadd.f32 %v1726_v3, %v1568_v39  ;;  %v1569_v43 = vadd.f32 %v1505_v35, %v3728_v10  ;;  %v2065_v9 = vld [vmem:[#allocation2 + $0x19a] sm:$0xff] }
 0x235   : > { %v2409_v63 = vadd.f32 %v2408_v57, %v2407_v0  ;;  %v1948_v11 = vpop.f32.mrf.mxu3  ;;  %v1621_v57 = vld [vmem:[#allocation2 + $0x198] sm:$0xff] }
 0x236   : > { %v2013_v16 = vadd.f32 %v1948_v11, %v1791_v46  ;;  %v1622_v46 = vld [vmem:[#allocation2 + $0x1a0] sm:$0xff] }
 0x237   : > { %v2175_v21 = vpop.f32.mrf.mxu0  ;;  %v1638_v10 = vpack.c.bf16 %v1622_v46, %v1621_v57 }
 0x238   : > { %v2235_v4 = vadd.f32 %v2170_v8, %v2013_v16 }
 0x23a   : > { %2268 = vst.msk [vmem:[%s3470_s14 + $0x50] sm:$0xff] %vm2257_vm4, %v2235_v4  ;;  %v2309_v25 = vsel %vm2257_vm4, %v2235_v4, 0.0  ;;  %v2369_v59 = vmul.f32 %v2235_v4, %v2235_v4  ;;  %2710 = vmatmul.msk.bf16.gmra.mxu0 %vm215_vm1, %v2081_v61 }
 0x23b   : > { %v2310_v58 = vadd.f32 %v2309_v25, %v2308_v50  ;;  %v1728_v23 = vpop.f32.mrf.mxu2  ;;  %v1508_v34 = vpop.f32.mrf.mxu1  ;;  %v1844_v25 = vld [vmem:[#allocation2 + $0x1a1] sm:$0xff] }
 0x23c   : > { %v2410_v27 = vsel %vm2257_vm4, %v2369_v59, 0.0  ;;  %v1792_v8 = vadd.f32 %v1728_v23, %v1569_v43  ;;  %v1570_v15 = vadd.f32 %v1508_v34, %v3337_v36  ;;  %v1860_v34 = vpack.c.bf16 %v1844_v25, %v1843_v62 }
 0x23d   : > { %v2411_v40 = vadd.f32 %v2410_v27, %v2409_v63  ;;  %v1950_v18 = vpop.f32.mrf.mxu3 }
 0x23e   : > { %v2014_v13 = vadd.f32 %v1950_v18, %v1792_v8  ;;  %2659 = vmatmul.msk.bf16.gmra.mxu1 %vm215_vm1, %v3538_v7  ;;  %v2066_v7 = vld [vmem:[#allocation2 + $0x1a2] sm:$0xff] }
 0x23f   : > { %v2177_v12 = vpop.f32.mrf.mxu0  ;;  %v2082_v35 = vpack.c.bf16 %v2066_v7, %v2065_v9 }
 0x240   : > { %v2236_v51 = vadd.f32 %v2172_v54, %v2014_v13  ;;  %2676 = vmatmul.msk.bf16.gmra.mxu2 %vm215_vm1, %v1637_v47 }
 0x242   : > { %2269 = vst.msk [vmem:[%s3470_s14 + $0x58] sm:$0xff] %vm2257_vm4, %v2236_v51  ;;  %v2311_v0 = vsel %vm2257_vm4, %v2236_v51, 0.0  ;;  %v2370_v38 = vmul.f32 %v2236_v51, %v2236_v51  ;;  %2693 = vmatmul.msk.bf16.gmra.mxu3 %vm215_vm1, %v1859_v60 }
 0x243   : > { %v2312_v33 = vadd.f32 %v2311_v0, %v2310_v58  ;;  %v1731_v41 = vpop.f32.mrf.mxu2  ;;  %v1510_v44 = vpop.f32.mrf.mxu1 }
 0x244   : > { %v2412_v19 = vsel %vm2257_vm4, %v2370_v38, 0.0  ;;  %v1793_v54 = vadd.f32 %v1731_v41, %v1570_v15  ;;  %v1571_v11 = vadd.f32 %v1510_v44, %v3343_v45 }
 0x245   : > { %v2413_v39 = vadd.f32 %v2412_v19, %v2411_v40  ;;  %v1953_v50 = vpop.f32.mrf.mxu3 }
 0x246   : > { %v2015_v3 = vadd.f32 %v1953_v50, %v1793_v54 }
 0x247   : > { %v2180_v6 = vpop.f32.mrf.mxu0 }
 0x248   : > { %v2237_v42 = vadd.f32 %v2175_v21, %v2015_v3 }
 0x24a   : > { %2270 = vst.msk [vmem:[%s3470_s14 + $0x60] sm:$0xff] %vm2257_vm4, %v2237_v42  ;;  %v2313_v36 = vsel %vm2257_vm4, %v2237_v42, 0.0  ;;  %v2371_v63 = vmul.f32 %v2237_v42, %v2237_v42  ;;  %2711 = vmatmul.msk.bf16.gmra.mxu0 %vm215_vm1, %v2082_v35 }
 0x24b   : > { %v2314_v16 = vadd.f32 %v2313_v36, %v2312_v33  ;;  %v1733_v4 = vpop.f32.mrf.mxu2  ;;  %v1513_v49 = vpop.f32.mrf.mxu1 }
 0x24c   : > { %v2414_v59 = vsel %vm2257_vm4, %v2371_v63, 0.0  ;;  %v1794_v21 = vadd.f32 %v1733_v4, %v1571_v11  ;;  %v1572_v8 = vadd.f32 %v1513_v49, %v3347_v22 }
 0x24d   : > { %v2415_v43 = vadd.f32 %v2414_v59, %v2413_v39  ;;  %v1955_v58 = vpop.f32.mrf.mxu3 }
 0x24e   : > { %v2016_v23 = vadd.f32 %v1955_v58, %v1794_v21  ;;  %2660 = vmatmul.msk.bf16.gmra.mxu1 %vm215_vm1, %v2081_v61 }
 0x24f   : > { %v2182_v55 = vpop.f32.mrf.mxu0 }
 0x250   : > { %v2238_v45 = vadd.f32 %v2177_v12, %v2016_v23  ;;  %2677 = vmatmul.msk.bf16.gmra.mxu2 %vm215_vm1, %v1638_v10 }
 0x252   : > { %2271 = vst.msk [vmem:[%s3470_s14 + $0x68] sm:$0xff] %vm2257_vm4, %v2238_v45  ;;  %v2315_v53 = vsel %vm2257_vm4, %v2238_v45, 0.0  ;;  %v2372_v27 = vmul.f32 %v2238_v45, %v2238_v45  ;;  %2694 = vmatmul.msk.bf16.gmra.mxu3 %vm215_vm1, %v1860_v34 }
 0x253   : > { %v2316_v47 = vadd.f32 %v2315_v53, %v2314_v16  ;;  %v1736_v40 = vpop.f32.mrf.mxu2  ;;  %v1515_v18 = vpop.f32.mrf.mxu1 }
 0x254   : > { %v2416_v61 = vsel %vm2257_vm4, %v2372_v27, 0.0  ;;  %v1795_v13 = vadd.f32 %v1736_v40, %v1572_v8  ;;  %v1573_v22 = vadd.f32 %v1515_v18, %v3356_v28 }
 0x255   : > { %v2417_v60 = vadd.f32 %v2416_v61, %v2415_v43  ;;  %v1958_v12 = vpop.f32.mrf.mxu3 }
 0x256   : > { %v2017_v51 = vadd.f32 %v1958_v12, %v1795_v13 }
 0x257   : > { %v2185_v0 = vpop.f32.mrf.mxu0 }
 0x258   : > { %v2239_v38 = vadd.f32 %v2180_v6, %v2017_v51 }
 0x25a   : > { %2272 = vst.msk [vmem:[%s3470_s14 + $0x70] sm:$0xff] %vm2257_vm4, %v2239_v38  ;;  %v2317_v15 = vsel %vm2257_vm4, %v2239_v38, 0.0  ;;  %v2373_v33 = vmul.f32 %v2239_v38, %v2239_v38 }
 0x25b   : > { %v2318_v41 = vadd.f32 %v2317_v15, %v2316_v47  ;;  %v1738_v44 = vpop.f32.mrf.mxu2  ;;  %v1518_v9 = vpop.f32.mrf.mxu1 }
 0x25c   : > { %v2418_v7 = vsel %vm2257_vm4, %v2373_v33, 0.0  ;;  %v1796_v19 = vadd.f32 %v1738_v44, %v1573_v22  ;;  %v1574_v57 = vadd.f32 %v1518_v9, %v3361_v14 }
 0x25d   : > { %v2419_v54 = vadd.f32 %v2418_v7, %v2417_v60  ;;  %v1960_v39 = vpop.f32.mrf.mxu3 }
 0x25e   : > { %v2018_v50 = vadd.f32 %v1960_v39, %v1796_v19 }
 0x25f   : > { %v2187_v3 = vpop.f32.mrf.mxu0 }
 0x260   : > { %v2240_v35 = vadd.f32 %v2182_v55, %v2018_v50 }
 0x262   : > { %2273 = vst.msk [vmem:[%s3470_s14 + $0x78] sm:$0xff] %vm2257_vm4, %v2240_v35  ;;  %v2319_v6 = vsel %vm2257_vm4, %v2240_v35, 0.0  ;;  %v2374_v42 = vmul.f32 %v2240_v35, %v2240_v35 }
 0x263   : > { %v2320_v28 = vadd.f32 %v2319_v6, %v2318_v41  ;;  %v1741_v46 = vpop.f32.mrf.mxu2  ;;  %v1520_v36 = vpop.f32.mrf.mxu1 }
 0x264   : > { %v2420_v63 = vsel %vm2257_vm4, %v2374_v42, 0.0  ;;  %v1797_v11 = vadd.f32 %v1741_v46, %v1574_v57  ;;  %v1575_v10 = vadd.f32 %v1520_v36, %v3370_v26 }
 0x265   : > { %v2421_v16 = vadd.f32 %v2420_v63, %v2419_v54  ;;  %v1963_v4 = vpop.f32.mrf.mxu3 }
 0x266   : > { %v2019_v49 = vadd.f32 %v1963_v4, %v1797_v11 }
 0x267   : > { %v2190_v62 = vpop.f32.mrf.mxu0 }
 0x268   : > { %v2241_v25 = vadd.f32 %v2185_v0, %v2019_v49 }
 0x26a   : > { %2274 = vst.msk [vmem:[%s3470_s14 + $0x80] sm:$0xff] %vm2257_vm4, %v2241_v25  ;;  %v2321_v59 = vsel %vm2257_vm4, %v2241_v25, 0.0  ;;  %v2375_v21 = vmul.f32 %v2241_v25, %v2241_v25 }
 0x26b   : > { %v2322_v14 = vadd.f32 %v2321_v59, %v2320_v28  ;;  %v1743_v43 = vpop.f32.mrf.mxu2  ;;  %v1523_v58 = vpop.f32.mrf.mxu1 }
 0x26c   : > { %v2422_v23 = vsel %vm2257_vm4, %v2375_v21, 0.0  ;;  %v1798_v34 = vadd.f32 %v1743_v43, %v1575_v10  ;;  %v1576_v18 = vadd.f32 %v1523_v58, %v3375_v48 }
 0x26d   : > { %v2423_v55 = vadd.f32 %v2422_v23, %v2421_v16  ;;  %v1965_v45 = vpop.f32.mrf.mxu3 }
 0x26e   : > { %v2020_v53 = vadd.f32 %v1965_v45, %v1798_v34 }
 0x26f   : > { %v2192_v27 = vpop.f32.mrf.mxu0 }
 0x270   : > { %v2242_v8 = vadd.f32 %v2187_v3, %v2020_v53 }
 0x272   : > { %2275 = vst.msk [vmem:[%s3470_s14 + $0x88] sm:$0xff] %vm2257_vm4, %v2242_v8  ;;  %v2323_v47 = vsel %vm2257_vm4, %v2242_v8, 0.0  ;;  %v2376_v40 = vmul.f32 %v2242_v8, %v2242_v8 }
 0x273   : > { %v2324_v26 = vadd.f32 %v2323_v47, %v2322_v14  ;;  %v1746_v61 = vpop.f32.mrf.mxu2  ;;  %v1525_v13 = vpop.f32.mrf.mxu1 }
 0x274   : > { %v2424_v60 = vsel %vm2257_vm4, %v2376_v40, 0.0  ;;  %v1799_v12 = vadd.f32 %v1746_v61, %v1576_v18  ;;  %v1577_v44 = vadd.f32 %v1525_v13, %v3384_v20 }
 0x275   : > { %v2425_v51 = vadd.f32 %v2424_v60, %v2423_v55  ;;  %v1968_v0 = vpop.f32.mrf.mxu3 }
 0x276   : > { %v2021_v38 = vadd.f32 %v1968_v0, %v1799_v12 }
 0x277   : > { %v2195_v15 = vpop.f32.mrf.mxu0 }
 0x278   : > { %v2243_v33 = vadd.f32 %v2190_v62, %v2021_v38 }
 0x27a   : > { %2276 = vst.msk [vmem:[%s3470_s14 + $0x90] sm:$0xff] %vm2257_vm4, %v2243_v33  ;;  %v2325_v22 = vsel %vm2257_vm4, %v2243_v33, 0.0  ;;  %v2377_v41 = vmul.f32 %v2243_v33, %v2243_v33 }
 0x27b   : > { %v2326_v48 = vadd.f32 %v2325_v22, %v2324_v26  ;;  %v1748_v9 = vpop.f32.mrf.mxu2  ;;  %v1528_v7 = vpop.f32.mrf.mxu1 }
 0x27c   : > { %v2426_v19 = vsel %vm2257_vm4, %v2377_v41, 0.0  ;;  %v1800_v54 = vadd.f32 %v1748_v9, %v1577_v44  ;;  %v1578_v28 = vadd.f32 %v1528_v7, %v3388_v37 }
 0x27d   : > { %v2427_v39 = vadd.f32 %v2426_v19, %v2425_v51  ;;  %v1970_v50 = vpop.f32.mrf.mxu3 }
 0x27e   : > { %v2022_v3 = vadd.f32 %v1970_v50, %v1800_v54 }
 0x27f   : > { %v2197_v35 = vpop.f32.mrf.mxu0 }
 0x280   : > { %v2244_v6 = vadd.f32 %v2192_v27, %v2022_v3 }
 0x282   : > { %2277 = vst.msk [vmem:[%s3470_s14 + $0x98] sm:$0xff] %vm2257_vm4, %v2244_v6  ;;  %v2327_v42 = vsel %vm2257_vm4, %v2244_v6, 0.0  ;;  %v2378_v57 = vmul.f32 %v2244_v6, %v2244_v6 }
 0x283   : > { %v2328_v20 = vadd.f32 %v2327_v42, %v2326_v48  ;;  %v1751_v46 = vpop.f32.mrf.mxu2  ;;  %v1530_v36 = vpop.f32.mrf.mxu1 }
 0x284   : > { %v2428_v63 = vsel %vm2257_vm4, %v2378_v57, 0.0  ;;  %v1801_v11 = vadd.f32 %v1751_v46, %v1578_v28  ;;  %v1579_v10 = vadd.f32 %v1530_v36, %v3397_v30 }
 0x285   : > { %v2429_v16 = vadd.f32 %v2428_v63, %v2427_v39  ;;  %v1973_v4 = vpop.f32.mrf.mxu3 }
 0x286   : > { %v2023_v49 = vadd.f32 %v1973_v4, %v1801_v11 }
 0x287   : > { %v2200_v62 = vpop.f32.mrf.mxu0 }
 0x288   : > { %v2245_v25 = vadd.f32 %v2195_v15, %v2023_v49 }
 0x28a   : > { %2278 = vst.msk [vmem:[%s3470_s14 + $0xa0] sm:$0xff] %vm2257_vm4, %v2245_v25  ;;  %v2329_v59 = vsel %vm2257_vm4, %v2245_v25, 0.0  ;;  %v2379_v21 = vmul.f32 %v2245_v25, %v2245_v25 }
 0x28b   : > { %v2330_v37 = vadd.f32 %v2329_v59, %v2328_v20  ;;  %v1753_v14 = vpop.f32.mrf.mxu2  ;;  %v1533_v43 = vpop.f32.mrf.mxu1 }
 0x28c   : > { %v2430_v58 = vsel %vm2257_vm4, %v2379_v21, 0.0  ;;  %v1802_v23 = vadd.f32 %v1753_v14, %v1579_v10  ;;  %v1580_v40 = vadd.f32 %v1533_v43, %v3401_v52 }
 0x28d   : > { %v2431_v34 = vadd.f32 %v2430_v58, %v2429_v16  ;;  %v1975_v55 = vpop.f32.mrf.mxu3 }
 0x28e   : > { %v2024_v45 = vadd.f32 %v1975_v55, %v1802_v23 }
 0x28f   : > { %v2202_v53 = vpop.f32.mrf.mxu0 }
 0x290   : > { %v2246_v27 = vadd.f32 %v2197_v35, %v2024_v45 }
 0x292   : > { %2279 = vst.msk [vmem:[%s3470_s14 + $0xa8] sm:$0xff] %vm2257_vm4, %v2246_v27  ;;  %v2331_v8 = vsel %vm2257_vm4, %v2246_v27, 0.0  ;;  %v2380_v47 = vmul.f32 %v2246_v27, %v2246_v27 }
 0x293   : > { %v2332_v30 = vadd.f32 %v2331_v8, %v2330_v37  ;;  %v1756_v18 = vpop.f32.mrf.mxu2  ;;  %v1535_v26 = vpop.f32.mrf.mxu1 }
 0x294   : > { %v2432_v61 = vsel %vm2257_vm4, %v2380_v47, 0.0  ;;  %v1803_v13 = vadd.f32 %v1756_v18, %v1580_v40  ;;  %v1581_v22 = vadd.f32 %v1535_v26, %v3410_v56 }
 0x295   : > { %v2433_v60 = vadd.f32 %v2432_v61, %v2431_v34  ;;  %v1978_v12 = vpop.f32.mrf.mxu3 }
 0x296   : > { %v2025_v51 = vadd.f32 %v1978_v12, %v1803_v13 }
 0x297   : > { %v2205_v38 = vpop.f32.mrf.mxu0 }
 0x298   : > { %v2247_v0 = vadd.f32 %v2200_v62, %v2025_v51 }
 0x29a   : > { %2280 = vst.msk [vmem:[%s3470_s14 + $0xb0] sm:$0xff] %vm2257_vm4, %v2247_v0  ;;  %v2333_v15 = vsel %vm2257_vm4, %v2247_v0, 0.0  ;;  %v2381_v33 = vmul.f32 %v2247_v0, %v2247_v0 }
 0x29b   : > { %v2334_v52 = vadd.f32 %v2333_v15, %v2332_v30  ;;  %v1758_v41 = vpop.f32.mrf.mxu2  ;;  %v1538_v44 = vpop.f32.mrf.mxu1 }
 0x29c   : > { %v2434_v48 = vsel %vm2257_vm4, %v2381_v33, 0.0  ;;  %v1804_v9 = vadd.f32 %v1758_v41, %v1581_v22  ;;  %v1582_v35 = vadd.f32 %v1538_v44, %v3414_v17 }
 0x29d   : > { %v2435_v7 = vadd.f32 %v2434_v48, %v2433_v60  ;;  %v1980_v19 = vpop.f32.mrf.mxu3 }
 0x29e   : > { %v2026_v54 = vadd.f32 %v1980_v19, %v1804_v9 }
 0x29f   : > { %v2207_v6 = vpop.f32.mrf.mxu0 }
 0x2a0   : > { %v2248_v39 = vadd.f32 %v2202_v53, %v2026_v54 }
 0x2a2   : > { %2281 = vst.msk [vmem:[%s3470_s14 + $0xb8] sm:$0xff] %vm2257_vm4, %v2248_v39  ;;  %v2335_v50 = vsel %vm2257_vm4, %v2248_v39, 0.0  ;;  %v2382_v3 = vmul.f32 %v2248_v39, %v2248_v39 }
 0x2a3   : > { %v2336_v56 = vadd.f32 %v2335_v50, %v2334_v52  ;;  %v1761_v42 = vpop.f32.mrf.mxu2  ;;  %v1540_v57 = vpop.f32.mrf.mxu1 }
 0x2a4   : > { %v2436_v28 = vsel %vm2257_vm4, %v2382_v3, 0.0  ;;  %v1805_v20 = vadd.f32 %v1761_v42, %v1582_v35  ;;  %v1583_v49 = vadd.f32 %v1540_v57, %v3423_v5 }
 0x2a5   : > { %v2437_v46 = vadd.f32 %v2436_v28, %v2435_v7  ;;  %v1983_v36 = vpop.f32.mrf.mxu3 }
 0x2a6   : > { %v2027_v63 = vadd.f32 %v1983_v36, %v1805_v20 }
 0x2a7   : > { %v2210_v14 = vpop.f32.mrf.mxu0 }
 0x2a8   : > { %v2249_v11 = vadd.f32 %v2205_v38, %v2027_v63 }
 0x2aa   : > { %2282 = vst.msk [vmem:[%s3470_s14 + $0xc0] sm:$0xff] %vm2257_vm4, %v2249_v11  ;;  %v2337_v16 = vsel %vm2257_vm4, %v2249_v11, 0.0  ;;  %v2383_v4 = vmul.f32 %v2249_v11, %v2249_v11 }
 0x2ab   : > { %v2338_v17 = vadd.f32 %v2337_v16, %v2336_v56  ;;  %v1763_v62 = vpop.f32.mrf.mxu2  ;;  %v1543_v25 = vpop.f32.mrf.mxu1 }
 0x2ac   : > { %v2438_v59 = vsel %vm2257_vm4, %v2383_v4, 0.0  ;;  %v1806_v21 = vadd.f32 %v1763_v62, %v1583_v49  ;;  %v1584_v55 = vadd.f32 %v1543_v25, %v3427_v24 }
 0x2ad   : > { %v2439_v10 = vadd.f32 %v2438_v59, %v2437_v46  ;;  %v1985_v37 = vpop.f32.mrf.mxu3 }
 0x2ae   : > { %v2028_v43 = vadd.f32 %v1985_v37, %v1806_v21 }
 0x2af   : > { %v2212_v18 = vpop.f32.mrf.mxu0 }
 0x2b0   : > { %v2250_v58 = vadd.f32 %v2207_v6, %v2028_v43 }
 0x2b2   : > { %2283 = vst.msk [vmem:[%s3470_s14 + $0xc8] sm:$0xff] %vm2257_vm4, %v2250_v58  ;;  %v2339_v23 = vsel %vm2257_vm4, %v2250_v58, 0.0  ;;  %v2384_v34 = vmul.f32 %v2250_v58, %v2250_v58 }
 0x2b3   : > { %v2340_v5 = vadd.f32 %v2339_v23, %v2338_v17  ;;  %v1766_v45 = vpop.f32.mrf.mxu2  ;;  %v1545_v53 = vpop.f32.mrf.mxu1 }
 0x2b4   : > { %v2440_v27 = vsel %vm2257_vm4, %v2384_v34, 0.0  ;;  %v1807_v8 = vadd.f32 %v1766_v45, %v1584_v55  ;;  %v1585_v60 = vadd.f32 %v1545_v53, %v3436_v1 }
 0x2b5   : > { %v2441_v47 = vadd.f32 %v2440_v27, %v2439_v10  ;;  %v1988_v40 = vpop.f32.mrf.mxu3 }
 0x2b6   : > { %v2029_v30 = vadd.f32 %v1988_v40, %v1807_v8 }
 0x2b7   : > { %v2215_v41 = vpop.f32.mrf.mxu0 }
 0x2b8   : > { %v2251_v26 = vadd.f32 %v2210_v14, %v2029_v30 }
 0x2ba   : > { %2284 = vst.msk [vmem:[%s3470_s14 + $0xd0] sm:$0xff] %vm2257_vm4, %v2251_v26  ;;  %v2341_v61 = vsel %vm2257_vm4, %v2251_v26, 0.0  ;;  %v2385_v13 = vmul.f32 %v2251_v26, %v2251_v26 }
 0x2bb   : > { %v2342_v24 = vadd.f32 %v2341_v61, %v2340_v5  ;;  %v1768_v12 = vpop.f32.mrf.mxu2  ;;  %v1548_v51 = vpop.f32.mrf.mxu1 }
 0x2bc   : > { %v2442_v0 = vsel %vm2257_vm4, %v2385_v13, 0.0  ;;  %v1808_v38 = vadd.f32 %v1768_v12, %v1585_v60  ;;  %v1586_v9 = vadd.f32 %v1548_v51, %v3440_v2 }
 0x2bd   : > { %v2443_v15 = vadd.f32 %v2442_v0, %v2441_v47  ;;  %v1990_v33 = vpop.f32.mrf.mxu3 }
 0x2be   : > { %v2030_v22 = vadd.f32 %v1990_v33, %v1808_v38 }
 0x2bf   : > { %v2217_v2 = vpop.f32.mrf.mxu0 }
 0x2c0   : > { %v2252_v52 = vadd.f32 %v2212_v18, %v2030_v22 }
 0x2c2   : > { %2285 = vst.msk [vmem:[%s3470_s14 + $0xd8] sm:$0xff] %vm2257_vm4, %v2252_v52  ;;  %v2343_v44 = vsel %vm2257_vm4, %v2252_v52, 0.0  ;;  %v2386_v48 = vmul.f32 %v2252_v52, %v2252_v52 }
 0x2c3   : > { %v2344_v1 = vadd.f32 %v2343_v44, %v2342_v24  ;;  %v1771_v7 = vpop.f32.mrf.mxu2  ;;  %v1550_v19 = vpop.f32.mrf.mxu1 }
 0x2c4   : > { %v2444_v54 = vsel %vm2257_vm4, %v2386_v48, 0.0  ;;  %v1809_v39 = vadd.f32 %v1771_v7, %v1586_v9  ;;  %v1587_v57 = vadd.f32 %v1550_v19, %v3449_v29 }
 0x2c5   : > { %v2445_v50 = vadd.f32 %v2444_v54, %v2443_v15  ;;  %v1993_v3 = vpop.f32.mrf.mxu3 }
 0x2c6   : > { %v2031_v35 = vadd.f32 %v1993_v3, %v1809_v39 }
 0x2c7   : > { %v2220_v14 = vpop.f32.mrf.mxu0 }
 0x2c8   : > { %v2253_v6 = vadd.f32 %v2215_v41, %v2031_v35 }
 0x2ca   : > { %2286 = vst.msk [vmem:[%s3470_s14 + $0xe0] sm:$0xff] %vm2257_vm4, %v2253_v6  ;;  %v2345_v56 = vsel %vm2257_vm4, %v2253_v6, 0.0  ;;  %v2387_v42 = vmul.f32 %v2253_v6, %v2253_v6 }
 0x2cb   : > { %v2346_v28 = vadd.f32 %v2345_v56, %v2344_v1  ;;  %v1773_v20 = vpop.f32.mrf.mxu2  ;;  %v1553_v16 = vpop.f32.mrf.mxu1 }
 0x2cc   : > { %v2446_v46 = vsel %vm2257_vm4, %v2387_v42, 0.0  ;;  %v1810_v36 = vadd.f32 %v1773_v20, %v1587_v57  ;;  %v1588_v25 = vadd.f32 %v1553_v16, %v3453_v32 }
 0x2cd   : > { %v2447_v63 = vadd.f32 %v2446_v46, %v2445_v50  ;;  %v1995_v11 = vpop.f32.mrf.mxu3 }
 0x2ce   : > { %v2032_v4 = vadd.f32 %v1995_v11, %v1810_v36 }
 0x2cf   : > { %v2222_v18 = vpop.f32.mrf.mxu0 }
 0x2d0   : > { %v2254_v49 = vadd.f32 %v2217_v2, %v2032_v4 }
 0x2d2   : > { %2287 = vst.msk [vmem:[%s3470_s14 + $0xe8] sm:$0xff] %vm2257_vm4, %v2254_v49  ;;  %v2347_v17 = vsel %vm2257_vm4, %v2254_v49, 0.0  ;;  %v2388_v62 = vmul.f32 %v2254_v49, %v2254_v49 }
 0x2d3   : > { %v2348_v29 = vadd.f32 %v2347_v17, %v2346_v28  ;;  %v1776_v59 = vpop.f32.mrf.mxu2  ;;  %v1555_v23 = vpop.f32.mrf.mxu1 }
 0x2d4   : > { %v2448_v21 = vsel %vm2257_vm4, %v2388_v62, 0.0  ;;  %v1811_v10 = vadd.f32 %v1776_v59, %v1588_v25  ;;  %v1589_v45 = vadd.f32 %v1555_v23, %v3462_v31 }
 0x2d5   : > { %v2449_v37 = vadd.f32 %v2448_v21, %v2447_v63  ;;  %v1998_v43 = vpop.f32.mrf.mxu3 }
 0x2d6   : > { %v2033_v58 = vadd.f32 %v1998_v43, %v1811_v10 }
 0x2d8   : > { %v2255_v34 = vadd.f32 %v2220_v14, %v2033_v58 }
 0x2da   : > { %2288 = vst.msk [vmem:[%s3470_s14 + $0xf0] sm:$0xff] %vm2257_vm4, %v2255_v34  ;;  %v2349_v55 = vsel %vm2257_vm4, %v2255_v34, 0.0  ;;  %v2389_v5 = vmul.f32 %v2255_v34, %v2255_v34 }
 0x2db   : > { %v2350_v32 = vadd.f32 %v2349_v55, %v2348_v29  ;;  %v1778_v53 = vpop.f32.mrf.mxu2 }
 0x2dc   : > { %v2450_v27 = vsel %vm2257_vm4, %v2389_v5, 0.0  ;;  %v1812_v8 = vadd.f32 %v1778_v53, %v1589_v45 }
 0x2dd   : > { %v2451_v47 = vadd.f32 %v2450_v27, %v2449_v37  ;;  %v2000_v40 = vpop.f32.mrf.mxu3 }
 0x2de   : > { %v2034_v30 = vadd.f32 %v2000_v40, %v1812_v8 }
 0x2e0   : > { %v2256_v26 = vadd.f32 %v2222_v18, %v2034_v30 }
 0x2e2   : > { %2289 = vst.msk [vmem:[%s3470_s14 + $0xf8] sm:$0xff] %vm2257_vm4, %v2256_v26  ;;  %v2351_v61 = vsel %vm2257_vm4, %v2256_v26, 0.0  ;;  %v2390_v13 = vmul.f32 %v2256_v26, %v2256_v26 }
 0x2e3   : > { %v2352_v60 = vadd.f32 %v2351_v61, %v2350_v32 }
 0x2e4   : > { %v2452_v24 = vsel %vm2257_vm4, %v2390_v13, 0.0 }
 0x2e5   : > { %v2353_v31 = vrot.slane %v2352_v60, 4  ;;  %v2453_v12 = vadd.f32 %v2452_v24, %v2451_v47 }
 0x2e7   : > { %v2354_v51 = vadd.f32 %v2353_v31, %v2352_v60  ;;  %v2454_v0 = vrot.slane %v2453_v12, 4 }
 0x2e9   : > { %v2355_v38 = vrot.slane %v2354_v51, 2  ;;  %v2455_v15 = vadd.f32 %v2454_v0, %v2453_v12 }
 0x2eb   : > { %v2356_v33 = vadd.f32 %v2355_v38, %v2354_v51  ;;  %v2456_v22 = vrot.slane %v2455_v15, 2 }
 0x2ed   : > { %v2357_v52 = vrot.slane %v2356_v33, 1  ;;  %v2457_v41 = vadd.f32 %v2456_v22, %v2455_v15 }
 0x2ef   : > { %v2458_v44 = vrot.slane %v2457_v41, 1  ;;  %v2358_v48 = vadd.f32 %v2357_v52, %v2356_v33 }
 0x2f1   : > { %v2459_v9 = vadd.f32 %v2458_v44, %v2457_v41 }
 0x2f3   : > { %v2461_v1 = vsel %vm2460_vm5, %v2358_v48, %v2459_v9 }
 0x2f4   : > { %2463 = vst.msk [vmem:[%s181_s18] sm:$0x3] %vm2462_vm6, %v2461_v1 }
 0x2f5 PF: > { %s14_s12 = sadd.s32 1, %s2813_s12  }
 0x2f6   : > { %p11_p4 = scmp.ge.s32.totalorder %s14_s12, 4  }
 0x2f8   :  { %13 = sbr.rel (!%p11_p4) target bundleno = 1 (0x1), region = 81 }

// kernel: conv_block_forward.4
= control target key start
LH: loop header
LB: loop body
LE: loop exit
PB: predicated region body
PF: predicated region fallthrough
CT: control target
= control target key end

     0   :  { %s2895_s18 = smov 0   ;;  %s3836_s0 = inlined_call_operand.vmem [shape: f32[2,16,16,8], index: 0, kind: input, shape index: {}]   ;;  %s3837_s1 = inlined_call_operand.vmem [shape: f32[1,8], index: 1, kind: input, shape index: {}]   ;;  %s3838_s2 = inlined_call_operand.vmem [shape: f32[1,8], index: 2, kind: input, shape index: {}]   ;;  %s3839_s3 = inlined_call_operand.vmem [shape: bf16[9,8,8], index: 3, kind: input, shape index: {}]   ;;  %s3840_s4 = inlined_call_operand.vmem [shape: f32[2,16,16,8], index: 4, kind: output, shape index: {0}]   ;;  %s3841_s5 = inlined_call_operand.vmem [shape: f32[2,2,8], index: 5, kind: output, shape index: {1}]  }
   0x1 LB: > { %s2674_s19 = sadd.s32 4294967295, %s2862_s18   ;;  %p2678_p0 = scmp.ge.s32.totalorder %s2862_s18, 1  ;;  %s2862_s18 = sphi %s2895_s18, %s16_s18  }
   0x2   : > { %p190_p1 = scmp.lt.s32.totalorder %s2862_s18, 3 }
   0x4   : > { %p191_p2 = pnand %p2678_p0, %p190_p1 }
   0x6   : > { %194 = sbr.rel (%p191_p2) target bundleno = 761 (0x2f9), region = 36 }
   0xb   : > { %v2684_v0 = vld [vmem:[%s3839_s3 + $0x4] sm:$0xf]  ;;  %vm595_vm0 = vcmask 1043456   ;;  %p222_p3 = scmp.lt.s32.totalorder %s2674_s19, 1  ;;  %v2910_v2 = vld [vmem:[%s3837_s1] ss:$0 sm:$0xff] }
   0xc   : > { %v597_v1 = vsel %vm595_vm0, %v2684_v0, 0  ;;  %vm373_vm1 = vcmask 64512   ;;  %v2717_v3 = vld [vmem:[%s3839_s3 + $0x8] sm:$0xf]  ;;  %v2920_v4 = vld [vmem:[%s3838_s2] ss:$0 sm:$0xff] }
   0xd   : > { %2840 = vmatpush.bf16.msra.mxu1 %v597_v1  ;;  %2841 = vmatpush.bf16.msra.mxu2 %v597_v1  ;;  %s3883_s19 = smov (!%p222_p3, %s2674_s19), 1  ;;  %v927_v5 = vsel %vm595_vm0, %v2717_v3, 0  ;;  %v2864_v6 = vmov 0.0   ;;  %vm376_vm2 = vcmask 58368   ;;  %v2734_v7 = vld [vmem:[%s3839_s3 + $0xc] sm:$0xf] }
   0xe   : > { %2842 = vmatpush.bf16.msra.mxu3 %v597_v1  ;;  %606 = vmatpush.bf16.msra.mxu0 %v597_v1  ;;  %374 = vst.msk [vmem:[#allocation2] sm:$0xff] %vm373_vm1, %v2864_v6  ;;  %s2838_s30 = sshll.u32 %s3883_s19, 8  ;;  %v1149_v8 = vsel %vm595_vm0, %v2734_v7, 0  ;;  %v496_v9 = vld [vmem:[%s3839_s3] sm:$0xf]  ;;  %vm383_vm3 = vcmask 57344  }
   0xf   : > { %375 = vst.msk [vmem:[#allocation2 + $0x8] sm:$0xff] %vm373_vm1, %v2864_v6  ;;  %s2940_s10 = scalar_lea.vmem %s3836_s0, %s2838_s30  ;;  %v737_v10 = vsel %vm595_vm0, %v496_v9, 0  ;;  %v2751_v11 = vld [vmem:[%s3839_s3 + $0x10] sm:$0xf]  ;;  %s3625_s29 = scalar_lea.vmem %s3840_s4, %s2838_s30  ;;  %vm2585_vm4 = vcmask 1040384  }
  0x10   : > { %377 = vst.msk [vmem:[#allocation2 + $0x10] sm:$0x3] %vm376_vm2, %v2864_v6  ;;  %v243_v12 = vld [vmem:[%s2940_s10 + $0x30] sm:$0xff]  ;;  %v244_v13 = vld [vmem:[%s2940_s10 + $0x38] sm:$0xff]  ;;  %v1371_v15 = vsel %vm595_vm0, %v2751_v11, 0  ;;  %v245_v25 = vld [vmem:[%s2940_s10 + $0x40] sm:$0xff] }
  0x11   : > { %936 = vmatpush.bf16.msrb.mxu2 %v927_v5  ;;  %v251_v14 = vld [vmem:[%s2940_s10 + $0x70] sm:$0xff]  ;;  %379 = vst.msk [vmem:[#allocation2 + $0x198] sm:$0xff] %vm373_vm1, %v2864_v6  ;;  %746 = vmatpush.bf16.msrb.mxu1 %v737_v10  ;;  %v279_v16 = vmul.f32 %v2910_v2, %v243_v12  ;;  %v280_v17 = vmul.f32 %v2910_v2, %v244_v13  ;;  %v252_v18 = vld [vmem:[%s2940_s10 + $0x78] sm:$0xff]  ;;  %v246_v26 = vld [vmem:[%s2940_s10 + $0x48] sm:$0xff]  ;;  %s2683_s30 = sshll.u32 %s3883_s19, 1 }
  0x12   : > { %1158 = vmatpush.bf16.msrb.mxu3 %v1149_v8  ;;  %v287_v19 = vmul.f32 %v2910_v2, %v251_v14  ;;  %v259_v20 = vld [vmem:[%s2940_s10 + $0xb0] sm:$0xff]  ;;  %v260_v21 = vld [vmem:[%s2940_s10 + $0xb8] sm:$0xff]  ;;  %380 = vst.msk [vmem:[#allocation2 + $0x1a0] sm:$0xff] %vm373_vm1, %v2864_v6  ;;  %1380 = vmatpush.bf16.msrb.mxu0 %v1371_v15  ;;  %v288_v22 = vmul.f32 %v2910_v2, %v252_v18  ;;  %v253_v35 = vld [vmem:[%s2940_s10 + $0x80] sm:$0xff]  ;;  %s235_s8 = scalar_lea.vmem %s3841_s5, %s2683_s30 }
  0x13   : > { %v295_v23 = vmul.f32 %v2910_v2, %v259_v20  ;;  %v296_v24 = vmul.f32 %v2910_v2, %v260_v21  ;;  %381 = vst.msk [vmem:[#allocation2 + $0x1a8] sm:$0x3] %vm376_vm2, %v2864_v6  ;;  %v315_v27 = vadd.f32 %v2920_v4, %v279_v16  ;;  %v316_v28 = vadd.f32 %v2920_v4, %v280_v17  ;;  %v254_v36 = vld [vmem:[%s2940_s10 + $0x88] sm:$0xff]  ;;  %v261_v37 = vld [vmem:[%s2940_s10 + $0xc0] sm:$0xff]  ;;  %v247_v53 = vld [vmem:[%s2940_s10 + $0x50] sm:$0xff] }
  0x14   : > { %v323_v29 = vadd.f32 %v2920_v4, %v287_v19  ;;  %v281_v30 = vmul.f32 %v2910_v2, %v245_v25  ;;  %v324_v31 = vadd.f32 %v2920_v4, %v288_v22  ;;  %v282_v34 = vmul.f32 %v2910_v2, %v246_v26  ;;  %v262_v43 = vld [vmem:[%s2940_s10 + $0xc8] sm:$0xff]  ;;  %v237_v44 = vld [vmem:[%s2940_s10] sm:$0xff]  ;;  %v248_v58 = vld [vmem:[%s2940_s10 + $0x58] sm:$0xff]  ;;  %384 = vst.msk [vmem:[#allocation2 + $0x18] sm:$0x1] %vm383_vm3, %v2864_v6 }
  0x15   : > { %v331_v32 = vadd.f32 %v2920_v4, %v295_v23  ;;  %v332_v33 = vadd.f32 %v2920_v4, %v296_v24  ;;  %v347_v38 = vmax.f32 %v315_v27, 0.0  ;;  %v348_v39 = vmax.f32 %v316_v28, 0.0  ;;  %v238_v48 = vld [vmem:[%s2940_s10 + $0x8] sm:$0xff]  ;;  %v255_v5 = vld [vmem:[%s2940_s10 + $0x90] sm:$0xff]  ;;  %v256_v7 = vld [vmem:[%s2940_s10 + $0x98] sm:$0xff] }
  0x16   : > { %v355_v40 = vmax.f32 %v323_v29, 0.0  ;;  %v497_v41 = vld [vmem:[#allocation2 + $0x1] sm:$0xff]  ;;  %v317_v42 = vadd.f32 %v2920_v4, %v281_v30  ;;  %v356_v45 = vmax.f32 %v324_v31, 0.0  ;;  %v318_v47 = vadd.f32 %v2920_v4, %v282_v34  ;;  %v263_v11 = vld [vmem:[%s2940_s10 + $0xd0] sm:$0xff]  ;;  %v264_v12 = vld [vmem:[%s2940_s10 + $0xd8] sm:$0xff] }
  0x17   : > { %v498_v46 = vld [vmem:[#allocation2 + $0x9] sm:$0xff]  ;;  %422 = vst.msk [vmem:[#allocation2 + $0x61] sm:$0xff] %vm373_vm1, %v347_v38  ;;  %v363_v49 = vmax.f32 %v331_v32, 0.0  ;;  %v289_v51 = vmul.f32 %v2910_v2, %v253_v35  ;;  %v290_v52 = vmul.f32 %v2910_v2, %v254_v36  ;;  %v364_v54 = vmax.f32 %v332_v33, 0.0  ;;  %v240_v20 = vld [vmem:[%s2940_s10 + $0x18] sm:$0xff] }
  0x18   : > { %v529_v50 = vpack.c.bf16 %v498_v46, %v497_v41  ;;  %423 = vst.msk [vmem:[#allocation2 + $0x69] sm:$0xff] %vm373_vm1, %v348_v39  ;;  %v297_v55 = vmul.f32 %v2910_v2, %v261_v37  ;;  %v298_v56 = vmul.f32 %v2910_v2, %v262_v43  ;;  %v273_v57 = vmul.f32 %v2910_v2, %v237_v44  ;;  %v239_v15 = vld [vmem:[%s2940_s10 + $0x10] sm:$0xff] }
  0x19   : > { %430 = vst.msk [vmem:[#allocation2 + $0xc1] sm:$0xff] %vm373_vm1, %v355_v40  ;;  %v349_v59 = vmax.f32 %v317_v42, 0.0  ;;  %v325_v60 = vadd.f32 %v2920_v4, %v289_v51  ;;  %v326_v61 = vadd.f32 %v2920_v4, %v290_v52  ;;  %v274_v62 = vmul.f32 %v2910_v2, %v238_v48 }
  0x1a   : > { %2685 = vmatmul.msk.bf16.vlgmr.msra.gmra.mxu0 %vm373_vm1, %v529_v50  ;;  %431 = vst.msk [vmem:[#allocation2 + $0xc9] sm:$0xff] %vm373_vm1, %v356_v45  ;;  %v350_v63 = vmax.f32 %v318_v47, 0.0  ;;  %v333_v0 = vadd.f32 %v2920_v4, %v297_v55  ;;  %v334_v1 = vadd.f32 %v2920_v4, %v298_v56  ;;  %v283_v3 = vmul.f32 %v2910_v2, %v247_v53  ;;  %v250_v50 = vld [vmem:[%s2940_s10 + $0x68] sm:$0xff] }
  0x1b   : > { %438 = vst.msk [vmem:[#allocation2 + $0x121] sm:$0xff] %vm373_vm1, %v363_v49  ;;  %v357_v8 = vmax.f32 %v325_v60, 0.0  ;;  %v309_v9 = vadd.f32 %v2920_v4, %v273_v57  ;;  %v284_v10 = vmul.f32 %v2910_v2, %v248_v58  ;;  %v358_v13 = vmax.f32 %v326_v61, 0.0  ;;  %v249_v49 = vld [vmem:[%s2940_s10 + $0x60] sm:$0xff]  ;;  %v258_v55 = vld [vmem:[%s2940_s10 + $0xa8] sm:$0xff] }
  0x1c   : > { %439 = vst.msk [vmem:[#allocation2 + $0x129] sm:$0xff] %vm373_vm1, %v364_v54  ;;  %v310_v14 = vadd.f32 %v2920_v4, %v274_v62  ;;  %v365_v16 = vmax.f32 %v333_v0, 0.0  ;;  %v319_v17 = vadd.f32 %v2920_v4, %v283_v3  ;;  %v291_v18 = vmul.f32 %v2910_v2, %v255_v5  ;;  %v257_v54 = vld [vmem:[%s2940_s10 + $0xa0] sm:$0xff]  ;;  %v266_v60 = vld [vmem:[%s2940_s10 + $0xe8] sm:$0xff] }
  0x1d   : > { %424 = vst.msk [vmem:[#allocation2 + $0x79] sm:$0xff] %vm373_vm1, %v349_v59  ;;  %v292_v19 = vmul.f32 %v2910_v2, %v256_v7  ;;  %v366_v22 = vmax.f32 %v334_v1, 0.0  ;;  %v320_v23 = vadd.f32 %v2920_v4, %v284_v10  ;;  %v299_v24 = vmul.f32 %v2910_v2, %v263_v11  ;;  %v265_v59 = vld [vmem:[%s2940_s10 + $0xe0] sm:$0xff]  ;;  %v242_v3 = vld [vmem:[%s2940_s10 + $0x28] sm:$0xff] }
  0x1e   : > { %v505_v21 = vld [vmem:[#allocation2 + $0x61] sm:$0xff]  ;;  %425 = vst.msk [vmem:[#allocation2 + $0x81] sm:$0xff] %vm373_vm1, %v350_v63  ;;  %v300_v25 = vmul.f32 %v2910_v2, %v264_v12  ;;  %v341_v27 = vmax.f32 %v309_v9, 0.0  ;;  %v327_v28 = vadd.f32 %v2920_v4, %v291_v18  ;;  %v275_v29 = vmul.f32 %v2910_v2, %v239_v15 }
  0x1f   : > { %v506_v26 = vld [vmem:[#allocation2 + $0x69] sm:$0xff]  ;;  %432 = vst.msk [vmem:[#allocation2 + $0xd9] sm:$0xff] %vm373_vm1, %v357_v8  ;;  %v342_v32 = vmax.f32 %v310_v14, 0.0  ;;  %v328_v33 = vadd.f32 %v2920_v4, %v292_v19  ;;  %v276_v34 = vmul.f32 %v2910_v2, %v240_v20  ;;  %v351_v36 = vmax.f32 %v319_v17, 0.0  ;;  %v241_v1 = vld [vmem:[%s2940_s10 + $0x20] sm:$0xff] }
  0x20   : > { %v3025_v30 = vpack.c.bf16 %v506_v26, %v505_v21  ;;  %v513_v31 = vld [vmem:[#allocation2 + $0xc1] sm:$0xff]  ;;  %433 = vst.msk [vmem:[#allocation2 + $0xe1] sm:$0xff] %vm373_vm1, %v358_v13  ;;  %v335_v37 = vadd.f32 %v2920_v4, %v299_v24  ;;  %v352_v40 = vmax.f32 %v320_v23, 0.0  ;;  %v336_v41 = vadd.f32 %v2920_v4, %v300_v25 }
  0x21   : > { %v514_v35 = vld [vmem:[#allocation2 + $0xc9] sm:$0xff]  ;;  %440 = vst.msk [vmem:[#allocation2 + $0x139] sm:$0xff] %vm373_vm1, %v365_v16  ;;  %v359_v43 = vmax.f32 %v327_v28, 0.0  ;;  %v311_v44 = vadd.f32 %v2920_v4, %v275_v29  ;;  %v360_v46 = vmax.f32 %v328_v33, 0.0  ;;  %v312_v47 = vadd.f32 %v2920_v4, %v276_v34 }
  0x22   : > { %2689 = vmatmul.msk.bf16.vlgmr.msra.gmra.mxu1 %vm373_vm1, %v3025_v30  ;;  %v3034_v38 = vpack.c.bf16 %v514_v35, %v513_v31  ;;  %v521_v39 = vld [vmem:[#allocation2 + $0x121] sm:$0xff]  ;;  %441 = vst.msk [vmem:[#allocation2 + $0x141] sm:$0xff] %vm373_vm1, %v366_v22  ;;  %v367_v48 = vmax.f32 %v335_v37, 0.0  ;;  %v368_v51 = vmax.f32 %v336_v41, 0.0  ;;  %v285_v52 = vmul.f32 %v2910_v2, %v249_v49 }
  0x23   : > { %v522_v42 = vld [vmem:[#allocation2 + $0x129] sm:$0xff]  ;;  %416 = vst.msk [vmem:[#allocation2 + $0x19] sm:$0xff] %vm373_vm1, %v341_v27  ;;  %v286_v53 = vmul.f32 %v2910_v2, %v250_v50  ;;  %v343_v56 = vmax.f32 %v311_v44, 0.0  ;;  %v293_v57 = vmul.f32 %v2910_v2, %v257_v54  ;;  %v294_v58 = vmul.f32 %v2910_v2, %v258_v55  ;;  %v2785_v50 = vld [vmem:[%s3839_s3 + $0x18] sm:$0xf] }
  0x24   : > { %2693 = vmatmul.msk.bf16.vlgmr.msra.gmra.mxu2 %vm373_vm1, %v3034_v38  ;;  %v3042_v45 = vpack.c.bf16 %v522_v42, %v521_v39  ;;  %417 = vst.msk [vmem:[#allocation2 + $0x21] sm:$0xff] %vm373_vm1, %v342_v32  ;;  %v344_v61 = vmax.f32 %v312_v47, 0.0  ;;  %v321_v62 = vadd.f32 %v2920_v4, %v285_v52  ;;  %v301_v0 = vmul.f32 %v2910_v2, %v265_v59  ;;  %v507_v14 = vld [vmem:[#allocation2 + $0x79] sm:$0xff]  ;;  %v2768_v54 = vld [vmem:[%s3839_s3 + $0x14] sm:$0xf] }
  0x25   : > { %426 = vst.msk [vmem:[#allocation2 + $0x91] sm:$0xff] %vm373_vm1, %v351_v36  ;;  %v322_v63 = vadd.f32 %v2920_v4, %v286_v53  ;;  %v329_v5 = vadd.f32 %v2920_v4, %v293_v57  ;;  %v330_v7 = vadd.f32 %v2920_v4, %v294_v58  ;;  %v302_v8 = vmul.f32 %v2910_v2, %v266_v60  ;;  %v508_v15 = vld [vmem:[#allocation2 + $0x81] sm:$0xff] }
  0x26   : > { %2697 = vmatmul.msk.bf16.vlgmr.msra.gmra.mxu3 %vm373_vm1, %v3042_v45  ;;  %427 = vst.msk [vmem:[#allocation2 + $0x99] sm:$0xff] %vm373_vm1, %v352_v40  ;;  %v277_v9 = vmul.f32 %v2910_v2, %v241_v1  ;;  %v353_v11 = vmax.f32 %v321_v62, 0.0  ;;  %v337_v13 = vadd.f32 %v2920_v4, %v301_v0  ;;  %v278_v19 = vmul.f32 %v2910_v2, %v242_v3  ;;  %v515_v23 = vld [vmem:[#allocation2 + $0xd9] sm:$0xff] }
  0x27   : > { %434 = vst.msk [vmem:[#allocation2 + $0xf1] sm:$0xff] %vm373_vm1, %v359_v43  ;;  %v354_v12 = vmax.f32 %v322_v63, 0.0  ;;  %v361_v17 = vmax.f32 %v329_v5, 0.0  ;;  %v338_v18 = vadd.f32 %v2920_v4, %v302_v8  ;;  %v362_v21 = vmax.f32 %v330_v7, 0.0  ;;  %v516_v24 = vld [vmem:[#allocation2 + $0xe1] sm:$0xff] }
  0x28   : > { %435 = vst.msk [vmem:[#allocation2 + $0xf9] sm:$0xff] %vm373_vm1, %v360_v46  ;;  %v313_v22 = vadd.f32 %v2920_v4, %v277_v9  ;;  %v369_v25 = vmax.f32 %v337_v13, 0.0  ;;  %v314_v26 = vadd.f32 %v2920_v4, %v278_v19  ;;  %v3083_v27 = vpack.c.bf16 %v508_v15, %v507_v14  ;;  %v523_v28 = vld [vmem:[#allocation2 + $0x139] sm:$0xff]  ;;  %v449_v8 = vld [vmem:[#allocation2 + $0x8] sm:$0xff] }
  0x29   : > { %442 = vst.msk [vmem:[#allocation2 + $0x151] sm:$0xff] %vm373_vm1, %v367_v48  ;;  %v370_v2 = vmax.f32 %v338_v18, 0.0  ;;  %v524_v29 = vld [vmem:[#allocation2 + $0x141] sm:$0xff]  ;;  %v3089_v32 = vpack.c.bf16 %v516_v24, %v515_v23  ;;  %v1816_v52 = vsel %vm595_vm0, %v2785_v50, 0  ;;  %v1593_v55 = vsel %vm595_vm0, %v2768_v54, 0 }
  0x2a   : > { %v499_v10 = vld [vmem:[#allocation2 + $0x19] sm:$0xff]  ;;  %443 = vst.msk [vmem:[#allocation2 + $0x159] sm:$0xff] %vm373_vm1, %v368_v51  ;;  %v345_v31 = vmax.f32 %v313_v22, 0.0  ;;  %v346_v33 = vmax.f32 %v314_v26, 0.0  ;;  %v3095_v4 = vpack.c.bf16 %v524_v29, %v523_v28  ;;  %1825 = vmatpush.bf16.msra.mxu2 %v1816_v52  ;;  %1602 = vmatpush.bf16.msra.mxu1 %v1593_v55  ;;  %v828_v9 = vld [vmem:[#allocation2 + $0x2] sm:$0xff] }
  0x2b   : > { %v500_v16 = vld [vmem:[#allocation2 + $0x21] sm:$0xff]  ;;  %418 = vst.msk [vmem:[#allocation2 + $0x31] sm:$0xff] %vm373_vm1, %v343_v56  ;;  %v2802_v51 = vld [vmem:[%s3839_s3 + $0x1c] sm:$0xf] }
  0x2c   : > { %v3077_v20 = vpack.c.bf16 %v500_v16, %v499_v10  ;;  %419 = vst.msk [vmem:[#allocation2 + $0x39] sm:$0xff] %vm373_vm1, %v344_v61  ;;  %v509_v37 = vld [vmem:[#allocation2 + $0x91] sm:$0xff]  ;;  %v2038_v53 = vsel %vm595_vm0, %v2802_v51, 0  ;;  %v2819_v56 = vld [vmem:[%s3839_s3 + $0x20] sm:$0xf] }
  0x2d   : > { %428 = vst.msk [vmem:[#allocation2 + $0xa9] sm:$0xff] %vm373_vm1, %v353_v11  ;;  %v510_v39 = vld [vmem:[#allocation2 + $0x99] sm:$0xff]  ;;  %2047 = vmatpush.bf16.msra.mxu3 %v2038_v53  ;;  %v2260_v57 = vsel %vm595_vm0, %v2819_v56, 0  ;;  %v829_v10 = vld [vmem:[#allocation2 + $0xa] sm:$0xff] }
  0x2e   : > { %2686 = vmatmul.msk.bf16.gmra.mxu0 %vm373_vm1, %v3077_v20  ;;  %429 = vst.msk [vmem:[#allocation2 + $0xb1] sm:$0xff] %vm373_vm1, %v354_v12  ;;  %v517_v40 = vld [vmem:[#allocation2 + $0xf1] sm:$0xff]  ;;  %v3110_v42 = vpack.c.bf16 %v510_v39, %v509_v37  ;;  %v448_v7 = vld [vmem:[#allocation2] sm:$0xff]  ;;  %v860_v14 = vpack.c.bf16 %v829_v10, %v828_v9 }
  0x2f   : > { %436 = vst.msk [vmem:[#allocation2 + $0x109] sm:$0xff] %vm373_vm1, %v361_v17  ;;  %v518_v41 = vld [vmem:[#allocation2 + $0xf9] sm:$0xff]  ;;  %2269 = vmatpush.bf16.msra.mxu0 %v2260_v57  ;;  %v480_v11 = vpack.c.bf16 %v449_v8, %v448_v7 }
  0x30   : > { %437 = vst.msk [vmem:[#allocation2 + $0x111] sm:$0xff] %vm373_vm1, %v362_v21  ;;  %v525_v43 = vld [vmem:[#allocation2 + $0x151] sm:$0xff]  ;;  %v3118_v46 = vpack.c.bf16 %v518_v41, %v517_v40  ;;  %v1051_v13 = vld [vmem:[#allocation2 + $0x20] sm:$0xff] }
  0x31   : > { %444 = vst.msk [vmem:[#allocation2 + $0x169] sm:$0xff] %vm373_vm1, %v369_v25  ;;  %v526_v44 = vld [vmem:[#allocation2 + $0x159] sm:$0xff] }
  0x32   : > { %2690 = vmatmul.msk.bf16.gmra.mxu1 %vm373_vm1, %v3083_v27  ;;  %445 = vst.msk [vmem:[#allocation2 + $0x171] sm:$0xff] %vm373_vm1, %v370_v2  ;;  %v501_v34 = vld [vmem:[#allocation2 + $0x31] sm:$0xff]  ;;  %v3126_v47 = vpack.c.bf16 %v526_v44, %v525_v43  ;;  %v830_v16 = vld [vmem:[#allocation2 + $0x1a] sm:$0xff] }
  0x33   : > { %420 = vst.msk [vmem:[#allocation2 + $0x49] sm:$0xff] %vm373_vm1, %v345_v31  ;;  %v502_v35 = vld [vmem:[#allocation2 + $0x39] sm:$0xff]  ;;  %v1057_v31 = vld [vmem:[#allocation2 + $0x68] sm:$0xff] }
  0x34   : > { %2694 = vmatmul.msk.bf16.gmra.mxu2 %vm373_vm1, %v3089_v32  ;;  %421 = vst.msk [vmem:[#allocation2 + $0x51] sm:$0xff] %vm373_vm1, %v346_v33  ;;  %v3104_v36 = vpack.c.bf16 %v502_v35, %v501_v34  ;;  %v511_v59 = vld [vmem:[#allocation2 + $0xa9] sm:$0xff]  ;;  %v1050_v12 = vld [vmem:[#allocation2 + $0x18] sm:$0xff]  ;;  %v1059_v40 = vld [vmem:[#allocation2 + $0x80] sm:$0xff] }
  0x35   : > { %385 = vst.msk [vmem:[#allocation2 + $0x30] sm:$0x1] %vm383_vm3, %v2864_v6  ;;  %v512_v60 = vld [vmem:[#allocation2 + $0xb1] sm:$0xff]  ;;  %v1082_v15 = vpack.c.bf16 %v1051_v13, %v1050_v12  ;;  %v838_v51 = vld [vmem:[#allocation2 + $0x7a] sm:$0xff] }
  0x36   : > { %2698 = vmatmul.msk.bf16.gmra.mxu3 %vm373_vm1, %v3095_v4  ;;  %386 = vst.msk [vmem:[#allocation2 + $0x48] sm:$0x1] %vm383_vm3, %v2864_v6  ;;  %v519_v61 = vld [vmem:[#allocation2 + $0x109] sm:$0xff]  ;;  %v3174_v63 = vpack.c.bf16 %v512_v60, %v511_v59  ;;  %v1053_v18 = vld [vmem:[#allocation2 + $0x38] sm:$0xff] }
  0x37   : > { %387 = vst.msk [vmem:[#allocation2 + $0x60] sm:$0x1] %vm383_vm3, %v2864_v6  ;;  %v520_v62 = vld [vmem:[#allocation2 + $0x111] sm:$0xff] }
  0x38   : > { %388 = vst.msk [vmem:[#allocation2 + $0x78] sm:$0x1] %vm383_vm3, %v2864_v6  ;;  %v527_v0 = vld [vmem:[#allocation2 + $0x169] sm:$0xff]  ;;  %v3182_v3 = vpack.c.bf16 %v520_v62, %v519_v61  ;;  %v832_v21 = vld [vmem:[#allocation2 + $0x32] sm:$0xff] }
  0x39   : > { %389 = vst.msk [vmem:[#allocation2 + $0x90] sm:$0x1] %vm383_vm3, %v2864_v6  ;;  %v528_v1 = vld [vmem:[#allocation2 + $0x171] sm:$0xff] }
  0x3a   : > { %390 = vst.msk [vmem:[#allocation2 + $0xa8] sm:$0x1] %vm383_vm3, %v2864_v6  ;;  %v503_v48 = vld [vmem:[#allocation2 + $0x49] sm:$0xff]  ;;  %v3190_v5 = vpack.c.bf16 %v528_v1, %v527_v0  ;;  %v1061_v56 = vld [vmem:[#allocation2 + $0x98] sm:$0xff] }
  0x3b   : > { %391 = vst.msk [vmem:[#allocation2 + $0xc0] sm:$0x1] %vm383_vm3, %v2864_v6  ;;  %v504_v49 = vld [vmem:[#allocation2 + $0x51] sm:$0xff] }
  0x3c   : > { %392 = vst.msk [vmem:[#allocation2 + $0xd8] sm:$0x1] %vm383_vm3, %v2864_v6  ;;  %v3164_v58 = vpack.c.bf16 %v504_v49, %v503_v48  ;;  %v1055_v24 = vld [vmem:[#allocation2 + $0x50] sm:$0xff] }
  0x3d   : > { %393 = vst.msk [vmem:[#allocation2 + $0xf0] sm:$0x1] %vm383_vm3, %v2864_v6  ;;  %v1054_v23 = vld [vmem:[#allocation2 + $0x48] sm:$0xff]  ;;  %v840_v7 = vld [vmem:[#allocation2 + $0x92] sm:$0xff] }
  0x3e   : > { %2687 = vmatmul.msk.bf16.gmra.mxu0 %vm373_vm1, %v3104_v36  ;;  %394 = vst.msk [vmem:[#allocation2 + $0x108] sm:$0x1] %vm383_vm3, %v2864_v6  ;;  %v3238_v26 = vpack.c.bf16 %v1055_v24, %v1054_v23  ;;  %v834_v2 = vld [vmem:[#allocation2 + $0x4a] sm:$0xff]  ;;  %v1056_v29 = vld [vmem:[#allocation2 + $0x60] sm:$0xff] }
  0x3f   : > { %395 = vst.msk [vmem:[#allocation2 + $0x120] sm:$0x1] %vm383_vm3, %v2864_v6  ;;  %v3250_v34 = vpack.c.bf16 %v1057_v31, %v1056_v29  ;;  %v1058_v39 = vld [vmem:[#allocation2 + $0x78] sm:$0xff]  ;;  %v1063_v12 = vld [vmem:[#allocation2 + $0xb0] sm:$0xff] }
  0x40   : > { %396 = vst.msk [vmem:[#allocation2 + $0x138] sm:$0x1] %vm383_vm3, %v2864_v6  ;;  %v3268_v44 = vpack.c.bf16 %v1059_v40, %v1058_v39  ;;  %v1060_v55 = vld [vmem:[#allocation2 + $0x90] sm:$0xff] }
  0x41   : > { %397 = vst.msk [vmem:[#allocation2 + $0x150] sm:$0x1] %vm383_vm3, %v2864_v6  ;;  %v3294_v60 = vpack.c.bf16 %v1061_v56, %v1060_v55 }
  0x42   : > { %2691 = vmatmul.msk.bf16.gmra.mxu1 %vm373_vm1, %v3110_v42  ;;  %398 = vst.msk [vmem:[#allocation2 + $0x168] sm:$0x1] %vm383_vm3, %v2864_v6 }
  0x43   : > { %399 = vst.msk [vmem:[#allocation2 + $0x180] sm:$0x1] %vm383_vm3, %v2864_v6 }
  0x44   : > { %2695 = vmatmul.msk.bf16.gmra.mxu2 %vm373_vm1, %v3118_v46  ;;  %400 = vst.msk [vmem:[#allocation2 + $0x29] sm:$0x1] %vm383_vm3, %v2864_v6 }
  0x45   : > { %401 = vst.msk [vmem:[#allocation2 + $0x41] sm:$0x1] %vm383_vm3, %v2864_v6 }
  0x46   : > { %2699 = vmatmul.msk.bf16.gmra.mxu3 %vm373_vm1, %v3126_v47  ;;  %402 = vst.msk [vmem:[#allocation2 + $0x59] sm:$0x1] %vm383_vm3, %v2864_v6 }
  0x47   : > { %403 = vst.msk [vmem:[#allocation2 + $0x71] sm:$0x1] %vm383_vm3, %v2864_v6 }
  0x48   : > { %404 = vst.msk [vmem:[#allocation2 + $0x89] sm:$0x1] %vm383_vm3, %v2864_v6 }
  0x49   : > { %405 = vst.msk [vmem:[#allocation2 + $0xa1] sm:$0x1] %vm383_vm3, %v2864_v6 }
  0x4a   : > { %406 = vst.msk [vmem:[#allocation2 + $0xb9] sm:$0x1] %vm383_vm3, %v2864_v6 }
  0x4b   : > { %407 = vst.msk [vmem:[#allocation2 + $0xd1] sm:$0x1] %vm383_vm3, %v2864_v6  ;;  %v831_v17 = vld [vmem:[#allocation2 + $0x22] sm:$0xff] }
  0x4c   : > { %408 = vst.msk [vmem:[#allocation2 + $0xe9] sm:$0x1] %vm383_vm3, %v2864_v6  ;;  %v3223_v19 = vpack.c.bf16 %v831_v17, %v830_v16  ;;  %v833_v22 = vld [vmem:[#allocation2 + $0x3a] sm:$0xff] }
  0x4d   : > { %409 = vst.msk [vmem:[#allocation2 + $0x101] sm:$0x1] %vm383_vm3, %v2864_v6  ;;  %v3234_v25 = vpack.c.bf16 %v833_v22, %v832_v21  ;;  %v835_v28 = vld [vmem:[#allocation2 + $0x52] sm:$0xff]  ;;  %v842_v21 = vld [vmem:[#allocation2 + $0xaa] sm:$0xff] }
  0x4e   : > { %2688 = vmatmul.msk.bf16.gmra.mxu0 %vm373_vm1, %v3164_v58  ;;  %410 = vst.msk [vmem:[#allocation2 + $0x119] sm:$0x1] %vm383_vm3, %v2864_v6  ;;  %v3246_v33 = vpack.c.bf16 %v835_v28, %v834_v2  ;;  %v837_v37 = vld [vmem:[#allocation2 + $0x6a] sm:$0xff]  ;;  %v1064_v2 = vld [vmem:[#allocation2 + $0xc0] sm:$0xff] }
  0x4f   : > { %411 = vst.msk [vmem:[#allocation2 + $0x131] sm:$0x1] %vm383_vm3, %v2864_v6  ;;  %v839_v52 = vld [vmem:[#allocation2 + $0x82] sm:$0xff] }
  0x50   : > { %412 = vst.msk [vmem:[#allocation2 + $0x149] sm:$0x1] %vm383_vm3, %v2864_v6  ;;  %v3288_v57 = vpack.c.bf16 %v839_v52, %v838_v51  ;;  %v841_v8 = vld [vmem:[#allocation2 + $0x9a] sm:$0xff]  ;;  %v1065_v28 = vld [vmem:[#allocation2 + $0xc8] sm:$0xff] }
  0x51   : > { %413 = vst.msk [vmem:[#allocation2 + $0x161] sm:$0x1] %vm383_vm3, %v2864_v6  ;;  %v3316_v13 = vpack.c.bf16 %v841_v8, %v840_v7  ;;  %v843_v22 = vld [vmem:[#allocation2 + $0xb2] sm:$0xff]  ;;  %v844_v52 = vld [vmem:[#allocation2 + $0xc2] sm:$0xff] }
  0x52   : > { %2692 = vmatmul.msk.bf16.gmra.mxu1 %vm373_vm1, %v3174_v63  ;;  %414 = vst.msk [vmem:[#allocation2 + $0x179] sm:$0x1] %vm383_vm3, %v2864_v6  ;;  %v3344_v29 = vpack.c.bf16 %v843_v22, %v842_v21  ;;  %v845_v55 = vld [vmem:[#allocation2 + $0xca] sm:$0xff]  ;;  %v1066_v8 = vld [vmem:[#allocation2 + $0xd8] sm:$0xff] }
  0x53   : > { %415 = vst.msk [vmem:[#allocation2 + $0x191] sm:$0x1] %vm383_vm3, %v2864_v6  ;;  %v1052_v6 = vld [vmem:[#allocation2 + $0x30] sm:$0xff] }
  0x54   : > { %2696 = vmatmul.msk.bf16.gmra.mxu2 %vm373_vm1, %v3182_v3 }
  0x56   : > { %2700 = vmatmul.msk.bf16.gmra.mxu3 %vm373_vm1, %v3190_v5 }
  0x5e   : > { %2752 = vmatmul.msk.bf16.vlgmr.msrb.gmra.mxu0 %vm373_vm1, %v3077_v20  ;;  %v3226_v20 = vpack.c.bf16 %v1053_v18, %v1052_v6 }
  0x62   : > { %2701 = vmatmul.msk.bf16.vlgmr.msrb.gmra.mxu1 %vm373_vm1, %v480_v11  ;;  %v1062_v11 = vld [vmem:[#allocation2 + $0xa8] sm:$0xff] }
  0x64   : > { %2718 = vmatmul.msk.bf16.vlgmr.msrb.gmra.mxu2 %vm373_vm1, %v860_v14 }
  0x66   : > { %2735 = vmatmul.msk.bf16.vlgmr.msrb.gmra.mxu3 %vm373_vm1, %v1082_v15 }
  0x6e   : > { %2753 = vmatmul.msk.bf16.gmra.mxu0 %vm373_vm1, %v3104_v36  ;;  %v836_v36 = vld [vmem:[#allocation2 + $0x62] sm:$0xff] }
  0x6f   : > { %v3262_v41 = vpack.c.bf16 %v837_v37, %v836_v36  ;;  %v3350_v36 = vpack.c.bf16 %v1065_v28, %v1064_v2 }
  0x71   : > { %3851 = vst [vmem:[#allocation8_spill] sm:$0xff] %v3350_v36 }
  0x72   : > { %2702 = vmatmul.msk.bf16.gmra.mxu1 %vm373_vm1, %v1082_v15  ;;  %v3322_v15 = vpack.c.bf16 %v1063_v12, %v1062_v11  ;;  %v1067_v11 = vld [vmem:[#allocation2 + $0xe0] sm:$0xff]  ;;  %v3368_v12 = vpack.c.bf16 %v845_v55, %v844_v52 }
  0x73   : > { %v3374_v22 = vpack.c.bf16 %v1067_v11, %v1066_v8  ;;  %v846_v8 = vld [vmem:[#allocation2 + $0xda] sm:$0xff]  ;;  %v847_v11 = vld [vmem:[#allocation2 + $0xe2] sm:$0xff] }
  0x74   : > { %2719 = vmatmul.msk.bf16.gmra.mxu2 %vm373_vm1, %v3223_v19  ;;  %3848 = vst [vmem:[#allocation5_spill] sm:$0xff] %v3322_v15 }
  0x75   : > { %3853 = vst [vmem:[#allocation10_spill] sm:$0xff] %v3368_v12 }
  0x76   : > { %2736 = vmatmul.msk.bf16.gmra.mxu3 %vm373_vm1, %v3226_v20 }
  0x7e   : > { %2754 = vmatmul.msk.bf16.gmra.mxu0 %vm373_vm1, %v3164_v58 }
  0x82   : > { %2703 = vmatmul.msk.bf16.gmra.mxu1 %vm373_vm1, %v3226_v20 }
  0x84   : > { %2720 = vmatmul.msk.bf16.gmra.mxu2 %vm373_vm1, %v3234_v25 }
  0x86   : > { %2737 = vmatmul.msk.bf16.gmra.mxu3 %vm373_vm1, %v3238_v26 }
  0x8e   : > { %2755 = vmatmul.msk.bf16.gmra.mxu0 %vm373_vm1, %v3025_v30 }
  0x92   : > { %2704 = vmatmul.msk.bf16.gmra.mxu1 %vm373_vm1, %v3238_v26 }
  0x94   : > { %2721 = vmatmul.msk.bf16.gmra.mxu2 %vm373_vm1, %v3246_v33 }
  0x96   : > { %2738 = vmatmul.msk.bf16.gmra.mxu3 %vm373_vm1, %v3250_v34 }
  0x97   : > { %v3256_v35 = vpop.f32.mrf.mxu0 }
  0x9e   : > { %2756 = vmatmul.msk.bf16.gmra.mxu0 %vm373_vm1, %v3083_v27 }
  0x9f   : > { %v3260_v30 = vpop.f32.mrf.mxu1  ;;  %v3264_v43 = vpop.f32.mrf.mxu0 }
  0xa2   : > { %2705 = vmatmul.msk.bf16.gmra.mxu1 %vm373_vm1, %v3250_v34 }
  0xa4   : > { %2722 = vmatmul.msk.bf16.gmra.mxu2 %vm373_vm1, %v3262_v41 }
  0xa6   : > { %2739 = vmatmul.msk.bf16.gmra.mxu3 %vm373_vm1, %v3268_v44 }
  0xa7   : > { %v3274_v27 = vpop.f32.mrf.mxu2  ;;  %v3276_v48 = vpop.f32.mrf.mxu1 }
  0xa9   : > { %v3278_v49 = vpop.f32.mrf.mxu3 }
  0xab   : > { %v3280_v50 = vpop.f32.mrf.mxu0 }
  0xae   : > { %2757 = vmatmul.msk.bf16.gmra.mxu0 %vm373_vm1, %v3110_v42 }
  0xaf   : > { %v3284_v53 = vpop.f32.mrf.mxu2  ;;  %v3286_v54 = vpop.f32.mrf.mxu1 }
  0xb1   : > { %v3290_v59 = vpop.f32.mrf.mxu3 }
  0xb2   : > { %2706 = vmatmul.msk.bf16.gmra.mxu1 %vm373_vm1, %v3268_v44 }
  0xb3   : > { %v3296_v61 = vpop.f32.mrf.mxu0 }
  0xb4   : > { %2723 = vmatmul.msk.bf16.gmra.mxu2 %vm373_vm1, %v3288_v57 }
  0xb6   : > { %2740 = vmatmul.msk.bf16.gmra.mxu3 %vm373_vm1, %v3294_v60 }
  0xb7   : > { %v3302_v42 = vpop.f32.mrf.mxu2  ;;  %v3304_v62 = vpop.f32.mrf.mxu1 }
  0xb9   : > { %v3306_v0 = vpop.f32.mrf.mxu3 }
  0xba   : > { %3846 = vst [vmem:[#allocation3_spill] sm:$0xff] %v3306_v0 }
  0xbb   : > { %v3308_v1 = vpop.f32.mrf.mxu0 }
  0xbe   : > { %2758 = vmatmul.msk.bf16.gmra.mxu0 %vm373_vm1, %v3174_v63 }
  0xbf   : > { %v3312_v9 = vpop.f32.mrf.mxu2  ;;  %v3314_v10 = vpop.f32.mrf.mxu1 }
  0xc1   : > { %v3318_v14 = vpop.f32.mrf.mxu3 }
  0xc2   : > { %3847 = vst [vmem:[#allocation4_spill] sm:$0xff] %v3318_v14  ;;  %2707 = vmatmul.msk.bf16.gmra.mxu1 %vm373_vm1, %v3294_v60  ;;  %v1069_v14 = vld [vmem:[#allocation2 + $0xf8] sm:$0xff] }
  0xc3   : > { %v3324_v16 = vpop.f32.mrf.mxu0 }
  0xc4   : > { %2724 = vmatmul.msk.bf16.gmra.mxu2 %vm373_vm1, %v3316_v13 }
  0xc6   : > { %2741 = vmatmul.msk.bf16.gmra.mxu3 %vm373_vm1, %v3322_v15 }
  0xc7   : > { %v3330_v63 = vpop.f32.mrf.mxu2  ;;  %v3332_v17 = vpop.f32.mrf.mxu1 }
  0xc9   : > { %v3334_v6 = vpop.f32.mrf.mxu3 }
  0xca   : > { %3849 = vst [vmem:[#allocation6_spill] sm:$0xff] %v3334_v6 }
  0xcb   : > { %v3336_v18 = vpop.f32.mrf.mxu0 }
  0xce   : > { %2759 = vmatmul.msk.bf16.gmra.mxu0 %vm373_vm1, %v3034_v38 }
  0xcf   : > { %v3340_v23 = vpop.f32.mrf.mxu2  ;;  %v3342_v24 = vpop.f32.mrf.mxu1 }
  0xd1   : > { %v3346_v31 = vpop.f32.mrf.mxu3 }
  0xd2   : > { %3850 = vst [vmem:[#allocation7_spill] sm:$0xff] %v3346_v31  ;;  %2708 = vmatmul.msk.bf16.gmra.mxu1 %vm373_vm1, %v3322_v15 }
  0xd3   : > { %v3352_v37 = vpop.f32.mrf.mxu0 }
  0xd4   : > { %2725 = vmatmul.msk.bf16.gmra.mxu2 %vm373_vm1, %v3344_v29 }
  0xd6   : > { %2742 = vmatmul.msk.bf16.gmra.mxu3 %vm373_vm1, %v3350_v36 }
  0xd7   : > { %v3358_v38 = vpop.f32.mrf.mxu2  ;;  %v3360_v39 = vpop.f32.mrf.mxu1 }
  0xd9   : > { %v3362_v40 = vpop.f32.mrf.mxu3 }
  0xda   : > { %3852 = vst [vmem:[#allocation9_spill] sm:$0xff] %v3362_v40 }
  0xdb   : > { %v1382_v51 = vpop.f32.mrf.mxu0 }
  0xde   : > { %2760 = vmatmul.msk.bf16.gmra.mxu0 %vm373_vm1, %v3089_v32 }
  0xdf   : > { %v3366_v56 = vpop.f32.mrf.mxu2  ;;  %v748_v7 = vpop.f32.mrf.mxu1 }
  0xe0   : > { %v749_v32 = vadd.f32 %v748_v7, %v3256_v35  ;;  %v1068_v7 = vld [vmem:[#allocation2 + $0xf0] sm:$0xff] }
  0xe1   : > { %v3370_v21 = vpop.f32.mrf.mxu3 }
  0xe2   : > { %3854 = vst [vmem:[#allocation11_spill] sm:$0xff] %v3370_v21  ;;  %2709 = vmatmul.msk.bf16.gmra.mxu1 %vm373_vm1, %v3350_v36 }
  0xe3   : > { %v1384_v2 = vpop.f32.mrf.mxu0 }
  0xe4   : > { %2726 = vmatmul.msk.bf16.gmra.mxu2 %vm373_vm1, %v3368_v12 }
  0xe6   : > { %2743 = vmatmul.msk.bf16.gmra.mxu3 %vm373_vm1, %v3374_v22 }
  0xe7   : > { %v938_v28 = vpop.f32.mrf.mxu2  ;;  %v750_v40 = vpop.f32.mrf.mxu1 }
  0xe8   : > { %v1018_v52 = vadd.f32 %v938_v28, %v749_v32  ;;  %v751_v55 = vadd.f32 %v750_v40, %v3264_v43  ;;  %v3387_v32 = vpack.c.bf16 %v847_v11, %v846_v8  ;;  %v849_v11 = vld [vmem:[#allocation2 + $0xfa] sm:$0xff] }
  0xe9   : > { %v1160_v21 = vpop.f32.mrf.mxu3 }
  0xea   : > { %v1240_v31 = vadd.f32 %v1160_v21, %v1018_v52 }
  0xeb   : > { %v1387_v6 = vpop.f32.mrf.mxu0 }
  0xec   : > { %v3382_v36 = vadd.f32 %v1382_v51, %v1240_v31  ;;  %v3391_v31 = vpack.c.bf16 %v1069_v14, %v1068_v7  ;;  %v848_v14 = vld [vmem:[#allocation2 + $0xf2] sm:$0xff]  ;;  %v1070_v7 = vld [vmem:[#allocation2 + $0x108] sm:$0xff] }
  0xee   : > { %2761 = vmatmul.msk.bf16.gmra.mxu0 %vm373_vm1, %v3118_v46 }
  0xef   : > { %v940_v12 = vpop.f32.mrf.mxu2  ;;  %v753_v35 = vpop.f32.mrf.mxu1 }
  0xf0   : > { %v1019_v0 = vadd.f32 %v940_v12, %v751_v55  ;;  %v754_v15 = vadd.f32 %v753_v35, %v3280_v50 }
  0xf1   : > { %v1162_v43 = vpop.f32.mrf.mxu3 }
  0xf2   : > { %v1241_v40 = vadd.f32 %v1162_v43, %v1019_v0  ;;  %2710 = vmatmul.msk.bf16.gmra.mxu1 %vm373_vm1, %v3374_v22  ;;  %v1071_v43 = vld [vmem:[#allocation2 + $0x110] sm:$0xff] }
  0xf3   : > { %v1389_v51 = vpop.f32.mrf.mxu0 }
  0xf4   : > { %2727 = vmatmul.msk.bf16.gmra.mxu2 %vm373_vm1, %v3387_v32  ;;  %v3395_v46 = vadd.f32 %v1384_v2, %v1241_v40 }
  0xf6   : > { %3855 = vst [vmem:[#allocation12_spill] sm:$0xff] %v3395_v46  ;;  %2744 = vmatmul.msk.bf16.gmra.mxu3 %vm373_vm1, %v3391_v31 }
  0xf7   : > { %v943_v12 = vpop.f32.mrf.mxu2  ;;  %v755_v50 = vpop.f32.mrf.mxu1 }
  0xf8   : > { %v1020_v21 = vadd.f32 %v943_v12, %v754_v15  ;;  %v756_v28 = vadd.f32 %v755_v50, %v3296_v61  ;;  %v3405_v15 = vpack.c.bf16 %v849_v11, %v848_v14 }
  0xf9   : > { %v1165_v0 = vpop.f32.mrf.mxu3 }
  0xfa   : > { %v1242_v52 = vadd.f32 %v1165_v0, %v1020_v21 }
  0xfb   : > { %v1392_v55 = vpop.f32.mrf.mxu0 }
  0xfc   : > { %v3400_v8 = vadd.f32 %v1387_v6, %v1242_v52  ;;  %v3409_v6 = vpack.c.bf16 %v1071_v43, %v1070_v7  ;;  %v851_v7 = vld [vmem:[#allocation2 + $0x112] sm:$0xff] }
  0xfe   : > { %2762 = vmatmul.msk.bf16.gmra.mxu0 %vm373_vm1, %v3182_v3 }
  0xff   : > { %v945_v2 = vpop.f32.mrf.mxu2  ;;  %v758_v35 = vpop.f32.mrf.mxu1 }
 0x100   : > { %v1021_v40 = vadd.f32 %v945_v2, %v756_v28  ;;  %v759_v46 = vadd.f32 %v758_v35, %v3308_v1  ;;  %v850_v35 = vld [vmem:[#allocation2 + $0x10a] sm:$0xff] }
 0x101   : > { %v1167_v61 = vpop.f32.mrf.mxu3 }
 0x102   : > { %v1243_v12 = vadd.f32 %v1167_v61, %v1021_v40  ;;  %2711 = vmatmul.msk.bf16.gmra.mxu1 %vm373_vm1, %v3391_v31  ;;  %v1072_v40 = vld [vmem:[#allocation2 + $0x120] sm:$0xff]  ;;  %v1073_v61 = vld [vmem:[#allocation2 + $0x128] sm:$0xff] }
 0x103   : > { %v1394_v50 = vpop.f32.mrf.mxu0 }
 0x104   : > { %2728 = vmatmul.msk.bf16.gmra.mxu2 %vm373_vm1, %v3405_v15  ;;  %v3413_v3 = vadd.f32 %v1389_v51, %v1243_v12 }
 0x106   : > { %3856 = vst [vmem:[#allocation13_spill] sm:$0xff] %v3413_v3  ;;  %2745 = vmatmul.msk.bf16.gmra.mxu3 %vm373_vm1, %v3409_v6 }
 0x107   : > { %v948_v21 = vpop.f32.mrf.mxu2  ;;  %v760_v1 = vpop.f32.mrf.mxu1 }
 0x108   : > { %v1022_v28 = vadd.f32 %v948_v21, %v759_v46  ;;  %v761_v0 = vadd.f32 %v760_v1, %v3324_v16  ;;  %v3423_v46 = vpack.c.bf16 %v851_v7, %v850_v35 }
 0x109   : > { %v1170_v52 = vpop.f32.mrf.mxu3 }
 0x10a   : > { %v1244_v14 = vadd.f32 %v1170_v52, %v1022_v28 }
 0x10b   : > { %v1397_v11 = vpop.f32.mrf.mxu0 }
 0x10c   : > { %v3418_v2 = vadd.f32 %v1392_v55, %v1244_v14  ;;  %v3427_v55 = vpack.c.bf16 %v1073_v61, %v1072_v40  ;;  %v853_v40 = vld [vmem:[#allocation2 + $0x12a] sm:$0xff] }
 0x10e   : > { %2763 = vmatmul.msk.bf16.gmra.mxu0 %vm373_vm1, %v3042_v45 }
 0x10f   : > { %v950_v51 = vpop.f32.mrf.mxu2  ;;  %v763_v43 = vpop.f32.mrf.mxu1 }
 0x110   : > { %v1023_v12 = vadd.f32 %v950_v51, %v761_v0  ;;  %v764_v3 = vadd.f32 %v763_v43, %v3336_v18  ;;  %v852_v43 = vld [vmem:[#allocation2 + $0x122] sm:$0xff] }
 0x111   : > { %v1172_v16 = vpop.f32.mrf.mxu3 }
 0x112   : > { %v1245_v21 = vadd.f32 %v1172_v16, %v1023_v12  ;;  %2712 = vmatmul.msk.bf16.gmra.mxu1 %vm373_vm1, %v3409_v6  ;;  %v1074_v12 = vld [vmem:[#allocation2 + $0x138] sm:$0xff]  ;;  %v1075_v16 = vld [vmem:[#allocation2 + $0x140] sm:$0xff] }
 0x113   : > { %v1399_v1 = vpop.f32.mrf.mxu0 }
 0x114   : > { %2729 = vmatmul.msk.bf16.gmra.mxu2 %vm373_vm1, %v3423_v46  ;;  %v3431_v45 = vadd.f32 %v1394_v50, %v1245_v21 }
 0x116   : > { %3857 = vst [vmem:[#allocation14_spill] sm:$0xff] %v3431_v45  ;;  %2746 = vmatmul.msk.bf16.gmra.mxu3 %vm373_vm1, %v3427_v55 }
 0x117   : > { %v953_v28 = vpop.f32.mrf.mxu2  ;;  %v765_v18 = vpop.f32.mrf.mxu1 }
 0x118   : > { %v1024_v0 = vadd.f32 %v953_v28, %v764_v3  ;;  %v766_v52 = vadd.f32 %v765_v18, %v3352_v37  ;;  %v3440_v3 = vpack.c.bf16 %v853_v40, %v852_v43 }
 0x119   : > { %v1175_v14 = vpop.f32.mrf.mxu3 }
 0x11a   : > { %v1246_v35 = vadd.f32 %v1175_v14, %v1024_v0  ;;  %v268_v14 = vld [vmem:[%s2940_s10 + $0xf8] sm:$0xff] }
 0x11b   : > { %v1402_v7 = vpop.f32.mrf.mxu0 }
 0x11c   : > { %v3436_v51 = vadd.f32 %v1397_v11, %v1246_v35  ;;  %v3444_v11 = vpack.c.bf16 %v1075_v16, %v1074_v12 }
 0x11e   : > { %3858 = vst [vmem:[#allocation15_spill] sm:$0xff] %v3436_v51  ;;  %2764 = vmatmul.msk.bf16.gmra.mxu0 %vm373_vm1, %v3095_v4  ;;  %v267_v4 = vld [vmem:[%s2940_s10 + $0xf0] sm:$0xff] }
 0x11f   : > { %v955_v50 = vpop.f32.mrf.mxu2  ;;  %v768_v61 = vpop.f32.mrf.mxu1 }
 0x120   : > { %v1025_v21 = vadd.f32 %v955_v50, %v766_v52  ;;  %v769_v35 = vadd.f32 %v768_v61, %v3260_v30  ;;  %v2854_v52 = vld [vmem:[%s3837_s1] ss:$0 sm:$0xff] }
 0x121   : > { %v1177_v37 = vpop.f32.mrf.mxu3  ;;  %v303_v43 = vmul.f32 %v2854_v52, %v267_v4  ;;  %v304_v40 = vmul.f32 %v2854_v52, %v268_v14  ;;  %v854_v4 = vld [vmem:[#allocation2 + $0x13a] sm:$0xff]  ;;  %v855_v14 = vld [vmem:[#allocation2 + $0x142] sm:$0xff] }
 0x122   : > { %v1247_v28 = vadd.f32 %v1177_v37, %v1025_v21  ;;  %2713 = vmatmul.msk.bf16.gmra.mxu1 %vm373_vm1, %v3427_v55 }
 0x123   : > { %v1404_v18 = vpop.f32.mrf.mxu0 }
 0x124   : > { %2730 = vmatmul.msk.bf16.gmra.mxu2 %vm373_vm1, %v3440_v3  ;;  %v3448_v0 = vadd.f32 %v1399_v1, %v1247_v28  ;;  %v2855_v1 = vld [vmem:[%s3838_s2] ss:$0 sm:$0xff] }
 0x125   : > { %v339_v21 = vadd.f32 %v2855_v1, %v303_v43  ;;  %v340_v37 = vadd.f32 %v2855_v1, %v304_v40  ;;  %v1076_v40 = vld [vmem:[#allocation2 + $0x150] sm:$0xff]  ;;  %v3468_v1 = vpack.c.bf16 %v855_v14, %v854_v4 }
 0x126   : > { %3859 = vst [vmem:[#allocation16_spill] sm:$0xff] %v3448_v0  ;;  %2747 = vmatmul.msk.bf16.gmra.mxu3 %vm373_vm1, %v3444_v11 }
 0x127   : > { %v958_v50 = vpop.f32.mrf.mxu2  ;;  %v770_v12 = vpop.f32.mrf.mxu1  ;;  %v371_v61 = vmax.f32 %v339_v21, 0.0  ;;  %v372_v0 = vmax.f32 %v340_v37, 0.0 }
 0x128   : > { %v1026_v16 = vadd.f32 %v958_v50, %v769_v35  ;;  %v771_v35 = vadd.f32 %v770_v12, %v3276_v48  ;;  %v1077_v50 = vld [vmem:[#allocation2 + $0x158] sm:$0xff] }
 0x129   : > { %v1180_v28 = vpop.f32.mrf.mxu3  ;;  %446 = vst.msk [vmem:[#allocation2 + $0x181] sm:$0xff] %vm373_vm1, %v371_v61 }
 0x12a   : > { %v1248_v30 = vadd.f32 %v1180_v28, %v1026_v16  ;;  %447 = vst.msk [vmem:[#allocation2 + $0x189] sm:$0xff] %vm373_vm1, %v372_v0 }
 0x12b   : > { %v1407_v51 = vpop.f32.mrf.mxu0 }
 0x12c   : > { %v3462_v45 = vadd.f32 %v1402_v7, %v1248_v30  ;;  %v1095_v7 = vpack.c.bf16 %v1077_v50, %v1076_v40  ;;  %v857_v40 = vld [vmem:[#allocation2 + $0x15a] sm:$0xff] }
 0x12e   : > { %3860 = vst [vmem:[#allocation17_spill] sm:$0xff] %v3462_v45  ;;  %2765 = vmatmul.msk.bf16.gmra.mxu0 %vm373_vm1, %v3126_v47 }
 0x12f   : > { %v960_v52 = vpop.f32.mrf.mxu2  ;;  %v773_v43 = vpop.f32.mrf.mxu1 }
 0x130   : > { %v1027_v16 = vadd.f32 %v960_v52, %v771_v35  ;;  %v774_v47 = vadd.f32 %v773_v43, %v3286_v54  ;;  %v856_v52 = vld [vmem:[#allocation2 + $0x152] sm:$0xff]  ;;  %v1078_v54 = vld [vmem:[#allocation2 + $0x168] sm:$0xff] }
 0x131   : > { %v1182_v21 = vpop.f32.mrf.mxu3  ;;  %v1079_v43 = vld [vmem:[#allocation2 + $0x170] sm:$0xff] }
 0x132   : > { %v1249_v37 = vadd.f32 %v1182_v21, %v1027_v16  ;;  %2714 = vmatmul.msk.bf16.gmra.mxu1 %vm373_vm1, %v3444_v11 }
 0x133   : > { %v1409_v28 = vpop.f32.mrf.mxu0 }
 0x134   : > { %2731 = vmatmul.msk.bf16.gmra.mxu2 %vm373_vm1, %v3468_v1  ;;  %v3474_v48 = vadd.f32 %v1404_v18, %v1249_v37  ;;  %v3483_v37 = vpack.c.bf16 %v857_v40, %v856_v52  ;;  %v1303_v52 = vld [vmem:[#allocation2 + $0x189] sm:$0xff] }
 0x136   : > { %3861 = vst [vmem:[#allocation18_spill] sm:$0xff] %v3474_v48  ;;  %2748 = vmatmul.msk.bf16.gmra.mxu3 %vm373_vm1, %v1095_v7 }
 0x137   : > { %v963_v0 = vpop.f32.mrf.mxu2  ;;  %v775_v12 = vpop.f32.mrf.mxu1 }
 0x138   : > { %v1028_v30 = vadd.f32 %v963_v0, %v774_v47  ;;  %v776_v50 = vadd.f32 %v775_v12, %v3304_v62 }
 0x139   : > { %v1185_v61 = vpop.f32.mrf.mxu3 }
 0x13a   : > { %v1250_v4 = vadd.f32 %v1185_v61, %v1028_v30 }
 0x13b   : > { %v1412_v14 = vpop.f32.mrf.mxu0 }
 0x13c   : > { %v3478_v35 = vadd.f32 %v1407_v51, %v1250_v4  ;;  %v1096_v51 = vpack.c.bf16 %v1079_v43, %v1078_v54  ;;  %v1302_v4 = vld [vmem:[#allocation2 + $0x181] sm:$0xff]  ;;  %v858_v43 = vld [vmem:[#allocation2 + $0x16a] sm:$0xff] }
 0x13e   : > { %3862 = vst [vmem:[#allocation19_spill] sm:$0xff] %v3478_v35  ;;  %2766 = vmatmul.msk.bf16.gmra.mxu0 %vm373_vm1, %v3190_v5 }
 0x13f   : > { %v965_v18 = vpop.f32.mrf.mxu2  ;;  %v778_v16 = vpop.f32.mrf.mxu1 }
 0x140   : > { %v1029_v21 = vadd.f32 %v965_v18, %v776_v50  ;;  %v779_v5 = vadd.f32 %v778_v16, %v3314_v10 }
 0x141   : > { %v1187_v47 = vpop.f32.mrf.mxu3 }
 0x142   : > { %v1251_v0 = vadd.f32 %v1187_v47, %v1029_v21  ;;  %2715 = vmatmul.msk.bf16.gmra.mxu1 %vm373_vm1, %v1095_v7  ;;  %v1319_v21 = vpack.c.bf16 %v1303_v52, %v1302_v4  ;;  %v859_v47 = vld [vmem:[#allocation2 + $0x172] sm:$0xff] }
 0x143   : > { %v1414_v30 = vpop.f32.mrf.mxu0  ;;  %v875_v48 = vpack.c.bf16 %v859_v47, %v858_v43 }
 0x144   : > { %2732 = vmatmul.msk.bf16.gmra.mxu2 %vm373_vm1, %v3483_v37  ;;  %v3488_v62 = vadd.f32 %v1409_v28, %v1251_v0  ;;  %v1080_v0 = vld [vmem:[#allocation2 + $0x180] sm:$0xff] }
 0x146   : > { %3863 = vst [vmem:[#allocation20_spill] sm:$0xff] %v3488_v62  ;;  %2749 = vmatmul.msk.bf16.gmra.mxu3 %vm373_vm1, %v1096_v51  ;;  %v1081_v62 = vld [vmem:[#allocation2 + $0x188] sm:$0xff] }
 0x147   : > { %v968_v12 = vpop.f32.mrf.mxu2  ;;  %v780_v61 = vpop.f32.mrf.mxu1 }
 0x148   : > { %v1030_v40 = vadd.f32 %v968_v12, %v779_v5  ;;  %v781_v28 = vadd.f32 %v780_v61, %v3332_v17  ;;  %v1097_v12 = vpack.c.bf16 %v1081_v62, %v1080_v0 }
 0x149   : > { %v1190_v50 = vpop.f32.mrf.mxu3 }
 0x14a   : > { %v1252_v18 = vadd.f32 %v1190_v50, %v1030_v40 }
 0x14b   : > { %v1417_v7 = vpop.f32.mrf.mxu0 }
 0x14c   : > { %v3492_v54 = vadd.f32 %v1412_v14, %v1252_v18 }
 0x14e   : > { %2767 = vmatmul.msk.bf16.gmra.mxu0 %vm373_vm1, %v1319_v21 }
 0x14f   : > { %v970_v10 = vpop.f32.mrf.mxu2  ;;  %v783_v16 = vpop.f32.mrf.mxu1 }
 0x150   : > { %v1031_v35 = vadd.f32 %v970_v10, %v781_v28  ;;  %v784_v17 = vadd.f32 %v783_v16, %v3342_v24 }
 0x151   : > { %v1192_v45 = vpop.f32.mrf.mxu3 }
 0x152   : > { %v1253_v5 = vadd.f32 %v1192_v45, %v1031_v35  ;;  %2716 = vmatmul.msk.bf16.gmra.mxu1 %vm373_vm1, %v1096_v51  ;;  %v1939_v51 = vld [vmem:[#allocation2 + $0x31] sm:$0xff] }
 0x153   : > { %v1419_v4 = vpop.f32.mrf.mxu0 }
 0x154   : > { %2733 = vmatmul.msk.bf16.gmra.mxu2 %vm373_vm1, %v875_v48  ;;  %v3498_v14 = vadd.f32 %v1414_v30, %v1253_v5  ;;  %v1940_v30 = vld [vmem:[#allocation2 + $0x39] sm:$0xff] }
 0x155   : > { %v1971_v28 = vpack.c.bf16 %v1940_v30, %v1939_v51 }
 0x156   : > { %2750 = vmatmul.msk.bf16.gmra.mxu3 %vm373_vm1, %v1097_v12 }
 0x157   : > { %v973_v61 = vpop.f32.mrf.mxu2  ;;  %v785_v52 = vpop.f32.mrf.mxu1 }
 0x158   : > { %v1032_v40 = vadd.f32 %v973_v61, %v784_v17  ;;  %v786_v45 = vadd.f32 %v785_v52, %v3360_v39 }
 0x159   : > { %v1195_v50 = vpop.f32.mrf.mxu3 }
 0x15a   : > { %v1254_v18 = vadd.f32 %v1195_v50, %v1032_v40 }
 0x15b   : > { %v1422_v21 = vpop.f32.mrf.mxu0 }
 0x15c   : > { %v3502_v43 = vadd.f32 %v1417_v7, %v1254_v18 }
 0x15e   : > { %2820 = vmatmul.msk.bf16.vlgmr.msra.gmra.mxu0 %vm373_vm1, %v3234_v25 }
 0x15f   : > { %v975_v48 = vpop.f32.mrf.mxu2  ;;  %v788_v35 = vpop.f32.mrf.mxu1 }
 0x160   : > { %v1033_v24 = vadd.f32 %v975_v48, %v786_v45  ;;  %v789_v39 = vadd.f32 %v788_v35, %v3274_v27 }
 0x161   : > { %v1197_v62 = vpop.f32.mrf.mxu3 }
 0x162   : > { %v1255_v47 = vadd.f32 %v1197_v62, %v1033_v24  ;;  %2769 = vmatmul.msk.bf16.vlgmr.msra.gmra.mxu1 %vm373_vm1, %v3223_v19 }
 0x163   : > { %v1424_v10 = vpop.f32.mrf.mxu0 }
 0x164   : > { %2786 = vmatmul.msk.bf16.vlgmr.msra.gmra.mxu2 %vm373_vm1, %v3226_v20  ;;  %v3511_v7 = vadd.f32 %v1419_v4, %v1255_v47 }
 0x166   : > { %2803 = vmatmul.msk.bf16.vlgmr.msra.gmra.mxu3 %vm373_vm1, %v1971_v28  ;;  %v1943_v28 = vld [vmem:[#allocation2 + $0x61] sm:$0xff] }
 0x167   : > { %v978_v16 = vpop.f32.mrf.mxu2  ;;  %v790_v0 = vpop.f32.mrf.mxu1 }
 0x168   : > { %v1034_v5 = vadd.f32 %v978_v16, %v789_v39  ;;  %v791_v19 = vadd.f32 %v790_v0, %v3284_v53 }
 0x169   : > { %v1200_v12 = vpop.f32.mrf.mxu3 }
 0x16a   : > { %v1256_v17 = vadd.f32 %v1200_v12, %v1034_v5 }
 0x16b   : > { %v1427_v61 = vpop.f32.mrf.mxu0 }
 0x16c   : > { %v3515_v52 = vadd.f32 %v1422_v21, %v1256_v17 }
 0x16e   : > { %2821 = vmatmul.msk.bf16.gmra.mxu0 %vm373_vm1, %v3246_v33 }
 0x16f   : > { %v980_v20 = vpop.f32.mrf.mxu2  ;;  %v793_v4 = vpop.f32.mrf.mxu1 }
 0x170   : > { %v1035_v40 = vadd.f32 %v980_v20, %v791_v19  ;;  %v794_v21 = vadd.f32 %v793_v4, %v3302_v42  ;;  %v1944_v42 = vld [vmem:[#allocation2 + $0x69] sm:$0xff] }
 0x171   : > { %v1202_v50 = vpop.f32.mrf.mxu3  ;;  %v1973_v16 = vpack.c.bf16 %v1944_v42, %v1943_v28 }
 0x172   : > { %v1257_v27 = vadd.f32 %v1202_v50, %v1035_v40  ;;  %2770 = vmatmul.msk.bf16.gmra.mxu1 %vm373_vm1, %v3234_v25 }
 0x173   : > { %v1429_v18 = vpop.f32.mrf.mxu0 }
 0x174   : > { %2787 = vmatmul.msk.bf16.gmra.mxu2 %vm373_vm1, %v3238_v26  ;;  %v3524_v45 = vadd.f32 %v1424_v10, %v1257_v27  ;;  %v1945_v27 = vld [vmem:[#allocation2 + $0x79] sm:$0xff] }
 0x176   : > { %2804 = vmatmul.msk.bf16.gmra.mxu3 %vm373_vm1, %v3164_v58 }
 0x177   : > { %v983_v53 = vpop.f32.mrf.mxu2  ;;  %v795_v48 = vpop.f32.mrf.mxu1 }
 0x178   : > { %v1036_v35 = vadd.f32 %v983_v53, %v794_v21  ;;  %v796_v25 = vadd.f32 %v795_v48, %v3312_v9 }
 0x179   : > { %v1205_v51 = vpop.f32.mrf.mxu3 }
 0x17a   : > { %v1258_v30 = vadd.f32 %v1205_v51, %v1036_v35 }
 0x17b   : > { %v1432_v24 = vpop.f32.mrf.mxu0 }
 0x17c   : > { %v3529_v62 = vadd.f32 %v1427_v61, %v1258_v30 }
 0x17e   : > { %2822 = vmatmul.msk.bf16.gmra.mxu0 %vm373_vm1, %v3262_v41 }
 0x17f   : > { %v985_v26 = vpop.f32.mrf.mxu2  ;;  %v798_v47 = vpop.f32.mrf.mxu1 }
 0x180   : > { %v1037_v10 = vadd.f32 %v985_v26, %v796_v25  ;;  %v799_v9 = vadd.f32 %v798_v47, %v3330_v63 }
 0x181   : > { %v1207_v39 = vpop.f32.mrf.mxu3 }
 0x182   : > { %v1259_v58 = vadd.f32 %v1207_v39, %v1037_v10  ;;  %2771 = vmatmul.msk.bf16.gmra.mxu1 %vm373_vm1, %v3246_v33  ;;  %v1947_v39 = vld [vmem:[#allocation2 + $0x91] sm:$0xff] }
 0x183   : > { %v1434_v0 = vpop.f32.mrf.mxu0 }
 0x184   : > { %2788 = vmatmul.msk.bf16.gmra.mxu2 %vm373_vm1, %v3250_v34  ;;  %v3538_v5 = vadd.f32 %v1429_v18, %v1259_v58  ;;  %v1946_v18 = vld [vmem:[#allocation2 + $0x81] sm:$0xff]  ;;  %v1948_v58 = vld [vmem:[#allocation2 + $0x99] sm:$0xff] }
 0x185   : > { %v1974_v48 = vpack.c.bf16 %v1946_v18, %v1945_v27  ;;  %v1949_v18 = vld [vmem:[#allocation2 + $0xa9] sm:$0xff] }
 0x186   : > { %2805 = vmatmul.msk.bf16.gmra.mxu3 %vm373_vm1, %v1973_v16 }
 0x187   : > { %v988_v12 = vpop.f32.mrf.mxu2  ;;  %v800_v17 = vpop.f32.mrf.mxu1 }
 0x188   : > { %v1038_v61 = vadd.f32 %v988_v12, %v799_v9  ;;  %v801_v33 = vadd.f32 %v800_v17, %v3340_v23  ;;  %v1975_v9 = vpack.c.bf16 %v1948_v58, %v1947_v39  ;;  %v3867_v58 = vld [vmem:[#allocation10_spill] sm:$0xff] }
 0x189   : > { %v1210_v19 = vpop.f32.mrf.mxu3 }
 0x18a   : > { %v1260_v20 = vadd.f32 %v1210_v19, %v1038_v61 }
 0x18b   : > { %v1437_v4 = vpop.f32.mrf.mxu0 }
 0x18c   : > { %v3542_v40 = vadd.f32 %v1432_v24, %v1260_v20 }
 0x18e   : > { %2823 = vmatmul.msk.bf16.gmra.mxu0 %vm373_vm1, %v3288_v57 }
 0x18f   : > { %v990_v34 = vpop.f32.mrf.mxu2  ;;  %v803_v50 = vpop.f32.mrf.mxu1 }
 0x190   : > { %v1039_v63 = vadd.f32 %v990_v34, %v801_v33  ;;  %v804_v23 = vadd.f32 %v803_v50, %v3358_v38 }
 0x191   : > { %v1212_v21 = vpop.f32.mrf.mxu3 }
 0x192   : > { %v1261_v53 = vadd.f32 %v1212_v21, %v1039_v63  ;;  %2772 = vmatmul.msk.bf16.gmra.mxu1 %vm373_vm1, %v3262_v41  ;;  %v1950_v63 = vld [vmem:[#allocation2 + $0xb1] sm:$0xff] }
 0x193   : > { %v1439_v35 = vpop.f32.mrf.mxu0 }
 0x194   : > { %2789 = vmatmul.msk.bf16.gmra.mxu2 %vm373_vm1, %v3268_v44  ;;  %v3551_v51 = vadd.f32 %v1434_v0, %v1261_v53 }
 0x196   : > { %2806 = vmatmul.msk.bf16.gmra.mxu3 %vm373_vm1, %v1974_v48  ;;  %v1976_v48 = vpack.c.bf16 %v1950_v63, %v1949_v18 }
 0x197   : > { %v993_v30 = vpop.f32.mrf.mxu2  ;;  %v805_v24 = vpop.f32.mrf.mxu1 }
 0x198   : > { %v1040_v25 = vadd.f32 %v993_v30, %v804_v23  ;;  %v806_v41 = vadd.f32 %v805_v24, %v3366_v56  ;;  %v3864_v23 = vld [vmem:[#allocation5_spill] sm:$0xff] }
 0x199   : > { %v1215_v26 = vpop.f32.mrf.mxu3 }
 0x19a   : > { %v1262_v47 = vadd.f32 %v1215_v26, %v1040_v25 }
 0x19b   : > { %v1442_v28 = vpop.f32.mrf.mxu0 }
 0x19c   : > { %v3555_v42 = vadd.f32 %v1437_v4, %v1262_v47 }
 0x19e   : > { %2824 = vmatmul.msk.bf16.gmra.mxu0 %vm373_vm1, %v3316_v13 }
 0x19f   : > { %v995_v44 = vpop.f32.mrf.mxu2  ;;  %v808_v10 = vpop.f32.mrf.mxu1 }
 0x1a0   : > { %v1041_v38 = vadd.f32 %v995_v44, %v806_v41  ;;  %v809_v56 = vadd.f32 %v808_v10, %v3278_v49 }
 0x1a1   : > { %v1217_v16 = vpop.f32.mrf.mxu3 }
 0x1a2   : > { %v1263_v0 = vadd.f32 %v1217_v16, %v1041_v38  ;;  %2773 = vmatmul.msk.bf16.gmra.mxu1 %vm373_vm1, %v3288_v57 }
 0x1a3   : > { %v1444_v12 = vpop.f32.mrf.mxu0 }
 0x1a4   : > { %2790 = vmatmul.msk.bf16.gmra.mxu2 %vm373_vm1, %v3294_v60  ;;  %v3564_v17 = vadd.f32 %v1439_v35, %v1263_v0  ;;  %v1951_v0 = vld [vmem:[#allocation2 + $0xc1] sm:$0xff] }
 0x1a6   : > { %2807 = vmatmul.msk.bf16.gmra.mxu3 %vm373_vm1, %v1975_v9  ;;  %v1952_v9 = vld [vmem:[#allocation2 + $0xc9] sm:$0xff] }
 0x1a7   : > { %v998_v61 = vpop.f32.mrf.mxu2  ;;  %v810_v19 = vpop.f32.mrf.mxu1 }
 0x1a8   : > { %v1042_v20 = vadd.f32 %v998_v61, %v809_v56  ;;  %v811_v57 = vadd.f32 %v810_v19, %v3290_v59  ;;  %v3865_v59 = vld [vmem:[#allocation3_spill] sm:$0xff]  ;;  %v1977_v19 = vpack.c.bf16 %v1952_v9, %v1951_v0 }
 0x1a9   : > { %v1220_v4 = vpop.f32.mrf.mxu3 }
 0x1aa   : > { %v1264_v33 = vadd.f32 %v1220_v4, %v1042_v20  ;;  %v3868_v4 = vld [vmem:[#allocation8_spill] sm:$0xff] }
 0x1ab   : > { %v1447_v34 = vpop.f32.mrf.mxu0 }
 0x1ac   : > { %v3568_v50 = vadd.f32 %v1442_v28, %v1264_v33 }
 0x1ae   : > { %2825 = vmatmul.msk.bf16.gmra.mxu0 %vm373_vm1, %v3344_v29 }
 0x1af   : > { %v1000_v60 = vpop.f32.mrf.mxu2  ;;  %v813_v27 = vpop.f32.mrf.mxu1 }
 0x1b0   : > { %v1043_v49 = vadd.f32 %v1000_v60, %v811_v57  ;;  %v814_v24 = vadd.f32 %v813_v27, %v3865_v59  ;;  %v1953_v59 = vld [vmem:[#allocation2 + $0xd9] sm:$0xff] }
 0x1b1   : > { %v1222_v21 = vpop.f32.mrf.mxu3 }
 0x1b2   : > { %v1265_v53 = vadd.f32 %v1222_v21, %v1043_v49  ;;  %2774 = vmatmul.msk.bf16.gmra.mxu1 %vm373_vm1, %v3316_v13  ;;  %v3866_v13 = vld [vmem:[#allocation4_spill] sm:$0xff] }
 0x1b3   : > { %v1449_v35 = vpop.f32.mrf.mxu0 }
 0x1b4   : > { %2791 = vmatmul.msk.bf16.gmra.mxu2 %vm373_vm1, %v3864_v23  ;;  %v3577_v30 = vadd.f32 %v1444_v12, %v1265_v53 }
 0x1b6   : > { %2808 = vmatmul.msk.bf16.gmra.mxu3 %vm373_vm1, %v1976_v48 }
 0x1b7   : > { %v1003_v25 = vpop.f32.mrf.mxu2  ;;  %v815_v26 = vpop.f32.mrf.mxu1 }
 0x1b8   : > { %v1044_v47 = vadd.f32 %v1003_v25, %v814_v24  ;;  %v816_v39 = vadd.f32 %v815_v26, %v3866_v13  ;;  %v1954_v24 = vld [vmem:[#allocation2 + $0xe1] sm:$0xff] }
 0x1b9   : > { %v1225_v28 = vpop.f32.mrf.mxu3  ;;  %v3871_v13 = vld [vmem:[#allocation9_spill] sm:$0xff] }
 0x1ba   : > { %v1266_v41 = vadd.f32 %v1225_v28, %v1044_v47  ;;  %v1978_v28 = vpack.c.bf16 %v1954_v24, %v1953_v59  ;;  %v3873_v24 = vld [vmem:[#allocation12_spill] sm:$0xff] }
 0x1bb   : > { %v1452_v44 = vpop.f32.mrf.mxu0 }
 0x1bc   : > { %v3581_v10 = vadd.f32 %v1447_v34, %v1266_v41  ;;  %v3869_v34 = vld [vmem:[#allocation6_spill] sm:$0xff] }
 0x1be   : > { %2826 = vmatmul.msk.bf16.gmra.mxu0 %vm373_vm1, %v3867_v58 }
 0x1bf   : > { %v1005_v38 = vpop.f32.mrf.mxu2  ;;  %v818_v16 = vpop.f32.mrf.mxu1 }
 0x1c0   : > { %v1045_v12 = vadd.f32 %v1005_v38, %v816_v39  ;;  %v819_v57 = vadd.f32 %v818_v16, %v3869_v34  ;;  %v1956_v34 = vld [vmem:[#allocation2 + $0xf9] sm:$0xff] }
 0x1c1   : > { %v1227_v56 = vpop.f32.mrf.mxu3 }
 0x1c2   : > { %v1267_v61 = vadd.f32 %v1227_v56, %v1045_v12  ;;  %2775 = vmatmul.msk.bf16.gmra.mxu1 %vm373_vm1, %v3344_v29  ;;  %v3870_v29 = vld [vmem:[#allocation7_spill] sm:$0xff] }
 0x1c3   : > { %v1454_v20 = vpop.f32.mrf.mxu0 }
 0x1c4   : > { %2792 = vmatmul.msk.bf16.gmra.mxu2 %vm373_vm1, %v3868_v4  ;;  %v3590_v33 = vadd.f32 %v1449_v35, %v1267_v61  ;;  %v1955_v4 = vld [vmem:[#allocation2 + $0xf1] sm:$0xff] }
 0x1c6   : > { %2809 = vmatmul.msk.bf16.gmra.mxu3 %vm373_vm1, %v1977_v19 }
 0x1c7   : > { %v1008_v60 = vpop.f32.mrf.mxu2  ;;  %v820_v27 = vpop.f32.mrf.mxu1 }
 0x1c8   : > { %v1046_v18 = vadd.f32 %v1008_v60, %v819_v57  ;;  %v821_v48 = vadd.f32 %v820_v27, %v3870_v29 }
 0x1c9   : > { %v1230_v63 = vpop.f32.mrf.mxu3 }
 0x1ca   : > { %v1268_v49 = vadd.f32 %v1230_v63, %v1046_v18  ;;  %v1979_v18 = vpack.c.bf16 %v1956_v34, %v1955_v4 }
 0x1cb   : > { %v1457_v21 = vpop.f32.mrf.mxu0 }
 0x1cc   : > { %v3594_v53 = vadd.f32 %v1452_v44, %v1268_v49 }
 0x1ce   : > { %2827 = vmatmul.msk.bf16.gmra.mxu0 %vm373_vm1, %v3387_v32 }
 0x1cf   : > { %v1010_v23 = vpop.f32.mrf.mxu2  ;;  %v823_v35 = vpop.f32.mrf.mxu1 }
 0x1d0   : > { %v1047_v25 = vadd.f32 %v1010_v23, %v821_v48  ;;  %v824_v39 = vadd.f32 %v823_v35, %v3871_v13 }
 0x1d1   : > { %v1232_v26 = vpop.f32.mrf.mxu3 }
 0x1d2   : > { %v1269_v47 = vadd.f32 %v1232_v26, %v1047_v25  ;;  %2776 = vmatmul.msk.bf16.gmra.mxu1 %vm373_vm1, %v3867_v58  ;;  %v3872_v58 = vld [vmem:[#allocation11_spill] sm:$0xff] }
 0x1d3   : > { %v1459_v41 = vpop.f32.mrf.mxu0 }
 0x1d4   : > { %2793 = vmatmul.msk.bf16.gmra.mxu2 %vm373_vm1, %v3374_v22  ;;  %v3603_v44 = vadd.f32 %v1454_v20, %v1269_v47  ;;  %v1957_v47 = vld [vmem:[#allocation2 + $0x109] sm:$0xff] }
 0x1d6   : > { %2810 = vmatmul.msk.bf16.gmra.mxu3 %vm373_vm1, %v1978_v28  ;;  %v1958_v28 = vld [vmem:[#allocation2 + $0x111] sm:$0xff] }
 0x1d7   : > { %v1013_v38 = vpop.f32.mrf.mxu2  ;;  %v825_v16 = vpop.f32.mrf.mxu1 }
 0x1d8   : > { %v1048_v0 = vadd.f32 %v1013_v38, %v824_v39  ;;  %v826_v19 = vadd.f32 %v825_v16, %v3872_v58  ;;  %v1980_v38 = vpack.c.bf16 %v1958_v28, %v1957_v47 }
 0x1d9   : > { %v1235_v9 = vpop.f32.mrf.mxu3 }
 0x1da   : > { %v1270_v12 = vadd.f32 %v1235_v9, %v1048_v0 }
 0x1db   : > { %v2271_v56 = vpop.f32.mrf.mxu0 }
 0x1dc   : > { %v3607_v61 = vadd.f32 %v1457_v21, %v1270_v12 }
 0x1de   : > { %2828 = vmatmul.msk.bf16.gmra.mxu0 %vm373_vm1, %v3405_v15 }
 0x1df   : > { %v1015_v22 = vpop.f32.mrf.mxu2  ;;  %v1604_v20 = vpop.f32.mrf.mxu1 }
 0x1e0   : > { %v1049_v57 = vadd.f32 %v1015_v22, %v826_v19  ;;  %v1684_v21 = vadd.f32 %v1604_v20, %v3382_v36 }
 0x1e1   : > { %v1237_v60 = vpop.f32.mrf.mxu3 }
 0x1e2   : > { %v1271_v27 = vadd.f32 %v1237_v60, %v1049_v57  ;;  %2777 = vmatmul.msk.bf16.gmra.mxu1 %vm373_vm1, %v3387_v32 }
 0x1e3   : > { %v2273_v63 = vpop.f32.mrf.mxu0 }
 0x1e4   : > { %2794 = vmatmul.msk.bf16.gmra.mxu2 %vm373_vm1, %v3391_v31  ;;  %v3616_v49 = vadd.f32 %v1459_v41, %v1271_v27 }
 0x1e6   : > { %2811 = vmatmul.msk.bf16.gmra.mxu3 %vm373_vm1, %v1979_v18 }
 0x1e7   : > { %v1827_v29 = vpop.f32.mrf.mxu2  ;;  %v1606_v48 = vpop.f32.mrf.mxu1 }
 0x1e8   : > { %v1907_v23 = vadd.f32 %v1827_v29, %v1684_v21  ;;  %v1685_v36 = vadd.f32 %v1606_v48, %v3873_v24  ;;  %v3874_v29 = vld [vmem:[#allocation13_spill] sm:$0xff]  ;;  %v1960_v24 = vld [vmem:[#allocation2 + $0x129] sm:$0xff] }
 0x1e9   : > { %v2049_v35 = vpop.f32.mrf.mxu3 }
 0x1ea   : > { %v2129_v59 = vadd.f32 %v2049_v35, %v1907_v23 }
 0x1eb   : > { %v2276_v32 = vpop.f32.mrf.mxu0 }
 0x1ec   : > { %v2351_v31 = vadd.f32 %v2271_v56, %v2129_v59 }
 0x1ee   : > { %2383 = vst.msk [vmem:[%s3625_s29] sm:$0xff] %vm373_vm1, %v2351_v31  ;;  %2829 = vmatmul.msk.bf16.gmra.mxu0 %vm373_vm1, %v3423_v46  ;;  %v2484_v0 = vmul.f32 %v2351_v31, %v2351_v31  ;;  %v2415_v12 = vsel %vm373_vm1, %v2351_v31, 0.0  ;;  %v1959_v31 = vld [vmem:[#allocation2 + $0x121] sm:$0xff] }
 0x1ef   : > { %v1829_v25 = vpop.f32.mrf.mxu2  ;;  %v1609_v26 = vpop.f32.mrf.mxu1  ;;  %v1981_v28 = vpack.c.bf16 %v1960_v24, %v1959_v31  ;;  %v3876_v24 = vld [vmem:[#allocation15_spill] sm:$0xff] }
 0x1f0   : > { %v1908_v41 = vadd.f32 %v1829_v25, %v1685_v36  ;;  %v1686_v19 = vadd.f32 %v1609_v26, %v3400_v8  ;;  %v2516_v4 = vsel %vm373_vm1, %v2484_v0, 0.0 }
 0x1f1   : > { %v2051_v13 = vpop.f32.mrf.mxu3 }
 0x1f2   : > { %v2130_v39 = vadd.f32 %v2051_v13, %v1908_v41  ;;  %2778 = vmatmul.msk.bf16.gmra.mxu1 %vm373_vm1, %v3405_v15 }
 0x1f3   : > { %v2278_v16 = vpop.f32.mrf.mxu0 }
 0x1f4   : > { %v2352_v9 = vadd.f32 %v2273_v63, %v2130_v39  ;;  %2795 = vmatmul.msk.bf16.gmra.mxu2 %vm373_vm1, %v3409_v6 }
 0x1f6   : > { %2384 = vst.msk [vmem:[%s3625_s29 + $0x8] sm:$0xff] %vm373_vm1, %v2352_v9  ;;  %v2416_v56 = vsel %vm373_vm1, %v2352_v9, 0.0  ;;  %v2485_v58 = vmul.f32 %v2352_v9, %v2352_v9  ;;  %2812 = vmatmul.msk.bf16.gmra.mxu3 %vm373_vm1, %v1980_v38 }
 0x1f7   : > { %v2417_v15 = vadd.f32 %v2416_v56, %v2415_v12  ;;  %v1832_v22 = vpop.f32.mrf.mxu2  ;;  %v1611_v20 = vpop.f32.mrf.mxu1 }
 0x1f8   : > { %v2517_v34 = vsel %vm373_vm1, %v2485_v58, 0.0  ;;  %v1909_v6 = vadd.f32 %v1832_v22, %v1686_v19  ;;  %v1687_v48 = vadd.f32 %v1611_v20, %v3874_v29 }
 0x1f9   : > { %v2518_v57 = vadd.f32 %v2517_v34, %v2516_v4  ;;  %v2054_v60 = vpop.f32.mrf.mxu3  ;;  %v3875_v34 = vld [vmem:[#allocation14_spill] sm:$0xff] }
 0x1fa   : > { %v2131_v27 = vadd.f32 %v2054_v60, %v1909_v6 }
 0x1fb   : > { %v2281_v18 = vpop.f32.mrf.mxu0 }
 0x1fc   : > { %v2353_v63 = vadd.f32 %v2276_v32, %v2131_v27  ;;  %v1961_v27 = vld [vmem:[#allocation2 + $0x139] sm:$0xff] }
 0x1fe   : > { %2385 = vst.msk [vmem:[%s3625_s29 + $0x10] sm:$0xff] %vm373_vm1, %v2353_v63  ;;  %v2418_v21 = vsel %vm373_vm1, %v2353_v63, 0.0  ;;  %v2486_v8 = vmul.f32 %v2353_v63, %v2353_v63  ;;  %2830 = vmatmul.msk.bf16.gmra.mxu0 %vm373_vm1, %v3440_v3  ;;  %v1962_v63 = vld [vmem:[#allocation2 + $0x141] sm:$0xff] }
 0x1ff   : > { %v2419_v23 = vadd.f32 %v2418_v21, %v2417_v15  ;;  %v1834_v35 = vpop.f32.mrf.mxu2  ;;  %v1614_v59 = vpop.f32.mrf.mxu1 }
 0x200   : > { %v2519_v36 = vsel %vm373_vm1, %v2486_v8, 0.0  ;;  %v1910_v25 = vadd.f32 %v1834_v35, %v1687_v48  ;;  %v1688_v0 = vadd.f32 %v1614_v59, %v3418_v2 }
 0x201   : > { %v2520_v32 = vadd.f32 %v2519_v36, %v2518_v57  ;;  %v2056_v26 = vpop.f32.mrf.mxu3 }
 0x202   : > { %v2132_v47 = vadd.f32 %v2056_v26, %v1910_v25  ;;  %2779 = vmatmul.msk.bf16.gmra.mxu1 %vm373_vm1, %v3423_v46 }
 0x203   : > { %v2283_v41 = vpop.f32.mrf.mxu0 }
 0x204   : > { %v2354_v13 = vadd.f32 %v2278_v16, %v2132_v47  ;;  %2796 = vmatmul.msk.bf16.gmra.mxu2 %vm373_vm1, %v3427_v55 }
 0x206   : > { %2386 = vst.msk [vmem:[%s3625_s29 + $0x18] sm:$0xff] %vm373_vm1, %v2354_v13  ;;  %v2420_v39 = vsel %vm373_vm1, %v2354_v13, 0.0  ;;  %v2487_v38 = vmul.f32 %v2354_v13, %v2354_v13  ;;  %2813 = vmatmul.msk.bf16.gmra.mxu3 %vm373_vm1, %v1981_v28 }
 0x207   : > { %v2421_v9 = vadd.f32 %v2420_v39, %v2419_v23  ;;  %v1837_v12 = vpop.f32.mrf.mxu2  ;;  %v1616_v56 = vpop.f32.mrf.mxu1  ;;  %v1982_v23 = vpack.c.bf16 %v1962_v63, %v1961_v27  ;;  %v1518_v39 = vld [vmem:[#allocation2 + $0x13a] sm:$0xff] }
 0x208   : > { %v2521_v46 = vsel %vm373_vm1, %v2487_v38, 0.0  ;;  %v1911_v58 = vadd.f32 %v1837_v12, %v1688_v0  ;;  %v1689_v2 = vadd.f32 %v1616_v56, %v3875_v34  ;;  %v1519_v38 = vld [vmem:[#allocation2 + $0x142] sm:$0xff]  ;;  %v1742_v12 = vld [vmem:[#allocation2 + $0x158] sm:$0xff] }
 0x209   : > { %v2522_v16 = vadd.f32 %v2521_v46, %v2520_v32  ;;  %v2059_v19 = vpop.f32.mrf.mxu3  ;;  %v1964_v34 = vld [vmem:[#allocation2 + $0x159] sm:$0xff] }
 0x20a   : > { %v2133_v15 = vadd.f32 %v2059_v19, %v1911_v58  ;;  %v3877_v58 = vld [vmem:[#allocation16_spill] sm:$0xff]  ;;  %v1538_v19 = vpack.c.bf16 %v1519_v38, %v1518_v39  ;;  %v1743_v39 = vld [vmem:[#allocation2 + $0x168] sm:$0xff]  ;;  %v1744_v38 = vld [vmem:[#allocation2 + $0x170] sm:$0xff] }
 0x20b   : > { %v2286_v55 = vpop.f32.mrf.mxu0 }
 0x20c   : > { %v2355_v22 = vadd.f32 %v2281_v18, %v2133_v15 }
 0x20e   : > { %2387 = vst.msk [vmem:[%s3625_s29 + $0x20] sm:$0xff] %vm373_vm1, %v2355_v22  ;;  %v2422_v20 = vsel %vm373_vm1, %v2355_v22, 0.0  ;;  %v2488_v4 = vmul.f32 %v2355_v22, %v2355_v22  ;;  %2831 = vmatmul.msk.bf16.gmra.mxu0 %vm373_vm1, %v3468_v1 }
 0x20f   : > { %v2423_v6 = vadd.f32 %v2422_v20, %v2421_v9  ;;  %v1839_v57 = vpop.f32.mrf.mxu2  ;;  %v1619_v60 = vpop.f32.mrf.mxu1  ;;  %v1741_v9 = vld [vmem:[#allocation2 + $0x150] sm:$0xff] }
 0x210   : > { %v2523_v21 = vsel %vm373_vm1, %v2488_v4, 0.0  ;;  %v1912_v8 = vadd.f32 %v1839_v57, %v1689_v2  ;;  %v1690_v36 = vadd.f32 %v1619_v60, %v3876_v24  ;;  %v1963_v4 = vld [vmem:[#allocation2 + $0x151] sm:$0xff] }
 0x211   : > { %v2524_v18 = vadd.f32 %v2523_v21, %v2522_v16  ;;  %v2061_v29 = vpop.f32.mrf.mxu3  ;;  %v1983_v63 = vpack.c.bf16 %v1964_v34, %v1963_v4  ;;  %v2188_v24 = vld [vmem:[#allocation2 + $0x172] sm:$0xff]  ;;  %v1762_v4 = vpack.c.bf16 %v1744_v38, %v1743_v39 }
 0x212   : > { %v2134_v48 = vadd.f32 %v2061_v29, %v1912_v8  ;;  %2780 = vmatmul.msk.bf16.gmra.mxu1 %vm373_vm1, %v3440_v3  ;;  %v3878_v29 = vld [vmem:[#allocation17_spill] sm:$0xff]  ;;  %v3881_v39 = vld [vmem:[#allocation20_spill] sm:$0xff] }
 0x213   : > { %v2288_v35 = vpop.f32.mrf.mxu0 }
 0x214   : > { %v2356_v59 = vadd.f32 %v2283_v41, %v2134_v48  ;;  %2797 = vmatmul.msk.bf16.gmra.mxu2 %vm373_vm1, %v3444_v11 }
 0x216   : > { %2388 = vst.msk [vmem:[%s3625_s29 + $0x28] sm:$0xff] %vm373_vm1, %v2356_v59  ;;  %v2424_v1 = vsel %vm373_vm1, %v2356_v59, 0.0  ;;  %v2489_v31 = vmul.f32 %v2356_v59, %v2356_v59  ;;  %2814 = vmatmul.msk.bf16.gmra.mxu3 %vm373_vm1, %v1982_v23 }
 0x217   : > { %v2425_v25 = vadd.f32 %v2424_v1, %v2423_v6  ;;  %v1842_v32 = vpop.f32.mrf.mxu2  ;;  %v1621_v26 = vpop.f32.mrf.mxu1  ;;  %v1761_v6 = vpack.c.bf16 %v1742_v12, %v1741_v9  ;;  %v3879_v12 = vld [vmem:[#allocation18_spill] sm:$0xff] }
 0x218   : > { %v2525_v3 = vsel %vm373_vm1, %v2489_v31, 0.0  ;;  %v1913_v47 = vadd.f32 %v1842_v32, %v1690_v36  ;;  %v1691_v16 = vadd.f32 %v1621_v26, %v3877_v58  ;;  %v2187_v31 = vld [vmem:[#allocation2 + $0x16a] sm:$0xff] }
 0x219   : > { %v2526_v28 = vadd.f32 %v2525_v3, %v2524_v18  ;;  %v2064_v41 = vpop.f32.mrf.mxu3  ;;  %v3693_v3 = vpack.c.bf16 %v2188_v24, %v2187_v31 }
 0x21a   : > { %v2135_v13 = vadd.f32 %v2064_v41, %v1913_v47  ;;  %v1521_v41 = vld [vmem:[#allocation2 + $0x15a] sm:$0xff] }
 0x21b   : > { %v2291_v11 = vpop.f32.mrf.mxu0 }
 0x21c   : > { %v2357_v0 = vadd.f32 %v2286_v55, %v2135_v13 }
 0x21e   : > { %2389 = vst.msk [vmem:[%s3625_s29 + $0x30] sm:$0xff] %vm373_vm1, %v2357_v0  ;;  %v2426_v56 = vsel %vm373_vm1, %v2357_v0, 0.0  ;;  %v2490_v46 = vmul.f32 %v2357_v0, %v2357_v0  ;;  %2832 = vmatmul.msk.bf16.gmra.mxu0 %vm373_vm1, %v3483_v37 }
 0x21f   : > { %v2427_v15 = vadd.f32 %v2426_v56, %v2425_v25  ;;  %v1844_v22 = vpop.f32.mrf.mxu2  ;;  %v1624_v20 = vpop.f32.mrf.mxu1 }
 0x220   : > { %v2527_v55 = vsel %vm373_vm1, %v2490_v46, 0.0  ;;  %v1914_v2 = vadd.f32 %v1844_v22, %v1691_v16  ;;  %v1692_v48 = vadd.f32 %v1624_v20, %v3878_v29  ;;  %v1966_v22 = vld [vmem:[#allocation2 + $0x171] sm:$0xff] }
 0x221   : > { %v2528_v57 = vadd.f32 %v2527_v55, %v2526_v28  ;;  %v2066_v60 = vpop.f32.mrf.mxu3  ;;  %v1520_v28 = vld [vmem:[#allocation2 + $0x152] sm:$0xff] }
 0x222   : > { %v2136_v27 = vadd.f32 %v2066_v60, %v1914_v2  ;;  %2781 = vmatmul.msk.bf16.gmra.mxu1 %vm373_vm1, %v1538_v19  ;;  %v1539_v46 = vpack.c.bf16 %v1521_v41, %v1520_v28  ;;  %v1746_v28 = vld [vmem:[#allocation2 + $0x188] sm:$0xff] }
 0x223   : > { %v2293_v21 = vpop.f32.mrf.mxu0 }
 0x224   : > { %v2358_v8 = vadd.f32 %v2288_v35, %v2136_v27  ;;  %2798 = vmatmul.msk.bf16.gmra.mxu2 %vm373_vm1, %v1761_v6 }
 0x226   : > { %2390 = vst.msk [vmem:[%s3625_s29 + $0x38] sm:$0xff] %vm373_vm1, %v2358_v8  ;;  %v2428_v37 = vsel %vm373_vm1, %v2358_v8, 0.0  ;;  %v2491_v18 = vmul.f32 %v2358_v8, %v2358_v8  ;;  %2815 = vmatmul.msk.bf16.gmra.mxu3 %vm373_vm1, %v1983_v63  ;;  %v3880_v8 = vld [vmem:[#allocation19_spill] sm:$0xff] }
 0x227   : > { %v2429_v23 = vadd.f32 %v2428_v37, %v2427_v15  ;;  %v1847_v59 = vpop.f32.mrf.mxu2  ;;  %v1626_v1 = vpop.f32.mrf.mxu1  ;;  %v1965_v15 = vld [vmem:[#allocation2 + $0x169] sm:$0xff] }
 0x228   : > { %v2529_v36 = vsel %vm373_vm1, %v2491_v18, 0.0  ;;  %v1915_v35 = vadd.f32 %v1847_v59, %v1692_v48  ;;  %v1693_v56 = vadd.f32 %v1626_v1, %v3879_v12  ;;  %v1984_v6 = vpack.c.bf16 %v1966_v22, %v1965_v15  ;;  %v2190_v59 = vld [vmem:[#allocation2 + $0x18a] sm:$0xff] }
 0x229   : > { %v2530_v25 = vadd.f32 %v2529_v36, %v2528_v57  ;;  %v2069_v32 = vpop.f32.mrf.mxu3 }
 0x22a   : > { %v2137_v26 = vadd.f32 %v2069_v32, %v1915_v35 }
 0x22b   : > { %v2296_v47 = vpop.f32.mrf.mxu0 }
 0x22c   : > { %v2359_v13 = vadd.f32 %v2291_v11, %v2137_v26  ;;  %v1745_v26 = vld [vmem:[#allocation2 + $0x180] sm:$0xff] }
 0x22e   : > { %2391 = vst.msk [vmem:[%s3625_s29 + $0x40] sm:$0xff] %vm373_vm1, %v2359_v13  ;;  %v2430_v0 = vsel %vm373_vm1, %v2359_v13, 0.0  ;;  %v2492_v9 = vmul.f32 %v2359_v13, %v2359_v13  ;;  %2833 = vmatmul.msk.bf16.gmra.mxu0 %vm373_vm1, %v3693_v3 }
 0x22f   : > { %v2431_v58 = vadd.f32 %v2430_v0, %v2429_v23  ;;  %v1849_v16 = vpop.f32.mrf.mxu2  ;;  %v1629_v19 = vpop.f32.mrf.mxu1  ;;  %v2189_v23 = vld [vmem:[#allocation2 + $0x182] sm:$0xff] }
 0x230   : > { %v2531_v11 = vsel %vm373_vm1, %v2492_v9, 0.0  ;;  %v1916_v20 = vadd.f32 %v1849_v16, %v1693_v56  ;;  %v1694_v37 = vadd.f32 %v1629_v19, %v3880_v8  ;;  %v2207_v35 = vpack.c.bf16 %v2190_v59, %v2189_v23  ;;  %v1967_v56 = vld [vmem:[#allocation2 + $0x181] sm:$0xff] }
 0x231   : > { %v2532_v34 = vadd.f32 %v2531_v11, %v2530_v25  ;;  %v2071_v55 = vpop.f32.mrf.mxu3  ;;  %v1763_v16 = vpack.c.bf16 %v1746_v28, %v1745_v26  ;;  %v1969_v28 = vld [vmem:[#allocation2 + $0x199] sm:$0xff] }
 0x232   : > { %v2138_v2 = vadd.f32 %v2071_v55, %v1916_v20  ;;  %2782 = vmatmul.msk.bf16.gmra.mxu1 %vm373_vm1, %v1539_v46  ;;  %v1968_v46 = vld [vmem:[#allocation2 + $0x189] sm:$0xff] }
 0x233   : > { %v2298_v57 = vpop.f32.mrf.mxu0  ;;  %v1985_v11 = vpack.c.bf16 %v1968_v46, %v1967_v56 }
 0x234   : > { %v2360_v60 = vadd.f32 %v2293_v21, %v2138_v2  ;;  %2799 = vmatmul.msk.bf16.gmra.mxu2 %vm373_vm1, %v1762_v4 }
 0x236   : > { %2392 = vst.msk [vmem:[%s3625_s29 + $0x48] sm:$0xff] %vm373_vm1, %v2360_v60  ;;  %v2432_v27 = vsel %vm373_vm1, %v2360_v60, 0.0  ;;  %v2493_v63 = vmul.f32 %v2360_v60, %v2360_v60  ;;  %2816 = vmatmul.msk.bf16.gmra.mxu3 %vm373_vm1, %v1984_v6 }
 0x237   : > { %v2433_v18 = vadd.f32 %v2432_v27, %v2431_v58  ;;  %v1852_v29 = vpop.f32.mrf.mxu2  ;;  %v1631_v48 = vpop.f32.mrf.mxu1 }
 0x238   : > { %v2533_v1 = vsel %vm373_vm1, %v2493_v63, 0.0  ;;  %v1917_v21 = vadd.f32 %v1852_v29, %v1694_v37  ;;  %v1695_v38 = vadd.f32 %v1631_v48, %v3881_v39  ;;  %v2191_v63 = vld [vmem:[#allocation2 + $0x19a] sm:$0xff] }
 0x239   : > { %v2534_v31 = vadd.f32 %v2533_v1, %v2532_v34  ;;  %v2074_v24 = vpop.f32.mrf.mxu3  ;;  %v1747_v1 = vld [vmem:[#allocation2 + $0x198] sm:$0xff] }
 0x23a   : > { %v2139_v36 = vadd.f32 %v2074_v24, %v1917_v21  ;;  %v1748_v21 = vld [vmem:[#allocation2 + $0x1a0] sm:$0xff] }
 0x23b   : > { %v2301_v25 = vpop.f32.mrf.mxu0  ;;  %v1764_v39 = vpack.c.bf16 %v1748_v21, %v1747_v1 }
 0x23c   : > { %v2361_v32 = vadd.f32 %v2296_v47, %v2139_v36 }
 0x23e   : > { %2393 = vst.msk [vmem:[%s3625_s29 + $0x50] sm:$0xff] %vm373_vm1, %v2361_v32  ;;  %v2434_v41 = vsel %vm373_vm1, %v2361_v32, 0.0  ;;  %v2494_v13 = vmul.f32 %v2361_v32, %v2361_v32  ;;  %2834 = vmatmul.msk.bf16.gmra.mxu0 %vm373_vm1, %v2207_v35 }
 0x23f   : > { %v2435_v0 = vadd.f32 %v2434_v41, %v2433_v18  ;;  %v1854_v9 = vpop.f32.mrf.mxu2  ;;  %v1634_v12 = vpop.f32.mrf.mxu1  ;;  %v1970_v41 = vld [vmem:[#allocation2 + $0x1a1] sm:$0xff] }
 0x240   : > { %v2535_v58 = vsel %vm373_vm1, %v2494_v13, 0.0  ;;  %v1918_v47 = vadd.f32 %v1854_v9, %v1695_v38  ;;  %v1696_v2 = vadd.f32 %v1634_v12, %v3492_v54  ;;  %v1986_v12 = vpack.c.bf16 %v1970_v41, %v1969_v28 }
 0x241   : > { %v2536_v19 = vadd.f32 %v2535_v58, %v2534_v31  ;;  %v2076_v15 = vpop.f32.mrf.mxu3 }
 0x242   : > { %v2140_v22 = vadd.f32 %v2076_v15, %v1918_v47  ;;  %2783 = vmatmul.msk.bf16.gmra.mxu1 %vm373_vm1, %v3693_v3  ;;  %v2192_v3 = vld [vmem:[#allocation2 + $0x1a2] sm:$0xff] }
 0x243   : > { %v2303_v20 = vpop.f32.mrf.mxu0  ;;  %v2208_v48 = vpack.c.bf16 %v2192_v3, %v2191_v63 }
 0x244   : > { %v2362_v4 = vadd.f32 %v2298_v57, %v2140_v22  ;;  %2800 = vmatmul.msk.bf16.gmra.mxu2 %vm373_vm1, %v1763_v16 }
 0x246   : > { %2394 = vst.msk [vmem:[%s3625_s29 + $0x58] sm:$0xff] %vm373_vm1, %v2362_v4  ;;  %v2436_v34 = vsel %vm373_vm1, %v2362_v4, 0.0  ;;  %v2495_v55 = vmul.f32 %v2362_v4, %v2362_v4  ;;  %2817 = vmatmul.msk.bf16.gmra.mxu3 %vm373_vm1, %v1985_v11 }
 0x247   : > { %v2437_v6 = vadd.f32 %v2436_v34, %v2435_v0  ;;  %v1857_v60 = vpop.f32.mrf.mxu2  ;;  %v1636_v27 = vpop.f32.mrf.mxu1 }
 0x248   : > { %v2537_v8 = vsel %vm373_vm1, %v2495_v55, 0.0  ;;  %v1919_v57 = vadd.f32 %v1857_v60, %v1696_v2  ;;  %v1697_v24 = vadd.f32 %v1636_v27, %v3498_v14 }
 0x249   : > { %v2538_v37 = vadd.f32 %v2537_v8, %v2536_v19  ;;  %v2079_v18 = vpop.f32.mrf.mxu3 }
 0x24a   : > { %v2141_v29 = vadd.f32 %v2079_v18, %v1919_v57 }
 0x24b   : > { %v2306_v23 = vpop.f32.mrf.mxu0 }
 0x24c   : > { %v2363_v59 = vadd.f32 %v2301_v25, %v2141_v29 }
 0x24e   : > { %2395 = vst.msk [vmem:[%s3625_s29 + $0x60] sm:$0xff] %vm373_vm1, %v2363_v59  ;;  %v2438_v54 = vsel %vm373_vm1, %v2363_v59, 0.0  ;;  %v2496_v31 = vmul.f32 %v2363_v59, %v2363_v59  ;;  %2835 = vmatmul.msk.bf16.gmra.mxu0 %vm373_vm1, %v2208_v48 }
 0x24f   : > { %v2439_v36 = vadd.f32 %v2438_v54, %v2437_v6  ;;  %v1859_v32 = vpop.f32.mrf.mxu2  ;;  %v1639_v26 = vpop.f32.mrf.mxu1 }
 0x250   : > { %v2539_v13 = vsel %vm373_vm1, %v2496_v31, 0.0  ;;  %v1920_v25 = vadd.f32 %v1859_v32, %v1697_v24  ;;  %v1698_v47 = vadd.f32 %v1639_v26, %v3502_v43 }
 0x251   : > { %v2540_v38 = vadd.f32 %v2539_v13, %v2538_v37  ;;  %v2081_v0 = vpop.f32.mrf.mxu3 }
 0x252   : > { %v2142_v9 = vadd.f32 %v2081_v0, %v1920_v25  ;;  %2784 = vmatmul.msk.bf16.gmra.mxu1 %vm373_vm1, %v2207_v35 }
 0x253   : > { %v2308_v56 = vpop.f32.mrf.mxu0 }
 0x254   : > { %v2364_v14 = vadd.f32 %v2303_v20, %v2142_v9  ;;  %2801 = vmatmul.msk.bf16.gmra.mxu2 %vm373_vm1, %v1764_v39 }
 0x256   : > { %2396 = vst.msk [vmem:[%s3625_s29 + $0x68] sm:$0xff] %vm373_vm1, %v2364_v14  ;;  %v2440_v46 = vsel %vm373_vm1, %v2364_v14, 0.0  ;;  %v2497_v58 = vmul.f32 %v2364_v14, %v2364_v14  ;;  %2818 = vmatmul.msk.bf16.gmra.mxu3 %vm373_vm1, %v1986_v12 }
 0x257   : > { %v2441_v16 = vadd.f32 %v2440_v46, %v2439_v36  ;;  %v1862_v19 = vpop.f32.mrf.mxu2  ;;  %v1641_v15 = vpop.f32.mrf.mxu1 }
 0x258   : > { %v2541_v35 = vsel %vm373_vm1, %v2497_v58, 0.0  ;;  %v1921_v22 = vadd.f32 %v1862_v19, %v1698_v47  ;;  %v1699_v43 = vadd.f32 %v1641_v15, %v3511_v7 }
 0x259   : > { %v2542_v11 = vadd.f32 %v2541_v35, %v2540_v38  ;;  %v2084_v20 = vpop.f32.mrf.mxu3 }
 0x25a   : > { %v2143_v4 = vadd.f32 %v2084_v20, %v1921_v22 }
 0x25b   : > { %v2311_v34 = vpop.f32.mrf.mxu0 }
 0x25c   : > { %v2365_v55 = vadd.f32 %v2306_v23, %v2143_v4 }
 0x25e   : > { %2397 = vst.msk [vmem:[%s3625_s29 + $0x70] sm:$0xff] %vm373_vm1, %v2365_v55  ;;  %v2442_v2 = vsel %vm373_vm1, %v2365_v55, 0.0  ;;  %v2498_v6 = vmul.f32 %v2365_v55, %v2365_v55 }
 0x25f   : > { %v2443_v60 = vadd.f32 %v2442_v2, %v2441_v16  ;;  %v1864_v27 = vpop.f32.mrf.mxu2  ;;  %v1644_v63 = vpop.f32.mrf.mxu1 }
 0x260   : > { %v2543_v3 = vsel %vm373_vm1, %v2498_v6, 0.0  ;;  %v1922_v8 = vadd.f32 %v1864_v27, %v1699_v43  ;;  %v1700_v1 = vadd.f32 %v1644_v63, %v3515_v52 }
 0x261   : > { %v2544_v57 = vadd.f32 %v2543_v3, %v2542_v11  ;;  %v2086_v37 = vpop.f32.mrf.mxu3 }
 0x262   : > { %v2144_v18 = vadd.f32 %v2086_v37, %v1922_v8 }
 0x263   : > { %v2313_v29 = vpop.f32.mrf.mxu0 }
 0x264   : > { %v2366_v48 = vadd.f32 %v2308_v56, %v2144_v18 }
 0x266   : > { %2398 = vst.msk [vmem:[%s3625_s29 + $0x78] sm:$0xff] %vm373_vm1, %v2366_v48  ;;  %v2444_v23 = vsel %vm373_vm1, %v2366_v48, 0.0  ;;  %v2499_v59 = vmul.f32 %v2366_v48, %v2366_v48 }
 0x267   : > { %v2445_v7 = vadd.f32 %v2444_v23, %v2443_v60  ;;  %v1867_v21 = vpop.f32.mrf.mxu2  ;;  %v1646_v54 = vpop.f32.mrf.mxu1 }
 0x268   : > { %v2545_v31 = vsel %vm373_vm1, %v2499_v59, 0.0  ;;  %v1923_v24 = vadd.f32 %v1867_v21, %v1700_v1  ;;  %v1701_v39 = vadd.f32 %v1646_v54, %v3524_v45 }
 0x269   : > { %v2546_v36 = vadd.f32 %v2545_v31, %v2544_v57  ;;  %v2089_v32 = vpop.f32.mrf.mxu3 }
 0x26a   : > { %v2145_v26 = vadd.f32 %v2089_v32, %v1923_v24 }
 0x26b   : > { %v2316_v28 = vpop.f32.mrf.mxu0 }
 0x26c   : > { %v2367_v41 = vadd.f32 %v2311_v34, %v2145_v26 }
 0x26e   : > { %2399 = vst.msk [vmem:[%s3625_s29 + $0x80] sm:$0xff] %vm373_vm1, %v2367_v41  ;;  %v2446_v13 = vsel %vm373_vm1, %v2367_v41, 0.0  ;;  %v2500_v25 = vmul.f32 %v2367_v41, %v2367_v41 }
 0x26f   : > { %v2447_v52 = vadd.f32 %v2446_v13, %v2445_v7  ;;  %v1869_v38 = vpop.f32.mrf.mxu2  ;;  %v1649_v0 = vpop.f32.mrf.mxu1 }
 0x270   : > { %v2547_v9 = vsel %vm373_vm1, %v2500_v25, 0.0  ;;  %v1924_v12 = vadd.f32 %v1869_v38, %v1701_v39  ;;  %v1702_v15 = vadd.f32 %v1649_v0, %v3529_v62 }
 0x271   : > { %v2548_v56 = vadd.f32 %v2547_v9, %v2546_v36  ;;  %v2091_v14 = vpop.f32.mrf.mxu3 }
 0x272   : > { %v2146_v46 = vadd.f32 %v2091_v14, %v1924_v12 }
 0x273   : > { %v2318_v58 = vpop.f32.mrf.mxu0 }
 0x274   : > { %v2368_v47 = vadd.f32 %v2313_v29, %v2146_v46 }
 0x276   : > { %2400 = vst.msk [vmem:[%s3625_s29 + $0x88] sm:$0xff] %vm373_vm1, %v2368_v47  ;;  %v2448_v16 = vsel %vm373_vm1, %v2368_v47, 0.0  ;;  %v2501_v19 = vmul.f32 %v2368_v47, %v2368_v47 }
 0x277   : > { %v2449_v45 = vadd.f32 %v2448_v16, %v2447_v52  ;;  %v1872_v35 = vpop.f32.mrf.mxu2  ;;  %v1651_v22 = vpop.f32.mrf.mxu1 }
 0x278   : > { %v2549_v11 = vsel %vm373_vm1, %v2501_v19, 0.0  ;;  %v1925_v20 = vadd.f32 %v1872_v35, %v1702_v15  ;;  %v1703_v27 = vadd.f32 %v1651_v22, %v3538_v5 }
 0x279   : > { %v2550_v4 = vadd.f32 %v2549_v11, %v2548_v56  ;;  %v2094_v34 = vpop.f32.mrf.mxu3 }
 0x27a   : > { %v2147_v55 = vadd.f32 %v2094_v34, %v1925_v20 }
 0x27b   : > { %v2321_v2 = vpop.f32.mrf.mxu0 }
 0x27c   : > { %v2369_v6 = vadd.f32 %v2316_v28, %v2147_v55 }
 0x27e   : > { %2401 = vst.msk [vmem:[%s3625_s29 + $0x90] sm:$0xff] %vm373_vm1, %v2369_v6  ;;  %v2450_v43 = vsel %vm373_vm1, %v2369_v6, 0.0  ;;  %v2502_v60 = vmul.f32 %v2369_v6, %v2369_v6 }
 0x27f   : > { %v2451_v62 = vadd.f32 %v2450_v43, %v2449_v45  ;;  %v1874_v63 = vpop.f32.mrf.mxu2  ;;  %v1654_v3 = vpop.f32.mrf.mxu1 }
 0x280   : > { %v2551_v8 = vsel %vm373_vm1, %v2502_v60, 0.0  ;;  %v1926_v57 = vadd.f32 %v1874_v63, %v1703_v27  ;;  %v1704_v7 = vadd.f32 %v1654_v3, %v3542_v40 }
 0x281   : > { %v2552_v37 = vadd.f32 %v2551_v8, %v2550_v4  ;;  %v2096_v18 = vpop.f32.mrf.mxu3 }
 0x282   : > { %v2148_v29 = vadd.f32 %v2096_v18, %v1926_v57 }
 0x283   : > { %v2323_v48 = vpop.f32.mrf.mxu0 }
 0x284   : > { %v2370_v23 = vadd.f32 %v2318_v58, %v2148_v29 }
 0x286   : > { %2402 = vst.msk [vmem:[%s3625_s29 + $0x98] sm:$0xff] %vm373_vm1, %v2370_v23  ;;  %v2452_v59 = vsel %vm373_vm1, %v2370_v23, 0.0  ;;  %v2503_v1 = vmul.f32 %v2370_v23, %v2370_v23 }
 0x287   : > { %v2453_v5 = vadd.f32 %v2452_v59, %v2451_v62  ;;  %v1877_v21 = vpop.f32.mrf.mxu2  ;;  %v1656_v54 = vpop.f32.mrf.mxu1 }
 0x288   : > { %v2553_v31 = vsel %vm373_vm1, %v2503_v1, 0.0  ;;  %v1927_v24 = vadd.f32 %v1877_v21, %v1704_v7  ;;  %v1705_v39 = vadd.f32 %v1656_v54, %v3551_v51 }
 0x289   : > { %v2554_v36 = vadd.f32 %v2553_v31, %v2552_v37  ;;  %v2099_v32 = vpop.f32.mrf.mxu3 }
 0x28a   : > { %v2149_v26 = vadd.f32 %v2099_v32, %v1927_v24 }
 0x28b   : > { %v2326_v28 = vpop.f32.mrf.mxu0 }
 0x28c   : > { %v2371_v41 = vadd.f32 %v2321_v2, %v2149_v26 }
 0x28e   : > { %2403 = vst.msk [vmem:[%s3625_s29 + $0xa0] sm:$0xff] %vm373_vm1, %v2371_v41  ;;  %v2454_v13 = vsel %vm373_vm1, %v2371_v41, 0.0  ;;  %v2504_v25 = vmul.f32 %v2371_v41, %v2371_v41 }
 0x28f   : > { %v2455_v40 = vadd.f32 %v2454_v13, %v2453_v5  ;;  %v1879_v52 = vpop.f32.mrf.mxu2  ;;  %v1659_v38 = vpop.f32.mrf.mxu1 }
 0x290   : > { %v2555_v0 = vsel %vm373_vm1, %v2504_v25, 0.0  ;;  %v1928_v9 = vadd.f32 %v1879_v52, %v1705_v39  ;;  %v1706_v19 = vadd.f32 %v1659_v38, %v3555_v42 }
 0x291   : > { %v2556_v12 = vadd.f32 %v2555_v0, %v2554_v36  ;;  %v2101_v56 = vpop.f32.mrf.mxu3 }
 0x292   : > { %v2150_v14 = vadd.f32 %v2101_v56, %v1928_v9 }
 0x293   : > { %v2328_v46 = vpop.f32.mrf.mxu0 }
 0x294   : > { %v2372_v58 = vadd.f32 %v2323_v48, %v2150_v14 }
 0x296   : > { %2404 = vst.msk [vmem:[%s3625_s29 + $0xa8] sm:$0xff] %vm373_vm1, %v2372_v58  ;;  %v2456_v47 = vsel %vm373_vm1, %v2372_v58, 0.0  ;;  %v2505_v16 = vmul.f32 %v2372_v58, %v2372_v58 }
 0x297   : > { %v2457_v51 = vadd.f32 %v2456_v47, %v2455_v40  ;;  %v1882_v15 = vpop.f32.mrf.mxu2  ;;  %v1661_v45 = vpop.f32.mrf.mxu1 }
 0x298   : > { %v2557_v35 = vsel %vm373_vm1, %v2505_v16, 0.0  ;;  %v1929_v22 = vadd.f32 %v1882_v15, %v1706_v19  ;;  %v1707_v43 = vadd.f32 %v1661_v45, %v3564_v17 }
 0x299   : > { %v2558_v11 = vadd.f32 %v2557_v35, %v2556_v12  ;;  %v2104_v20 = vpop.f32.mrf.mxu3 }
 0x29a   : > { %v2151_v4 = vadd.f32 %v2104_v20, %v1929_v22 }
 0x29b   : > { %v2331_v55 = vpop.f32.mrf.mxu0 }
 0x29c   : > { %v2373_v34 = vadd.f32 %v2326_v28, %v2151_v4 }
 0x29e   : > { %2405 = vst.msk [vmem:[%s3625_s29 + $0xb0] sm:$0xff] %vm373_vm1, %v2373_v34  ;;  %v2458_v2 = vsel %vm373_vm1, %v2373_v34, 0.0  ;;  %v2506_v6 = vmul.f32 %v2373_v34, %v2373_v34 }
 0x29f   : > { %v2459_v42 = vadd.f32 %v2458_v2, %v2457_v51  ;;  %v1884_v60 = vpop.f32.mrf.mxu2  ;;  %v1664_v27 = vpop.f32.mrf.mxu1 }
 0x2a0   : > { %v2559_v62 = vsel %vm373_vm1, %v2506_v6, 0.0  ;;  %v1930_v63 = vadd.f32 %v1884_v60, %v1707_v43  ;;  %v1708_v48 = vadd.f32 %v1664_v27, %v3568_v50 }
 0x2a1   : > { %v2560_v3 = vadd.f32 %v2559_v62, %v2558_v11  ;;  %v2106_v8 = vpop.f32.mrf.mxu3 }
 0x2a2   : > { %v2152_v57 = vadd.f32 %v2106_v8, %v1930_v63 }
 0x2a3   : > { %v2333_v23 = vpop.f32.mrf.mxu0 }
 0x2a4   : > { %v2374_v37 = vadd.f32 %v2328_v46, %v2152_v57 }
 0x2a6   : > { %2406 = vst.msk [vmem:[%s3625_s29 + $0xb8] sm:$0xff] %vm373_vm1, %v2374_v37  ;;  %v2460_v18 = vsel %vm373_vm1, %v2374_v37, 0.0  ;;  %v2507_v29 = vmul.f32 %v2374_v37, %v2374_v37 }
 0x2a7   : > { %v2461_v17 = vadd.f32 %v2460_v18, %v2459_v42  ;;  %v1887_v59 = vpop.f32.mrf.mxu2  ;;  %v1666_v1 = vpop.f32.mrf.mxu1 }
 0x2a8   : > { %v2561_v7 = vsel %vm373_vm1, %v2507_v29, 0.0  ;;  %v1931_v5 = vadd.f32 %v1887_v59, %v1708_v48  ;;  %v1709_v26 = vadd.f32 %v1666_v1, %v3577_v30 }
 0x2a9   : > { %v2562_v21 = vadd.f32 %v2561_v7, %v2560_v3  ;;  %v2109_v54 = vpop.f32.mrf.mxu3 }
 0x2aa   : > { %v2153_v31 = vadd.f32 %v2109_v54, %v1931_v5 }
 0x2ab   : > { %v2336_v52 = vpop.f32.mrf.mxu0 }
 0x2ac   : > { %v2375_v24 = vadd.f32 %v2331_v55, %v2153_v31 }
 0x2ae   : > { %2407 = vst.msk [vmem:[%s3625_s29 + $0xc0] sm:$0xff] %vm373_vm1, %v2375_v24  ;;  %v2462_v36 = vsel %vm373_vm1, %v2375_v24, 0.0  ;;  %v2508_v32 = vmul.f32 %v2375_v24, %v2375_v24 }
 0x2af   : > { %v2463_v50 = vadd.f32 %v2462_v36, %v2461_v17  ;;  %v1889_v28 = vpop.f32.mrf.mxu2  ;;  %v1669_v41 = vpop.f32.mrf.mxu1 }
 0x2b0   : > { %v2563_v13 = vsel %vm373_vm1, %v2508_v32, 0.0  ;;  %v1932_v25 = vadd.f32 %v1889_v28, %v1709_v26  ;;  %v1710_v56 = vadd.f32 %v1669_v41, %v3581_v10 }
 0x2b1   : > { %v2564_v39 = vadd.f32 %v2563_v13, %v2562_v21  ;;  %v2111_v40 = vpop.f32.mrf.mxu3 }
 0x2b2   : > { %v2154_v38 = vadd.f32 %v2111_v40, %v1932_v25 }
 0x2b3   : > { %v2338_v15 = vpop.f32.mrf.mxu0 }
 0x2b4   : > { %v2376_v0 = vadd.f32 %v2333_v23, %v2154_v38 }
 0x2b6   : > { %2408 = vst.msk [vmem:[%s3625_s29 + $0xc8] sm:$0xff] %vm373_vm1, %v2376_v0  ;;  %v2464_v9 = vsel %vm373_vm1, %v2376_v0, 0.0  ;;  %v2509_v12 = vmul.f32 %v2376_v0, %v2376_v0 }
 0x2b7   : > { %v2465_v30 = vadd.f32 %v2464_v9, %v2463_v50  ;;  %v1892_v14 = vpop.f32.mrf.mxu2  ;;  %v1671_v46 = vpop.f32.mrf.mxu1 }
 0x2b8   : > { %v2565_v58 = vsel %vm373_vm1, %v2509_v12, 0.0  ;;  %v1933_v47 = vadd.f32 %v1892_v14, %v1710_v56  ;;  %v1711_v11 = vadd.f32 %v1671_v46, %v3590_v33 }
 0x2b9   : > { %v2566_v16 = vadd.f32 %v2565_v58, %v2564_v39  ;;  %v2114_v19 = vpop.f32.mrf.mxu3 }
 0x2ba   : > { %v2155_v51 = vadd.f32 %v2114_v19, %v1933_v47 }
 0x2bb   : > { %v2341_v60 = vpop.f32.mrf.mxu0 }
 0x2bc   : > { %v2377_v45 = vadd.f32 %v2336_v52, %v2155_v51 }
 0x2be   : > { %2409 = vst.msk [vmem:[%s3625_s29 + $0xd0] sm:$0xff] %vm373_vm1, %v2377_v45  ;;  %v2466_v35 = vsel %vm373_vm1, %v2377_v45, 0.0  ;;  %v2510_v22 = vmul.f32 %v2377_v45, %v2377_v45 }
 0x2bf   : > { %v2467_v10 = vadd.f32 %v2466_v35, %v2465_v30  ;;  %v1894_v20 = vpop.f32.mrf.mxu2  ;;  %v1674_v4 = vpop.f32.mrf.mxu1 }
 0x2c0   : > { %v2567_v34 = vsel %vm373_vm1, %v2510_v22, 0.0  ;;  %v1934_v55 = vadd.f32 %v1894_v20, %v1711_v11  ;;  %v1712_v63 = vadd.f32 %v1674_v4, %v3594_v53 }
 0x2c1   : > { %v2568_v2 = vadd.f32 %v2567_v34, %v2566_v16  ;;  %v2116_v6 = vpop.f32.mrf.mxu3 }
 0x2c2   : > { %v2156_v43 = vadd.f32 %v2116_v6, %v1934_v55 }
 0x2c3   : > { %v2343_v53 = vpop.f32.mrf.mxu0 }
 0x2c4   : > { %v2378_v42 = vadd.f32 %v2338_v15, %v2156_v43 }
 0x2c6   : > { %2410 = vst.msk [vmem:[%s3625_s29 + $0xd8] sm:$0xff] %vm373_vm1, %v2378_v42  ;;  %v2468_v27 = vsel %vm373_vm1, %v2378_v42, 0.0  ;;  %v2511_v62 = vmul.f32 %v2378_v42, %v2378_v42 }
 0x2c7   : > { %v2469_v33 = vadd.f32 %v2468_v27, %v2467_v10  ;;  %v1897_v3 = vpop.f32.mrf.mxu2  ;;  %v1676_v8 = vpop.f32.mrf.mxu1 }
 0x2c8   : > { %v2569_v57 = vsel %vm373_vm1, %v2511_v62, 0.0  ;;  %v1935_v37 = vadd.f32 %v1897_v3, %v1712_v63  ;;  %v1713_v1 = vadd.f32 %v1676_v8, %v3603_v44 }
 0x2c9   : > { %v2570_v18 = vadd.f32 %v2569_v57, %v2568_v2  ;;  %v2119_v29 = vpop.f32.mrf.mxu3 }
 0x2ca   : > { %v2157_v48 = vadd.f32 %v2119_v29, %v1935_v37 }
 0x2cb   : > { %v2346_v52 = vpop.f32.mrf.mxu0 }
 0x2cc   : > { %v2379_v23 = vadd.f32 %v2341_v60, %v2157_v48 }
 0x2ce   : > { %2411 = vst.msk [vmem:[%s3625_s29 + $0xe0] sm:$0xff] %vm373_vm1, %v2379_v23  ;;  %v2470_v17 = vsel %vm373_vm1, %v2379_v23, 0.0  ;;  %v2512_v59 = vmul.f32 %v2379_v23, %v2379_v23 }
 0x2cf   : > { %v2471_v7 = vadd.f32 %v2470_v17, %v2469_v33  ;;  %v1899_v5 = vpop.f32.mrf.mxu2  ;;  %v1679_v36 = vpop.f32.mrf.mxu1 }
 0x2d0   : > { %v2571_v21 = vsel %vm373_vm1, %v2512_v59, 0.0  ;;  %v1936_v54 = vadd.f32 %v1899_v5, %v1713_v1  ;;  %v1714_v41 = vadd.f32 %v1679_v36, %v3607_v61 }
 0x2d1   : > { %v2572_v31 = vadd.f32 %v2571_v21, %v2570_v18  ;;  %v2121_v24 = vpop.f32.mrf.mxu3 }
 0x2d2   : > { %v2158_v32 = vadd.f32 %v2121_v24, %v1936_v54 }
 0x2d3   : > { %v2348_v15 = vpop.f32.mrf.mxu0 }
 0x2d4   : > { %v2380_v26 = vadd.f32 %v2343_v53, %v2158_v32 }
 0x2d6   : > { %2412 = vst.msk [vmem:[%s3625_s29 + $0xe8] sm:$0xff] %vm373_vm1, %v2380_v26  ;;  %v2472_v50 = vsel %vm373_vm1, %v2380_v26, 0.0  ;;  %v2513_v28 = vmul.f32 %v2380_v26, %v2380_v26 }
 0x2d7   : > { %v2473_v44 = vadd.f32 %v2472_v50, %v2471_v7  ;;  %v1902_v13 = vpop.f32.mrf.mxu2  ;;  %v1681_v9 = vpop.f32.mrf.mxu1 }
 0x2d8   : > { %v2573_v25 = vsel %vm373_vm1, %v2513_v28, 0.0  ;;  %v1937_v39 = vadd.f32 %v1902_v13, %v1714_v41  ;;  %v1715_v14 = vadd.f32 %v1681_v9, %v3616_v49 }
 0x2d9   : > { %v2574_v40 = vadd.f32 %v2573_v25, %v2572_v31  ;;  %v2124_v38 = vpop.f32.mrf.mxu3 }
 0x2da   : > { %v2159_v0 = vadd.f32 %v2124_v38, %v1937_v39 }
 0x2dc   : > { %v2381_v12 = vadd.f32 %v2346_v52, %v2159_v0 }
 0x2de   : > { %2413 = vst.msk [vmem:[%s3625_s29 + $0xf0] sm:$0xff] %vm373_vm1, %v2381_v12  ;;  %v2474_v56 = vsel %vm373_vm1, %v2381_v12, 0.0  ;;  %v2514_v30 = vmul.f32 %v2381_v12, %v2381_v12 }
 0x2df   : > { %v2475_v61 = vadd.f32 %v2474_v56, %v2473_v44  ;;  %v1904_v46 = vpop.f32.mrf.mxu2 }
 0x2e0   : > { %v2575_v58 = vsel %vm373_vm1, %v2514_v30, 0.0  ;;  %v1938_v47 = vadd.f32 %v1904_v46, %v1715_v14 }
 0x2e1   : > { %v2576_v16 = vadd.f32 %v2575_v58, %v2574_v40  ;;  %v2126_v19 = vpop.f32.mrf.mxu3 }
 0x2e2   : > { %v2160_v51 = vadd.f32 %v2126_v19, %v1938_v47 }
 0x2e4   : > { %v2382_v45 = vadd.f32 %v2348_v15, %v2160_v51 }
 0x2e6   : > { %2414 = vst.msk [vmem:[%s3625_s29 + $0xf8] sm:$0xff] %vm373_vm1, %v2382_v45  ;;  %v2476_v35 = vsel %vm373_vm1, %v2382_v45, 0.0  ;;  %v2515_v22 = vmul.f32 %v2382_v45, %v2382_v45 }
 0x2e7   : > { %v2477_v11 = vadd.f32 %v2476_v35, %v2475_v61 }
 0x2e8   : > { %v2577_v10 = vsel %vm373_vm1, %v2515_v22, 0.0 }
 0x2e9   : > { %v2478_v49 = vrot.slane %v2477_v11, 4  ;;  %v2578_v20 = vadd.f32 %v2577_v10, %v2576_v16 }
 0x2eb   : > { %v2479_v4 = vadd.f32 %v2478_v49, %v2477_v11  ;;  %v2579_v34 = vrot.slane %v2578_v20, 4 }
 0x2ed   : > { %v2480_v55 = vrot.slane %v2479_v4, 2  ;;  %v2580_v2 = vadd.f32 %v2579_v34, %v2578_v20 }
 0x2ef   : > { %v2481_v6 = vadd.f32 %v2480_v55, %v2479_v4  ;;  %v2581_v43 = vrot.slane %v2580_v2, 2 }
 0x2f1   : > { %v2482_v42 = vrot.slane %v2481_v6, 1  ;;  %v2582_v60 = vadd.f32 %v2581_v43, %v2580_v2 }
 0x2f3   : > { %v2583_v27 = vrot.slane %v2582_v60, 1  ;;  %v2483_v62 = vadd.f32 %v2482_v42, %v2481_v6 }
 0x2f5   : > { %v2584_v63 = vadd.f32 %v2583_v27, %v2582_v60 }
 0x2f7   : > { %v2586_v33 = vsel %vm2585_vm4, %v2483_v62, %v2584_v63 }
 0x2f8   : > { %2587 = vst.msk [vmem:[%s235_s8] sm:$0x3] %vm376_vm2, %v2586_v33 }
 0x2f9 PF: > { %s16_s18 = sadd.s32 1, %s2862_s18  }
 0x2fa   : > { %p13_p4 = scmp.ge.s32.totalorder %s16_s18, 4  }
 0x2fc   :  { %15 = sbr.rel (!%p13_p4) target bundleno = 1 (0x1), region = 89 }

</bundles_post_ra>
